<compile_context>
chip_gen: v6e
topology: v6e:2x2x1
jax: 0.10.0
libtpu: 0.0.40
codegen_flags: <defaults>
</compile_context>

<pallas_src>
import functools

import jax
import jax.numpy as jnp
from jax import lax
from jax.experimental import pallas as pl
from jax.experimental.pallas import tpu as pltpu


# ---------------------------------------------------------------------------
# Pallas matmul + bias (+ optional ReLU) kernel: single full-K step
# ---------------------------------------------------------------------------
def _mm_bias_act_kernel(x_ref, w_ref, b_ref, o_ref, *, relu):
    r = jnp.dot(x_ref[...], w_ref[...], preferred_element_type=jnp.float32)
    r = r + b_ref[...]                      # (bm, bn) + (1, bn) broadcast
    if relu:
        r = jnp.maximum(r, 0.0)
    o_ref[...] = r.astype(o_ref.dtype)


def matmul_bias_act(x, w, b, *, relu, out_dtype=jnp.float32, tm=None, tn=None):
    """out = relu?(x @ w + b); bf16 operands, f32 accumulation, fused epilogue.

    K is never tiled (single full-K step).  M / N are tiled only when the
    requested tile divides them exactly and satisfies the (8, 128) constraint;
    otherwise a single full-dim block is used.  No operand is ever padded or
    copied on the host side.
    """
    M, K = x.shape
    K2, N = w.shape
    assert K == K2
    xb = x.astype(jnp.bfloat16)
    wb = w.astype(jnp.bfloat16)
    b2 = b.astype(jnp.float32).reshape(1, N)

    bm = tm if (tm is not None and M % tm == 0 and tm % 8 == 0) else M
    bn = tn if (tn is not None and N % tn == 0 and tn % 128 == 0) else N

    grid = (M // bm, N // bn)
    return pl.pallas_call(
        functools.partial(_mm_bias_act_kernel, relu=relu),
        out_shape=jax.ShapeDtypeStruct((M, N), out_dtype),
        grid_spec=pltpu.PrefetchScalarGridSpec(
            num_scalar_prefetch=0,
            grid=grid,
            in_specs=[
                pl.BlockSpec((bm, K), lambda i, j: (i, 0)),
                pl.BlockSpec((K, bn), lambda i, j: (0, j)),
                pl.BlockSpec((1, bn), lambda i, j: (0, j)),
            ],
            out_specs=pl.BlockSpec((bm, bn), lambda i, j: (i, j)),
        ),
        compiler_params=pltpu.CompilerParams(
            dimension_semantics=("parallel", "parallel"),
        ),
    )(xb, wb, b2)


# ---------------------------------------------------------------------------
# im2col glue (plain JAX, kept in bf16)
# ---------------------------------------------------------------------------
def _im2col_nhwc(xp, kh, kw, oh, ow):
    """xp: (N, >=oh+kh-1, >=ow+kw-1, C) -> (N*oh*ow, kh*kw*C), tap-major."""
    n = xp.shape[0]
    taps = [xp[:, dy:dy + oh, dx:dx + ow, :] for dy in range(kh) for dx in range(kw)]
    cols = jnp.concatenate(taps, axis=-1)
    return cols.reshape(n * oh * ow, -1)


def _divisible_hw(n, h, w, div=16, max_extra=8):
    """Smallest (hc, wc) >= (h, w) with n*hc*wc divisible by `div`.

    The extra output rows/cols are computed from zero padding and sliced away
    after the matmul; this makes M split into 2 clean tm%8==0 tiles with NO
    jnp.pad copy of the im2col buffer.
    """
    best = None
    for dh in range(max_extra):
        for dw in range(max_extra):
            hc, wc = h + dh, w + dw
            if (n * hc * wc) % div == 0 and (best is None or hc * wc < best[0] * best[1]):
                best = (hc, wc)
    return best if best is not None else (h, w)


# ---------------------------------------------------------------------------
# ConvTranspose2d (k=3, stride=1, padding=1) == 'same' 3x3 conv with the
# spatially-flipped / in-out-swapped kernel.
# ---------------------------------------------------------------------------
def conv_transpose2d_s1(x_nhwc, wmat, bvec, *, relu, out_dtype=jnp.bfloat16):
    x = x_nhwc.astype(jnp.bfloat16)
    n, h, w, _ = x.shape
    cout = wmat.shape[1]
    hc, wc = _divisible_hw(n, h, w)
    # Halo pad (1 each side) plus the extra rows/cols that make M 16-divisible.
    xp = jnp.pad(x, ((0, 0), (1, hc - h + 1), (1, wc - w + 1), (0, 0)))
    cols = _im2col_nhwc(xp, 3, 3, hc, wc)                  # (n*hc*wc, 9*Cin)
    M = n * hc * wc
    tm = M // 2 if M % 16 == 0 else None                   # 2 balanced steps
    out = matmul_bias_act(cols, wmat, bvec, relu=relu, out_dtype=out_dtype, tm=tm)
    return out.reshape(n, hc, wc, cout)[:, :h, :w, :]


# ---------------------------------------------------------------------------
# ConvTranspose2d (k=3, stride=2, padding=1) via polyphase decomposition:
# ONE matmul of a 2x2 im2col of the undilated input with a combined
# (4*Cin, 4*Cout) weight, then a pure reshape/transpose interleave.
# ---------------------------------------------------------------------------
def conv_transpose2d_s2(x_nhwc, wmat, bvec, *, relu, out_dtype=jnp.bfloat16):
    x = x_nhwc.astype(jnp.bfloat16)
    n, h, w, _ = x.shape
    cout = wmat.shape[1] // 4
    hc, wc = _divisible_hw(n, h, w)
    # Bottom/right halo pad (1) plus the extra rows/cols for M 16-divisibility.
    xp = jnp.pad(x, ((0, 0), (0, hc - h + 1), (0, wc - w + 1), (0, 0)))
    cols = _im2col_nhwc(xp, 2, 2, hc, wc)                  # (n*hc*wc, 4*Cin)
    M = n * hc * wc
    tm = M // 2 if M % 16 == 0 else None
    out = matmul_bias_act(cols, wmat, bvec, relu=relu, out_dtype=out_dtype, tm=tm)
    # Phase columns are (py, px)-major / channel-minor -> interleave by a single
    # reshape/transpose (no zero-fill, no strided scatters); out-of-range
    # parities / extra rows+cols come from zero padding and are sliced away.
    out = out.reshape(n, hc, wc, 2, 2, cout).transpose(0, 1, 3, 2, 4, 5)
    out = out.reshape(n, 2 * hc, 2 * wc, cout)
    return out[:, :2 * h - 1, :2 * w - 1, :]


# ---------------------------------------------------------------------------
# One-time weight preprocessing
# ---------------------------------------------------------------------------
def _s1_weight(wt):
    """(Cin, Cout, 3, 3) -> (9*Cin, Cout) forward-conv matmul weight."""
    cin, cout = wt.shape[0], wt.shape[1]
    wc = jnp.flip(wt, axis=(2, 3)).transpose(2, 3, 0, 1)   # (kh, kw, cin, cout)
    return wc.reshape(9 * cin, cout)


def _s2_polyphase_weight_bias(wt, b):
    """Combined polyphase matmul weight/bias for a stride-2 pad-1 3x3 deconv.

    Row index    = (dy*2 + dx) * Cin + ci   (2x2 im2col tap (dy, dx))
    Column index = (py*2 + px) * Cout + co  (output-pixel parity phase)
    y[2a+py, 2b+px, co] = sum_taps x[a+dy, b+dx, ci] * W[ci, co, ky, kx],
    where parity 0 uses (d=0, k=1) and parity 1 uses (d=0, k=2), (d=1, k=0).
    """
    cin, cout = wt.shape[0], wt.shape[1]
    wc = jnp.zeros((4 * cin, 4 * cout), jnp.float32)

    def terms(par):
        return [(0, 1)] if par == 0 else [(0, 2), (1, 0)]

    for py in (0, 1):
        for px in (0, 1):
            phase = py * 2 + px
            for dy, ky in terms(py):
                for dx, kx in terms(px):
                    tap = dy * 2 + dx
                    wc = wc.at[tap * cin:(tap + 1) * cin,
                               phase * cout:(phase + 1) * cout].set(wt[:, :, ky, kx])
    return wc, jnp.tile(b, 4)


def prepare_params(params):
    """Layout permutes, matmul-form weights and bf16 casts (done once)."""
    p = {}
    # Permute w1/b1 output columns so x @ w1 is already (H, W, C)-minor NHWC:
    # removes the unflatten-NCHW -> NHWC transpose from the hot path.
    w1 = params["w1"].reshape(-1, 64, 28, 23).transpose(0, 2, 3, 1)
    p["w1"] = w1.reshape(-1, 28 * 23 * 64).astype(jnp.bfloat16)
    p["b1"] = params["b1"].reshape(64, 28, 23).transpose(1, 2, 0).reshape(-1)
    p["wm1"] = _s1_weight(params["wt1"]).astype(jnp.bfloat16)
    p["bm1"] = params["bt1"]
    wm2, bm2 = _s2_polyphase_weight_bias(params["wt2"], params["bt2"])
    p["wm2"], p["bm2"] = wm2.astype(jnp.bfloat16), bm2
    wm3, bm3 = _s2_polyphase_weight_bias(params["wt3"], params["bt3"])
    p["wm3"], p["bm3"] = wm3.astype(jnp.bfloat16), bm3
    return p


# ---------------------------------------------------------------------------
# Decoder forward
# ---------------------------------------------------------------------------
def init_params(key, input_size):
    ks = jax.random.split(key, 8)
    s = 0.05
    return {
        "w1": jax.random.normal(ks[0], (input_size, 28 * 23 * 64), jnp.float32) * s,
        "b1": jax.random.normal(ks[1], (28 * 23 * 64,), jnp.float32) * s,
        "wt1": jax.random.normal(ks[2], (64, 32, 3, 3), jnp.float32) * s,
        "bt1": jax.random.normal(ks[3], (32,), jnp.float32) * s,
        "wt2": jax.random.normal(ks[4], (32, 16, 3, 3), jnp.float32) * s,
        "bt2": jax.random.normal(ks[5], (16,), jnp.float32) * s,
        "wt3": jax.random.normal(ks[6], (16, 3, 3, 3), jnp.float32) * s,
        "bt3": jax.random.normal(ks[7], (3,), jnp.float32) * s,
    }


@jax.jit
def decoder_forward(prepped, x):
    n = x.shape[0]
    # Linear(input_size, 28*23*64) + ReLU: full-K, bm = M (no row padding),
    # two 20608-wide N tiles (balanced across v7x's 2 TCs; still near-optimal
    # on single-TC v5e/v6e, where the layer is pure weight-DMA bound).
    h = matmul_bias_act(x, prepped["w1"], prepped["b1"], relu=True,
                        out_dtype=jnp.bfloat16, tn=20608)
    h = h.reshape(n, 28, 23, 64)                              # already NHWC
    # ConvTranspose2d(64, 32, 3, s=1, p=1) + ReLU
    h = conv_transpose2d_s1(h, prepped["wm1"], prepped["bm1"], relu=True)
    # ConvTranspose2d(32, 16, 3, s=2, p=1) + ReLU (polyphase, one matmul)
    h = conv_transpose2d_s2(h, prepped["wm2"], prepped["bm2"], relu=True)
    # ConvTranspose2d(16, 3, 3, s=2, p=1) (no activation, polyphase)
    h = conv_transpose2d_s2(h, prepped["wm3"], prepped["bm3"], relu=False,
                            out_dtype=jnp.float32)
    # back to PyTorch NCHW (kept to preserve the module's output layout)
    return h.transpose(0, 3, 1, 2)


# ---------------------------------------------------------------------------
# Pure-JAX f32 reference (lax conv with lhs_dilation == conv transpose)
# ---------------------------------------------------------------------------
def _ref_conv_transpose(x_nhwc, wt, b, stride, padding, relu):
    k = wt.shape[2]
    pp = k - 1 - padding
    wc = jnp.flip(wt, axis=(2, 3)).transpose(2, 3, 0, 1)  # HWIO
    y = lax.conv_general_dilated(
        x_nhwc, wc, window_strides=(1, 1),
        padding=[(pp, pp), (pp, pp)], lhs_dilation=(stride, stride),
        dimension_numbers=("NHWC", "HWIO", "NHWC"),
    ) + b
    return jnp.maximum(y, 0.0) if relu else y


def decoder_forward_ref(params, x):
    n = x.shape[0]
    h = jnp.maximum(x @ params["w1"] + params["b1"], 0.0)
    h = h.reshape(n, 64, 28, 23).transpose(0, 2, 3, 1)
    h = _ref_conv_transpose(h, params["wt1"], params["bt1"], 1, 1, True)
    h = _ref_conv_transpose(h, params["wt2"], params["bt2"], 2, 1, True)
    h = _ref_conv_transpose(h, params["wt3"], params["bt3"], 2, 1, False)
    return h.transpose(0, 3, 1, 2)


if __name__ == "__main__":
    key = jax.random.PRNGKey(0)
    k_param, k_x = jax.random.split(key)

    input_size = 32
    batch = 2
    params = init_params(k_param, input_size)
    x = jax.random.normal(k_x, (batch, input_size), jnp.float32)

    prepped = prepare_params(params)
    out = jax.block_until_ready(decoder_forward(prepped, x))
    assert out.shape == (batch, 3, 109, 89), out.shape

    ref = jax.block_until_ready(decoder_forward_ref(params, x))
    # bf16 matmul operands (f32 accumulation) -> relaxed tolerance vs f32 ref.
    assert jnp.allclose(out, ref, rtol=3e-2, atol=3e-2), float(jnp.max(jnp.abs(out - ref)))

    print("KERNEL_OK")
</pallas_src>

<mosaic_0001>
module attributes {stable_mosaic.version = 11 : i64} {
  func.func @_mm_bias_act_kernel(%arg0: i32, %arg1: i32, %arg2: memref<2x32xbf16, #tpu.memory_space<vmem>>, %arg3: memref<32x20608xbf16, #tpu.memory_space<vmem>>, %arg4: memref<1x20608xf32, #tpu.memory_space<vmem>>, %arg5: memref<2x20608xbf16, #tpu.memory_space<vmem>>) attributes {dimension_semantics = [#tpu.dimension_semantics<parallel>, #tpu.dimension_semantics<parallel>], iteration_bounds = array<i64: 1, 2>, scalar_prefetch = 0 : i64, scratch_operands = 0 : i64, tpu.core_type = #tpu.core_type<tc>, window_params = [{transform_indices = @transform_0, window_bounds = array<i64: 2, 32>}, {transform_indices = @transform_1, window_bounds = array<i64: 32, 20608>}, {transform_indices = @transform_2, window_bounds = array<i64: 1, 20608>}, {transform_indices = @transform_3, window_bounds = array<i64: 2, 20608>}]} {
    %c0 = arith.constant 0 : index
    %c0_0 = arith.constant 0 : index
    %0 = vector.load %arg2[%c0, %c0_0] : memref<2x32xbf16, #tpu.memory_space<vmem>>, vector<2x32xbf16>
    %c0_1 = arith.constant 0 : index
    %c0_2 = arith.constant 0 : index
    %1 = vector.load %arg3[%c0_1, %c0_2] : memref<32x20608xbf16, #tpu.memory_space<vmem>>, vector<32x20608xbf16>
    %cst = arith.constant dense<0.000000e+00> : vector<2x20608xf32>
    %2 = tpu.matmul %0, %1, %cst {dimension_numbers = #tpu.dot_dimension_numbers<[1], [0], [0], [1], [0, 0, 1, 1], [], []>} : vector<2x32xbf16>, vector<32x20608xbf16>, vector<2x20608xf32> -> vector<2x20608xf32>
    %c0_3 = arith.constant 0 : index
    %c0_4 = arith.constant 0 : index
    %3 = vector.load %arg4[%c0_3, %c0_4] : memref<1x20608xf32, #tpu.memory_space<vmem>>, vector<1x20608xf32>
    %4 = vector.broadcast %3 : vector<1x20608xf32> to vector<2x20608xf32>
    %5 = arith.addf %2, %4 : vector<2x20608xf32>
    %cst_5 = arith.constant 0.000000e+00 : f32
    %6 = vector.broadcast %cst_5 : f32 to vector<2x20608xf32>
    %7 = arith.maximumf %5, %6 : vector<2x20608xf32>
    %8 = arith.truncf %7 : vector<2x20608xf32> to vector<2x20608xbf16>
    %c0_6 = arith.constant 0 : index
    %c0_7 = arith.constant 0 : index
    %9 = vector.load %arg5[%c0_6, %c0_7] : memref<2x20608xbf16, #tpu.memory_space<vmem>>, vector<2x20608xbf16>
    tpu.vector_store %arg5[%c0_6, %c0_7], %8 {strides = array<i32>} : memref<2x20608xbf16, #tpu.memory_space<vmem>>, vector<2x20608xbf16>,
    return
  }
  func.func @transform_0(%arg0: i32, %arg1: i32) -> (i32, i32) {
    %c0_i32 = arith.constant 0 : i32
    %c0_i32_0 = arith.constant 0 : i32
    return %arg0, %c0_i32 : i32, i32
  }
  func.func @transform_1(%arg0: i32, %arg1: i32) -> (i32, i32) {
    %c0_i32 = arith.constant 0 : i32
    %c0_i32_0 = arith.constant 0 : i32
    return %c0_i32, %arg1 : i32, i32
  }
  func.func @transform_2(%arg0: i32, %arg1: i32) -> (i32, i32) {
    %c0_i32 = arith.constant 0 : i32
    %c0_i32_0 = arith.constant 0 : i32
    return %c0_i32, %arg1 : i32, i32
  }
  func.func @transform_3(%arg0: i32, %arg1: i32) -> (i32, i32) {
    %c0_i32 = arith.constant 0 : i32
    return %arg0, %arg1 : i32, i32
  }
}

module attributes {stable_mosaic.version = 11 : i64} {
  func.func @_mm_bias_act_kernel(%arg0: i32, %arg1: i32, %arg2: memref<672x576xbf16, #tpu.memory_space<vmem>>, %arg3: memref<576x32xbf16, #tpu.memory_space<vmem>>, %arg4: memref<1x32xf32, #tpu.memory_space<vmem>>, %arg5: memref<672x32xbf16, #tpu.memory_space<vmem>>) attributes {dimension_semantics = [#tpu.dimension_semantics<parallel>, #tpu.dimension_semantics<parallel>], iteration_bounds = array<i64: 2, 1>, scalar_prefetch = 0 : i64, scratch_operands = 0 : i64, tpu.core_type = #tpu.core_type<tc>, window_params = [{transform_indices = @transform_0, window_bounds = array<i64: 672, 576>}, {transform_indices = @transform_1, window_bounds = array<i64: 576, 32>}, {transform_indices = @transform_2, window_bounds = array<i64: 1, 32>}, {transform_indices = @transform_3, window_bounds = array<i64: 672, 32>}]} {
    %c0 = arith.constant 0 : index
    %c0_0 = arith.constant 0 : index
    %0 = vector.load %arg2[%c0, %c0_0] : memref<672x576xbf16, #tpu.memory_space<vmem>>, vector<672x576xbf16>
    %c0_1 = arith.constant 0 : index
    %c0_2 = arith.constant 0 : index
    %1 = vector.load %arg3[%c0_1, %c0_2] : memref<576x32xbf16, #tpu.memory_space<vmem>>, vector<576x32xbf16>
    %cst = arith.constant dense<0.000000e+00> : vector<672x32xf32>
    %2 = tpu.matmul %0, %1, %cst {dimension_numbers = #tpu.dot_dimension_numbers<[1], [0], [0], [1], [0, 0, 1, 1], [], []>} : vector<672x576xbf16>, vector<576x32xbf16>, vector<672x32xf32> -> vector<672x32xf32>
    %c0_3 = arith.constant 0 : index
    %c0_4 = arith.constant 0 : index
    %3 = vector.load %arg4[%c0_3, %c0_4] : memref<1x32xf32, #tpu.memory_space<vmem>>, vector<1x32xf32>
    %4 = vector.broadcast %3 : vector<1x32xf32> to vector<672x32xf32>
    %5 = arith.addf %2, %4 : vector<672x32xf32>
    %cst_5 = arith.constant 0.000000e+00 : f32
    %6 = vector.broadcast %cst_5 : f32 to vector<672x32xf32>
    %7 = arith.maximumf %5, %6 : vector<672x32xf32>
    %8 = arith.truncf %7 : vector<672x32xf32> to vector<672x32xbf16>
    %c0_6 = arith.constant 0 : index
    %c0_7 = arith.constant 0 : index
    %9 = vector.load %arg5[%c0_6, %c0_7] : memref<672x32xbf16, #tpu.memory_space<vmem>>, vector<672x32xbf16>
    tpu.vector_store %arg5[%c0_6, %c0_7], %8 {strides = array<i32>} : memref<672x32xbf16, #tpu.memory_space<vmem>>, vector<672x32xbf16>,
    return
  }
  func.func @transform_0(%arg0: i32, %arg1: i32) -> (i32, i32) {
    %c0_i32 = arith.constant 0 : i32
    %c0_i32_0 = arith.constant 0 : i32
    return %arg0, %c0_i32 : i32, i32
  }
  func.func @transform_1(%arg0: i32, %arg1: i32) -> (i32, i32) {
    %c0_i32 = arith.constant 0 : i32
    %c0_i32_0 = arith.constant 0 : i32
    return %c0_i32, %arg1 : i32, i32
  }
  func.func @transform_2(%arg0: i32, %arg1: i32) -> (i32, i32) {
    %c0_i32 = arith.constant 0 : i32
    %c0_i32_0 = arith.constant 0 : i32
    return %c0_i32, %arg1 : i32, i32
  }
  func.func @transform_3(%arg0: i32, %arg1: i32) -> (i32, i32) {
    %c0_i32 = arith.constant 0 : i32
    return %arg0, %arg1 : i32, i32
  }
}

module attributes {stable_mosaic.version = 11 : i64} {
  func.func @_mm_bias_act_kernel(%arg0: i32, %arg1: i32, %arg2: memref<672x128xbf16, #tpu.memory_space<vmem>>, %arg3: memref<128x64xbf16, #tpu.memory_space<vmem>>, %arg4: memref<1x64xf32, #tpu.memory_space<vmem>>, %arg5: memref<672x64xbf16, #tpu.memory_space<vmem>>) attributes {dimension_semantics = [#tpu.dimension_semantics<parallel>, #tpu.dimension_semantics<parallel>], iteration_bounds = array<i64: 2, 1>, scalar_prefetch = 0 : i64, scratch_operands = 0 : i64, tpu.core_type = #tpu.core_type<tc>, window_params = [{transform_indices = @transform_0, window_bounds = array<i64: 672, 128>}, {transform_indices = @transform_1, window_bounds = array<i64: 128, 64>}, {transform_indices = @transform_2, window_bounds = array<i64: 1, 64>}, {transform_indices = @transform_3, window_bounds = array<i64: 672, 64>}]} {
    %c0 = arith.constant 0 : index
    %c0_0 = arith.constant 0 : index
    %0 = vector.load %arg2[%c0, %c0_0] : memref<672x128xbf16, #tpu.memory_space<vmem>>, vector<672x128xbf16>
    %c0_1 = arith.constant 0 : index
    %c0_2 = arith.constant 0 : index
    %1 = vector.load %arg3[%c0_1, %c0_2] : memref<128x64xbf16, #tpu.memory_space<vmem>>, vector<128x64xbf16>
    %cst = arith.constant dense<0.000000e+00> : vector<672x64xf32>
    %2 = tpu.matmul %0, %1, %cst {dimension_numbers = #tpu.dot_dimension_numbers<[1], [0], [0], [1], [0, 0, 1, 1], [], []>} : vector<672x128xbf16>, vector<128x64xbf16>, vector<672x64xf32> -> vector<672x64xf32>
    %c0_3 = arith.constant 0 : index
    %c0_4 = arith.constant 0 : index
    %3 = vector.load %arg4[%c0_3, %c0_4] : memref<1x64xf32, #tpu.memory_space<vmem>>, vector<1x64xf32>
    %4 = vector.broadcast %3 : vector<1x64xf32> to vector<672x64xf32>
    %5 = arith.addf %2, %4 : vector<672x64xf32>
    %cst_5 = arith.constant 0.000000e+00 : f32
    %6 = vector.broadcast %cst_5 : f32 to vector<672x64xf32>
    %7 = arith.maximumf %5, %6 : vector<672x64xf32>
    %8 = arith.truncf %7 : vector<672x64xf32> to vector<672x64xbf16>
    %c0_6 = arith.constant 0 : index
    %c0_7 = arith.constant 0 : index
    %9 = vector.load %arg5[%c0_6, %c0_7] : memref<672x64xbf16, #tpu.memory_space<vmem>>, vector<672x64xbf16>
    tpu.vector_store %arg5[%c0_6, %c0_7], %8 {strides = array<i32>} : memref<672x64xbf16, #tpu.memory_space<vmem>>, vector<672x64xbf16>,
    return
  }
  func.func @transform_0(%arg0: i32, %arg1: i32) -> (i32, i32) {
    %c0_i32 = arith.constant 0 : i32
    %c0_i32_0 = arith.constant 0 : i32
    return %arg0, %c0_i32 : i32, i32
  }
  func.func @transform_1(%arg0: i32, %arg1: i32) -> (i32, i32) {
    %c0_i32 = arith.constant 0 : i32
    %c0_i32_0 = arith.constant 0 : i32
    return %c0_i32, %arg1 : i32, i32
  }
  func.func @transform_2(%arg0: i32, %arg1: i32) -> (i32, i32) {
    %c0_i32 = arith.constant 0 : i32
    %c0_i32_0 = arith.constant 0 : i32
    return %c0_i32, %arg1 : i32, i32
  }
  func.func @transform_3(%arg0: i32, %arg1: i32) -> (i32, i32) {
    %c0_i32 = arith.constant 0 : i32
    return %arg0, %arg1 : i32, i32
  }
}

module attributes {stable_mosaic.version = 11 : i64} {
  func.func @_mm_bias_act_kernel(%arg0: i32, %arg1: i32, %arg2: memref<2520x64xbf16, #tpu.memory_space<vmem>>, %arg3: memref<64x12xbf16, #tpu.memory_space<vmem>>, %arg4: memref<1x12xf32, #tpu.memory_space<vmem>>, %arg5: memref<2520x12xf32, #tpu.memory_space<vmem>>) attributes {dimension_semantics = [#tpu.dimension_semantics<parallel>, #tpu.dimension_semantics<parallel>], iteration_bounds = array<i64: 2, 1>, scalar_prefetch = 0 : i64, scratch_operands = 0 : i64, tpu.core_type = #tpu.core_type<tc>, window_params = [{transform_indices = @transform_0, window_bounds = array<i64: 2520, 64>}, {transform_indices = @transform_1, window_bounds = array<i64: 64, 12>}, {transform_indices = @transform_2, window_bounds = array<i64: 1, 12>}, {transform_indices = @transform_3, window_bounds = array<i64: 2520, 12>}]} {
    %c0 = arith.constant 0 : index
    %c0_0 = arith.constant 0 : index
    %0 = vector.load %arg2[%c0, %c0_0] : memref<2520x64xbf16, #tpu.memory_space<vmem>>, vector<2520x64xbf16>
    %c0_1 = arith.constant 0 : index
    %c0_2 = arith.constant 0 : index
    %1 = vector.load %arg3[%c0_1, %c0_2] : memref<64x12xbf16, #tpu.memory_space<vmem>>, vector<64x12xbf16>
    %cst = arith.constant dense<0.000000e+00> : vector<2520x12xf32>
    %2 = tpu.matmul %0, %1, %cst {dimension_numbers = #tpu.dot_dimension_numbers<[1], [0], [0], [1], [0, 0, 1, 1], [], []>} : vector<2520x64xbf16>, vector<64x12xbf16>, vector<2520x12xf32> -> vector<2520x12xf32>
    %c0_3 = arith.constant 0 : index
    %c0_4 = arith.constant 0 : index
    %3 = vector.load %arg4[%c0_3, %c0_4] : memref<1x12xf32, #tpu.memory_space<vmem>>, vector<1x12xf32>
    %4 = vector.broadcast %3 : vector<1x12xf32> to vector<2520x12xf32>
    %5 = arith.addf %2, %4 : vector<2520x12xf32>
    %c0_5 = arith.constant 0 : index
    %c0_6 = arith.constant 0 : index
    %6 = vector.load %arg5[%c0_5, %c0_6] : memref<2520x12xf32, #tpu.memory_space<vmem>>, vector<2520x12xf32>
    tpu.vector_store %arg5[%c0_5, %c0_6], %5 {strides = array<i32>} : memref<2520x12xf32, #tpu.memory_space<vmem>>, vector<2520x12xf32>,
    return
  }
  func.func @transform_0(%arg0: i32, %arg1: i32) -> (i32, i32) {
    %c0_i32 = arith.constant 0 : i32
    %c0_i32_0 = arith.constant 0 : i32
    return %arg0, %c0_i32 : i32, i32
  }
  func.func @transform_1(%arg0: i32, %arg1: i32) -> (i32, i32) {
    %c0_i32 = arith.constant 0 : i32
    %c0_i32_0 = arith.constant 0 : i32
    return %c0_i32, %arg1 : i32, i32
  }
  func.func @transform_2(%arg0: i32, %arg1: i32) -> (i32, i32) {
    %c0_i32 = arith.constant 0 : i32
    %c0_i32_0 = arith.constant 0 : i32
    return %c0_i32, %arg1 : i32, i32
  }
  func.func @transform_3(%arg0: i32, %arg1: i32) -> (i32, i32) {
    %c0_i32 = arith.constant 0 : i32
    return %arg0, %arg1 : i32, i32
  }
}

</mosaic_0001>

<bundles_post_ra>
// kernel: decoder_forward.4
= control target key start
LH: loop header
LB: loop body
LE: loop exit
PB: predicated region body
PF: predicated region fallthrough
CT: control target
= control target key end

     0   :  { %8 = vsyncpa [#allocation3], 0  ;;  %s10264_s0 = inlined_call_operand.vmem [shape: bf16[2,32], index: 0, kind: input, shape index: {}]   ;;  %s10265_s1 = inlined_call_operand.hbm [shape: bf16[32,41216], index: 1, kind: input, shape index: {}]   ;;  %s10266_s2 = inlined_call_operand.vmem [shape: f32[1,41216], index: 2, kind: input, shape index: {}]   ;;  %s10267_s3 = inlined_call_operand.vmem [shape: bf16[2,41216], index: 3, kind: output, shape index: {}]  }
   0x1   :  { %10 = vsyncpa [#allocation3 + $0x1], 0  ;;  %s9143_s12 = smov 0   ;;  %s9145_s13 = smov 0  }
   0x2   :  { %s9147_s14 = smov 0   ;;  %s9149_s15 = smov 0  }
   0x3   :  { %s9151_s16 = smov 0   ;;  %s9153_s17 = smov 0  }
   0x4 LB: > { %s7981_s18 = sadd.s32 4294967295, %s9113_s17   ;;  %s25_s19 = sadd.s32 1, %s9109_s16  ;;  %s9113_s17 = sphi %s9153_s17, %s16_s17   ;;  %s9109_s16 = sphi %s9151_s16, %s10275_s16   ;;  %s9105_s15 = sphi %s9149_s15, %s10274_s15   ;;  %s9101_s14 = sphi %s9147_s14, %s10273_s14   ;;  %s9097_s13 = sphi %s9145_s13, %s10272_s13   ;;  %s9093_s12 = sphi %s9143_s12, %s10271_s12  }
   0x5   : > { %p26_p0 = scmp.ge.s32.totalorder %s25_s19, 2  ;;  %s61_s20 = sadd.s32 1, %s9101_s14 }
   0x6   : > { %p68_p1 = scmp.ne.s32.totalorder %s9101_s14, %s9097_s13  ;;  %p69_p2 = scmp.eq.s32.totalorder %s9113_s17, 0 }
   0x7   : > { %s10277_s19 = smov (%p26_p0, %s25_s19), 0  ;;  %p74_p4 = scmp.ne.s32.totalorder %s9097_s13, %s9093_s12 }
   0x8   : > { %p70_p3 = por %p69_p2, %p68_p1  ;;  %s58_s21 = ssub.s32 %s9109_s16, %s10277_s19 }
   0x9   : > { %p75_p5 = scmp.eq.s32.totalorder %s7981_s18, 0  ;;  %p59_p6 = scmp.eq.s32.totalorder %s58_s21, 0 }
   0xa   : > { %p8495_p8 = scmp.lt.s32.totalorder %s9113_s17, 2  ;;  %s158_s24 = sand.u32 1, %s9101_s14  }
   0xb   : > { %p9182_p7 = por %p75_p5, %p74_p4  ;;  %s8475_s25 = smul.u32 10304, %s9109_s16 }
   0xc   : > { %s9188_s23 = scalar_select %p59_p6, %s9101_s14, %s61_s20  }
   0xd   : > { %s8487_s26 = smul.u32 2576, %s158_s24  ;;  %s168_s29 = scalar_lea.hbm %s10265_s1, %s8475_s25 }
   0xe   : > { %p9195_p9 = pnand %p8495_p8, %p70_p3  ;;  %p7987_p10 = scmp.ge.s32.totalorder %s9113_s17, 1 }
   0xf   : > { %s162_s4 = scalar_lea.vmem [#allocation2], %s8487_s26  ;;  %s159_s6 = scalar_lea.sflag [#allocation3], %s158_s24 }
  0x10   : > { %s169_s5 = sshll.u32 %s162_s4, 4  ;;  %p9037_p11 = pneg %p9195_p9  ;;  %s170_s5 = int_to_ptr.vmem [resolvable:$true] %s169_s5 }
  0x11   : > { %s9048_s7 = scalar_lea.vmem %s170_s5, 41216  ;;  %s9115_s8 = smov [#allocation2]  }
  0x12   : > { %p9049_p12 = scmp.ne.s32.totalorder %s170_s5, %s9048_s7  ;;  %s9053_s9 = sshll.u32 %s9115_s8, 4  ;;  %s9054_s9 = int_to_ptr.vmem [resolvable:$false] %s9053_s9 }
  0x13   : > { %s9055_s10 = scalar_lea.vmem %s9054_s9, 82432  ;;  %p9056_p1 = scmp.lt.s32.totalorder %s170_s5, %s9054_s9 }
  0x14   : > { %p9051_p13 = pnand %p9049_p12, %p9037_p11  ;;  %p9057_p2 = scmp.lt.s32.totalorder %s9055_s10, %s9048_s7 }
  0x16   : > { %p9052_p0 = pneg %p9051_p13  ;;  %p9058_p3 = por %p9057_p2, %p9056_p1 }
  0x18   : > { %p9059_p4 = pnand %p9058_p3, %p9052_p0 }
  0x1a   : > { %9062 = shalt.err (!%p9059_p4)
}
  0x1b   : > { %s9116_s11 = smov 20608   ;;  %s9117_s12 = smov 10304  }
  0x1c   : > { %s9118_s18 = smov 644   ;;  %p185_p5 = scmp.lt.s32.totalorder %s9113_s17, 3 }
  0x1d   : > { %8494 = dma.hbm_to_vmem [thread:$0]  (!%p9195_p9), %s168_s29, 41216, %s170_s5, %s159_s6, %s9116_s11, %s9117_s12, %s9118_s18  }
  0x1e   : > { %p186_p6 = pnand %p7987_p10, %p185_p5 }
  0x1f   : > { %s191_s20 = sand.u32 (!%p186_p6), 1, %s9097_s13  }
  0x20   : > { %189 = sbr.rel (%p186_p6) target bundleno = 570 (0x23a), region = 32  ;;  %s192_s24 = scalar_lea.sflag (!%p186_p6), [#allocation3], %s191_s20 }
  0x21   : > { %s8488_s21 = smul.u32 (!%p186_p6), 2576, %s191_s20 }
  0x23   : > { %s9208_s25 = scalar_lea.vmem (!%p186_p6), [#allocation2], %s8488_s21 }
  0x25   : > { %9088 = dma.done.wait (%p9182_p7), %s192_s24, 41216  }
  0x26   : > { %9090 = vsyncadd (%p9182_p7), %s192_s24, 4294926080  ;;  %v9119_v0 = vmov 0   ;;  %v8551_v1 = vld [vmem:[%s9208_s25 + $0x50c] ss:$644 sps:$4 sm:$0xff]   ;;  %v8553_v2 = vld [vmem:[%s9208_s25 + $0x514] ss:$644 sps:$4 sm:$0xff]  }
  0x27   : > { %3067 = vmatprep.mubr.bf16.mxu0 %v9119_v0  ;;  %3108 = vmatprep.mubr.bf16.mxu1 %v9119_v0  ;;  %v8555_v3 = vld [vmem:[%s9208_s25 + $0x508] ss:$644 sps:$4 sm:$0xff]   ;;  %v8556_v4 = vld [vmem:[%s9208_s25 + $0x510] ss:$644 sps:$4 sm:$0xff]   ;;  %v8561_v7 = vld [vmem:[%s9208_s25] ss:$644 sps:$4 sm:$0xff]  }
  0x28   : > { %3047 = vmatprep.subr.bf16.mxu0 %v8551_v1  ;;  %3088 = vmatprep.subr.bf16.mxu1 %v8553_v2  ;;  %v8557_v5 = vld [vmem:[%s9208_s25 + $0x4] ss:$644 sps:$4 sm:$0xff]   ;;  %v8559_v6 = vld [vmem:[%s9208_s25 + $0xc] ss:$644 sps:$4 sm:$0xff]   ;;  %v8563_v10 = vld [vmem:[%s9208_s25 + $0x518] ss:$644 sps:$4 sm:$0xff]  }
  0x29   : > { %3048 = vmatpush1.bf16.msra.mxu0 %v8555_v3  ;;  %3089 = vmatpush1.bf16.msra.mxu1 %v8556_v4  ;;  %v8562_v8 = vld [vmem:[%s9208_s25 + $0x8] ss:$644 sps:$4 sm:$0xff]   ;;  %v9227_v9 = vld [vmem:[%s10264_s0] sm:$0x1]  ;;  %vm3031_vm0 = vcmask 261120   ;;  %s232_s29 = smul.u32 161, %s9105_s15 }
  0x2a   : > { %3049 = vmatprep.subr.bf16.mxu0 %v8557_v5  ;;  %3090 = vmatprep.subr.bf16.mxu1 %v8559_v6  ;;  %v8565_v11 = vld [vmem:[%s9208_s25 + $0x51c] ss:$644 sps:$4 sm:$0xff]   ;;  %v8568_v13 = vld [vmem:[%s9208_s25 + $0x524] ss:$644 sps:$4 sm:$0xff]   ;;  %v8571_v14 = vld [vmem:[%s9208_s25 + $0x14] ss:$644 sps:$4 sm:$0xff]  }
  0x2b   : > { %v8566_v12 = vld [vmem:[%s9208_s25 + $0x520] ss:$644 sps:$4 sm:$0xff]   ;;  %v8569_v16 = vld [vmem:[%s9208_s25 + $0x10] ss:$644 sps:$4 sm:$0xff]   ;;  %v8572_v17 = vld [vmem:[%s9208_s25 + $0x18] ss:$644 sps:$4 sm:$0xff]  }
  0x2c   : > { %v8574_v15 = vld [vmem:[%s9208_s25 + $0x1c] ss:$644 sps:$4 sm:$0xff]   ;;  %v8577_v18 = vld [vmem:[%s9208_s25 + $0x52c] ss:$644 sps:$4 sm:$0xff]   ;;  %v8580_v19 = vld [vmem:[%s9208_s25 + $0x534] ss:$644 sps:$4 sm:$0xff]  }
  0x2d   : > { %3050 = vmatpush1.bf16.msra.mxu0 %v8561_v7  ;;  %3091 = vmatpush1.bf16.msra.mxu1 %v8562_v8  ;;  %v8575_v20 = vld [vmem:[%s9208_s25 + $0x528] ss:$644 sps:$4 sm:$0xff]   ;;  %v8578_v21 = vld [vmem:[%s9208_s25 + $0x530] ss:$644 sps:$4 sm:$0xff]   ;;  %v8581_v24 = vld [vmem:[%s9208_s25 + $0x20] ss:$644 sps:$4 sm:$0xff]  }
  0x2e   : > { %3129 = vmatprep.subr.bf16.mxu0 %v8565_v11  ;;  %3170 = vmatprep.subr.bf16.mxu1 %v8568_v13  ;;  %v8583_v22 = vld [vmem:[%s9208_s25 + $0x24] ss:$644 sps:$4 sm:$0xff]   ;;  %v8586_v23 = vld [vmem:[%s9208_s25 + $0x2c] ss:$644 sps:$4 sm:$0xff]   ;;  %v8589_v26 = vld [vmem:[%s9208_s25 + $0x53c] ss:$644 sps:$4 sm:$0xff]  }
  0x2f   : > { %v8584_v25 = vld [vmem:[%s9208_s25 + $0x28] ss:$644 sps:$4 sm:$0xff]   ;;  %v8587_v28 = vld [vmem:[%s9208_s25 + $0x538] ss:$644 sps:$4 sm:$0xff]   ;;  %v8590_v29 = vld [vmem:[%s9208_s25 + $0x540] ss:$644 sps:$4 sm:$0xff]  }
  0x30   : > { %8311 = vmatmul.mubr.msk.bf16.vlgmr.msra.gmra.mxu0 %vm3031_vm0, %v9227_v9  ;;  %8312 = vmatmul.mubr.msk.bf16.vlgmr.msra.gmra.mxu1 %vm3031_vm0, %v9227_v9  ;;  %v8592_v27 = vld [vmem:[%s9208_s25 + $0x544] ss:$644 sps:$4 sm:$0xff]   ;;  %v8595_v30 = vld [vmem:[%s9208_s25 + $0x34] ss:$644 sps:$4 sm:$0xff]   ;;  %v8598_v31 = vld [vmem:[%s9208_s25 + $0x3c] ss:$644 sps:$4 sm:$0xff]  }
  0x31   : > { %3130 = vmatpush1.bf16.msra.mxu0 %v8563_v10  ;;  %3171 = vmatpush1.bf16.msra.mxu1 %v8566_v12  ;;  %v8593_v32 = vld [vmem:[%s9208_s25 + $0x30] ss:$644 sps:$4 sm:$0xff]   ;;  %v8596_v33 = vld [vmem:[%s9208_s25 + $0x38] ss:$644 sps:$4 sm:$0xff]   ;;  %v8599_v36 = vld [vmem:[%s9208_s25 + $0x548] ss:$644 sps:$4 sm:$0xff]  }
  0x32   : > { %3131 = vmatprep.subr.bf16.mxu0 %v8571_v14  ;;  %3172 = vmatprep.subr.bf16.mxu1 %v8574_v15  ;;  %v8601_v34 = vld [vmem:[%s9208_s25 + $0x54c] ss:$644 sps:$4 sm:$0xff]   ;;  %v8604_v35 = vld [vmem:[%s9208_s25 + $0x554] ss:$644 sps:$4 sm:$0xff]   ;;  %v8607_v38 = vld [vmem:[%s9208_s25 + $0x44] ss:$644 sps:$4 sm:$0xff]  }
  0x33   : > { %3149 = vmatprep.mubr.bf16.mxu0 %v9119_v0  ;;  %3190 = vmatprep.mubr.bf16.mxu1 %v9119_v0  ;;  %v8602_v37 = vld [vmem:[%s9208_s25 + $0x550] ss:$644 sps:$4 sm:$0xff]   ;;  %v8605_v40 = vld [vmem:[%s9208_s25 + $0x40] ss:$644 sps:$4 sm:$0xff]   ;;  %v8608_v41 = vld [vmem:[%s9208_s25 + $0x48] ss:$644 sps:$4 sm:$0xff]  }
  0x34   : > { %v8610_v39 = vld [vmem:[%s9208_s25 + $0x4c] ss:$644 sps:$4 sm:$0xff]   ;;  %v8613_v42 = vld [vmem:[%s9208_s25 + $0x55c] ss:$644 sps:$4 sm:$0xff]   ;;  %v8616_v43 = vld [vmem:[%s9208_s25 + $0x564] ss:$644 sps:$4 sm:$0xff]  }
  0x35   : > { %3132 = vmatpush1.bf16.msra.mxu0 %v8569_v16  ;;  %3173 = vmatpush1.bf16.msra.mxu1 %v8572_v17  ;;  %v8611_v44 = vld [vmem:[%s9208_s25 + $0x558] ss:$644 sps:$4 sm:$0xff]   ;;  %v8614_v45 = vld [vmem:[%s9208_s25 + $0x560] ss:$644 sps:$4 sm:$0xff]   ;;  %v8617_v48 = vld [vmem:[%s9208_s25 + $0x50] ss:$644 sps:$4 sm:$0xff]  }
  0x36   : > { %3211 = vmatprep.subr.bf16.mxu0 %v8577_v18  ;;  %3252 = vmatprep.subr.bf16.mxu1 %v8580_v19  ;;  %v8619_v46 = vld [vmem:[%s9208_s25 + $0x54] ss:$644 sps:$4 sm:$0xff]   ;;  %v8622_v47 = vld [vmem:[%s9208_s25 + $0x5c] ss:$644 sps:$4 sm:$0xff]   ;;  %v8625_v50 = vld [vmem:[%s9208_s25 + $0x56c] ss:$644 sps:$4 sm:$0xff]  }
  0x37   : > { %v8620_v49 = vld [vmem:[%s9208_s25 + $0x58] ss:$644 sps:$4 sm:$0xff]   ;;  %v8623_v52 = vld [vmem:[%s9208_s25 + $0x568] ss:$644 sps:$4 sm:$0xff]   ;;  %v8626_v53 = vld [vmem:[%s9208_s25 + $0x570] ss:$644 sps:$4 sm:$0xff]  }
  0x38   : > { %8313 = vmatmul.mubr.msk.bf16.vlgmr.msra.gmra.mxu0 %vm3031_vm0, %v9227_v9  ;;  %8314 = vmatmul.mubr.msk.bf16.vlgmr.msra.gmra.mxu1 %vm3031_vm0, %v9227_v9  ;;  %v8628_v51 = vld [vmem:[%s9208_s25 + $0x574] ss:$644 sps:$4 sm:$0xff]   ;;  %v8631_v54 = vld [vmem:[%s9208_s25 + $0x64] ss:$644 sps:$4 sm:$0xff]   ;;  %v8634_v55 = vld [vmem:[%s9208_s25 + $0x6c] ss:$644 sps:$4 sm:$0xff]  }
  0x39   : > { %3212 = vmatpush1.bf16.msra.mxu0 %v8575_v20  ;;  %3253 = vmatpush1.bf16.msra.mxu1 %v8578_v21  ;;  %v8629_v56 = vld [vmem:[%s9208_s25 + $0x60] ss:$644 sps:$4 sm:$0xff]   ;;  %v8632_v57 = vld [vmem:[%s9208_s25 + $0x68] ss:$644 sps:$4 sm:$0xff]   ;;  %v8635_v60 = vld [vmem:[%s9208_s25 + $0x578] ss:$644 sps:$4 sm:$0xff]  }
  0x3a   : > { %3213 = vmatprep.subr.bf16.mxu0 %v8583_v22  ;;  %3254 = vmatprep.subr.bf16.mxu1 %v8586_v23  ;;  %v8637_v58 = vld [vmem:[%s9208_s25 + $0x57c] ss:$644 sps:$4 sm:$0xff]   ;;  %v8640_v59 = vld [vmem:[%s9208_s25 + $0x584] ss:$644 sps:$4 sm:$0xff]   ;;  %v8643_v62 = vld [vmem:[%s9208_s25 + $0x74] ss:$644 sps:$4 sm:$0xff]  }
  0x3b   : > { %3231 = vmatprep.mubr.bf16.mxu0 %v9119_v0  ;;  %3272 = vmatprep.mubr.bf16.mxu1 %v9119_v0  ;;  %v8638_v61 = vld [vmem:[%s9208_s25 + $0x580] ss:$644 sps:$4 sm:$0xff]   ;;  %v8641_v1 = vld [vmem:[%s9208_s25 + $0x70] ss:$644 sps:$4 sm:$0xff]   ;;  %v8644_v2 = vld [vmem:[%s9208_s25 + $0x78] ss:$644 sps:$4 sm:$0xff]  }
  0x3c   : > { %v8646_v63 = vld [vmem:[%s9208_s25 + $0x7c] ss:$644 sps:$4 sm:$0xff]   ;;  %v8649_v3 = vld [vmem:[%s9208_s25 + $0x58c] ss:$644 sps:$4 sm:$0xff]   ;;  %v8652_v4 = vld [vmem:[%s9208_s25 + $0x594] ss:$644 sps:$4 sm:$0xff]  }
  0x3d   : > { %3214 = vmatpush1.bf16.msra.mxu0 %v8581_v24  ;;  %3255 = vmatpush1.bf16.msra.mxu1 %v8584_v25  ;;  %v8647_v5 = vld [vmem:[%s9208_s25 + $0x588] ss:$644 sps:$4 sm:$0xff]   ;;  %v8650_v6 = vld [vmem:[%s9208_s25 + $0x590] ss:$644 sps:$4 sm:$0xff]   ;;  %v8653_v10 = vld [vmem:[%s9208_s25 + $0x80] ss:$644 sps:$4 sm:$0xff]  }
  0x3e   : > { %3293 = vmatprep.subr.bf16.mxu0 %v8589_v26  ;;  %3334 = vmatprep.subr.bf16.mxu1 %v8592_v27  ;;  %v8655_v7 = vld [vmem:[%s9208_s25 + $0x84] ss:$644 sps:$4 sm:$0xff]   ;;  %v8658_v8 = vld [vmem:[%s9208_s25 + $0x8c] ss:$644 sps:$4 sm:$0xff]   ;;  %v8661_v12 = vld [vmem:[%s9208_s25 + $0x59c] ss:$644 sps:$4 sm:$0xff]  }
  0x3f   : > { %v8656_v11 = vld [vmem:[%s9208_s25 + $0x88] ss:$644 sps:$4 sm:$0xff]   ;;  %v8659_v14 = vld [vmem:[%s9208_s25 + $0x598] ss:$644 sps:$4 sm:$0xff]   ;;  %v8662_v15 = vld [vmem:[%s9208_s25 + $0x5a0] ss:$644 sps:$4 sm:$0xff]  }
  0x40   : > { %8315 = vmatmul.mubr.msk.bf16.vlgmr.msra.gmra.mxu0 %vm3031_vm0, %v9227_v9  ;;  %8316 = vmatmul.mubr.msk.bf16.vlgmr.msra.gmra.mxu1 %vm3031_vm0, %v9227_v9  ;;  %v8664_v13 = vld [vmem:[%s9208_s25 + $0x5a4] ss:$644 sps:$4 sm:$0xff]   ;;  %v8667_v16 = vld [vmem:[%s9208_s25 + $0x94] ss:$644 sps:$4 sm:$0xff]   ;;  %v8670_v17 = vld [vmem:[%s9208_s25 + $0x9c] ss:$644 sps:$4 sm:$0xff]  }
  0x41   : > { %3294 = vmatpush1.bf16.msra.mxu0 %v8587_v28  ;;  %3335 = vmatpush1.bf16.msra.mxu1 %v8590_v29  ;;  %v8665_v18 = vld [vmem:[%s9208_s25 + $0x90] ss:$644 sps:$4 sm:$0xff]   ;;  %v8668_v19 = vld [vmem:[%s9208_s25 + $0x98] ss:$644 sps:$4 sm:$0xff]   ;;  %v8671_v22 = vld [vmem:[%s9208_s25 + $0x5a8] ss:$644 sps:$4 sm:$0xff]  }
  0x42   : > { %3295 = vmatprep.subr.bf16.mxu0 %v8595_v30  ;;  %3336 = vmatprep.subr.bf16.mxu1 %v8598_v31  ;;  %v8673_v20 = vld [vmem:[%s9208_s25 + $0x5ac] ss:$644 sps:$4 sm:$0xff]   ;;  %v8676_v21 = vld [vmem:[%s9208_s25 + $0x5b4] ss:$644 sps:$4 sm:$0xff]   ;;  %v8679_v24 = vld [vmem:[%s9208_s25 + $0xa4] ss:$644 sps:$4 sm:$0xff]  }
  0x43   : > { %3313 = vmatprep.mubr.bf16.mxu0 %v9119_v0  ;;  %3354 = vmatprep.mubr.bf16.mxu1 %v9119_v0  ;;  %v8674_v23 = vld [vmem:[%s9208_s25 + $0x5b0] ss:$644 sps:$4 sm:$0xff]   ;;  %v8677_v26 = vld [vmem:[%s9208_s25 + $0xa0] ss:$644 sps:$4 sm:$0xff]   ;;  %v8680_v27 = vld [vmem:[%s9208_s25 + $0xa8] ss:$644 sps:$4 sm:$0xff]  }
  0x44   : > { %v8682_v25 = vld [vmem:[%s9208_s25 + $0xac] ss:$644 sps:$4 sm:$0xff]   ;;  %v8685_v28 = vld [vmem:[%s9208_s25 + $0x5bc] ss:$644 sps:$4 sm:$0xff]   ;;  %v8688_v29 = vld [vmem:[%s9208_s25 + $0x5c4] ss:$644 sps:$4 sm:$0xff]  }
  0x45   : > { %3296 = vmatpush1.bf16.msra.mxu0 %v8593_v32  ;;  %3337 = vmatpush1.bf16.msra.mxu1 %v8596_v33  ;;  %v8683_v30 = vld [vmem:[%s9208_s25 + $0x5b8] ss:$644 sps:$4 sm:$0xff]   ;;  %v8686_v31 = vld [vmem:[%s9208_s25 + $0x5c0] ss:$644 sps:$4 sm:$0xff]   ;;  %p9553_p7 = scmp.lt.s32.totalorder %s232_s29, 321  ;;  %vm9122_vm1 = vmmov 0  }
  0x46   : > { %3375 = vmatprep.subr.bf16.mxu0 %v8601_v34  ;;  %3416 = vmatprep.subr.bf16.mxu1 %v8604_v35  ;;  %v8691_v32 = vld [vmem:[%s9208_s25 + $0xb4] ss:$644 sps:$4 sm:$0xff]   ;;  %v8694_v33 = vld [vmem:[%s9208_s25 + $0xbc] ss:$644 sps:$4 sm:$0xff]  }
  0x47   : > { %v8689_v34 = vld [vmem:[%s9208_s25 + $0xb0] ss:$644 sps:$4 sm:$0xff]   ;;  %v8692_v35 = vld [vmem:[%s9208_s25 + $0xb8] ss:$644 sps:$4 sm:$0xff]   ;;  %s10279_s29 = smov (!%p9553_p7, %s232_s29), 321 }
  0x48   : > { %8317 = vmatmul.mubr.msk.bf16.vlgmr.msra.gmra.mxu0 %vm3031_vm0, %v9227_v9  ;;  %8318 = vmatmul.mubr.msk.bf16.vlgmr.msra.gmra.mxu1 %vm3031_vm0, %v9227_v9  ;;  %s9583_s5 = scalar_lea.vmem %s10266_s2, %s10279_s29  ;;  %s9704_s8 = scalar_lea.vmem %s10267_s3, %s10279_s29 }
  0x49   : > { %3376 = vmatpush1.bf16.msra.mxu0 %v8599_v36  ;;  %3417 = vmatpush1.bf16.msra.mxu1 %v8602_v37  ;;  %v8697_v36 = vld [vmem:[%s9208_s25 + $0x5cc] ss:$644 sps:$4 sm:$0xff]   ;;  %v8700_v37 = vld [vmem:[%s9208_s25 + $0x5d4] ss:$644 sps:$4 sm:$0xff]  }
  0x4a   : > { %3377 = vmatprep.subr.bf16.mxu0 %v8607_v38  ;;  %3418 = vmatprep.subr.bf16.mxu1 %v8610_v39  ;;  %v8695_v38 = vld [vmem:[%s9208_s25 + $0x5c8] ss:$644 sps:$4 sm:$0xff]   ;;  %v8698_v39 = vld [vmem:[%s9208_s25 + $0x5d0] ss:$644 sps:$4 sm:$0xff]  }
  0x4b   : > { %3395 = vmatprep.mubr.bf16.mxu0 %v9119_v0  ;;  %3436 = vmatprep.mubr.bf16.mxu1 %v9119_v0 }
  0x4d   : > { %3378 = vmatpush1.bf16.msra.mxu0 %v8605_v40  ;;  %3419 = vmatpush1.bf16.msra.mxu1 %v8608_v41  ;;  %v8703_v40 = vld [vmem:[%s9208_s25 + $0xc4] ss:$644 sps:$4 sm:$0xff]   ;;  %v8706_v41 = vld [vmem:[%s9208_s25 + $0xcc] ss:$644 sps:$4 sm:$0xff]  }
  0x4e   : > { %3457 = vmatprep.subr.bf16.mxu0 %v8613_v42  ;;  %3498 = vmatprep.subr.bf16.mxu1 %v8616_v43  ;;  %v8701_v42 = vld [vmem:[%s9208_s25 + $0xc0] ss:$644 sps:$4 sm:$0xff]   ;;  %v8704_v43 = vld [vmem:[%s9208_s25 + $0xc8] ss:$644 sps:$4 sm:$0xff]  }
  0x50   : > { %8319 = vmatmul.mubr.msk.bf16.vlgmr.msra.gmra.mxu0 %vm3031_vm0, %v9227_v9  ;;  %8320 = vmatmul.mubr.msk.bf16.vlgmr.msra.gmra.mxu1 %vm3031_vm0, %v9227_v9 }
  0x51   : > { %3458 = vmatpush1.bf16.msra.mxu0 %v8611_v44  ;;  %3499 = vmatpush1.bf16.msra.mxu1 %v8614_v45  ;;  %v8709_v44 = vld [vmem:[%s9208_s25 + $0x5dc] ss:$644 sps:$4 sm:$0xff]   ;;  %v8712_v45 = vld [vmem:[%s9208_s25 + $0x5e4] ss:$644 sps:$4 sm:$0xff]  }
  0x52   : > { %3459 = vmatprep.subr.bf16.mxu0 %v8619_v46  ;;  %3500 = vmatprep.subr.bf16.mxu1 %v8622_v47  ;;  %v8707_v46 = vld [vmem:[%s9208_s25 + $0x5d8] ss:$644 sps:$4 sm:$0xff]   ;;  %v8710_v47 = vld [vmem:[%s9208_s25 + $0x5e0] ss:$644 sps:$4 sm:$0xff]  }
  0x53   : > { %3477 = vmatprep.mubr.bf16.mxu0 %v9119_v0  ;;  %3518 = vmatprep.mubr.bf16.mxu1 %v9119_v0 }
  0x55   : > { %3460 = vmatpush1.bf16.msra.mxu0 %v8617_v48  ;;  %3501 = vmatpush1.bf16.msra.mxu1 %v8620_v49  ;;  %v8715_v48 = vld [vmem:[%s9208_s25 + $0xd4] ss:$644 sps:$4 sm:$0xff]   ;;  %v8718_v49 = vld [vmem:[%s9208_s25 + $0xdc] ss:$644 sps:$4 sm:$0xff]  }
  0x56   : > { %3539 = vmatprep.subr.bf16.mxu0 %v8625_v50  ;;  %3580 = vmatprep.subr.bf16.mxu1 %v8628_v51  ;;  %v8713_v50 = vld [vmem:[%s9208_s25 + $0xd0] ss:$644 sps:$4 sm:$0xff]   ;;  %v8716_v51 = vld [vmem:[%s9208_s25 + $0xd8] ss:$644 sps:$4 sm:$0xff]  }
  0x58   : > { %8321 = vmatmul.mubr.msk.bf16.vlgmr.msra.gmra.mxu0 %vm3031_vm0, %v9227_v9  ;;  %8322 = vmatmul.mubr.msk.bf16.vlgmr.msra.gmra.mxu1 %vm3031_vm0, %v9227_v9 }
  0x59   : > { %3540 = vmatpush1.bf16.msra.mxu0 %v8623_v52  ;;  %3581 = vmatpush1.bf16.msra.mxu1 %v8626_v53  ;;  %v8721_v52 = vld [vmem:[%s9208_s25 + $0x5ec] ss:$644 sps:$4 sm:$0xff]   ;;  %v8724_v53 = vld [vmem:[%s9208_s25 + $0x5f4] ss:$644 sps:$4 sm:$0xff]  }
  0x5a   : > { %3541 = vmatprep.subr.bf16.mxu0 %v8631_v54  ;;  %3582 = vmatprep.subr.bf16.mxu1 %v8634_v55  ;;  %v8719_v54 = vld [vmem:[%s9208_s25 + $0x5e8] ss:$644 sps:$4 sm:$0xff]   ;;  %v8722_v55 = vld [vmem:[%s9208_s25 + $0x5f0] ss:$644 sps:$4 sm:$0xff]  }
  0x5b   : > { %3559 = vmatprep.mubr.bf16.mxu0 %v9119_v0  ;;  %3600 = vmatprep.mubr.bf16.mxu1 %v9119_v0 }
  0x5d   : > { %3542 = vmatpush1.bf16.msra.mxu0 %v8629_v56  ;;  %3583 = vmatpush1.bf16.msra.mxu1 %v8632_v57  ;;  %v8727_v56 = vld [vmem:[%s9208_s25 + $0xe4] ss:$644 sps:$4 sm:$0xff]   ;;  %v8730_v57 = vld [vmem:[%s9208_s25 + $0xec] ss:$644 sps:$4 sm:$0xff]  }
  0x5e   : > { %3621 = vmatprep.subr.bf16.mxu0 %v8637_v58  ;;  %3662 = vmatprep.subr.bf16.mxu1 %v8640_v59  ;;  %v8725_v58 = vld [vmem:[%s9208_s25 + $0xe0] ss:$644 sps:$4 sm:$0xff]   ;;  %v8728_v59 = vld [vmem:[%s9208_s25 + $0xe8] ss:$644 sps:$4 sm:$0xff]  }
  0x60   : > { %8323 = vmatmul.mubr.msk.bf16.vlgmr.msra.gmra.mxu0 %vm3031_vm0, %v9227_v9  ;;  %8324 = vmatmul.mubr.msk.bf16.vlgmr.msra.gmra.mxu1 %vm3031_vm0, %v9227_v9 }
  0x61   : > { %3622 = vmatpush1.bf16.msra.mxu0 %v8635_v60  ;;  %3663 = vmatpush1.bf16.msra.mxu1 %v8638_v61  ;;  %v8733_v60 = vld [vmem:[%s9208_s25 + $0x5fc] ss:$644 sps:$4 sm:$0xff]   ;;  %v8736_v61 = vld [vmem:[%s9208_s25 + $0x604] ss:$644 sps:$4 sm:$0xff]  }
  0x62   : > { %3623 = vmatprep.subr.bf16.mxu0 %v8643_v62  ;;  %3664 = vmatprep.subr.bf16.mxu1 %v8646_v63  ;;  %v8731_v62 = vld [vmem:[%s9208_s25 + $0x5f8] ss:$644 sps:$4 sm:$0xff]   ;;  %v8734_v63 = vld [vmem:[%s9208_s25 + $0x600] ss:$644 sps:$4 sm:$0xff]  }
  0x63   : > { %3641 = vmatprep.mubr.bf16.mxu0 %v9119_v0  ;;  %3682 = vmatprep.mubr.bf16.mxu1 %v9119_v0 }
  0x65   : > { %3624 = vmatpush1.bf16.msra.mxu0 %v8641_v1  ;;  %3665 = vmatpush1.bf16.msra.mxu1 %v8644_v2  ;;  %v8739_v1 = vld [vmem:[%s9208_s25 + $0xf4] ss:$644 sps:$4 sm:$0xff]   ;;  %v8742_v2 = vld [vmem:[%s9208_s25 + $0xfc] ss:$644 sps:$4 sm:$0xff]  }
  0x66   : > { %3703 = vmatprep.subr.bf16.mxu0 %v8649_v3  ;;  %3744 = vmatprep.subr.bf16.mxu1 %v8652_v4  ;;  %v8737_v3 = vld [vmem:[%s9208_s25 + $0xf0] ss:$644 sps:$4 sm:$0xff]   ;;  %v8740_v4 = vld [vmem:[%s9208_s25 + $0xf8] ss:$644 sps:$4 sm:$0xff]  }
  0x68   : > { %8325 = vmatmul.mubr.msk.bf16.vlgmr.msra.gmra.mxu0 %vm3031_vm0, %v9227_v9  ;;  %8326 = vmatmul.mubr.msk.bf16.vlgmr.msra.gmra.mxu1 %vm3031_vm0, %v9227_v9 }
  0x69   : > { %3704 = vmatpush1.bf16.msra.mxu0 %v8647_v5  ;;  %3745 = vmatpush1.bf16.msra.mxu1 %v8650_v6  ;;  %v8745_v5 = vld [vmem:[%s9208_s25 + $0x60c] ss:$644 sps:$4 sm:$0xff]   ;;  %v8748_v6 = vld [vmem:[%s9208_s25 + $0x614] ss:$644 sps:$4 sm:$0xff]  }
  0x6a   : > { %3705 = vmatprep.subr.bf16.mxu0 %v8655_v7  ;;  %3746 = vmatprep.subr.bf16.mxu1 %v8658_v8  ;;  %v8743_v7 = vld [vmem:[%s9208_s25 + $0x608] ss:$644 sps:$4 sm:$0xff]   ;;  %v8746_v8 = vld [vmem:[%s9208_s25 + $0x610] ss:$644 sps:$4 sm:$0xff]  }
  0x6b   : > { %3723 = vmatprep.mubr.bf16.mxu0 %v9119_v0  ;;  %3764 = vmatprep.mubr.bf16.mxu1 %v9119_v0 }
  0x6d   : > { %3706 = vmatpush1.bf16.msra.mxu0 %v8653_v10  ;;  %3747 = vmatpush1.bf16.msra.mxu1 %v8656_v11  ;;  %v8751_v10 = vld [vmem:[%s9208_s25 + $0x104] ss:$644 sps:$4 sm:$0xff]   ;;  %v8754_v11 = vld [vmem:[%s9208_s25 + $0x10c] ss:$644 sps:$4 sm:$0xff]  }
  0x6e   : > { %3785 = vmatprep.subr.bf16.mxu0 %v8661_v12  ;;  %3826 = vmatprep.subr.bf16.mxu1 %v8664_v13  ;;  %v8749_v12 = vld [vmem:[%s9208_s25 + $0x100] ss:$644 sps:$4 sm:$0xff]   ;;  %v8752_v13 = vld [vmem:[%s9208_s25 + $0x108] ss:$644 sps:$4 sm:$0xff]  }
  0x70   : > { %8327 = vmatmul.mubr.msk.bf16.vlgmr.msra.gmra.mxu0 %vm3031_vm0, %v9227_v9  ;;  %8328 = vmatmul.mubr.msk.bf16.vlgmr.msra.gmra.mxu1 %vm3031_vm0, %v9227_v9 }
  0x71   : > { %3786 = vmatpush1.bf16.msra.mxu0 %v8659_v14  ;;  %3827 = vmatpush1.bf16.msra.mxu1 %v8662_v15  ;;  %v8757_v14 = vld [vmem:[%s9208_s25 + $0x61c] ss:$644 sps:$4 sm:$0xff]   ;;  %v8760_v15 = vld [vmem:[%s9208_s25 + $0x624] ss:$644 sps:$4 sm:$0xff]  }
  0x72   : > { %3787 = vmatprep.subr.bf16.mxu0 %v8667_v16  ;;  %3828 = vmatprep.subr.bf16.mxu1 %v8670_v17  ;;  %v8758_v16 = vld [vmem:[%s9208_s25 + $0x620] ss:$644 sps:$4 sm:$0xff]   ;;  %v8763_v17 = vld [vmem:[%s9208_s25 + $0x114] ss:$644 sps:$4 sm:$0xff]  }
  0x73   : > { %3805 = vmatprep.mubr.bf16.mxu0 %v9119_v0  ;;  %3846 = vmatprep.mubr.bf16.mxu1 %v9119_v0 }
  0x75   : > { %3788 = vmatpush1.bf16.msra.mxu0 %v8665_v18  ;;  %3829 = vmatpush1.bf16.msra.mxu1 %v8668_v19  ;;  %v8766_v18 = vld [vmem:[%s9208_s25 + $0x11c] ss:$644 sps:$4 sm:$0xff]  }
  0x76   : > { %3867 = vmatprep.subr.bf16.mxu0 %v8673_v20  ;;  %3908 = vmatprep.subr.bf16.mxu1 %v8676_v21  ;;  %v9462_v19 = vld [vmem:[%s10264_s0] sm:$0x1]  ;;  %v8764_v21 = vld [vmem:[%s9208_s25 + $0x118] ss:$644 sps:$4 sm:$0xff]  }
  0x77   : > { %v8761_v20 = vld [vmem:[%s9208_s25 + $0x110] ss:$644 sps:$4 sm:$0xff]  }
  0x78   : > { %8329 = vmatmul.mubr.msk.bf16.vlgmr.msra.gmra.mxu0 %vm3031_vm0, %v9227_v9  ;;  %8330 = vmatmul.mubr.msk.bf16.vlgmr.msra.gmra.mxu1 %vm3031_vm0, %v9227_v9 }
  0x79   : > { %3868 = vmatpush1.bf16.msra.mxu0 %v8671_v22  ;;  %3909 = vmatpush1.bf16.msra.mxu1 %v8674_v23  ;;  %v8769_v22 = vld [vmem:[%s9208_s25 + $0x62c] ss:$644 sps:$4 sm:$0xff]   ;;  %v8772_v23 = vld [vmem:[%s9208_s25 + $0x634] ss:$644 sps:$4 sm:$0xff]  }
  0x7a   : > { %3869 = vmatprep.subr.bf16.mxu0 %v8679_v24  ;;  %3910 = vmatprep.subr.bf16.mxu1 %v8682_v25  ;;  %v8767_v24 = vld [vmem:[%s9208_s25 + $0x628] ss:$644 sps:$4 sm:$0xff]   ;;  %v8770_v25 = vld [vmem:[%s9208_s25 + $0x630] ss:$644 sps:$4 sm:$0xff]  }
  0x7b   : > { %3887 = vmatprep.mubr.bf16.mxu0 %v9119_v0  ;;  %3928 = vmatprep.mubr.bf16.mxu1 %v9119_v0 }
  0x7d   : > { %3870 = vmatpush1.bf16.msra.mxu0 %v8677_v26  ;;  %3911 = vmatpush1.bf16.msra.mxu1 %v8680_v27  ;;  %v8775_v26 = vld [vmem:[%s9208_s25 + $0x124] ss:$644 sps:$4 sm:$0xff]   ;;  %v8778_v27 = vld [vmem:[%s9208_s25 + $0x12c] ss:$644 sps:$4 sm:$0xff]  }
  0x7e   : > { %3949 = vmatprep.subr.bf16.mxu0 %v8685_v28  ;;  %3990 = vmatprep.subr.bf16.mxu1 %v8688_v29  ;;  %v8773_v28 = vld [vmem:[%s9208_s25 + $0x120] ss:$644 sps:$4 sm:$0xff]   ;;  %v8776_v29 = vld [vmem:[%s9208_s25 + $0x128] ss:$644 sps:$4 sm:$0xff]  }
  0x80   : > { %8331 = vmatmul.mubr.msk.bf16.vlgmr.msra.gmra.mxu0 %vm3031_vm0, %v9227_v9  ;;  %8332 = vmatmul.mubr.msk.bf16.vlgmr.msra.gmra.mxu1 %vm3031_vm0, %v9227_v9 }
  0x81   : > { %3950 = vmatpush1.bf16.msra.mxu0 %v8683_v30  ;;  %3991 = vmatpush1.bf16.msra.mxu1 %v8686_v31  ;;  %v8781_v30 = vld [vmem:[%s9208_s25 + $0x63c] ss:$644 sps:$4 sm:$0xff]   ;;  %v8784_v31 = vld [vmem:[%s9208_s25 + $0x644] ss:$644 sps:$4 sm:$0xff]  }
  0x82   : > { %3951 = vmatprep.subr.bf16.mxu0 %v8691_v32  ;;  %3992 = vmatprep.subr.bf16.mxu1 %v8694_v33  ;;  %v8779_v32 = vld [vmem:[%s9208_s25 + $0x638] ss:$644 sps:$4 sm:$0xff]   ;;  %v8782_v33 = vld [vmem:[%s9208_s25 + $0x640] ss:$644 sps:$4 sm:$0xff]  }
  0x83   : > { %3969 = vmatprep.mubr.bf16.mxu0 %v9119_v0  ;;  %4010 = vmatprep.mubr.bf16.mxu1 %v9119_v0 }
  0x85   : > { %3952 = vmatpush1.bf16.msra.mxu0 %v8689_v34  ;;  %3993 = vmatpush1.bf16.msra.mxu1 %v8692_v35  ;;  %v8787_v34 = vld [vmem:[%s9208_s25 + $0x134] ss:$644 sps:$4 sm:$0xff]   ;;  %v8790_v35 = vld [vmem:[%s9208_s25 + $0x13c] ss:$644 sps:$4 sm:$0xff]  }
  0x86   : > { %4031 = vmatprep.subr.bf16.mxu0 %v8697_v36  ;;  %4072 = vmatprep.subr.bf16.mxu1 %v8700_v37  ;;  %v8785_v36 = vld [vmem:[%s9208_s25 + $0x130] ss:$644 sps:$4 sm:$0xff]   ;;  %v8788_v37 = vld [vmem:[%s9208_s25 + $0x138] ss:$644 sps:$4 sm:$0xff]  }
  0x88   : > { %8333 = vmatmul.mubr.msk.bf16.vlgmr.msra.gmra.mxu0 %vm3031_vm0, %v9227_v9  ;;  %8334 = vmatmul.mubr.msk.bf16.vlgmr.msra.gmra.mxu1 %vm3031_vm0, %v9227_v9 }
  0x89   : > { %4032 = vmatpush1.bf16.msra.mxu0 %v8695_v38  ;;  %4073 = vmatpush1.bf16.msra.mxu1 %v8698_v39  ;;  %v8793_v38 = vld [vmem:[%s9208_s25 + $0x64c] ss:$644 sps:$4 sm:$0xff]   ;;  %v8796_v39 = vld [vmem:[%s9208_s25 + $0x654] ss:$644 sps:$4 sm:$0xff]  }
  0x8a   : > { %4033 = vmatprep.subr.bf16.mxu0 %v8703_v40  ;;  %4074 = vmatprep.subr.bf16.mxu1 %v8706_v41  ;;  %v8791_v40 = vld [vmem:[%s9208_s25 + $0x648] ss:$644 sps:$4 sm:$0xff]   ;;  %v8794_v41 = vld [vmem:[%s9208_s25 + $0x650] ss:$644 sps:$4 sm:$0xff]  }
  0x8b   : > { %4051 = vmatprep.mubr.bf16.mxu0 %v9119_v0  ;;  %4092 = vmatprep.mubr.bf16.mxu1 %v9119_v0 }
  0x8d   : > { %4034 = vmatpush1.bf16.msra.mxu0 %v8701_v42  ;;  %4075 = vmatpush1.bf16.msra.mxu1 %v8704_v43  ;;  %v8799_v42 = vld [vmem:[%s9208_s25 + $0x144] ss:$644 sps:$4 sm:$0xff]   ;;  %v8802_v43 = vld [vmem:[%s9208_s25 + $0x14c] ss:$644 sps:$4 sm:$0xff]  }
  0x8e   : > { %4113 = vmatprep.subr.bf16.mxu0 %v8709_v44  ;;  %4154 = vmatprep.subr.bf16.mxu1 %v8712_v45  ;;  %v8797_v44 = vld [vmem:[%s9208_s25 + $0x140] ss:$644 sps:$4 sm:$0xff]   ;;  %v8800_v45 = vld [vmem:[%s9208_s25 + $0x148] ss:$644 sps:$4 sm:$0xff]  }
  0x90   : > { %8335 = vmatmul.mubr.msk.bf16.vlgmr.msra.gmra.mxu0 %vm3031_vm0, %v9227_v9  ;;  %8336 = vmatmul.mubr.msk.bf16.vlgmr.msra.gmra.mxu1 %vm3031_vm0, %v9227_v9 }
  0x91   : > { %4114 = vmatpush1.bf16.msra.mxu0 %v8707_v46  ;;  %4155 = vmatpush1.bf16.msra.mxu1 %v8710_v47  ;;  %v8805_v46 = vld [vmem:[%s9208_s25 + $0x65c] ss:$644 sps:$4 sm:$0xff]   ;;  %v8808_v47 = vld [vmem:[%s9208_s25 + $0x664] ss:$644 sps:$4 sm:$0xff]  }
  0x92   : > { %4115 = vmatprep.subr.bf16.mxu0 %v8715_v48  ;;  %4156 = vmatprep.subr.bf16.mxu1 %v8718_v49  ;;  %v8803_v48 = vld [vmem:[%s9208_s25 + $0x658] ss:$644 sps:$4 sm:$0xff]   ;;  %v8806_v49 = vld [vmem:[%s9208_s25 + $0x660] ss:$644 sps:$4 sm:$0xff]  }
  0x93   : > { %4133 = vmatprep.mubr.bf16.mxu0 %v9119_v0  ;;  %4174 = vmatprep.mubr.bf16.mxu1 %v9119_v0 }
  0x95   : > { %4116 = vmatpush1.bf16.msra.mxu0 %v8713_v50  ;;  %4157 = vmatpush1.bf16.msra.mxu1 %v8716_v51  ;;  %v8811_v50 = vld [vmem:[%s9208_s25 + $0x154] ss:$644 sps:$4 sm:$0xff]   ;;  %v8814_v51 = vld [vmem:[%s9208_s25 + $0x15c] ss:$644 sps:$4 sm:$0xff]  }
  0x96   : > { %4195 = vmatprep.subr.bf16.mxu0 %v8721_v52  ;;  %4236 = vmatprep.subr.bf16.mxu1 %v8724_v53  ;;  %v8809_v52 = vld [vmem:[%s9208_s25 + $0x150] ss:$644 sps:$4 sm:$0xff]   ;;  %v8812_v53 = vld [vmem:[%s9208_s25 + $0x158] ss:$644 sps:$4 sm:$0xff]  }
  0x98   : > { %8337 = vmatmul.mubr.msk.bf16.vlgmr.msra.gmra.mxu0 %vm3031_vm0, %v9227_v9  ;;  %8338 = vmatmul.mubr.msk.bf16.vlgmr.msra.gmra.mxu1 %vm3031_vm0, %v9227_v9 }
  0x99   : > { %4196 = vmatpush1.bf16.msra.mxu0 %v8719_v54  ;;  %4237 = vmatpush1.bf16.msra.mxu1 %v8722_v55  ;;  %v8817_v54 = vld [vmem:[%s9208_s25 + $0x66c] ss:$644 sps:$4 sm:$0xff]   ;;  %v8820_v55 = vld [vmem:[%s9208_s25 + $0x674] ss:$644 sps:$4 sm:$0xff]  }
  0x9a   : > { %4197 = vmatprep.subr.bf16.mxu0 %v8727_v56  ;;  %4238 = vmatprep.subr.bf16.mxu1 %v8730_v57  ;;  %v8815_v56 = vld [vmem:[%s9208_s25 + $0x668] ss:$644 sps:$4 sm:$0xff]   ;;  %v8818_v57 = vld [vmem:[%s9208_s25 + $0x670] ss:$644 sps:$4 sm:$0xff]  }
  0x9b   : > { %4215 = vmatprep.mubr.bf16.mxu0 %v9119_v0  ;;  %4256 = vmatprep.mubr.bf16.mxu1 %v9119_v0 }
  0x9d   : > { %4198 = vmatpush1.bf16.msra.mxu0 %v8725_v58  ;;  %4239 = vmatpush1.bf16.msra.mxu1 %v8728_v59  ;;  %v8823_v58 = vld [vmem:[%s9208_s25 + $0x164] ss:$644 sps:$4 sm:$0xff]   ;;  %v8826_v59 = vld [vmem:[%s9208_s25 + $0x16c] ss:$644 sps:$4 sm:$0xff]  }
  0x9e   : > { %4277 = vmatprep.subr.bf16.mxu0 %v8733_v60  ;;  %4318 = vmatprep.subr.bf16.mxu1 %v8736_v61  ;;  %v8821_v60 = vld [vmem:[%s9208_s25 + $0x160] ss:$644 sps:$4 sm:$0xff]   ;;  %v8824_v61 = vld [vmem:[%s9208_s25 + $0x168] ss:$644 sps:$4 sm:$0xff]  }
  0xa0   : > { %8339 = vmatmul.mubr.msk.bf16.vlgmr.msra.gmra.mxu0 %vm3031_vm0, %v9227_v9  ;;  %8340 = vmatmul.mubr.msk.bf16.vlgmr.msra.gmra.mxu1 %vm3031_vm0, %v9227_v9 }
  0xa1   : > { %4278 = vmatpush1.bf16.msra.mxu0 %v8731_v62  ;;  %4319 = vmatpush1.bf16.msra.mxu1 %v8734_v63  ;;  %v8829_v62 = vld [vmem:[%s9208_s25 + $0x67c] ss:$644 sps:$4 sm:$0xff]   ;;  %v8832_v63 = vld [vmem:[%s9208_s25 + $0x684] ss:$644 sps:$4 sm:$0xff]  }
  0xa2   : > { %4279 = vmatprep.subr.bf16.mxu0 %v8739_v1  ;;  %4320 = vmatprep.subr.bf16.mxu1 %v8742_v2  ;;  %v8827_v1 = vld [vmem:[%s9208_s25 + $0x678] ss:$644 sps:$4 sm:$0xff]   ;;  %v8830_v2 = vld [vmem:[%s9208_s25 + $0x680] ss:$644 sps:$4 sm:$0xff]  }
  0xa3   : > { %4297 = vmatprep.mubr.bf16.mxu0 %v9119_v0  ;;  %4338 = vmatprep.mubr.bf16.mxu1 %v9119_v0 }
  0xa5   : > { %4280 = vmatpush1.bf16.msra.mxu0 %v8737_v3  ;;  %4321 = vmatpush1.bf16.msra.mxu1 %v8740_v4  ;;  %v8835_v3 = vld [vmem:[%s9208_s25 + $0x174] ss:$644 sps:$4 sm:$0xff]   ;;  %v8838_v4 = vld [vmem:[%s9208_s25 + $0x17c] ss:$644 sps:$4 sm:$0xff]  }
  0xa6   : > { %4359 = vmatprep.subr.bf16.mxu0 %v8745_v5  ;;  %4400 = vmatprep.subr.bf16.mxu1 %v8748_v6  ;;  %v8833_v5 = vld [vmem:[%s9208_s25 + $0x170] ss:$644 sps:$4 sm:$0xff]   ;;  %v8836_v6 = vld [vmem:[%s9208_s25 + $0x178] ss:$644 sps:$4 sm:$0xff]  }
  0xa8   : > { %8341 = vmatmul.mubr.msk.bf16.vlgmr.msra.gmra.mxu0 %vm3031_vm0, %v9227_v9  ;;  %8342 = vmatmul.mubr.msk.bf16.vlgmr.msra.gmra.mxu1 %vm3031_vm0, %v9227_v9  ;;  %v8755_v9 = vld [vmem:[%s9208_s25 + $0x618] ss:$644 sps:$4 sm:$0xff]  }
  0xa9   : > { %4360 = vmatpush1.bf16.msra.mxu0 %v8743_v7  ;;  %4401 = vmatpush1.bf16.msra.mxu1 %v8746_v8  ;;  %v8841_v7 = vld [vmem:[%s9208_s25 + $0x68c] ss:$644 sps:$4 sm:$0xff]   ;;  %v8844_v8 = vld [vmem:[%s9208_s25 + $0x694] ss:$644 sps:$4 sm:$0xff]  }
  0xaa   : > { %4361 = vmatprep.subr.bf16.mxu0 %v8751_v10  ;;  %4402 = vmatprep.subr.bf16.mxu1 %v8754_v11  ;;  %v614_v10 = vlaneseq  ;;  %v8839_v11 = vld [vmem:[%s9208_s25 + $0x688] ss:$644 sps:$4 sm:$0xff]  }
  0xab   : > { %4379 = vmatprep.mubr.bf16.mxu0 %v9119_v0  ;;  %4420 = vmatprep.mubr.bf16.mxu1 %v9119_v0 }
  0xad   : > { %4362 = vmatpush1.bf16.msra.mxu0 %v8749_v12  ;;  %4403 = vmatpush1.bf16.msra.mxu1 %v8752_v13  ;;  %v8842_v12 = vld [vmem:[%s9208_s25 + $0x690] ss:$644 sps:$4 sm:$0xff]   ;;  %v8847_v13 = vld [vmem:[%s9208_s25 + $0x184] ss:$644 sps:$4 sm:$0xff]  }
  0xae   : > { %4441 = vmatprep.subr.bf16.mxu0 %v8757_v14  ;;  %4482 = vmatprep.subr.bf16.mxu1 %v8760_v15  ;;  %v8850_v14 = vld [vmem:[%s9208_s25 + $0x18c] ss:$644 sps:$4 sm:$0xff]   ;;  %v9571_v15 = vshrl.u32 %v614_v10, 7  ;;  %v8869_v10 = vld [vmem:[%s9208_s25 + $0x1a0] ss:$644 sps:$4 sm:$0xff]  }
  0xb0   : > { %8343 = vmatmul.mubr.msk.bf16.vlgmr.msra.gmra.mxu0 %vm3031_vm0, %v9462_v19  ;;  %8344 = vmatmul.mubr.msk.bf16.vlgmr.msra.gmra.mxu1 %vm3031_vm0, %v9462_v19 }
  0xb1   : > { %4442 = vmatpush1.bf16.msra.mxu0 %v8755_v9  ;;  %4483 = vmatpush1.bf16.msra.mxu1 %v8758_v16  ;;  %v8845_v9 = vld [vmem:[%s9208_s25 + $0x180] ss:$644 sps:$4 sm:$0xff]   ;;  %v8848_v16 = vld [vmem:[%s9208_s25 + $0x188] ss:$644 sps:$4 sm:$0xff]  }
  0xb2   : > { %4443 = vmatprep.subr.bf16.mxu0 %v8763_v17  ;;  %4484 = vmatprep.subr.bf16.mxu1 %v8766_v18  ;;  %v8853_v17 = vld [vmem:[%s9208_s25 + $0x69c] ss:$644 sps:$4 sm:$0xff]   ;;  %v8856_v18 = vld [vmem:[%s9208_s25 + $0x6a4] ss:$644 sps:$4 sm:$0xff]  }
  0xb3   : > { %4461 = vmatprep.mubr.bf16.mxu0 %v9119_v0  ;;  %4502 = vmatprep.mubr.bf16.mxu1 %v9119_v0 }
  0xb5   : > { %4444 = vmatpush1.bf16.msra.mxu0 %v8761_v20  ;;  %4485 = vmatpush1.bf16.msra.mxu1 %v8764_v21  ;;  %v9590_v20 = vsub.s32 0, %v9571_v15  ;;  %v9593_v21 = vsub.s32 1, %v9571_v15 }
  0xb6   : > { %4523 = vmatprep.subr.bf16.mxu0 %v8769_v22  ;;  %4564 = vmatprep.subr.bf16.mxu1 %v8772_v23  ;;  %v9596_v22 = vsub.s32 3, %v9571_v15  ;;  %v9599_v23 = vld [vmem:[%s9583_s5] sm:$0xff] }
  0xb8   : > { %8345 = vmatmul.mubr.msk.bf16.vlgmr.msra.gmra.mxu0 %vm3031_vm0, %v9462_v19  ;;  %8346 = vmatmul.mubr.msk.bf16.vlgmr.msra.gmra.mxu1 %vm3031_vm0, %v9462_v19 }
  0xb9   : > { %4524 = vmatpush1.bf16.msra.mxu0 %v8767_v24  ;;  %4565 = vmatpush1.bf16.msra.mxu1 %v8770_v25  ;;  %v9602_v24 = vsub.s32 2, %v9571_v15  ;;  %v8851_v25 = vld [vmem:[%s9208_s25 + $0x698] ss:$644 sps:$4 sm:$0xff]  }
  0xba   : > { %4525 = vmatprep.subr.bf16.mxu0 %v8775_v26  ;;  %4566 = vmatprep.subr.bf16.mxu1 %v8778_v27  ;;  %v8854_v26 = vld [vmem:[%s9208_s25 + $0x6a0] ss:$644 sps:$4 sm:$0xff]   ;;  %v8859_v27 = vld [vmem:[%s9208_s25 + $0x194] ss:$644 sps:$4 sm:$0xff]  }
  0xbb   : > { %4543 = vmatprep.mubr.bf16.mxu0 %v9119_v0  ;;  %4584 = vmatprep.mubr.bf16.mxu1 %v9119_v0 }
  0xbd   : > { %4526 = vmatpush1.bf16.msra.mxu0 %v8773_v28  ;;  %4567 = vmatpush1.bf16.msra.mxu1 %v8776_v29  ;;  %v8862_v28 = vld [vmem:[%s9208_s25 + $0x19c] ss:$644 sps:$4 sm:$0xff]   ;;  %v621_v29 = vrot.slane %v9599_v23, %v9593_v21 }
  0xbe   : > { %4605 = vmatprep.subr.bf16.mxu0 %v8781_v30  ;;  %4646 = vmatprep.subr.bf16.mxu1 %v8784_v31  ;;  %v629_v30 = vrot.slane %v9599_v23, %v9596_v22  ;;  %v617_v31 = vrot.slane %v9599_v23, %v9590_v20 }
  0xc0   : > { %8347 = vmatmul.mubr.msk.bf16.vlgmr.msra.gmra.mxu0 %vm3031_vm0, %v9462_v19  ;;  %8348 = vmatmul.mubr.msk.bf16.vlgmr.msra.gmra.mxu1 %vm3031_vm0, %v9462_v19 }
  0xc1   : > { %4606 = vmatpush1.bf16.msra.mxu0 %v8779_v32  ;;  %4647 = vmatpush1.bf16.msra.mxu1 %v8782_v33  ;;  %v625_v33 = vrot.slane %v9599_v23, %v9602_v24 }
  0xc2   : > { %4607 = vmatprep.subr.bf16.mxu0 %v8787_v34  ;;  %4648 = vmatprep.subr.bf16.mxu1 %v8790_v35  ;;  %v8857_v35 = vld [vmem:[%s9208_s25 + $0x190] ss:$644 sps:$4 sm:$0xff]  }
  0xc3   : > { %4625 = vmatprep.mubr.bf16.mxu0 %v9119_v0  ;;  %4666 = vmatprep.mubr.bf16.mxu1 %v9119_v0 }
  0xc5   : > { %4608 = vmatpush1.bf16.msra.mxu0 %v8785_v36  ;;  %4649 = vmatpush1.bf16.msra.mxu1 %v8788_v37  ;;  %v8860_v36 = vld [vmem:[%s9208_s25 + $0x198] ss:$644 sps:$4 sm:$0xff]   ;;  %v9120_v37 = vmov 1966171168  }
  0xc6   : > { %4687 = vmatprep.subr.bf16.mxu0 %v8793_v38  ;;  %4728 = vmatprep.subr.bf16.mxu1 %v8796_v39  ;;  %v6843_v38 = vunpack.c.l.s4 %v9120_v37  ;;  %v9623_v39 = vsub.s32 4, %v9571_v15 }
  0xc8   : > { %8349 = vmatmul.mubr.msk.bf16.vlgmr.msra.gmra.mxu0 %vm3031_vm0, %v9462_v19  ;;  %8350 = vmatmul.mubr.msk.bf16.vlgmr.msra.gmra.mxu1 %vm3031_vm0, %v9462_v19 }
  0xc9   : > { %4688 = vmatpush1.bf16.msra.mxu0 %v8791_v40  ;;  %4729 = vmatpush1.bf16.msra.mxu1 %v8794_v41  ;;  %v8865_v40 = vld [vmem:[%s9208_s25 + $0x6ac] ss:$644 sps:$4 sm:$0xff]  }
  0xca   : > { %4689 = vmatprep.subr.bf16.mxu0 %v8799_v42  ;;  %4730 = vmatprep.subr.bf16.mxu1 %v8802_v43  ;;  %v9627_v43 = vsub.s32 6, %v9571_v15 }
  0xcb   : > { %4707 = vmatprep.mubr.bf16.mxu0 %v9119_v0  ;;  %4748 = vmatprep.mubr.bf16.mxu1 %v9119_v0 }
  0xcd   : > { %4690 = vmatpush1.bf16.msra.mxu0 %v8797_v44  ;;  %4731 = vmatpush1.bf16.msra.mxu1 %v8800_v45  ;;  %v8868_v44 = vld [vmem:[%s9208_s25 + $0x6b4] ss:$644 sps:$4 sm:$0xff]  }
  0xce   : > { %4769 = vmatprep.subr.bf16.mxu0 %v8805_v46  ;;  %4810 = vmatprep.subr.bf16.mxu1 %v8808_v47  ;;  %v9633_v47 = vsub.s32 5, %v9571_v15 }
  0xd0   : > { %8351 = vmatmul.mubr.msk.bf16.vlgmr.msra.gmra.mxu0 %vm3031_vm0, %v9462_v19  ;;  %8352 = vmatmul.mubr.msk.bf16.vlgmr.msra.gmra.mxu1 %vm3031_vm0, %v9462_v19 }
  0xd1   : > { %4770 = vmatpush1.bf16.msra.mxu0 %v8803_v48  ;;  %4811 = vmatpush1.bf16.msra.mxu1 %v8806_v49 }
  0xd2   : > { %4771 = vmatprep.subr.bf16.mxu0 %v8811_v50  ;;  %4812 = vmatprep.subr.bf16.mxu1 %v8814_v51 }
  0xd3   : > { %4789 = vmatprep.mubr.bf16.mxu0 %v9119_v0  ;;  %4830 = vmatprep.mubr.bf16.mxu1 %v9119_v0 }
  0xd5   : > { %4772 = vmatpush1.bf16.msra.mxu0 %v8809_v52  ;;  %4813 = vmatpush1.bf16.msra.mxu1 %v8812_v53  ;;  %v8863_v52 = vld [vmem:[%s9208_s25 + $0x6a8] ss:$644 sps:$4 sm:$0xff]   ;;  %v9637_v53 = vsub.s32 7, %v9571_v15 }
  0xd6   : > { %4851 = vmatprep.subr.bf16.mxu0 %v8817_v54  ;;  %4892 = vmatprep.subr.bf16.mxu1 %v8820_v55  ;;  %v6844_v54 = vunpack.c.0.s8 %v6843_v38  ;;  %v633_v55 = vrot.slane %v9599_v23, %v9623_v39 }
  0xd8   : > { %8353 = vmatmul.mubr.msk.bf16.vlgmr.msra.gmra.mxu0 %vm3031_vm0, %v9462_v19  ;;  %8354 = vmatmul.mubr.msk.bf16.vlgmr.msra.gmra.mxu1 %vm3031_vm0, %v9462_v19 }
  0xd9   : > { %4852 = vmatpush1.bf16.msra.mxu0 %v8815_v56  ;;  %4893 = vmatpush1.bf16.msra.mxu1 %v8818_v57  ;;  %v8866_v56 = vld [vmem:[%s9208_s25 + $0x6b0] ss:$644 sps:$4 sm:$0xff]  }
  0xda   : > { %4853 = vmatprep.subr.bf16.mxu0 %v8823_v58  ;;  %4894 = vmatprep.subr.bf16.mxu1 %v8826_v59 }
  0xdb   : > { %4871 = vmatprep.mubr.bf16.mxu0 %v9119_v0  ;;  %4912 = vmatprep.mubr.bf16.mxu1 %v9119_v0 }
  0xdd   : > { %4854 = vmatpush1.bf16.msra.mxu0 %v8821_v60  ;;  %4895 = vmatpush1.bf16.msra.mxu1 %v8824_v61  ;;  %v641_v61 = vrot.slane %v9599_v23, %v9627_v43 }
  0xde   : > { %4933 = vmatprep.subr.bf16.mxu0 %v8829_v62  ;;  %4974 = vmatprep.subr.bf16.mxu1 %v8832_v63  ;;  %v8871_v62 = vld [vmem:[%s9208_s25 + $0x1a4] ss:$644 sps:$4 sm:$0xff]   ;;  %v637_v63 = vrot.slane %v9599_v23, %v9633_v47 }
  0xe0   : > { %8355 = vmatmul.mubr.msk.bf16.vlgmr.msra.gmra.mxu0 %vm3031_vm0, %v9462_v19  ;;  %8356 = vmatmul.mubr.msk.bf16.vlgmr.msra.gmra.mxu1 %vm3031_vm0, %v9462_v19 }
  0xe1   : > { %4934 = vmatpush1.bf16.msra.mxu0 %v8827_v1  ;;  %4975 = vmatpush1.bf16.msra.mxu1 %v8830_v2  ;;  %v8874_v1 = vld [vmem:[%s9208_s25 + $0x1ac] ss:$644 sps:$4 sm:$0xff]  }
  0xe2   : > { %4935 = vmatprep.subr.bf16.mxu0 %v8835_v3  ;;  %4976 = vmatprep.subr.bf16.mxu1 %v8838_v4 }
  0xe3   : > { %4953 = vmatprep.mubr.bf16.mxu0 %v9119_v0  ;;  %4994 = vmatprep.mubr.bf16.mxu1 %v9119_v0 }
  0xe5   : > { %4936 = vmatpush1.bf16.msra.mxu0 %v8833_v5  ;;  %4977 = vmatpush1.bf16.msra.mxu1 %v8836_v6  ;;  %v645_v6 = vrot.slane %v9599_v23, %v9637_v53  ;;  %v8880_v23 = vld [vmem:[%s9208_s25 + $0x6c4] ss:$644 sps:$4 sm:$0xff]  }
  0xe6   : > { %5015 = vmatprep.subr.bf16.mxu0 %v8841_v7  ;;  %5056 = vmatprep.subr.bf16.mxu1 %v8844_v8  ;;  %v9655_v7 = vsub.s32 %v6844_v54, %v9571_v15  ;;  %v9662_v15 = vld [vmem:[%s9583_s5 + $0x8] sm:$0xff] }
  0xe8   : > { %8357 = vmatmul.mubr.msk.bf16.vlgmr.msra.gmra.mxu0 %vm3031_vm0, %v9462_v19  ;;  %8358 = vmatmul.mubr.msk.bf16.vlgmr.msra.gmra.mxu1 %vm3031_vm0, %v9462_v19 }
  0xe9   : > { %5016 = vmatpush1.bf16.msra.mxu0 %v8839_v11  ;;  %5057 = vmatpush1.bf16.msra.mxu1 %v8842_v12 }
  0xea   : > { %5017 = vmatprep.subr.bf16.mxu0 %v8847_v13  ;;  %5058 = vmatprep.subr.bf16.mxu1 %v8850_v14 }
  0xeb   : > { %5035 = vmatprep.mubr.bf16.mxu0 %v9119_v0  ;;  %5076 = vmatprep.mubr.bf16.mxu1 %v9119_v0 }
  0xed   : > { %5018 = vmatpush1.bf16.msra.mxu0 %v8845_v9  ;;  %5059 = vmatpush1.bf16.msra.mxu1 %v8848_v16  ;;  %v8872_v16 = vld [vmem:[%s9208_s25 + $0x1a8] ss:$644 sps:$4 sm:$0xff]  }
  0xee   : > { %5097 = vmatprep.subr.bf16.mxu0 %v8853_v17  ;;  %5138 = vmatprep.subr.bf16.mxu1 %v8856_v18  ;;  %v8877_v17 = vld [vmem:[%s9208_s25 + $0x6bc] ss:$644 sps:$4 sm:$0xff]  }
  0xf0   : > { %v3069_v32 = vpop.f32.mrf.mxu0  ;;  %v3110_v34 = vpop.f32.mrf.mxu1  ;;  %8359 = vmatmul.mubr.msk.bf16.vlgmr.msra.gmra.mxu0 %vm3031_vm0, %v9462_v19  ;;  %8360 = vmatmul.mubr.msk.bf16.vlgmr.msra.gmra.mxu1 %vm3031_vm0, %v9462_v19 }
  0xf1   : > { %5098 = vmatpush1.bf16.msra.mxu0 %v8851_v25  ;;  %5139 = vmatpush1.bf16.msra.mxu1 %v8854_v26  ;;  %v3070_v48 = vadd.f32 %v3069_v32, %v617_v31  ;;  %v3111_v49 = vadd.f32 %v3110_v34, %v625_v33  ;;  %v8878_v31 = vld [vmem:[%s9208_s25 + $0x6c0] ss:$644 sps:$4 sm:$0xff]   ;;  %v8883_v32 = vld [vmem:[%s9208_s25 + $0x1b4] ss:$644 sps:$4 sm:$0xff]  }
  0xf2   : > { %v3071_v41 = vpop.f32.mrf.mxu0  ;;  %v3112_v42 = vpop.f32.mrf.mxu1  ;;  %5099 = vmatprep.subr.bf16.mxu0 %v8859_v27  ;;  %5140 = vmatprep.subr.bf16.mxu1 %v8862_v28  ;;  %v8875_v28 = vld [vmem:[%s9208_s25 + $0x6b8] ss:$644 sps:$4 sm:$0xff]  }
  0xf3   : > { %v3072_v45 = vadd.f32 %v3071_v41, %v621_v29  ;;  %v3113_v46 = vadd.f32 %v3112_v42, %v629_v30  ;;  %5117 = vmatprep.mubr.bf16.mxu0 %v9119_v0  ;;  %5158 = vmatprep.mubr.bf16.mxu1 %v9119_v0  ;;  %v6355_v2 = vmax.f32 %v3070_v48, 0.0  ;;  %v6357_v3 = vmax.f32 %v3111_v49, 0.0 }
  0xf4   : > { %v3073_v50 = vpop.f32.mrf.mxu0  ;;  %v3114_v51 = vpop.f32.mrf.mxu1  ;;  %v653_v41 = vrot.slane %v9662_v15, %v9593_v21  ;;  %v661_v42 = vrot.slane %v9662_v15, %v9596_v22  ;;  %v657_v49 = vrot.slane %v9662_v15, %v9602_v24 }
  0xf5   : > { %5100 = vmatpush1.bf16.msra.mxu0 %v8857_v35  ;;  %5141 = vmatpush1.bf16.msra.mxu1 %v8860_v36  ;;  %v6356_v57 = vmax.f32 %v3072_v45, 0.0  ;;  %v6358_v58 = vmax.f32 %v3113_v46, 0.0  ;;  %v649_v46 = vrot.slane %v9662_v15, %v9590_v20 }
  0xf6   : > { %v3074_v59 = vpop.f32.mrf.mxu0  ;;  %v3115_v60 = vpop.f32.mrf.mxu1  ;;  %5179 = vmatprep.subr.bf16.mxu0 %v8865_v40  ;;  %5220 = vmatprep.subr.bf16.mxu1 %v8868_v44  ;;  %v8886_v44 = vld [vmem:[%s9208_s25 + $0x1bc] ss:$644 sps:$4 sm:$0xff]  }
  0xf7   : > { %v8392_v11 = vpack.c.bf16 %v6356_v57, %v6355_v2  ;;  %v8393_v12 = vpack.c.bf16 %v6358_v58, %v6357_v3  ;;  %v8884_v58 = vld [vmem:[%s9208_s25 + $0x1b8] ss:$644 sps:$4 sm:$0xff]   ;;  %v8889_v59 = vld [vmem:[%s9208_s25 + $0x6cc] ss:$644 sps:$4 sm:$0xff]  }
  0xf8   : > { %v3151_v4 = vpop.f32.mrf.mxu0  ;;  %v3192_v5 = vpop.f32.mrf.mxu1  ;;  %8361 = vmatmul.mubr.msk.bf16.vlgmr.msra.gmra.mxu0 %vm3031_vm0, %v9462_v19  ;;  %8362 = vmatmul.mubr.msk.bf16.vlgmr.msra.gmra.mxu1 %vm3031_vm0, %v9462_v19 }
  0xf9   : > { %v3152_v8 = vadd.f32 %v3151_v4, %v633_v55  ;;  %5180 = vmatpush1.bf16.msra.mxu0 %v8863_v52  ;;  %v3193_v13 = vadd.f32 %v3192_v5, %v641_v61  ;;  %5221 = vmatpush1.bf16.msra.mxu1 %v8866_v56  ;;  %v6848_v33 = vrot.slane %v8392_v11, %v9655_v7  ;;  %v8881_v52 = vld [vmem:[%s9208_s25 + $0x1b0] ss:$644 sps:$4 sm:$0xff]  }
  0xfa   : > { %v3153_v14 = vpop.f32.mrf.mxu0  ;;  %v3194_v9 = vpop.f32.mrf.mxu1  ;;  %5181 = vmatprep.subr.bf16.mxu0 %v8871_v62  ;;  %5222 = vmatprep.subr.bf16.mxu1 %v8874_v1  ;;  %v6855_v34 = vrot.slane %v8393_v12, %v9655_v7  ;;  %v8892_v62 = vld [vmem:[%s9208_s25 + $0x6d4] ss:$644 sps:$4 sm:$0xff]   ;;  %v665_v5 = vrot.slane %v9662_v15, %v9623_v39 }
  0xfb   : > { %v3154_v18 = vadd.f32 %v3153_v14, %v637_v63  ;;  %5199 = vmatprep.mubr.bf16.mxu0 %v9119_v0  ;;  %v3195_v25 = vadd.f32 %v3194_v9, %v645_v6  ;;  %5240 = vmatprep.mubr.bf16.mxu1 %v9119_v0  ;;  %v6359_v29 = vmax.f32 %v3152_v8, 0.0  ;;  %v6361_v35 = vmax.f32 %v3193_v13, 0.0  ;;  %v8887_v9 = vld [vmem:[%s9208_s25 + $0x6c8] ss:$644 sps:$4 sm:$0xff]  }
  0xfc   : > { %v3155_v26 = vpop.f32.mrf.mxu0  ;;  %v3196_v27 = vpop.f32.mrf.mxu1  ;;  %v6870_v54 = vcombine.low %v6848_v33, %v6855_v34  ;;  %v673_v6 = vrot.slane %v9662_v15, %v9627_v43 }
  0xfd   : > { %v6360_v30 = vmax.f32 %v3154_v18, 0.0  ;;  %5182 = vmatpush1.bf16.msra.mxu0 %v8869_v10  ;;  %v6362_v36 = vmax.f32 %v3195_v25, 0.0  ;;  %5223 = vmatpush1.bf16.msra.mxu1 %v8872_v16  ;;  %v8890_v16 = vld [vmem:[%s9208_s25 + $0x6d0] ss:$644 sps:$4 sm:$0xff]   ;;  %v8895_v18 = vld [vmem:[%s9208_s25 + $0x1c4] ss:$644 sps:$4 sm:$0xff]  }
  0xfe   : > { %v3156_v37 = vpop.f32.mrf.mxu0  ;;  %v3197_v38 = vpop.f32.mrf.mxu1  ;;  %5261 = vmatprep.subr.bf16.mxu0 %v8877_v17  ;;  %5302 = vmatprep.subr.bf16.mxu1 %v8880_v23  ;;  %v6878_v8 = vrot.slane %v6870_v54, %v9655_v7  ;;  %v669_v17 = vrot.slane %v9662_v15, %v9633_v47  ;;  %v8898_v23 = vld [vmem:[%s9208_s25 + $0x1cc] ss:$644 sps:$4 sm:$0xff]  }
  0xff   : > { %v8394_v40 = vpack.c.bf16 %v6360_v30, %v6359_v29  ;;  %v8395_v45 = vpack.c.bf16 %v6362_v36, %v6361_v35  ;;  %v677_v30 = vrot.slane %v9662_v15, %v9637_v53  ;;  %v8893_v37 = vld [vmem:[%s9208_s25 + $0x1c0] ss:$644 sps:$4 sm:$0xff]   ;;  %v8896_v38 = vld [vmem:[%s9208_s25 + $0x1c8] ss:$644 sps:$4 sm:$0xff]  }
 0x100   : > { %v3233_v48 = vpop.f32.mrf.mxu0  ;;  %v3274_v50 = vpop.f32.mrf.mxu1  ;;  %8363 = vmatmul.mubr.msk.bf16.vlgmr.msra.gmra.mxu0 %vm3031_vm0, %v9462_v19  ;;  %8364 = vmatmul.mubr.msk.bf16.vlgmr.msra.gmra.mxu1 %vm3031_vm0, %v9462_v19  ;;  %v8901_v15 = vld [vmem:[%s9208_s25 + $0x6dc] ss:$644 sps:$4 sm:$0xff]  }
 0x101   : > { %v6862_v51 = vrot.slane %v8394_v40, %v9655_v7  ;;  %5262 = vmatpush1.bf16.msra.mxu0 %v8875_v28  ;;  %v6869_v55 = vrot.slane %v8395_v45, %v9655_v7  ;;  %5303 = vmatpush1.bf16.msra.mxu1 %v8878_v31  ;;  %v3234_v1 = vadd.f32 %v3233_v48, %v649_v46 }
 0x102   : > { %v3235_v56 = vpop.f32.mrf.mxu0  ;;  %v3276_v57 = vpop.f32.mrf.mxu1  ;;  %5263 = vmatprep.subr.bf16.mxu0 %v8883_v32  ;;  %5304 = vmatprep.subr.bf16.mxu1 %v8886_v44  ;;  %v3275_v2 = vadd.f32 %v3274_v50, %v657_v49  ;;  %v9724_v49 = vld [vmem:[%s9583_s5 + $0x10] sm:$0xff] }
 0x103   : > { %v3236_v60 = vadd.f32 %v3235_v56, %v653_v41  ;;  %v3277_v61 = vadd.f32 %v3276_v57, %v661_v42  ;;  %5281 = vmatprep.mubr.bf16.mxu0 %v9119_v0  ;;  %v6871_v63 = vcombine.low %v6862_v51, %v6869_v55  ;;  %5322 = vmatprep.mubr.bf16.mxu1 %v9119_v0  ;;  %v6363_v26 = vmax.f32 %v3234_v1, 0.0  ;;  %v8904_v41 = vld [vmem:[%s9208_s25 + $0x6e4] ss:$644 sps:$4 sm:$0xff]   ;;  %v8899_v57 = vld [vmem:[%s9208_s25 + $0x6d8] ss:$644 sps:$4 sm:$0xff]  }
 0x104   : > { %v3237_v3 = vpop.f32.mrf.mxu0  ;;  %v3278_v4 = vpop.f32.mrf.mxu1  ;;  %v6365_v27 = vmax.f32 %v3275_v2, 0.0  ;;  %v681_v2 = vrot.slane %v9724_v49, %v9590_v20 }
 0x105   : > { %5264 = vmatpush1.bf16.msra.mxu0 %v8881_v52  ;;  %v6885_v10 = vrot.slane %v6871_v63, %v9655_v7  ;;  %v6364_v11 = vmax.f32 %v3236_v60, 0.0  ;;  %v6366_v12 = vmax.f32 %v3277_v61, 0.0  ;;  %5305 = vmatpush1.bf16.msra.mxu1 %v8884_v58  ;;  %v8902_v58 = vld [vmem:[%s9208_s25 + $0x6e0] ss:$644 sps:$4 sm:$0xff]   ;;  %v685_v60 = vrot.slane %v9724_v49, %v9593_v21 }
 0x106   : > { %v3238_v13 = vpop.f32.mrf.mxu0  ;;  %v3279_v14 = vpop.f32.mrf.mxu1  ;;  %5343 = vmatprep.subr.bf16.mxu0 %v8889_v59  ;;  %5384 = vmatprep.subr.bf16.mxu1 %v8892_v62  ;;  %v693_v61 = vrot.slane %v9724_v49, %v9596_v22  ;;  %v8907_v62 = vld [vmem:[%s9208_s25 + $0x1d4] ss:$644 sps:$4 sm:$0xff]   ;;  %v8910_v63 = vld [vmem:[%s9208_s25 + $0x1dc] ss:$644 sps:$4 sm:$0xff]   ;;  %v689_v4 = vrot.slane %v9724_v49, %v9602_v24 }
 0x107   : > { %v6886_v25 = vcombine.low %v6878_v8, %v6885_v10  ;;  %v8396_v32 = vpack.c.bf16 %v6364_v11, %v6363_v26  ;;  %v8397_v33 = vpack.c.bf16 %v6366_v12, %v6365_v27  ;;  %v8905_v13 = vld [vmem:[%s9208_s25 + $0x1d0] ss:$644 sps:$4 sm:$0xff]   ;;  %v8908_v14 = vld [vmem:[%s9208_s25 + $0x1d8] ss:$644 sps:$4 sm:$0xff]  }
 0x108   : > { %v3315_v28 = vpop.f32.mrf.mxu0  ;;  %v3356_v29 = vpop.f32.mrf.mxu1  ;;  %8365 = vmatmul.mubr.msk.bf16.vlgmr.msra.gmra.mxu0 %vm3031_vm0, %v9462_v19  ;;  %8366 = vmatmul.mubr.msk.bf16.vlgmr.msra.gmra.mxu1 %vm3031_vm0, %v9462_v19 }
 0x109   : > { %v3316_v31 = vadd.f32 %v3315_v28, %v665_v5  ;;  %7853 = vst [vmem:[%s9704_s8] sm:$0xff] %v6886_v25  ;;  %v3357_v34 = vadd.f32 %v3356_v29, %v673_v6  ;;  %5344 = vmatpush1.bf16.msra.mxu0 %v8887_v9  ;;  %5385 = vmatpush1.bf16.msra.mxu1 %v8890_v16 }
 0x10a   : > { %v3317_v35 = vpop.f32.mrf.mxu0  ;;  %v3358_v36 = vpop.f32.mrf.mxu1  ;;  %5345 = vmatprep.subr.bf16.mxu0 %v8895_v18  ;;  %5386 = vmatprep.subr.bf16.mxu1 %v8898_v23  ;;  %v6897_v50 = vrot.slane %v8396_v32, %v9655_v7  ;;  %v6904_v51 = vrot.slane %v8397_v33, %v9655_v7  ;;  %v8916_v18 = vld [vmem:[%s9208_s25 + $0x6f4] ss:$644 sps:$4 sm:$0xff]   ;;  %v697_v28 = vrot.slane %v9724_v49, %v9623_v39 }
 0x10b   : > { %v3318_v40 = vadd.f32 %v3317_v35, %v669_v17  ;;  %v3359_v42 = vadd.f32 %v3358_v36, %v677_v30  ;;  %5363 = vmatprep.mubr.bf16.mxu0 %v9119_v0  ;;  %5404 = vmatprep.mubr.bf16.mxu1 %v9119_v0  ;;  %v6367_v46 = vmax.f32 %v3316_v31, 0.0  ;;  %v6369_v52 = vmax.f32 %v3357_v34, 0.0  ;;  %v8913_v17 = vld [vmem:[%s9208_s25 + $0x6ec] ss:$644 sps:$4 sm:$0xff]  }
 0x10c   : > { %v3319_v44 = vpop.f32.mrf.mxu0  ;;  %v3360_v45 = vpop.f32.mrf.mxu1  ;;  %v6919_v8 = vcombine.low %v6897_v50, %v6904_v51  ;;  %v705_v29 = vrot.slane %v9724_v49, %v9627_v43  ;;  %v8911_v36 = vld [vmem:[%s9208_s25 + $0x6e8] ss:$644 sps:$4 sm:$0xff]   ;;  %v9769_v51 = vld [vmem:[%s10264_s0] sm:$0x1] }
 0x10d   : > { %v6368_v48 = vmax.f32 %v3318_v40, 0.0  ;;  %v6370_v54 = vmax.f32 %v3359_v42, 0.0  ;;  %5346 = vmatpush1.bf16.msra.mxu0 %v8893_v37  ;;  %5387 = vmatpush1.bf16.msra.mxu1 %v8896_v38  ;;  %v8914_v37 = vld [vmem:[%s9208_s25 + $0x6f0] ss:$644 sps:$4 sm:$0xff]   ;;  %v701_v38 = vrot.slane %v9724_v49, %v9633_v47  ;;  %v8919_v40 = vld [vmem:[%s9208_s25 + $0x1e4] ss:$644 sps:$4 sm:$0xff]  }
 0x10e   : > { %v3320_v55 = vpop.f32.mrf.mxu0  ;;  %v3361_v56 = vpop.f32.mrf.mxu1  ;;  %5425 = vmatprep.subr.bf16.mxu0 %v8901_v15  ;;  %5466 = vmatprep.subr.bf16.mxu1 %v8904_v41  ;;  %v6927_v30 = vrot.slane %v6919_v8, %v9655_v7 }
 0x10f   : > { %v8398_v59 = vpack.c.bf16 %v6368_v48, %v6367_v46  ;;  %v8399_v1 = vpack.c.bf16 %v6370_v54, %v6369_v52  ;;  %v709_v46 = vrot.slane %v9724_v49, %v9637_v53  ;;  %v8922_v48 = vld [vmem:[%s9208_s25 + $0x1ec] ss:$644 sps:$4 sm:$0xff]  }
 0x110   : > { %v3397_v3 = vpop.f32.mrf.mxu0  ;;  %v3438_v5 = vpop.f32.mrf.mxu1  ;;  %8367 = vmatmul.mubr.msk.bf16.vlgmr.msra.gmra.mxu0 %vm3031_vm0, %v9462_v19  ;;  %8368 = vmatmul.mubr.msk.bf16.vlgmr.msra.gmra.mxu1 %vm3031_vm0, %v9462_v19 }
 0x111   : > { %v6911_v6 = vrot.slane %v8398_v59, %v9655_v7  ;;  %v6918_v10 = vrot.slane %v8399_v1, %v9655_v7  ;;  %5426 = vmatpush1.bf16.msra.mxu0 %v8899_v57  ;;  %5467 = vmatpush1.bf16.msra.mxu1 %v8902_v58  ;;  %v3398_v25 = vadd.f32 %v3397_v3, %v681_v2  ;;  %v8917_v57 = vld [vmem:[%s9208_s25 + $0x1e0] ss:$644 sps:$4 sm:$0xff]   ;;  %v8920_v59 = vld [vmem:[%s9208_s25 + $0x1e8] ss:$644 sps:$4 sm:$0xff]  }
 0x112   : > { %v3399_v11 = vpop.f32.mrf.mxu0  ;;  %v3440_v12 = vpop.f32.mrf.mxu1  ;;  %5427 = vmatprep.subr.bf16.mxu0 %v8907_v62  ;;  %5468 = vmatprep.subr.bf16.mxu1 %v8910_v63  ;;  %v3439_v26 = vadd.f32 %v3438_v5, %v689_v4  ;;  %v8928_v1 = vld [vmem:[%s9208_s25 + $0x704] ss:$644 sps:$4 sm:$0xff]  }
 0x113   : > { %v3400_v9 = vadd.f32 %v3399_v11, %v685_v60  ;;  %v3441_v16 = vadd.f32 %v3440_v12, %v693_v61  ;;  %v6920_v23 = vcombine.low %v6911_v6, %v6918_v10  ;;  %5445 = vmatprep.mubr.bf16.mxu0 %v9119_v0  ;;  %5486 = vmatprep.mubr.bf16.mxu1 %v9119_v0  ;;  %v6371_v41 = vmax.f32 %v3398_v25, 0.0  ;;  %v8925_v60 = vld [vmem:[%s9208_s25 + $0x6fc] ss:$644 sps:$4 sm:$0xff]  }
 0x114   : > { %v3401_v19 = vpop.f32.mrf.mxu0  ;;  %v3442_v27 = vpop.f32.mrf.mxu1  ;;  %v6373_v42 = vmax.f32 %v3439_v26, 0.0  ;;  %v9783_v4 = vld [vmem:[%s9583_s5 + $0x18] sm:$0xff] }
 0x115   : > { %v6934_v31 = vrot.slane %v6920_v23, %v9655_v7  ;;  %v6372_v32 = vmax.f32 %v3400_v9, 0.0  ;;  %v6374_v33 = vmax.f32 %v3441_v16, 0.0  ;;  %5428 = vmatpush1.bf16.msra.mxu0 %v8905_v13  ;;  %5469 = vmatpush1.bf16.msra.mxu1 %v8908_v14  ;;  %v8923_v13 = vld [vmem:[%s9208_s25 + $0x6f8] ss:$644 sps:$4 sm:$0xff]   ;;  %v8926_v9 = vld [vmem:[%s9208_s25 + $0x700] ss:$644 sps:$4 sm:$0xff]   ;;  %v717_v16 = vrot.slane %v9783_v4, %v9593_v21 }
 0x116   : > { %v3402_v34 = vpop.f32.mrf.mxu0  ;;  %v3443_v35 = vpop.f32.mrf.mxu1  ;;  %5507 = vmatprep.subr.bf16.mxu0 %v8913_v17  ;;  %5548 = vmatprep.subr.bf16.mxu1 %v8916_v18  ;;  %v725_v17 = vrot.slane %v9783_v4, %v9596_v22  ;;  %v8931_v18 = vld [vmem:[%s9208_s25 + $0x1f4] ss:$644 sps:$4 sm:$0xff]   ;;  %v713_v25 = vrot.slane %v9783_v4, %v9590_v20  ;;  %v721_v19 = vrot.slane %v9783_v4, %v9602_v24 }
 0x117   : > { %v6935_v15 = vcombine.low %v6927_v30, %v6934_v31  ;;  %v8400_v52 = vpack.c.bf16 %v6372_v32, %v6371_v41  ;;  %v8401_v54 = vpack.c.bf16 %v6374_v33, %v6373_v42  ;;  %v8929_v34 = vld [vmem:[%s9208_s25 + $0x1f0] ss:$644 sps:$4 sm:$0xff]  }
 0x118   : > { %v3479_v44 = vpop.f32.mrf.mxu0  ;;  %v3520_v45 = vpop.f32.mrf.mxu1  ;;  %8369 = vmatmul.mubr.msk.bf16.vlgmr.msra.gmra.mxu0 %vm3031_vm0, %v9769_v51  ;;  %8370 = vmatmul.mubr.msk.bf16.vlgmr.msra.gmra.mxu1 %vm3031_vm0, %v9769_v51 }
 0x119   : > { %v3480_v50 = vadd.f32 %v3479_v44, %v697_v28  ;;  %7854 = vst [vmem:[%s9704_s8 + $0x8] sm:$0xff] %v6935_v15  ;;  %v3521_v55 = vadd.f32 %v3520_v45, %v705_v29  ;;  %5508 = vmatpush1.bf16.msra.mxu0 %v8911_v36  ;;  %5549 = vmatpush1.bf16.msra.mxu1 %v8914_v37  ;;  %v8934_v28 = vld [vmem:[%s9208_s25 + $0x1fc] ss:$644 sps:$4 sm:$0xff]   ;;  %v8940_v45 = vld [vmem:[%s9208_s25 + $0x714] ss:$644 sps:$4 sm:$0xff]  }
 0x11a   : > { %v3481_v49 = vpop.f32.mrf.mxu0  ;;  %v3522_v56 = vpop.f32.mrf.mxu1  ;;  %5509 = vmatprep.subr.bf16.mxu0 %v8919_v40  ;;  %5550 = vmatprep.subr.bf16.mxu1 %v8922_v48  ;;  %v6946_v5 = vrot.slane %v8400_v52, %v9655_v7  ;;  %v6953_v6 = vrot.slane %v8401_v54, %v9655_v7  ;;  %v8932_v37 = vld [vmem:[%s9208_s25 + $0x1f8] ss:$644 sps:$4 sm:$0xff]   ;;  %v737_v48 = vrot.slane %v9783_v4, %v9627_v43 }
 0x11b   : > { %v3482_v58 = vadd.f32 %v3481_v49, %v701_v38  ;;  %v3523_v61 = vadd.f32 %v3522_v56, %v709_v46  ;;  %5527 = vmatprep.mubr.bf16.mxu0 %v9119_v0  ;;  %v6375_v2 = vmax.f32 %v3480_v50, 0.0  ;;  %5568 = vmatprep.mubr.bf16.mxu1 %v9119_v0  ;;  %v6377_v8 = vmax.f32 %v3521_v55, 0.0  ;;  %v8937_v38 = vld [vmem:[%s9208_s25 + $0x70c] ss:$644 sps:$4 sm:$0xff]  }
 0x11c   : > { %v3483_v62 = vpop.f32.mrf.mxu0  ;;  %v3524_v63 = vpop.f32.mrf.mxu1  ;;  %v6968_v30 = vcombine.low %v6946_v5, %v6953_v6  ;;  %v729_v46 = vrot.slane %v9783_v4, %v9623_v39  ;;  %v8946_v5 = vld [vmem:[%s9208_s25 + $0x20c] ss:$644 sps:$4 sm:$0xff]  }
 0x11d   : > { %v6376_v3 = vmax.f32 %v3482_v58, 0.0  ;;  %v6378_v10 = vmax.f32 %v3523_v61, 0.0  ;;  %5510 = vmatpush1.bf16.msra.mxu0 %v8917_v57  ;;  %5551 = vmatpush1.bf16.msra.mxu1 %v8920_v59  ;;  %v8935_v57 = vld [vmem:[%s9208_s25 + $0x708] ss:$644 sps:$4 sm:$0xff]   ;;  %v8938_v58 = vld [vmem:[%s9208_s25 + $0x710] ss:$644 sps:$4 sm:$0xff]   ;;  %v733_v59 = vrot.slane %v9783_v4, %v9633_v47 }
 0x11e   : > { %v3484_v11 = vpop.f32.mrf.mxu0  ;;  %v3525_v12 = vpop.f32.mrf.mxu1  ;;  %5589 = vmatprep.subr.bf16.mxu0 %v8925_v60  ;;  %5630 = vmatprep.subr.bf16.mxu1 %v8928_v1  ;;  %v6976_v50 = vrot.slane %v6968_v30, %v9655_v7  ;;  %v8943_v60 = vld [vmem:[%s9208_s25 + $0x204] ss:$644 sps:$4 sm:$0xff]  }
 0x11f   : > { %v8402_v14 = vpack.c.bf16 %v6376_v3, %v6375_v2  ;;  %v8403_v23 = vpack.c.bf16 %v6378_v10, %v6377_v8  ;;  %v741_v3 = vrot.slane %v9783_v4, %v9637_v53  ;;  %v8941_v4 = vld [vmem:[%s9208_s25 + $0x200] ss:$644 sps:$4 sm:$0xff]  }
 0x120   : > { %v3561_v26 = vpop.f32.mrf.mxu0  ;;  %v3602_v27 = vpop.f32.mrf.mxu1  ;;  %8371 = vmatmul.mubr.msk.bf16.vlgmr.msra.gmra.mxu0 %vm3031_vm0, %v9769_v51  ;;  %8372 = vmatmul.mubr.msk.bf16.vlgmr.msra.gmra.mxu1 %vm3031_vm0, %v9769_v51 }
 0x121   : > { %v6960_v29 = vrot.slane %v8402_v14, %v9655_v7  ;;  %v6967_v31 = vrot.slane %v8403_v23, %v9655_v7  ;;  %5590 = vmatpush1.bf16.msra.mxu0 %v8923_v13  ;;  %5631 = vmatpush1.bf16.msra.mxu1 %v8926_v9  ;;  %v3562_v15 = vadd.f32 %v3561_v26, %v713_v25  ;;  %v8944_v9 = vld [vmem:[%s9208_s25 + $0x208] ss:$644 sps:$4 sm:$0xff]  }
 0x122   : > { %v3563_v32 = vpop.f32.mrf.mxu0  ;;  %v3604_v33 = vpop.f32.mrf.mxu1  ;;  %5591 = vmatprep.subr.bf16.mxu0 %v8931_v18  ;;  %v3603_v41 = vadd.f32 %v3602_v27, %v721_v19  ;;  %5632 = vmatprep.subr.bf16.mxu1 %v8934_v28  ;;  %v8952_v25 = vld [vmem:[%s9208_s25 + $0x724] ss:$644 sps:$4 sm:$0xff]  }
 0x123   : > { %v3564_v35 = vadd.f32 %v3563_v32, %v717_v16  ;;  %v3605_v36 = vadd.f32 %v3604_v33, %v725_v17  ;;  %v6969_v40 = vcombine.low %v6960_v29, %v6967_v31  ;;  %5609 = vmatprep.mubr.bf16.mxu0 %v9119_v0  ;;  %5650 = vmatprep.mubr.bf16.mxu1 %v9119_v0  ;;  %v6379_v62 = vmax.f32 %v3562_v15, 0.0  ;;  %v8949_v16 = vld [vmem:[%s9208_s25 + $0x71c] ss:$644 sps:$4 sm:$0xff]  }
 0x124   : > { %v3565_v42 = vpop.f32.mrf.mxu0  ;;  %v3606_v44 = vpop.f32.mrf.mxu1  ;;  %v6381_v63 = vmax.f32 %v3603_v41, 0.0  ;;  %v9837_v27 = vld [vmem:[%s9583_s5 + $0x20] sm:$0xff] }
 0x125   : > { %v6983_v52 = vrot.slane %v6969_v40, %v9655_v7  ;;  %v6380_v54 = vmax.f32 %v3564_v35, 0.0  ;;  %v6382_v55 = vmax.f32 %v3605_v36, 0.0  ;;  %5592 = vmatpush1.bf16.msra.mxu0 %v8929_v34  ;;  %5633 = vmatpush1.bf16.msra.mxu1 %v8932_v37  ;;  %v8947_v34 = vld [vmem:[%s9208_s25 + $0x718] ss:$644 sps:$4 sm:$0xff]   ;;  %v8950_v36 = vld [vmem:[%s9208_s25 + $0x720] ss:$644 sps:$4 sm:$0xff]   ;;  %v749_v37 = vrot.slane %v9837_v27, %v9593_v21 }
 0x126   : > { %v3566_v49 = vpop.f32.mrf.mxu0  ;;  %v3607_v56 = vpop.f32.mrf.mxu1  ;;  %5671 = vmatprep.subr.bf16.mxu0 %v8937_v38  ;;  %5712 = vmatprep.subr.bf16.mxu1 %v8940_v45  ;;  %v757_v38 = vrot.slane %v9837_v27, %v9596_v22  ;;  %v8955_v40 = vld [vmem:[%s9208_s25 + $0x214] ss:$644 sps:$4 sm:$0xff]   ;;  %v745_v41 = vrot.slane %v9837_v27, %v9590_v20  ;;  %v753_v44 = vrot.slane %v9837_v27, %v9602_v24 }
 0x127   : > { %v6984_v61 = vcombine.low %v6976_v50, %v6983_v52  ;;  %v8404_v8 = vpack.c.bf16 %v6380_v54, %v6379_v62  ;;  %v8405_v10 = vpack.c.bf16 %v6382_v55, %v6381_v63  ;;  %v8953_v49 = vld [vmem:[%s9208_s25 + $0x210] ss:$644 sps:$4 sm:$0xff]  }
 0x128   : > { %v3643_v1 = vpop.f32.mrf.mxu0  ;;  %v3684_v2 = vpop.f32.mrf.mxu1  ;;  %8373 = vmatmul.mubr.msk.bf16.vlgmr.msra.gmra.mxu0 %vm3031_vm0, %v9769_v51  ;;  %8374 = vmatmul.mubr.msk.bf16.vlgmr.msra.gmra.mxu1 %vm3031_vm0, %v9769_v51 }
 0x129   : > { %v3644_v6 = vadd.f32 %v3643_v1, %v729_v46  ;;  %7855 = vst [vmem:[%s9704_s8 + $0x10] sm:$0xff] %v6984_v61  ;;  %v3685_v11 = vadd.f32 %v3684_v2, %v737_v48  ;;  %5672 = vmatpush1.bf16.msra.mxu0 %v8935_v57  ;;  %5713 = vmatpush1.bf16.msra.mxu1 %v8938_v58  ;;  %v8958_v46 = vld [vmem:[%s9208_s25 + $0x21c] ss:$644 sps:$4 sm:$0xff]   ;;  %v8964_v2 = vld [vmem:[%s9208_s25 + $0x734] ss:$644 sps:$4 sm:$0xff]  }
 0x12a   : > { %v3645_v12 = vpop.f32.mrf.mxu0  ;;  %v3686_v13 = vpop.f32.mrf.mxu1  ;;  %5673 = vmatprep.subr.bf16.mxu0 %v8943_v60  ;;  %5714 = vmatprep.subr.bf16.mxu1 %v8946_v5  ;;  %v6995_v28 = vrot.slane %v8404_v8, %v9655_v7  ;;  %v7002_v29 = vrot.slane %v8405_v10, %v9655_v7  ;;  %v8956_v58 = vld [vmem:[%s9208_s25 + $0x218] ss:$644 sps:$4 sm:$0xff]   ;;  %v769_v5 = vrot.slane %v9837_v27, %v9627_v43 }
 0x12b   : > { %v3646_v14 = vadd.f32 %v3645_v12, %v733_v59  ;;  %v3687_v17 = vadd.f32 %v3686_v13, %v741_v3  ;;  %5691 = vmatprep.mubr.bf16.mxu0 %v9119_v0  ;;  %v6383_v26 = vmax.f32 %v3644_v6, 0.0  ;;  %5732 = vmatprep.mubr.bf16.mxu1 %v9119_v0  ;;  %v6385_v30 = vmax.f32 %v3685_v11, 0.0  ;;  %v8961_v59 = vld [vmem:[%s9208_s25 + $0x72c] ss:$644 sps:$4 sm:$0xff]  }
 0x12c   : > { %v3647_v18 = vpop.f32.mrf.mxu0  ;;  %v3688_v23 = vpop.f32.mrf.mxu1  ;;  %v7017_v50 = vcombine.low %v6995_v28, %v7002_v29  ;;  %v761_v3 = vrot.slane %v9837_v27, %v9623_v39  ;;  %v8970_v28 = vld [vmem:[%s9208_s25 + $0x22c] ss:$644 sps:$4 sm:$0xff]  }
 0x12d   : > { %v6384_v19 = vmax.f32 %v3646_v14, 0.0  ;;  %v6386_v31 = vmax.f32 %v3687_v17, 0.0  ;;  %5674 = vmatpush1.bf16.msra.mxu0 %v8941_v4  ;;  %5715 = vmatpush1.bf16.msra.mxu1 %v8944_v9  ;;  %v8959_v4 = vld [vmem:[%s9208_s25 + $0x728] ss:$644 sps:$4 sm:$0xff]   ;;  %v8962_v14 = vld [vmem:[%s9208_s25 + $0x730] ss:$644 sps:$4 sm:$0xff]   ;;  %v765_v9 = vrot.slane %v9837_v27, %v9633_v47 }
 0x12e   : > { %v3648_v32 = vpop.f32.mrf.mxu0  ;;  %v3689_v33 = vpop.f32.mrf.mxu1  ;;  %5753 = vmatprep.subr.bf16.mxu0 %v8949_v16  ;;  %5794 = vmatprep.subr.bf16.mxu1 %v8952_v25  ;;  %v7025_v6 = vrot.slane %v7017_v50, %v9655_v7  ;;  %v8967_v16 = vld [vmem:[%s9208_s25 + $0x224] ss:$644 sps:$4 sm:$0xff]  }
 0x12f   : > { %v8406_v35 = vpack.c.bf16 %v6384_v19, %v6383_v26  ;;  %v8407_v15 = vpack.c.bf16 %v6386_v31, %v6385_v30  ;;  %v773_v19 = vrot.slane %v9837_v27, %v9637_v53  ;;  %v8965_v27 = vld [vmem:[%s9208_s25 + $0x220] ss:$644 sps:$4 sm:$0xff]  }
 0x130   : > { %v3725_v42 = vpop.f32.mrf.mxu0  ;;  %v3766_v45 = vpop.f32.mrf.mxu1  ;;  %8375 = vmatmul.mubr.msk.bf16.vlgmr.msra.gmra.mxu0 %vm3031_vm0, %v9769_v51  ;;  %8376 = vmatmul.mubr.msk.bf16.vlgmr.msra.gmra.mxu1 %vm3031_vm0, %v9769_v51 }
 0x131   : > { %v7009_v48 = vrot.slane %v8406_v35, %v9655_v7  ;;  %v7016_v52 = vrot.slane %v8407_v15, %v9655_v7  ;;  %5754 = vmatpush1.bf16.msra.mxu0 %v8947_v34  ;;  %5795 = vmatpush1.bf16.msra.mxu1 %v8950_v36  ;;  %v3726_v61 = vadd.f32 %v3725_v42, %v745_v41  ;;  %v8968_v36 = vld [vmem:[%s9208_s25 + $0x228] ss:$644 sps:$4 sm:$0xff]  }
 0x132   : > { %v3727_v54 = vpop.f32.mrf.mxu0  ;;  %v3768_v55 = vpop.f32.mrf.mxu1  ;;  %5755 = vmatprep.subr.bf16.mxu0 %v8955_v40  ;;  %v3767_v62 = vadd.f32 %v3766_v45, %v753_v44  ;;  %5796 = vmatprep.subr.bf16.mxu1 %v8958_v46  ;;  %v8976_v41 = vld [vmem:[%s9208_s25 + $0x744] ss:$644 sps:$4 sm:$0xff]  }
 0x133   : > { %v3728_v56 = vadd.f32 %v3727_v54, %v749_v37  ;;  %v3769_v57 = vadd.f32 %v3768_v55, %v757_v38  ;;  %v7018_v60 = vcombine.low %v7009_v48, %v7016_v52  ;;  %5773 = vmatprep.mubr.bf16.mxu0 %v9119_v0  ;;  %5814 = vmatprep.mubr.bf16.mxu1 %v9119_v0  ;;  %v6387_v18 = vmax.f32 %v3726_v61, 0.0  ;;  %v8973_v37 = vld [vmem:[%s9208_s25 + $0x73c] ss:$644 sps:$4 sm:$0xff]  }
 0x134   : > { %v3729_v63 = vpop.f32.mrf.mxu0  ;;  %v3770_v1 = vpop.f32.mrf.mxu1  ;;  %v6389_v23 = vmax.f32 %v3767_v62, 0.0  ;;  %v9891_v45 = vld [vmem:[%s9583_s5 + $0x28] sm:$0xff] }
 0x135   : > { %v7032_v8 = vrot.slane %v7018_v60, %v9655_v7  ;;  %v6388_v10 = vmax.f32 %v3728_v56, 0.0  ;;  %v6390_v11 = vmax.f32 %v3769_v57, 0.0  ;;  %5756 = vmatpush1.bf16.msra.mxu0 %v8953_v49  ;;  %5797 = vmatpush1.bf16.msra.mxu1 %v8956_v58  ;;  %v8971_v49 = vld [vmem:[%s9208_s25 + $0x738] ss:$644 sps:$4 sm:$0xff]   ;;  %v8974_v57 = vld [vmem:[%s9208_s25 + $0x740] ss:$644 sps:$4 sm:$0xff]   ;;  %v781_v58 = vrot.slane %v9891_v45, %v9593_v21 }
 0x136   : > { %v3730_v12 = vpop.f32.mrf.mxu0  ;;  %v3771_v13 = vpop.f32.mrf.mxu1  ;;  %5835 = vmatprep.subr.bf16.mxu0 %v8961_v59  ;;  %5876 = vmatprep.subr.bf16.mxu1 %v8964_v2  ;;  %v789_v59 = vrot.slane %v9891_v45, %v9596_v22  ;;  %v8979_v60 = vld [vmem:[%s9208_s25 + $0x234] ss:$644 sps:$4 sm:$0xff]   ;;  %v777_v62 = vrot.slane %v9891_v45, %v9590_v20  ;;  %v785_v1 = vrot.slane %v9891_v45, %v9602_v24 }
 0x137   : > { %v7033_v17 = vcombine.low %v7025_v6, %v7032_v8  ;;  %v8408_v30 = vpack.c.bf16 %v6388_v10, %v6387_v18  ;;  %v8409_v31 = vpack.c.bf16 %v6390_v11, %v6389_v23  ;;  %v8977_v12 = vld [vmem:[%s9208_s25 + $0x230] ss:$644 sps:$4 sm:$0xff]  }
 0x138   : > { %v3807_v25 = vpop.f32.mrf.mxu0  ;;  %v3848_v26 = vpop.f32.mrf.mxu1  ;;  %8377 = vmatmul.mubr.msk.bf16.vlgmr.msra.gmra.mxu0 %vm3031_vm0, %v9769_v51  ;;  %8378 = vmatmul.mubr.msk.bf16.vlgmr.msra.gmra.mxu1 %vm3031_vm0, %v9769_v51 }
 0x139   : > { %v3808_v29 = vadd.f32 %v3807_v25, %v761_v3  ;;  %7856 = vst [vmem:[%s9704_s8 + $0x18] sm:$0xff] %v7033_v17  ;;  %v3849_v32 = vadd.f32 %v3848_v26, %v769_v5  ;;  %5836 = vmatpush1.bf16.msra.mxu0 %v8959_v4  ;;  %5877 = vmatpush1.bf16.msra.mxu1 %v8962_v14  ;;  %v8982_v3 = vld [vmem:[%s9208_s25 + $0x23c] ss:$644 sps:$4 sm:$0xff]   ;;  %v8988_v26 = vld [vmem:[%s9208_s25 + $0x754] ss:$644 sps:$4 sm:$0xff]  }
 0x13a   : > { %v3809_v33 = vpop.f32.mrf.mxu0  ;;  %v3850_v34 = vpop.f32.mrf.mxu1  ;;  %5837 = vmatprep.subr.bf16.mxu0 %v8967_v16  ;;  %5878 = vmatprep.subr.bf16.mxu1 %v8970_v28  ;;  %v7044_v46 = vrot.slane %v8408_v30, %v9655_v7  ;;  %v7051_v48 = vrot.slane %v8409_v31, %v9655_v7  ;;  %v8980_v14 = vld [vmem:[%s9208_s25 + $0x238] ss:$644 sps:$4 sm:$0xff]   ;;  %v801_v28 = vrot.slane %v9891_v45, %v9627_v43 }
 0x13b   : > { %v3810_v35 = vadd.f32 %v3809_v33, %v765_v9  ;;  %v3851_v38 = vadd.f32 %v3850_v34, %v773_v19  ;;  %5855 = vmatprep.mubr.bf16.mxu0 %v9119_v0  ;;  %v6391_v42 = vmax.f32 %v3808_v29, 0.0  ;;  %5896 = vmatprep.mubr.bf16.mxu1 %v9119_v0  ;;  %v6393_v50 = vmax.f32 %v3849_v32, 0.0  ;;  %v8985_v9 = vld [vmem:[%s9208_s25 + $0x74c] ss:$644 sps:$4 sm:$0xff]  }
 0x13c   : > { %v3811_v40 = vpop.f32.mrf.mxu0  ;;  %v3852_v15 = vpop.f32.mrf.mxu1  ;;  %v7066_v6 = vcombine.low %v7044_v46, %v7051_v48  ;;  %v793_v19 = vrot.slane %v9891_v45, %v9623_v39  ;;  %v8994_v46 = vld [vmem:[%s9208_s25 + $0x24c] ss:$644 sps:$4 sm:$0xff]  }
 0x13d   : > { %v6392_v44 = vmax.f32 %v3810_v35, 0.0  ;;  %v6394_v52 = vmax.f32 %v3851_v38, 0.0  ;;  %5838 = vmatpush1.bf16.msra.mxu0 %v8965_v27  ;;  %5879 = vmatpush1.bf16.msra.mxu1 %v8968_v36  ;;  %v8983_v27 = vld [vmem:[%s9208_s25 + $0x748] ss:$644 sps:$4 sm:$0xff]   ;;  %v8986_v35 = vld [vmem:[%s9208_s25 + $0x750] ss:$644 sps:$4 sm:$0xff]   ;;  %v797_v36 = vrot.slane %v9891_v45, %v9633_v47 }
 0x13e   : > { %v3812_v54 = vpop.f32.mrf.mxu0  ;;  %v3853_v55 = vpop.f32.mrf.mxu1  ;;  %5917 = vmatprep.subr.bf16.mxu0 %v8973_v37  ;;  %5958 = vmatprep.subr.bf16.mxu1 %v8976_v41  ;;  %v7074_v29 = vrot.slane %v7066_v6, %v9655_v7  ;;  %v8991_v37 = vld [vmem:[%s9208_s25 + $0x244] ss:$644 sps:$4 sm:$0xff]  }
 0x13f   : > { %v8410_v56 = vpack.c.bf16 %v6392_v44, %v6391_v42  ;;  %v8411_v61 = vpack.c.bf16 %v6394_v52, %v6393_v50  ;;  %v805_v44 = vrot.slane %v9891_v45, %v9637_v53  ;;  %v8989_v45 = vld [vmem:[%s9208_s25 + $0x240] ss:$644 sps:$4 sm:$0xff]  }
 0x140   : > { %v3889_v63 = vpop.f32.mrf.mxu0  ;;  %v3930_v2 = vpop.f32.mrf.mxu1  ;;  %8379 = vmatmul.mubr.msk.bf16.vlgmr.msra.gmra.mxu0 %vm3031_vm0, %v9769_v51  ;;  %8380 = vmatmul.mubr.msk.bf16.vlgmr.msra.gmra.mxu1 %vm3031_vm0, %v9769_v51 }
 0x141   : > { %v7058_v5 = vrot.slane %v8410_v56, %v9655_v7  ;;  %v7065_v8 = vrot.slane %v8411_v61, %v9655_v7  ;;  %5918 = vmatpush1.bf16.msra.mxu0 %v8971_v49  ;;  %5959 = vmatpush1.bf16.msra.mxu1 %v8974_v57  ;;  %v3890_v17 = vadd.f32 %v3889_v63, %v777_v62  ;;  %v8992_v57 = vld [vmem:[%s9208_s25 + $0x248] ss:$644 sps:$4 sm:$0xff]  }
 0x142   : > { %v3891_v10 = vpop.f32.mrf.mxu0  ;;  %v3932_v11 = vpop.f32.mrf.mxu1  ;;  %5919 = vmatprep.subr.bf16.mxu0 %v8979_v60  ;;  %v3931_v18 = vadd.f32 %v3930_v2, %v785_v1  ;;  %5960 = vmatprep.subr.bf16.mxu1 %v8982_v3  ;;  %v9000_v62 = vld [vmem:[%s9208_s25 + $0x764] ss:$644 sps:$4 sm:$0xff]  }
 0x143   : > { %v3892_v13 = vadd.f32 %v3891_v10, %v781_v58  ;;  %v3933_v4 = vadd.f32 %v3932_v11, %v789_v59  ;;  %v7067_v16 = vcombine.low %v7058_v5, %v7065_v8  ;;  %5937 = vmatprep.mubr.bf16.mxu0 %v9119_v0  ;;  %5978 = vmatprep.mubr.bf16.mxu1 %v9119_v0  ;;  %v6395_v40 = vmax.f32 %v3890_v17, 0.0  ;;  %v8997_v58 = vld [vmem:[%s9208_s25 + $0x75c] ss:$644 sps:$4 sm:$0xff]  }
 0x144   : > { %v3893_v23 = vpop.f32.mrf.mxu0  ;;  %v3934_v25 = vpop.f32.mrf.mxu1  ;;  %v6397_v15 = vmax.f32 %v3931_v18, 0.0  ;;  %v9945_v2 = vld [vmem:[%s9583_s5 + $0x30] sm:$0xff] }
 0x145   : > { %v7081_v30 = vrot.slane %v7067_v16, %v9655_v7  ;;  %v6396_v31 = vmax.f32 %v3892_v13, 0.0  ;;  %v6398_v32 = vmax.f32 %v3933_v4, 0.0  ;;  %5920 = vmatpush1.bf16.msra.mxu0 %v8977_v12  ;;  %5961 = vmatpush1.bf16.msra.mxu1 %v8980_v14  ;;  %v8995_v12 = vld [vmem:[%s9208_s25 + $0x758] ss:$644 sps:$4 sm:$0xff]   ;;  %v8998_v4 = vld [vmem:[%s9208_s25 + $0x760] ss:$644 sps:$4 sm:$0xff]   ;;  %v813_v14 = vrot.slane %v9945_v2, %v9593_v21 }
 0x146   : > { %v3894_v33 = vpop.f32.mrf.mxu0  ;;  %v3935_v34 = vpop.f32.mrf.mxu1  ;;  %5999 = vmatprep.subr.bf16.mxu0 %v8985_v9  ;;  %6040 = vmatprep.subr.bf16.mxu1 %v8988_v26  ;;  %v821_v9 = vrot.slane %v9945_v2, %v9596_v22  ;;  %v9003_v16 = vld [vmem:[%s9208_s25 + $0x254] ss:$644 sps:$4 sm:$0xff]   ;;  %v809_v18 = vrot.slane %v9945_v2, %v9590_v20  ;;  %v817_v25 = vrot.slane %v9945_v2, %v9602_v24 }
 0x147   : > { %v7082_v38 = vcombine.low %v7074_v29, %v7081_v30  ;;  %v8412_v50 = vpack.c.bf16 %v6396_v31, %v6395_v40  ;;  %v8413_v52 = vpack.c.bf16 %v6398_v32, %v6397_v15  ;;  %v9001_v33 = vld [vmem:[%s9208_s25 + $0x250] ss:$644 sps:$4 sm:$0xff]  }
 0x148   : > { %v3971_v41 = vpop.f32.mrf.mxu0  ;;  %v4012_v42 = vpop.f32.mrf.mxu1  ;;  %8381 = vmatmul.mubr.msk.bf16.vlgmr.msra.gmra.mxu0 %vm3031_vm0, %v9769_v51  ;;  %8382 = vmatmul.mubr.msk.bf16.vlgmr.msra.gmra.mxu1 %vm3031_vm0, %v9769_v51 }
 0x149   : > { %v3972_v48 = vadd.f32 %v3971_v41, %v793_v19  ;;  %7857 = vst [vmem:[%s9704_s8 + $0x20] sm:$0xff] %v7082_v38  ;;  %v4013_v54 = vadd.f32 %v4012_v42, %v801_v28  ;;  %6000 = vmatpush1.bf16.msra.mxu0 %v8983_v27  ;;  %6041 = vmatpush1.bf16.msra.mxu1 %v8986_v35  ;;  %v9006_v19 = vld [vmem:[%s9208_s25 + $0x25c] ss:$644 sps:$4 sm:$0xff]   ;;  %v9012_v42 = vld [vmem:[%s9208_s25 + $0x774] ss:$644 sps:$4 sm:$0xff]  }
 0x14a   : > { %v3973_v55 = vpop.f32.mrf.mxu0  ;;  %v4014_v49 = vpop.f32.mrf.mxu1  ;;  %6001 = vmatprep.subr.bf16.mxu0 %v8991_v37  ;;  %6042 = vmatprep.subr.bf16.mxu1 %v8994_v46  ;;  %v7093_v3 = vrot.slane %v8412_v50, %v9655_v7  ;;  %v7100_v5 = vrot.slane %v8413_v52, %v9655_v7  ;;  %v9004_v35 = vld [vmem:[%s9208_s25 + $0x258] ss:$644 sps:$4 sm:$0xff]   ;;  %v833_v46 = vrot.slane %v9945_v2, %v9627_v43 }
 0x14b   : > { %v3974_v56 = vadd.f32 %v3973_v55, %v797_v36  ;;  %v4015_v59 = vadd.f32 %v4014_v49, %v805_v44  ;;  %6019 = vmatprep.mubr.bf16.mxu0 %v9119_v0  ;;  %v6399_v63 = vmax.f32 %v3972_v48, 0.0  ;;  %6060 = vmatprep.mubr.bf16.mxu1 %v9119_v0  ;;  %v6401_v6 = vmax.f32 %v4013_v54, 0.0  ;;  %v9009_v36 = vld [vmem:[%s9208_s25 + $0x76c] ss:$644 sps:$4 sm:$0xff]  }
 0x14c   : > { %v3975_v60 = vpop.f32.mrf.mxu0  ;;  %v4016_v61 = vpop.f32.mrf.mxu1  ;;  %v7115_v29 = vcombine.low %v7093_v3, %v7100_v5  ;;  %v825_v44 = vrot.slane %v9945_v2, %v9623_v39  ;;  %v9018_v3 = vld [vmem:[%s9208_s25 + $0x26c] ss:$644 sps:$4 sm:$0xff]  }
 0x14d   : > { %v6400_v1 = vmax.f32 %v3974_v56, 0.0  ;;  %v6402_v8 = vmax.f32 %v4015_v59, 0.0  ;;  %6002 = vmatpush1.bf16.msra.mxu0 %v8989_v45  ;;  %6043 = vmatpush1.bf16.msra.mxu1 %v8992_v57  ;;  %v9007_v45 = vld [vmem:[%s9208_s25 + $0x768] ss:$644 sps:$4 sm:$0xff]   ;;  %v9010_v56 = vld [vmem:[%s9208_s25 + $0x770] ss:$644 sps:$4 sm:$0xff]   ;;  %v829_v57 = vrot.slane %v9945_v2, %v9633_v47 }
 0x14e   : > { %v3976_v10 = vpop.f32.mrf.mxu0  ;;  %v4017_v11 = vpop.f32.mrf.mxu1  ;;  %6081 = vmatprep.subr.bf16.mxu0 %v8997_v58  ;;  %6122 = vmatprep.subr.bf16.mxu1 %v9000_v62  ;;  %v7123_v48 = vrot.slane %v7115_v29, %v9655_v7  ;;  %v9015_v58 = vld [vmem:[%s9208_s25 + $0x264] ss:$644 sps:$4 sm:$0xff]  }
 0x14f   : > { %v8414_v13 = vpack.c.bf16 %v6400_v1, %v6399_v63  ;;  %v8415_v17 = vpack.c.bf16 %v6402_v8, %v6401_v6  ;;  %v837_v1 = vrot.slane %v9945_v2, %v9637_v53  ;;  %v9013_v2 = vld [vmem:[%s9208_s25 + $0x260] ss:$644 sps:$4 sm:$0xff]  }
 0x150   : > { %v4053_v23 = vpop.f32.mrf.mxu0  ;;  %v4094_v26 = vpop.f32.mrf.mxu1  ;;  %8383 = vmatmul.mubr.msk.bf16.vlgmr.msra.gmra.mxu0 %vm3031_vm0, %v9769_v51  ;;  %8384 = vmatmul.mubr.msk.bf16.vlgmr.msra.gmra.mxu1 %vm3031_vm0, %v9769_v51 }
 0x151   : > { %v7107_v28 = vrot.slane %v8414_v13, %v9655_v7  ;;  %v7114_v30 = vrot.slane %v8415_v17, %v9655_v7  ;;  %6082 = vmatpush1.bf16.msra.mxu0 %v8995_v12  ;;  %6123 = vmatpush1.bf16.msra.mxu1 %v8998_v4  ;;  %v4054_v38 = vadd.f32 %v4053_v23, %v809_v18  ;;  %v9016_v4 = vld [vmem:[%s9208_s25 + $0x268] ss:$644 sps:$4 sm:$0xff]  }
 0x152   : > { %v4055_v31 = vpop.f32.mrf.mxu0  ;;  %v4096_v32 = vpop.f32.mrf.mxu1  ;;  %6083 = vmatprep.subr.bf16.mxu0 %v9003_v16  ;;  %v4095_v40 = vadd.f32 %v4094_v26, %v817_v25  ;;  %6124 = vmatprep.subr.bf16.mxu1 %v9006_v19  ;;  %v9024_v18 = vld [vmem:[%s9208_s25 + $0x784] ss:$644 sps:$4 sm:$0xff]  }
 0x153   : > { %v4056_v34 = vadd.f32 %v4055_v31, %v813_v14  ;;  %v4097_v27 = vadd.f32 %v4096_v32, %v821_v9  ;;  %v7116_v37 = vcombine.low %v7107_v28, %v7114_v30  ;;  %6101 = vmatprep.mubr.bf16.mxu0 %v9119_v0  ;;  %6142 = vmatprep.mubr.bf16.mxu1 %v9119_v0  ;;  %v6403_v60 = vmax.f32 %v4054_v38, 0.0  ;;  %v9021_v14 = vld [vmem:[%s9208_s25 + $0x77c] ss:$644 sps:$4 sm:$0xff]  }
 0x154   : > { %v4057_v15 = vpop.f32.mrf.mxu0  ;;  %v4098_v41 = vpop.f32.mrf.mxu1  ;;  %v6405_v61 = vmax.f32 %v4095_v40, 0.0  ;;  %v9999_v26 = vld [vmem:[%s9583_s5 + $0x38] sm:$0xff] }
 0x155   : > { %v7130_v50 = vrot.slane %v7116_v37, %v9655_v7  ;;  %v6404_v52 = vmax.f32 %v4056_v34, 0.0  ;;  %v6406_v54 = vmax.f32 %v4097_v27, 0.0  ;;  %6084 = vmatpush1.bf16.msra.mxu0 %v9001_v33  ;;  %6125 = vmatpush1.bf16.msra.mxu1 %v9004_v35  ;;  %v9019_v33 = vld [vmem:[%s9208_s25 + $0x778] ss:$644 sps:$4 sm:$0xff]   ;;  %v9022_v27 = vld [vmem:[%s9208_s25 + $0x780] ss:$644 sps:$4 sm:$0xff]   ;;  %v845_v35 = vrot.slane %v9999_v26, %v9593_v21 }
 0x156   : > { %v4058_v55 = vpop.f32.mrf.mxu0  ;;  %v4099_v49 = vpop.f32.mrf.mxu1  ;;  %6163 = vmatprep.subr.bf16.mxu0 %v9009_v36  ;;  %6204 = vmatprep.subr.bf16.mxu1 %v9012_v42  ;;  %v853_v36 = vrot.slane %v9999_v26, %v9596_v22  ;;  %v9027_v37 = vld [vmem:[%s9208_s25 + $0x274] ss:$644 sps:$4 sm:$0xff]   ;;  %v841_v40 = vrot.slane %v9999_v26, %v9590_v20  ;;  %v849_v41 = vrot.slane %v9999_v26, %v9602_v24 }
 0x157   : > { %v7131_v59 = vcombine.low %v7123_v48, %v7130_v50  ;;  %v8416_v6 = vpack.c.bf16 %v6404_v52, %v6403_v60  ;;  %v8417_v8 = vpack.c.bf16 %v6406_v54, %v6405_v61  ;;  %v9025_v55 = vld [vmem:[%s9208_s25 + $0x270] ss:$644 sps:$4 sm:$0xff]  }
 0x158   : > { %v4135_v62 = vpop.f32.mrf.mxu0  ;;  %v4176_v63 = vpop.f32.mrf.mxu1  ;;  %8385 = vmatmul.mubr.msk.bf16.vlgmr.msra.gmra.mxu0 %vm3031_vm0, %v9769_v51  ;;  %8386 = vmatmul.mubr.msk.bf16.vlgmr.msra.gmra.mxu1 %vm3031_vm0, %v9769_v51 }
 0x159   : > { %v4136_v5 = vadd.f32 %v4135_v62, %v825_v44  ;;  %7858 = vst [vmem:[%s9704_s8 + $0x28] sm:$0xff] %v7131_v59  ;;  %v4177_v10 = vadd.f32 %v4176_v63, %v833_v46  ;;  %6164 = vmatpush1.bf16.msra.mxu0 %v9007_v45  ;;  %6205 = vmatpush1.bf16.msra.mxu1 %v9010_v56  ;;  %v9030_v44 = vld [vmem:[%s9208_s25 + $0x27c] ss:$644 sps:$4 sm:$0xff]  }
 0x15a   : > { %v4137_v11 = vpop.f32.mrf.mxu0  ;;  %v4178_v12 = vpop.f32.mrf.mxu1  ;;  %6165 = vmatprep.subr.bf16.mxu0 %v9015_v58  ;;  %6206 = vmatprep.subr.bf16.mxu1 %v9018_v3  ;;  %v7142_v19 = vrot.slane %v8416_v6, %v9655_v7  ;;  %v7149_v28 = vrot.slane %v8417_v8, %v9655_v7  ;;  %v9028_v56 = vld [vmem:[%s9208_s25 + $0x278] ss:$644 sps:$4 sm:$0xff]   ;;  %v857_v62 = vrot.slane %v9999_v26, %v9623_v39 }
 0x15b   : > { %v4138_v13 = vadd.f32 %v4137_v11, %v829_v57  ;;  %v4179_v9 = vadd.f32 %v4178_v12, %v837_v1  ;;  %6183 = vmatprep.mubr.bf16.mxu0 %v9119_v0  ;;  %v6407_v23 = vmax.f32 %v4136_v5, 0.0  ;;  %6224 = vmatprep.mubr.bf16.mxu1 %v9119_v0  ;;  %v6409_v29 = vmax.f32 %v4177_v10, 0.0  ;;  %v9031_v11 = vld [vmem:[%s9208_s25 + $0x788] ss:$644 sps:$4 sm:$0xff]  }
 0x15c   : > { %v4139_v16 = vpop.f32.mrf.mxu0  ;;  %v4180_v17 = vpop.f32.mrf.mxu1  ;;  %v7164_v48 = vcombine.low %v7142_v19, %v7149_v28  ;;  %v865_v63 = vrot.slane %v9999_v26, %v9627_v43  ;;  %v9121_v12 = vmov 0.0  }
 0x15d   : > { %v6408_v25 = vmax.f32 %v4138_v13, 0.0  ;;  %v6410_v30 = vmax.f32 %v4179_v9, 0.0  ;;  %6166 = vmatpush1.bf16.msra.mxu0 %v9013_v2  ;;  %6207 = vmatpush1.bf16.msra.mxu1 %v9016_v4  ;;  %v869_v16 = vrot.slane %v9999_v26, %v9637_v53 }
 0x15e   : > { %v4140_v31 = vpop.f32.mrf.mxu0  ;;  %v4181_v32 = vpop.f32.mrf.mxu1  ;;  %6245 = vmatprep.subr.bf16.mxu0 %v9021_v14  ;;  %6286 = vmatprep.subr.bf16.mxu1 %v9024_v18  ;;  %v7172_v1 = vrot.slane %v7164_v48, %v9655_v7 }
 0x15f   : > { %v8418_v34 = vpack.c.bf16 %v6408_v25, %v6407_v23  ;;  %v8419_v38 = vpack.c.bf16 %v6410_v30, %v6409_v29  ;;  %v9032_v29 = vld [vmem:[%s9208_s25 + $0x280] ss:$644 sps:$4 sm:$0xff]  }
 0x160   : > { %v4217_v15 = vpop.f32.mrf.mxu0  ;;  %v4258_v42 = vpop.f32.mrf.mxu1  ;;  %8387 = vmatmul.mubr.msk.bf16.vlgmr.msra.gmra.mxu0 %vm3031_vm0, %v9769_v51  ;;  %8388 = vmatmul.mubr.msk.bf16.vlgmr.msra.gmra.mxu1 %vm3031_vm0, %v9769_v51 }
 0x161   : > { %v7156_v46 = vrot.slane %v8418_v34, %v9655_v7  ;;  %v7163_v50 = vrot.slane %v8419_v38, %v9655_v7  ;;  %6246 = vmatpush1.bf16.msra.mxu0 %v9019_v33  ;;  %6287 = vmatpush1.bf16.msra.mxu1 %v9022_v27  ;;  %v4218_v58 = vadd.f32 %v4217_v15, %v841_v40  ;;  %v580_v27 = vld [vmem:[%s9583_s5 + $0x40] sm:$0xff] }
 0x162   : > { %v4219_v52 = vpop.f32.mrf.mxu0  ;;  %v4260_v54 = vpop.f32.mrf.mxu1  ;;  %6247 = vmatprep.subr.bf16.mxu0 %v9027_v37  ;;  %v4259_v59 = vadd.f32 %v4258_v42, %v849_v41  ;;  %6288 = vmatprep.subr.bf16.mxu1 %v9030_v44  ;;  %v877_v42 = vrot.slane %v580_v27, %v9593_v21  ;;  %v885_v44 = vrot.slane %v580_v27, %v9596_v22 }
 0x163   : > { %v4220_v49 = vadd.f32 %v4219_v52, %v845_v35  ;;  %v4261_v45 = vadd.f32 %v4260_v54, %v853_v36  ;;  %v7165_v57 = vcombine.low %v7156_v46, %v7163_v50  ;;  %6265 = vmatprep.mubr.bf16.mxu0 %v9119_v0  ;;  %6306 = vmatprep.mubr.bf16.mxu1 %v9119_v0  ;;  %v6411_v13 = vmax.f32 %v4218_v58, 0.0 }
 0x164   : > { %v4221_v60 = vpop.f32.mrf.mxu0  ;;  %v4262_v61 = vpop.f32.mrf.mxu1  ;;  %v861_v0 = vrot.slane %v9999_v26, %v9633_v47  ;;  %v6413_v4 = vmax.f32 %v4259_v59, 0.0  ;;  %v873_v48 = vrot.slane %v580_v27, %v9590_v20  ;;  %v881_v52 = vrot.slane %v580_v27, %v9602_v24 }
 0x165   : > { %v7179_v3 = vrot.slane %v7165_v57, %v9655_v7  ;;  %v6412_v5 = vmax.f32 %v4220_v49, 0.0  ;;  %v6414_v6 = vmax.f32 %v4261_v45, 0.0  ;;  %6248 = vmatpush1.bf16.msra.mxu0 %v9025_v55  ;;  %6289 = vmatpush1.bf16.msra.mxu1 %v9028_v56 }
 0x166   : > { %v4222_v8 = vpop.f32.mrf.mxu0  ;;  %v4263_v10 = vpop.f32.mrf.mxu1  ;;  %8479 = vmatprep.subr.bf16.mxu0 %v9121_v12 }
 0x167   : > { %v7180_v2 = vcombine.low %v7172_v1, %v7179_v3  ;;  %v8420_v18 = vpack.c.bf16 %v6412_v5, %v6411_v13  ;;  %v8421_v23 = vpack.c.bf16 %v6414_v6, %v6413_v4  ;;  %v889_v3 = vrot.slane %v580_v27, %v9623_v39 }
 0x168   : > { %v4299_v14 = vpop.f32.mrf.mxu0  ;;  %v4340_v9 = vpop.f32.mrf.mxu1  ;;  %8389 = vmatmul.mubr.msk.bf16.vlgmr.msra.gmra.mxu0 %vm3031_vm0, %v9769_v51  ;;  %8390 = vmatmul.mubr.msk.bf16.vlgmr.msra.gmra.mxu1 %vm3031_vm0, %v9769_v51  ;;  %v897_v5 = vrot.slane %v580_v27, %v9627_v43 }
 0x169   : > { %v4300_v17 = vadd.f32 %v4299_v14, %v857_v62  ;;  %7859 = vst [vmem:[%s9704_s8 + $0x30] sm:$0xff] %v7180_v2  ;;  %v4341_v25 = vadd.f32 %v4340_v9, %v865_v63  ;;  %8480 = vmatpush3.bf16.msra.mxu0 %v9031_v11  ;;  %8483 = vmatprep.mubr.msk.bf16.mxu0 %vm9122_vm1, %v9121_v12 }
 0x16a   : > { %v4301_v19 = vpop.f32.mrf.mxu0  ;;  %v4342_v28 = vpop.f32.mrf.mxu1  ;;  %8481 = vmatprep.subr.bf16.mxu0 %v9121_v12  ;;  %v7191_v35 = vrot.slane %v8420_v18, %v9655_v7  ;;  %v7198_v36 = vrot.slane %v8421_v23, %v9655_v7 }
 0x16b   : > { %v4302_v30 = vadd.f32 %v4301_v19, %v861_v0  ;;  %v4343_v26 = vadd.f32 %v4342_v28, %v869_v16  ;;  %v6415_v33 = vmax.f32 %v4300_v17, 0.0  ;;  %v6417_v37 = vmax.f32 %v4341_v25, 0.0 }
 0x16c   : > { %v4303_v31 = vpop.f32.mrf.mxu0  ;;  %v4344_v32 = vpop.f32.mrf.mxu1  ;;  %v7213_v49 = vcombine.low %v7191_v35, %v7198_v36  ;;  %v893_v0 = vrot.slane %v580_v27, %v9633_v47  ;;  %v901_v16 = vrot.slane %v580_v27, %v9637_v53 }
 0x16d   : > { %v6416_v34 = vmax.f32 %v4302_v30, 0.0  ;;  %v6418_v38 = vmax.f32 %v4343_v26, 0.0  ;;  %8482 = vmatpush3.bf16.msra.mxu0 %v9032_v29 }
 0x16e   : > { %v4304_v40 = vpop.f32.mrf.mxu0  ;;  %v4345_v15 = vpop.f32.mrf.mxu1  ;;  %v7221_v6 = vrot.slane %v7213_v49, %v9655_v7 }
 0x16f   : > { %v8422_v41 = vpack.c.bf16 %v6416_v34, %v6415_v33  ;;  %v8423_v46 = vpack.c.bf16 %v6418_v38, %v6417_v37  ;;  %v581_v34 = vld [vmem:[%s9583_s5 + $0x48] sm:$0xff] }
 0x170   : > { %v4381_v50 = vpop.f32.mrf.mxu0  ;;  %v4422_v54 = vpop.f32.mrf.mxu1  ;;  %8484 = vmatmul.mubr.msk.bf16.vlgmr.msra.gmra.mxu0 %vm3031_vm0, %v9769_v51 }
 0x171   : > { %v7205_v55 = vrot.slane %v8422_v41, %v9655_v7  ;;  %v7212_v45 = vrot.slane %v8423_v46, %v9655_v7  ;;  %v4382_v61 = vadd.f32 %v4381_v50, %v873_v48  ;;  %v4423_v62 = vadd.f32 %v4422_v54, %v881_v52 }
 0x172   : > { %v4383_v56 = vpop.f32.mrf.mxu0  ;;  %v4424_v57 = vpop.f32.mrf.mxu1  ;;  %v909_v41 = vrot.slane %v581_v34, %v9593_v21  ;;  %v905_v46 = vrot.slane %v581_v34, %v9590_v20  ;;  %v913_v50 = vrot.slane %v581_v34, %v9602_v24 }
 0x173   : > { %v4384_v58 = vadd.f32 %v4383_v56, %v877_v42  ;;  %v4425_v59 = vadd.f32 %v4424_v57, %v885_v44  ;;  %v7214_v60 = vcombine.low %v7205_v55, %v7212_v45  ;;  %v6419_v13 = vmax.f32 %v4382_v61, 0.0 }
 0x174   : > { %v4385_v63 = vpop.f32.mrf.mxu0  ;;  %v4426_v1 = vpop.f32.mrf.mxu1  ;;  %v6421_v4 = vmax.f32 %v4423_v62, 0.0  ;;  %v917_v42 = vrot.slane %v581_v34, %v9596_v22 }
 0x175   : > { %v7228_v51 = vrot.slane %v7214_v60, %v9655_v7  ;;  %v6420_v8 = vmax.f32 %v4384_v58, 0.0  ;;  %v6422_v10 = vmax.f32 %v4425_v59, 0.0  ;;  %v921_v1 = vrot.slane %v581_v34, %v9623_v39 }
 0x176   : > { %v4386_v11 = vpop.f32.mrf.mxu0  ;;  %v4427_v12 = vpop.f32.mrf.mxu1 }
 0x177   : > { %v7229_v2 = vcombine.low %v7221_v6, %v7228_v51  ;;  %v8424_v18 = vpack.c.bf16 %v6420_v8, %v6419_v13  ;;  %v8425_v23 = vpack.c.bf16 %v6422_v10, %v6421_v4  ;;  %v925_v12 = vrot.slane %v581_v34, %v9633_v47 }
 0x178   : > { %v4463_v14 = vpop.f32.mrf.mxu0  ;;  %v4504_v9 = vpop.f32.mrf.mxu1 }
 0x179   : > { %v4464_v17 = vadd.f32 %v4463_v14, %v889_v3  ;;  %7860 = vst [vmem:[%s9704_s8 + $0x38] sm:$0xff] %v7229_v2  ;;  %v4505_v25 = vadd.f32 %v4504_v9, %v897_v5  ;;  %v7240_v35 = vrot.slane %v8424_v18, %v9655_v7  ;;  %v7247_v36 = vrot.slane %v8425_v23, %v9655_v7 }
 0x17a   : > { %v4465_v19 = vpop.f32.mrf.mxu0  ;;  %v4506_v28 = vpop.f32.mrf.mxu1  ;;  %v929_v3 = vrot.slane %v581_v34, %v9627_v43  ;;  %v933_v9 = vrot.slane %v581_v34, %v9637_v53 }
 0x17b   : > { %v4466_v29 = vadd.f32 %v4465_v19, %v893_v0  ;;  %v4507_v30 = vadd.f32 %v4506_v28, %v901_v16  ;;  %v6423_v32 = vmax.f32 %v4464_v17, 0.0  ;;  %v6425_v37 = vmax.f32 %v4505_v25, 0.0 }
 0x17c   : > { %v4467_v26 = vpop.f32.mrf.mxu0  ;;  %v4508_v31 = vpop.f32.mrf.mxu1  ;;  %v7262_v55 = vcombine.low %v7240_v35, %v7247_v36 }
 0x17d   : > { %v6424_v33 = vmax.f32 %v4466_v29, 0.0  ;;  %v6426_v27 = vmax.f32 %v4507_v30, 0.0 }
 0x17e   : > { %v4468_v38 = vpop.f32.mrf.mxu0  ;;  %v4509_v40 = vpop.f32.mrf.mxu1  ;;  %v7270_v5 = vrot.slane %v7262_v55, %v9655_v7 }
 0x17f   : > { %v8426_v15 = vpack.c.bf16 %v6424_v33, %v6423_v32  ;;  %v8427_v44 = vpack.c.bf16 %v6426_v27, %v6425_v37  ;;  %v582_v33 = vld [vmem:[%s9583_s5 + $0x50] sm:$0xff] }
 0x180   : > { %v4545_v48 = vpop.f32.mrf.mxu0  ;;  %v4586_v52 = vpop.f32.mrf.mxu1 }
 0x181   : > { %v7254_v54 = vrot.slane %v8426_v15, %v9655_v7  ;;  %v7261_v49 = vrot.slane %v8427_v44, %v9655_v7  ;;  %v4546_v60 = vadd.f32 %v4545_v48, %v905_v46  ;;  %v4587_v61 = vadd.f32 %v4586_v52, %v913_v50 }
 0x182   : > { %v4547_v45 = vpop.f32.mrf.mxu0  ;;  %v4588_v56 = vpop.f32.mrf.mxu1  ;;  %v941_v15 = vrot.slane %v582_v33, %v9593_v21  ;;  %v937_v44 = vrot.slane %v582_v33, %v9590_v20  ;;  %v945_v48 = vrot.slane %v582_v33, %v9602_v24 }
 0x183   : > { %v4548_v57 = vadd.f32 %v4547_v45, %v909_v41  ;;  %v4589_v58 = vadd.f32 %v4588_v56, %v917_v42  ;;  %v7263_v59 = vcombine.low %v7254_v54, %v7261_v49  ;;  %v6427_v2 = vmax.f32 %v4546_v60, 0.0 }
 0x184   : > { %v4549_v62 = vpop.f32.mrf.mxu0  ;;  %v4590_v63 = vpop.f32.mrf.mxu1  ;;  %v6429_v13 = vmax.f32 %v4587_v61, 0.0  ;;  %v949_v41 = vrot.slane %v582_v33, %v9596_v22 }
 0x185   : > { %v7277_v6 = vrot.slane %v7263_v59, %v9655_v7  ;;  %v6428_v51 = vmax.f32 %v4548_v57, 0.0  ;;  %v6430_v8 = vmax.f32 %v4589_v58, 0.0  ;;  %v953_v63 = vrot.slane %v582_v33, %v9623_v39 }
 0x186   : > { %v4550_v10 = vpop.f32.mrf.mxu0  ;;  %v4591_v11 = vpop.f32.mrf.mxu1 }
 0x187   : > { %v7278_v0 = vcombine.low %v7270_v5, %v7277_v6  ;;  %v8428_v17 = vpack.c.bf16 %v6428_v51, %v6427_v2  ;;  %v8429_v18 = vpack.c.bf16 %v6430_v8, %v6429_v13  ;;  %v957_v11 = vrot.slane %v582_v33, %v9633_v47 }
 0x188   : > { %v4627_v4 = vpop.f32.mrf.mxu0  ;;  %v4668_v14 = vpop.f32.mrf.mxu1 }
 0x189   : > { %v4628_v16 = vadd.f32 %v4627_v4, %v921_v1  ;;  %7861 = vst [vmem:[%s9704_s8 + $0x40] sm:$0xff] %v7278_v0  ;;  %v4669_v23 = vadd.f32 %v4668_v14, %v929_v3  ;;  %v7289_v35 = vrot.slane %v8428_v17, %v9655_v7  ;;  %v7296_v36 = vrot.slane %v8429_v18, %v9655_v7 }
 0x18a   : > { %v4629_v25 = vpop.f32.mrf.mxu0  ;;  %v4670_v19 = vpop.f32.mrf.mxu1  ;;  %v961_v1 = vrot.slane %v582_v33, %v9627_v43  ;;  %v965_v14 = vrot.slane %v582_v33, %v9637_v53 }
 0x18b   : > { %v4630_v28 = vadd.f32 %v4629_v25, %v925_v12  ;;  %v4671_v29 = vadd.f32 %v4670_v19, %v933_v9  ;;  %v6431_v31 = vmax.f32 %v4628_v16, 0.0  ;;  %v6433_v37 = vmax.f32 %v4669_v23, 0.0 }
 0x18c   : > { %v4631_v30 = vpop.f32.mrf.mxu0  ;;  %v4672_v26 = vpop.f32.mrf.mxu1  ;;  %v7311_v54 = vcombine.low %v7289_v35, %v7296_v36 }
 0x18d   : > { %v6432_v32 = vmax.f32 %v4630_v28, 0.0  ;;  %v6434_v34 = vmax.f32 %v4671_v29, 0.0 }
 0x18e   : > { %v4632_v27 = vpop.f32.mrf.mxu0  ;;  %v4673_v38 = vpop.f32.mrf.mxu1  ;;  %v7319_v3 = vrot.slane %v7311_v54, %v9655_v7 }
 0x18f   : > { %v8430_v40 = vpack.c.bf16 %v6432_v32, %v6431_v31  ;;  %v8431_v42 = vpack.c.bf16 %v6434_v34, %v6433_v37  ;;  %v583_v32 = vld [vmem:[%s9583_s5 + $0x58] sm:$0xff] }
 0x190   : > { %v4709_v46 = vpop.f32.mrf.mxu0  ;;  %v4750_v50 = vpop.f32.mrf.mxu1 }
 0x191   : > { %v7303_v52 = vrot.slane %v8430_v40, %v9655_v7  ;;  %v7310_v55 = vrot.slane %v8431_v42, %v9655_v7  ;;  %v4710_v59 = vadd.f32 %v4709_v46, %v937_v44  ;;  %v4751_v60 = vadd.f32 %v4750_v50, %v945_v48 }
 0x192   : > { %v4711_v49 = vpop.f32.mrf.mxu0  ;;  %v4752_v45 = vpop.f32.mrf.mxu1  ;;  %v973_v40 = vrot.slane %v583_v32, %v9593_v21  ;;  %v969_v42 = vrot.slane %v583_v32, %v9590_v20  ;;  %v977_v46 = vrot.slane %v583_v32, %v9602_v24 }
 0x193   : > { %v4712_v56 = vadd.f32 %v4711_v49, %v941_v15  ;;  %v4753_v57 = vadd.f32 %v4752_v45, %v949_v41  ;;  %v7312_v58 = vcombine.low %v7303_v52, %v7310_v55  ;;  %v6435_v0 = vmax.f32 %v4710_v59, 0.0 }
 0x194   : > { %v4713_v61 = vpop.f32.mrf.mxu0  ;;  %v4754_v62 = vpop.f32.mrf.mxu1  ;;  %v6437_v2 = vmax.f32 %v4751_v60, 0.0  ;;  %v981_v15 = vrot.slane %v583_v32, %v9596_v22 }
 0x195   : > { %v7326_v5 = vrot.slane %v7312_v58, %v9655_v7  ;;  %v6436_v6 = vmax.f32 %v4712_v56, 0.0  ;;  %v6438_v51 = vmax.f32 %v4753_v57, 0.0  ;;  %v985_v62 = vrot.slane %v583_v32, %v9623_v39 }
 0x196   : > { %v4714_v8 = vpop.f32.mrf.mxu0  ;;  %v4755_v10 = vpop.f32.mrf.mxu1 }
 0x197   : > { %v7327_v12 = vcombine.low %v7319_v3, %v7326_v5  ;;  %v8432_v16 = vpack.c.bf16 %v6436_v6, %v6435_v0  ;;  %v8433_v17 = vpack.c.bf16 %v6438_v51, %v6437_v2  ;;  %v989_v10 = vrot.slane %v583_v32, %v9633_v47 }
 0x198   : > { %v4791_v13 = vpop.f32.mrf.mxu0  ;;  %v4832_v4 = vpop.f32.mrf.mxu1 }
 0x199   : > { %v4792_v9 = vadd.f32 %v4791_v13, %v953_v63  ;;  %7862 = vst [vmem:[%s9704_s8 + $0x48] sm:$0xff] %v7327_v12  ;;  %v4833_v18 = vadd.f32 %v4832_v4, %v961_v1  ;;  %v7338_v35 = vrot.slane %v8432_v16, %v9655_v7  ;;  %v7345_v36 = vrot.slane %v8433_v17, %v9655_v7 }
 0x19a   : > { %v4793_v23 = vpop.f32.mrf.mxu0  ;;  %v4834_v25 = vpop.f32.mrf.mxu1  ;;  %v993_v63 = vrot.slane %v583_v32, %v9627_v43  ;;  %v997_v4 = vrot.slane %v583_v32, %v9637_v53 }
 0x19b   : > { %v4794_v19 = vadd.f32 %v4793_v23, %v957_v11  ;;  %v4835_v28 = vadd.f32 %v4834_v25, %v965_v14  ;;  %v6439_v26 = vmax.f32 %v4792_v9, 0.0  ;;  %v6441_v37 = vmax.f32 %v4833_v18, 0.0 }
 0x19c   : > { %v4795_v29 = vpop.f32.mrf.mxu0  ;;  %v4836_v30 = vpop.f32.mrf.mxu1  ;;  %v7360_v52 = vcombine.low %v7338_v35, %v7345_v36 }
 0x19d   : > { %v6440_v31 = vmax.f32 %v4794_v19, 0.0  ;;  %v6442_v33 = vmax.f32 %v4835_v28, 0.0 }
 0x19e   : > { %v4796_v34 = vpop.f32.mrf.mxu0  ;;  %v4837_v27 = vpop.f32.mrf.mxu1  ;;  %v7368_v1 = vrot.slane %v7360_v52, %v9655_v7 }
 0x19f   : > { %v8434_v38 = vpack.c.bf16 %v6440_v31, %v6439_v26  ;;  %v8435_v41 = vpack.c.bf16 %v6442_v33, %v6441_v37  ;;  %v584_v31 = vld [vmem:[%s9583_s5 + $0x60] sm:$0xff] }
 0x1a0   : > { %v4873_v44 = vpop.f32.mrf.mxu0  ;;  %v4914_v48 = vpop.f32.mrf.mxu1 }
 0x1a1   : > { %v7352_v50 = vrot.slane %v8434_v38, %v9655_v7  ;;  %v7359_v54 = vrot.slane %v8435_v41, %v9655_v7  ;;  %v4874_v58 = vadd.f32 %v4873_v44, %v969_v42  ;;  %v4915_v59 = vadd.f32 %v4914_v48, %v977_v46 }
 0x1a2   : > { %v4875_v55 = vpop.f32.mrf.mxu0  ;;  %v4916_v49 = vpop.f32.mrf.mxu1  ;;  %v1005_v38 = vrot.slane %v584_v31, %v9593_v21  ;;  %v1001_v41 = vrot.slane %v584_v31, %v9590_v20  ;;  %v1009_v44 = vrot.slane %v584_v31, %v9602_v24 }
 0x1a3   : > { %v4876_v45 = vadd.f32 %v4875_v55, %v973_v40  ;;  %v4917_v56 = vadd.f32 %v4916_v49, %v981_v15  ;;  %v7361_v57 = vcombine.low %v7352_v50, %v7359_v54  ;;  %v6443_v12 = vmax.f32 %v4874_v58, 0.0 }
 0x1a4   : > { %v4877_v60 = vpop.f32.mrf.mxu0  ;;  %v4918_v61 = vpop.f32.mrf.mxu1  ;;  %v6445_v0 = vmax.f32 %v4915_v59, 0.0  ;;  %v1013_v40 = vrot.slane %v584_v31, %v9596_v22 }
 0x1a5   : > { %v7375_v3 = vrot.slane %v7361_v57, %v9655_v7  ;;  %v6444_v5 = vmax.f32 %v4876_v45, 0.0  ;;  %v6446_v6 = vmax.f32 %v4917_v56, 0.0  ;;  %v1017_v61 = vrot.slane %v584_v31, %v9623_v39 }
 0x1a6   : > { %v4878_v51 = vpop.f32.mrf.mxu0  ;;  %v4919_v8 = vpop.f32.mrf.mxu1 }
 0x1a7   : > { %v7376_v11 = vcombine.low %v7368_v1, %v7375_v3  ;;  %v8436_v9 = vpack.c.bf16 %v6444_v5, %v6443_v12  ;;  %v8437_v16 = vpack.c.bf16 %v6446_v6, %v6445_v0  ;;  %v1021_v8 = vrot.slane %v584_v31, %v9633_v47 }
 0x1a8   : > { %v4955_v2 = vpop.f32.mrf.mxu0  ;;  %v4996_v13 = vpop.f32.mrf.mxu1 }
 0x1a9   : > { %v4956_v14 = vadd.f32 %v4955_v2, %v985_v62  ;;  %7863 = vst [vmem:[%s9704_s8 + $0x50] sm:$0xff] %v7376_v11  ;;  %v4997_v17 = vadd.f32 %v4996_v13, %v993_v63  ;;  %v7387_v35 = vrot.slane %v8436_v9, %v9655_v7  ;;  %v7394_v36 = vrot.slane %v8437_v16, %v9655_v7 }
 0x1aa   : > { %v4957_v18 = vpop.f32.mrf.mxu0  ;;  %v4998_v23 = vpop.f32.mrf.mxu1  ;;  %v1025_v62 = vrot.slane %v584_v31, %v9627_v43  ;;  %v1029_v13 = vrot.slane %v584_v31, %v9637_v53 }
 0x1ab   : > { %v4958_v25 = vadd.f32 %v4957_v18, %v989_v10  ;;  %v4999_v19 = vadd.f32 %v4998_v23, %v997_v4  ;;  %v6447_v30 = vmax.f32 %v4956_v14, 0.0  ;;  %v6449_v37 = vmax.f32 %v4997_v17, 0.0 }
 0x1ac   : > { %v4959_v28 = vpop.f32.mrf.mxu0  ;;  %v5000_v29 = vpop.f32.mrf.mxu1  ;;  %v7409_v50 = vcombine.low %v7387_v35, %v7394_v36 }
 0x1ad   : > { %v6448_v26 = vmax.f32 %v4958_v25, 0.0  ;;  %v6450_v32 = vmax.f32 %v4999_v19, 0.0 }
 0x1ae   : > { %v4960_v33 = vpop.f32.mrf.mxu0  ;;  %v5001_v34 = vpop.f32.mrf.mxu1  ;;  %v7417_v63 = vrot.slane %v7409_v50, %v9655_v7 }
 0x1af   : > { %v8438_v27 = vpack.c.bf16 %v6448_v26, %v6447_v30  ;;  %v8439_v15 = vpack.c.bf16 %v6450_v32, %v6449_v37  ;;  %v585_v26 = vld [vmem:[%s9583_s5 + $0x68] sm:$0xff] }
 0x1b0   : > { %v5037_v42 = vpop.f32.mrf.mxu0  ;;  %v5078_v46 = vpop.f32.mrf.mxu1 }
 0x1b1   : > { %v7401_v48 = vrot.slane %v8438_v27, %v9655_v7  ;;  %v7408_v52 = vrot.slane %v8439_v15, %v9655_v7  ;;  %v5038_v57 = vadd.f32 %v5037_v42, %v1001_v41  ;;  %v5079_v58 = vadd.f32 %v5078_v46, %v1009_v44 }
 0x1b2   : > { %v5039_v54 = vpop.f32.mrf.mxu0  ;;  %v5080_v55 = vpop.f32.mrf.mxu1  ;;  %v1037_v27 = vrot.slane %v585_v26, %v9593_v21  ;;  %v1041_v41 = vrot.slane %v585_v26, %v9602_v24  ;;  %v1045_v42 = vrot.slane %v585_v26, %v9596_v22 }
 0x1b3   : > { %v5040_v49 = vadd.f32 %v5039_v54, %v1005_v38  ;;  %v5081_v45 = vadd.f32 %v5080_v55, %v1013_v40  ;;  %v7410_v56 = vcombine.low %v7401_v48, %v7408_v52  ;;  %v6451_v11 = vmax.f32 %v5038_v57, 0.0 }
 0x1b4   : > { %v5041_v59 = vpop.f32.mrf.mxu0  ;;  %v5082_v60 = vpop.f32.mrf.mxu1  ;;  %v6453_v12 = vmax.f32 %v5079_v58, 0.0  ;;  %v1033_v40 = vrot.slane %v585_v26, %v9590_v20 }
 0x1b5   : > { %v7424_v1 = vrot.slane %v7410_v56, %v9655_v7  ;;  %v6452_v3 = vmax.f32 %v5040_v49, 0.0  ;;  %v6454_v5 = vmax.f32 %v5081_v45, 0.0  ;;  %v1049_v60 = vrot.slane %v585_v26, %v9623_v39 }
 0x1b6   : > { %v5042_v6 = vpop.f32.mrf.mxu0  ;;  %v5083_v51 = vpop.f32.mrf.mxu1 }
 0x1b7   : > { %v7425_v10 = vcombine.low %v7417_v63, %v7424_v1  ;;  %v8440_v14 = vpack.c.bf16 %v6452_v3, %v6451_v11  ;;  %v8441_v9 = vpack.c.bf16 %v6454_v5, %v6453_v12  ;;  %v1053_v51 = vrot.slane %v585_v26, %v9633_v47 }
 0x1b8   : > { %v5119_v0 = vpop.f32.mrf.mxu0  ;;  %v5160_v2 = vpop.f32.mrf.mxu1 }
 0x1b9   : > { %v5120_v4 = vadd.f32 %v5119_v0, %v1017_v61  ;;  %7864 = vst [vmem:[%s9704_s8 + $0x58] sm:$0xff] %v7425_v10  ;;  %v5161_v16 = vadd.f32 %v5160_v2, %v1025_v62  ;;  %v7436_v35 = vrot.slane %v8440_v14, %v9655_v7  ;;  %v7443_v36 = vrot.slane %v8441_v9, %v9655_v7 }
 0x1ba   : > { %v5121_v17 = vpop.f32.mrf.mxu0  ;;  %v5162_v18 = vpop.f32.mrf.mxu1  ;;  %v1057_v61 = vrot.slane %v585_v26, %v9627_v43  ;;  %v1061_v0 = vrot.slane %v585_v26, %v9637_v53 }
 0x1bb   : > { %v5122_v23 = vadd.f32 %v5121_v17, %v1021_v8  ;;  %v5163_v25 = vadd.f32 %v5162_v18, %v1029_v13  ;;  %v6455_v29 = vmax.f32 %v5120_v4, 0.0  ;;  %v6457_v37 = vmax.f32 %v5161_v16, 0.0 }
 0x1bc   : > { %v5123_v19 = vpop.f32.mrf.mxu0  ;;  %v5164_v28 = vpop.f32.mrf.mxu1  ;;  %v7458_v48 = vcombine.low %v7436_v35, %v7443_v36 }
 0x1bd   : > { %v6456_v30 = vmax.f32 %v5122_v23, 0.0  ;;  %v6458_v31 = vmax.f32 %v5163_v25, 0.0 }
 0x1be   : > { %v5124_v32 = vpop.f32.mrf.mxu0  ;;  %v5165_v33 = vpop.f32.mrf.mxu1  ;;  %v7466_v62 = vrot.slane %v7458_v48, %v9655_v7 }
 0x1bf   : > { %v8442_v34 = vpack.c.bf16 %v6456_v30, %v6455_v29  ;;  %v8443_v38 = vpack.c.bf16 %v6458_v31, %v6457_v37  ;;  %v586_v31 = vld [vmem:[%s9583_s5 + $0x70] sm:$0xff] }
 0x1c0   : > { %v5201_v15 = vpop.f32.mrf.mxu0  ;;  %v5242_v46 = vpop.f32.mrf.mxu1 }
 0x1c1   : > { %v7450_v44 = vrot.slane %v8442_v34, %v9655_v7  ;;  %v7457_v50 = vrot.slane %v8443_v38, %v9655_v7  ;;  %v5202_v45 = vadd.f32 %v5201_v15, %v1033_v40  ;;  %v5243_v56 = vadd.f32 %v5242_v46, %v1041_v41 }
 0x1c2   : > { %v5203_v52 = vpop.f32.mrf.mxu0  ;;  %v5244_v55 = vpop.f32.mrf.mxu1  ;;  %v1065_v40 = vrot.slane %v586_v31, %v9590_v20  ;;  %v1073_v41 = vrot.slane %v586_v31, %v9602_v24 }
 0x1c3   : > { %v5204_v54 = vadd.f32 %v5203_v52, %v1037_v27  ;;  %v7459_v49 = vcombine.low %v7450_v44, %v7457_v50  ;;  %v5245_v57 = vadd.f32 %v5244_v55, %v1045_v42  ;;  %v6459_v10 = vmax.f32 %v5202_v45, 0.0 }
 0x1c4   : > { %v5205_v58 = vpop.f32.mrf.mxu0  ;;  %v5246_v59 = vpop.f32.mrf.mxu1  ;;  %v6461_v11 = vmax.f32 %v5243_v56, 0.0  ;;  %v1069_v27 = vrot.slane %v586_v31, %v9593_v21  ;;  %v1077_v44 = vrot.slane %v586_v31, %v9596_v22 }
 0x1c5   : > { %v7473_v63 = vrot.slane %v7459_v49, %v9655_v7  ;;  %v6460_v1 = vmax.f32 %v5204_v54, 0.0  ;;  %v6462_v3 = vmax.f32 %v5245_v57, 0.0 }
 0x1c6   : > { %v5206_v5 = vpop.f32.mrf.mxu0  ;;  %v5247_v6 = vpop.f32.mrf.mxu1 }
 0x1c7   : > { %v7474_v8 = vcombine.low %v7466_v62, %v7473_v63  ;;  %v8444_v4 = vpack.c.bf16 %v6460_v1, %v6459_v10  ;;  %v8445_v14 = vpack.c.bf16 %v6462_v3, %v6461_v11  ;;  %v1089_v5 = vrot.slane %v586_v31, %v9627_v43 }
 0x1c8   : > { %v5283_v12 = vpop.f32.mrf.mxu0  ;;  %v5324_v13 = vpop.f32.mrf.mxu1 }
 0x1c9   : > { %v5284_v2 = vadd.f32 %v5283_v12, %v1049_v60  ;;  %7865 = vst [vmem:[%s9704_s8 + $0x60] sm:$0xff] %v7474_v8  ;;  %v5325_v9 = vadd.f32 %v5324_v13, %v1057_v61  ;;  %v7485_v30 = vrot.slane %v8444_v4, %v9655_v7  ;;  %v7492_v35 = vrot.slane %v8445_v14, %v9655_v7 }
 0x1ca   : > { %v5285_v16 = vpop.f32.mrf.mxu0  ;;  %v5326_v18 = vpop.f32.mrf.mxu1  ;;  %v1081_v61 = vrot.slane %v586_v31, %v9623_v39  ;;  %v1093_v12 = vrot.slane %v586_v31, %v9637_v53 }
 0x1cb   : > { %v5286_v17 = vadd.f32 %v5285_v16, %v1053_v51  ;;  %v5327_v23 = vadd.f32 %v5326_v18, %v1061_v0  ;;  %v6463_v19 = vmax.f32 %v5284_v2, 0.0  ;;  %v6465_v26 = vmax.f32 %v5325_v9, 0.0 }
 0x1cc   : > { %v5287_v25 = vpop.f32.mrf.mxu0  ;;  %v5328_v29 = vpop.f32.mrf.mxu1  ;;  %v7507_v46 = vcombine.low %v7485_v30, %v7492_v35  ;;  %v1085_v51 = vrot.slane %v586_v31, %v9633_v47 }
 0x1cd   : > { %v6464_v28 = vmax.f32 %v5286_v17, 0.0  ;;  %v6466_v36 = vmax.f32 %v5327_v23, 0.0  ;;  %v587_v29 = vld [vmem:[%s9583_s5 + $0x78] sm:$0xff] }
 0x1ce   : > { %v5288_v37 = vpop.f32.mrf.mxu0  ;;  %v5329_v33 = vpop.f32.mrf.mxu1  ;;  %v7515_v59 = vrot.slane %v7507_v46, %v9655_v7 }
 0x1cf   : > { %v8446_v32 = vpack.c.bf16 %v6464_v28, %v6463_v19  ;;  %v8447_v34 = vpack.c.bf16 %v6466_v36, %v6465_v26  ;;  %v1101_v33 = vrot.slane %v587_v29, %v9593_v21 }
 0x1d0   : > { %v5365_v15 = vpop.f32.mrf.mxu0  ;;  %v5406_v42 = vpop.f32.mrf.mxu1 }
 0x1d1   : > { %v7499_v38 = vrot.slane %v8446_v32, %v9655_v7  ;;  %v7506_v48 = vrot.slane %v8447_v34, %v9655_v7  ;;  %v5366_v49 = vadd.f32 %v5365_v15, %v1065_v40  ;;  %v5407_v45 = vadd.f32 %v5406_v42, %v1073_v41 }
 0x1d2   : > { %v5367_v50 = vpop.f32.mrf.mxu0  ;;  %v5408_v52 = vpop.f32.mrf.mxu1  ;;  %v1105_v40 = vrot.slane %v587_v29, %v9602_v24  ;;  %v1109_v15 = vrot.slane %v587_v29, %v9596_v22 }
 0x1d3   : > { %v7508_v54 = vcombine.low %v7499_v38, %v7506_v48  ;;  %v5368_v55 = vadd.f32 %v5367_v50, %v1069_v27  ;;  %v5409_v56 = vadd.f32 %v5408_v52, %v1077_v44  ;;  %v6467_v8 = vmax.f32 %v5366_v49, 0.0 }
 0x1d4   : > { %v5369_v57 = vpop.f32.mrf.mxu0  ;;  %v5410_v58 = vpop.f32.mrf.mxu1  ;;  %v6469_v10 = vmax.f32 %v5407_v45, 0.0  ;;  %v1097_v27 = vrot.slane %v587_v29, %v9590_v20 }
 0x1d5   : > { %v7522_v60 = vrot.slane %v7508_v54, %v9655_v7  ;;  %v6468_v62 = vmax.f32 %v5368_v55, 0.0  ;;  %v6470_v63 = vmax.f32 %v5409_v56, 0.0  ;;  %v1113_v58 = vrot.slane %v587_v29, %v9623_v39 }
 0x1d6   : > { %v5370_v1 = vpop.f32.mrf.mxu0  ;;  %v5411_v3 = vpop.f32.mrf.mxu1 }
 0x1d7   : > { %v7523_v6 = vcombine.low %v7515_v59, %v7522_v60  ;;  %v8448_v13 = vpack.c.bf16 %v6468_v62, %v6467_v8  ;;  %v8449_v4 = vpack.c.bf16 %v6470_v63, %v6469_v10  ;;  %v1121_v59 = vrot.slane %v587_v29, %v9627_v43 }
 0x1d8   : > { %v5447_v11 = vpop.f32.mrf.mxu0  ;;  %v5488_v2 = vpop.f32.mrf.mxu1 }
 0x1d9   : > { %7866 = vst [vmem:[%s9704_s8 + $0x68] sm:$0xff] %v7523_v6  ;;  %v5448_v0 = vadd.f32 %v5447_v11, %v1081_v61  ;;  %v5489_v14 = vadd.f32 %v5488_v2, %v1089_v5  ;;  %v7534_v30 = vrot.slane %v8448_v13, %v9655_v7  ;;  %v7541_v35 = vrot.slane %v8449_v4, %v9655_v7 }
 0x1da   : > { %v5449_v9 = vpop.f32.mrf.mxu0  ;;  %v5490_v17 = vpop.f32.mrf.mxu1  ;;  %v1117_v5 = vrot.slane %v587_v29, %v9633_v47  ;;  %v1125_v11 = vrot.slane %v587_v29, %v9637_v53 }
 0x1db   : > { %v5450_v16 = vadd.f32 %v5449_v9, %v1085_v51  ;;  %v5491_v18 = vadd.f32 %v5490_v17, %v1093_v12  ;;  %v6471_v25 = vmax.f32 %v5448_v0, 0.0  ;;  %v6473_v26 = vmax.f32 %v5489_v14, 0.0 }
 0x1dc   : > { %v5451_v23 = vpop.f32.mrf.mxu0  ;;  %v5492_v28 = vpop.f32.mrf.mxu1  ;;  %v7556_v44 = vcombine.low %v7534_v30, %v7541_v35 }
 0x1dd   : > { %v6472_v19 = vmax.f32 %v5450_v16, 0.0  ;;  %v6474_v36 = vmax.f32 %v5491_v18, 0.0  ;;  %v588_v28 = vld [vmem:[%s9583_s5 + $0x80] sm:$0xff] }
 0x1de   : > { %v5452_v37 = vpop.f32.mrf.mxu0  ;;  %v5493_v32 = vpop.f32.mrf.mxu1  ;;  %v7564_v60 = vrot.slane %v7556_v44, %v9655_v7 }
 0x1df   : > { %v8450_v31 = vpack.c.bf16 %v6472_v19, %v6471_v25  ;;  %v8451_v34 = vpack.c.bf16 %v6474_v36, %v6473_v26  ;;  %v1133_v32 = vrot.slane %v588_v28, %v9593_v21 }
 0x1e0   : > { %v5529_v38 = vpop.f32.mrf.mxu0  ;;  %v5570_v42 = vpop.f32.mrf.mxu1 }
 0x1e1   : > { %v7548_v41 = vrot.slane %v8450_v31, %v9655_v7  ;;  %v7555_v46 = vrot.slane %v8451_v34, %v9655_v7  ;;  %v5530_v55 = vadd.f32 %v5529_v38, %v1097_v27  ;;  %v5571_v49 = vadd.f32 %v5570_v42, %v1105_v40 }
 0x1e2   : > { %v5531_v48 = vpop.f32.mrf.mxu0  ;;  %v5572_v52 = vpop.f32.mrf.mxu1  ;;  %v1129_v34 = vrot.slane %v588_v28, %v9590_v20  ;;  %v1137_v38 = vrot.slane %v588_v28, %v9602_v24  ;;  %v1141_v40 = vrot.slane %v588_v28, %v9596_v22 }
 0x1e3   : > { %v5532_v50 = vadd.f32 %v5531_v48, %v1101_v33  ;;  %v7557_v54 = vcombine.low %v7548_v41, %v7555_v46  ;;  %v5573_v45 = vadd.f32 %v5572_v52, %v1109_v15  ;;  %v6475_v51 = vmax.f32 %v5530_v55, 0.0 }
 0x1e4   : > { %v5533_v56 = vpop.f32.mrf.mxu0  ;;  %v5574_v57 = vpop.f32.mrf.mxu1  ;;  %v6477_v8 = vmax.f32 %v5571_v49, 0.0 }
 0x1e5   : > { %v7571_v61 = vrot.slane %v7557_v54, %v9655_v7  ;;  %v6476_v62 = vmax.f32 %v5532_v50, 0.0  ;;  %v6478_v63 = vmax.f32 %v5573_v45, 0.0  ;;  %v1145_v57 = vrot.slane %v588_v28, %v9623_v39 }
 0x1e6   : > { %v5534_v1 = vpop.f32.mrf.mxu0  ;;  %v5575_v3 = vpop.f32.mrf.mxu1 }
 0x1e7   : > { %v7572_v6 = vcombine.low %v7564_v60, %v7571_v61  ;;  %v8452_v2 = vpack.c.bf16 %v6476_v62, %v6475_v51  ;;  %v8453_v13 = vpack.c.bf16 %v6478_v63, %v6477_v8  ;;  %v1149_v3 = vrot.slane %v588_v28, %v9633_v47 }
 0x1e8   : > { %v5611_v10 = vpop.f32.mrf.mxu0  ;;  %v5652_v0 = vpop.f32.mrf.mxu1 }
 0x1e9   : > { %v5612_v12 = vadd.f32 %v5611_v10, %v1113_v58  ;;  %7867 = vst [vmem:[%s9704_s8 + $0x70] sm:$0xff] %v7572_v6  ;;  %v5653_v4 = vadd.f32 %v5652_v0, %v1121_v59  ;;  %v7583_v30 = vrot.slane %v8452_v2, %v9655_v7  ;;  %v7590_v35 = vrot.slane %v8453_v13, %v9655_v7 }
 0x1ea   : > { %v5613_v14 = vpop.f32.mrf.mxu0  ;;  %v5654_v16 = vpop.f32.mrf.mxu1  ;;  %v1153_v58 = vrot.slane %v588_v28, %v9627_v43  ;;  %v1157_v10 = vrot.slane %v588_v28, %v9637_v53 }
 0x1eb   : > { %v5614_v9 = vadd.f32 %v5613_v14, %v1117_v5  ;;  %v5655_v17 = vadd.f32 %v5654_v16, %v1125_v11  ;;  %v6479_v23 = vmax.f32 %v5612_v12, 0.0  ;;  %v6481_v29 = vmax.f32 %v5653_v4, 0.0 }
 0x1ec   : > { %v5615_v18 = vpop.f32.mrf.mxu0  ;;  %v5656_v19 = vpop.f32.mrf.mxu1  ;;  %v7605_v42 = vcombine.low %v7583_v30, %v7590_v35 }
 0x1ed   : > { %v6480_v25 = vmax.f32 %v5614_v9, 0.0  ;;  %v6482_v26 = vmax.f32 %v5655_v17, 0.0  ;;  %v589_v19 = vld [vmem:[%s9583_s5 + $0x88] sm:$0xff] }
 0x1ee   : > { %v5616_v36 = vpop.f32.mrf.mxu0  ;;  %v5657_v31 = vpop.f32.mrf.mxu1  ;;  %v7613_v59 = vrot.slane %v7605_v42, %v9655_v7 }
 0x1ef   : > { %v8454_v37 = vpack.c.bf16 %v6480_v25, %v6479_v23  ;;  %v8455_v33 = vpack.c.bf16 %v6482_v26, %v6481_v29  ;;  %v1165_v31 = vrot.slane %v589_v19, %v9593_v21 }
 0x1f0   : > { %v5693_v27 = vpop.f32.mrf.mxu0  ;;  %v5734_v41 = vpop.f32.mrf.mxu1 }
 0x1f1   : > { %v7597_v15 = vrot.slane %v8454_v37, %v9655_v7  ;;  %v7604_v44 = vrot.slane %v8455_v33, %v9655_v7  ;;  %v5694_v54 = vadd.f32 %v5693_v27, %v1129_v34  ;;  %v5735_v55 = vadd.f32 %v5734_v41, %v1137_v38 }
 0x1f2   : > { %v5695_v46 = vpop.f32.mrf.mxu0  ;;  %v5736_v50 = vpop.f32.mrf.mxu1  ;;  %v1161_v33 = vrot.slane %v589_v19, %v9590_v20  ;;  %v1169_v27 = vrot.slane %v589_v19, %v9602_v24  ;;  %v1173_v38 = vrot.slane %v589_v19, %v9596_v22 }
 0x1f3   : > { %v5696_v48 = vadd.f32 %v5695_v46, %v1133_v32  ;;  %v7606_v52 = vcombine.low %v7597_v15, %v7604_v44  ;;  %v5737_v49 = vadd.f32 %v5736_v50, %v1141_v40  ;;  %v6483_v6 = vmax.f32 %v5694_v54, 0.0 }
 0x1f4   : > { %v5697_v45 = vpop.f32.mrf.mxu0  ;;  %v5738_v56 = vpop.f32.mrf.mxu1  ;;  %v6485_v51 = vmax.f32 %v5735_v55, 0.0 }
 0x1f5   : > { %v7620_v60 = vrot.slane %v7606_v52, %v9655_v7  ;;  %v6484_v61 = vmax.f32 %v5696_v48, 0.0  ;;  %v6486_v62 = vmax.f32 %v5737_v49, 0.0  ;;  %v1177_v56 = vrot.slane %v589_v19, %v9623_v39 }
 0x1f6   : > { %v5698_v63 = vpop.f32.mrf.mxu0  ;;  %v5739_v1 = vpop.f32.mrf.mxu1 }
 0x1f7   : > { %v7621_v5 = vcombine.low %v7613_v59, %v7620_v60  ;;  %v8456_v0 = vpack.c.bf16 %v6484_v61, %v6483_v6  ;;  %v8457_v2 = vpack.c.bf16 %v6486_v62, %v6485_v51  ;;  %v1181_v1 = vrot.slane %v589_v19, %v9633_v47 }
 0x1f8   : > { %v5775_v8 = vpop.f32.mrf.mxu0  ;;  %v5816_v12 = vpop.f32.mrf.mxu1 }
 0x1f9   : > { %v5776_v11 = vadd.f32 %v5775_v8, %v1145_v57  ;;  %7868 = vst [vmem:[%s9704_s8 + $0x78] sm:$0xff] %v7621_v5  ;;  %v5817_v13 = vadd.f32 %v5816_v12, %v1153_v58  ;;  %v7632_v30 = vrot.slane %v8456_v0, %v9655_v7  ;;  %v7639_v35 = vrot.slane %v8457_v2, %v9655_v7 }
 0x1fa   : > { %v5777_v4 = vpop.f32.mrf.mxu0  ;;  %v5818_v9 = vpop.f32.mrf.mxu1  ;;  %v1185_v57 = vrot.slane %v589_v19, %v9627_v43  ;;  %v1189_v8 = vrot.slane %v589_v19, %v9637_v53 }
 0x1fb   : > { %v5778_v14 = vadd.f32 %v5777_v4, %v1149_v3  ;;  %v5819_v16 = vadd.f32 %v5818_v9, %v1157_v10  ;;  %v6487_v18 = vmax.f32 %v5776_v11, 0.0  ;;  %v6489_v28 = vmax.f32 %v5817_v13, 0.0 }
 0x1fc   : > { %v5779_v17 = vpop.f32.mrf.mxu0  ;;  %v5820_v25 = vpop.f32.mrf.mxu1  ;;  %v7654_v41 = vcombine.low %v7632_v30, %v7639_v35 }
 0x1fd   : > { %v6488_v23 = vmax.f32 %v5778_v14, 0.0  ;;  %v6490_v29 = vmax.f32 %v5819_v16, 0.0  ;;  %v590_v25 = vld [vmem:[%s9583_s5 + $0x90] sm:$0xff] }
 0x1fe   : > { %v5780_v26 = vpop.f32.mrf.mxu0  ;;  %v5821_v37 = vpop.f32.mrf.mxu1  ;;  %v7662_v58 = vrot.slane %v7654_v41, %v9655_v7 }
 0x1ff   : > { %v8458_v36 = vpack.c.bf16 %v6488_v23, %v6487_v18  ;;  %v8459_v32 = vpack.c.bf16 %v6490_v29, %v6489_v28  ;;  %v1197_v37 = vrot.slane %v590_v25, %v9593_v21 }
 0x200   : > { %v5857_v34 = vpop.f32.mrf.mxu0  ;;  %v5898_v15 = vpop.f32.mrf.mxu1 }
 0x201   : > { %v7646_v40 = vrot.slane %v8458_v36, %v9655_v7  ;;  %v7653_v42 = vrot.slane %v8459_v32, %v9655_v7  ;;  %v5858_v52 = vadd.f32 %v5857_v34, %v1161_v33  ;;  %v5899_v54 = vadd.f32 %v5898_v15, %v1169_v27 }
 0x202   : > { %v5859_v44 = vpop.f32.mrf.mxu0  ;;  %v5900_v48 = vpop.f32.mrf.mxu1  ;;  %v1193_v32 = vrot.slane %v590_v25, %v9590_v20  ;;  %v1201_v34 = vrot.slane %v590_v25, %v9602_v24  ;;  %v1205_v27 = vrot.slane %v590_v25, %v9596_v22 }
 0x203   : > { %v5860_v46 = vadd.f32 %v5859_v44, %v1165_v31  ;;  %v7655_v50 = vcombine.low %v7646_v40, %v7653_v42  ;;  %v5901_v55 = vadd.f32 %v5900_v48, %v1173_v38  ;;  %v6491_v5 = vmax.f32 %v5858_v52, 0.0 }
 0x204   : > { %v5861_v49 = vpop.f32.mrf.mxu0  ;;  %v5902_v45 = vpop.f32.mrf.mxu1  ;;  %v6493_v6 = vmax.f32 %v5899_v54, 0.0 }
 0x205   : > { %v7669_v59 = vrot.slane %v7655_v50, %v9655_v7  ;;  %v6492_v60 = vmax.f32 %v5860_v46, 0.0  ;;  %v6494_v61 = vmax.f32 %v5901_v55, 0.0  ;;  %v1209_v45 = vrot.slane %v590_v25, %v9623_v39 }
 0x206   : > { %v5862_v62 = vpop.f32.mrf.mxu0  ;;  %v5903_v63 = vpop.f32.mrf.mxu1 }
 0x207   : > { %v7670_v3 = vcombine.low %v7662_v58, %v7669_v59  ;;  %v8460_v12 = vpack.c.bf16 %v6492_v60, %v6491_v5  ;;  %v8461_v0 = vpack.c.bf16 %v6494_v61, %v6493_v6  ;;  %v1213_v63 = vrot.slane %v590_v25, %v9633_v47 }
 0x208   : > { %v5939_v51 = vpop.f32.mrf.mxu0  ;;  %v5980_v11 = vpop.f32.mrf.mxu1 }
 0x209   : > { %v5940_v10 = vadd.f32 %v5939_v51, %v1177_v56  ;;  %7869 = vst [vmem:[%s9704_s8 + $0x80] sm:$0xff] %v7670_v3  ;;  %v5981_v2 = vadd.f32 %v5980_v11, %v1185_v57  ;;  %v7681_v30 = vrot.slane %v8460_v12, %v9655_v7  ;;  %v7688_v35 = vrot.slane %v8461_v0, %v9655_v7 }
 0x20a   : > { %v5941_v13 = vpop.f32.mrf.mxu0  ;;  %v5982_v14 = vpop.f32.mrf.mxu1  ;;  %v1217_v56 = vrot.slane %v590_v25, %v9627_v43  ;;  %v1221_v51 = vrot.slane %v590_v25, %v9637_v53 }
 0x20b   : > { %v5942_v4 = vadd.f32 %v5941_v13, %v1181_v1  ;;  %v5983_v9 = vadd.f32 %v5982_v14, %v1189_v8  ;;  %v6495_v17 = vmax.f32 %v5940_v10, 0.0  ;;  %v6497_v19 = vmax.f32 %v5981_v2, 0.0 }
 0x20c   : > { %v5943_v16 = vpop.f32.mrf.mxu0  ;;  %v5984_v23 = vpop.f32.mrf.mxu1  ;;  %v7703_v15 = vcombine.low %v7681_v30, %v7688_v35 }
 0x20d   : > { %v6496_v18 = vmax.f32 %v5942_v4, 0.0  ;;  %v6498_v28 = vmax.f32 %v5983_v9, 0.0  ;;  %v591_v23 = vld [vmem:[%s9583_s5 + $0x98] sm:$0xff] }
 0x20e   : > { %v5944_v29 = vpop.f32.mrf.mxu0  ;;  %v5985_v36 = vpop.f32.mrf.mxu1  ;;  %v7711_v57 = vrot.slane %v7703_v15, %v9655_v7 }
 0x20f   : > { %v8462_v26 = vpack.c.bf16 %v6496_v18, %v6495_v17  ;;  %v8463_v31 = vpack.c.bf16 %v6498_v28, %v6497_v19  ;;  %v1229_v36 = vrot.slane %v591_v23, %v9593_v21 }
 0x210   : > { %v6021_v33 = vpop.f32.mrf.mxu0  ;;  %v6062_v40 = vpop.f32.mrf.mxu1 }
 0x211   : > { %v7695_v38 = vrot.slane %v8462_v26, %v9655_v7  ;;  %v7702_v41 = vrot.slane %v8463_v31, %v9655_v7  ;;  %v6022_v50 = vadd.f32 %v6021_v33, %v1193_v32  ;;  %v6063_v52 = vadd.f32 %v6062_v40, %v1201_v34 }
 0x212   : > { %v6023_v42 = vpop.f32.mrf.mxu0  ;;  %v6064_v46 = vpop.f32.mrf.mxu1  ;;  %v1225_v31 = vrot.slane %v591_v23, %v9590_v20  ;;  %v1233_v33 = vrot.slane %v591_v23, %v9602_v24  ;;  %v1237_v34 = vrot.slane %v591_v23, %v9596_v22  ;;  %v1249_v22 = vrot.slane %v591_v23, %v9627_v43 }
 0x213   : > { %v6024_v44 = vadd.f32 %v6023_v42, %v1197_v37  ;;  %v7704_v48 = vcombine.low %v7695_v38, %v7702_v41  ;;  %v6065_v54 = vadd.f32 %v6064_v46, %v1205_v27  ;;  %v6499_v3 = vmax.f32 %v6022_v50, 0.0 }
 0x214   : > { %v6025_v55 = vpop.f32.mrf.mxu0  ;;  %v6066_v49 = vpop.f32.mrf.mxu1  ;;  %v6501_v5 = vmax.f32 %v6063_v52, 0.0 }
 0x215   : > { %v7718_v58 = vrot.slane %v7704_v48, %v9655_v7  ;;  %v6500_v59 = vmax.f32 %v6024_v44, 0.0  ;;  %v6502_v60 = vmax.f32 %v6065_v54, 0.0  ;;  %v1241_v54 = vrot.slane %v591_v23, %v9623_v39 }
 0x216   : > { %v6026_v61 = vpop.f32.mrf.mxu0  ;;  %v6067_v62 = vpop.f32.mrf.mxu1 }
 0x217   : > { %v7719_v1 = vcombine.low %v7711_v57, %v7718_v58  ;;  %v8464_v11 = vpack.c.bf16 %v6500_v59, %v6499_v3  ;;  %v8465_v12 = vpack.c.bf16 %v6502_v60, %v6501_v5  ;;  %v1245_v58 = vrot.slane %v591_v23, %v9633_v47 }
 0x218   : > { %v6103_v6 = vpop.f32.mrf.mxu0  ;;  %v6144_v10 = vpop.f32.mrf.mxu1 }
 0x219   : > { %v6104_v8 = vadd.f32 %v6103_v6, %v1209_v45  ;;  %7870 = vst [vmem:[%s9704_s8 + $0x88] sm:$0xff] %v7719_v1  ;;  %v6145_v0 = vadd.f32 %v6144_v10, %v1217_v56  ;;  %v7730_v30 = vrot.slane %v8464_v11, %v9655_v7  ;;  %v7737_v35 = vrot.slane %v8465_v12, %v9655_v7 }
 0x21a   : > { %v6105_v2 = vpop.f32.mrf.mxu0  ;;  %v6146_v4 = vpop.f32.mrf.mxu1 }
 0x21b   : > { %v6106_v13 = vadd.f32 %v6105_v2, %v1213_v63  ;;  %v6147_v14 = vadd.f32 %v6146_v4, %v1221_v51  ;;  %v6503_v16 = vmax.f32 %v6104_v8, 0.0  ;;  %v6505_v25 = vmax.f32 %v6145_v0, 0.0 }
 0x21c   : > { %v6107_v9 = vpop.f32.mrf.mxu0  ;;  %v6148_v18 = vpop.f32.mrf.mxu1  ;;  %v7752_v40 = vcombine.low %v7730_v30, %v7737_v35  ;;  %v1253_v63 = vrot.slane %v591_v23, %v9637_v53 }
 0x21d   : > { %v6504_v17 = vmax.f32 %v6106_v13, 0.0  ;;  %v6506_v19 = vmax.f32 %v6147_v14, 0.0  ;;  %v7988_v9 = vld [vmem:[%s9583_s5 + $0xa0] ss:$0 sm:$0xff] }
 0x21e   : > { %v6108_v28 = vpop.f32.mrf.mxu0  ;;  %v6149_v26 = vpop.f32.mrf.mxu1  ;;  %v7760_v24 = vrot.slane %v7752_v40, %v9655_v7 }
 0x21f   : > { %v8466_v29 = vpack.c.bf16 %v6504_v17, %v6503_v16  ;;  %v8467_v37 = vpack.c.bf16 %v6506_v19, %v6505_v25 }
 0x220   : > { %v6185_v32 = vpop.f32.mrf.mxu0  ;;  %v6226_v38 = vpop.f32.mrf.mxu1 }
 0x221   : > { %v7744_v27 = vrot.slane %v8466_v29, %v9655_v7  ;;  %v7751_v15 = vrot.slane %v8467_v37, %v9655_v7  ;;  %v6186_v48 = vadd.f32 %v6185_v32, %v1225_v31  ;;  %v6227_v21 = vadd.f32 %v6226_v38, %v1233_v33 }
 0x222   : > { %v6187_v41 = vpop.f32.mrf.mxu0  ;;  %v6228_v44 = vpop.f32.mrf.mxu1 }
 0x223   : > { %v6188_v42 = vadd.f32 %v6187_v41, %v1229_v36  ;;  %v7753_v46 = vcombine.low %v7744_v27, %v7751_v15  ;;  %v6229_v50 = vadd.f32 %v6228_v44, %v1237_v34  ;;  %v6507_v60 = vmax.f32 %v6186_v48, 0.0 }
 0x224   : > { %v6189_v52 = vpop.f32.mrf.mxu0  ;;  %v6230_v20 = vpop.f32.mrf.mxu1  ;;  %v6509_v61 = vmax.f32 %v6227_v21, 0.0 }
 0x225   : > { %v7767_v55 = vrot.slane %v7753_v46, %v9655_v7  ;;  %v6508_v49 = vmax.f32 %v6188_v42, 0.0  ;;  %v6510_v45 = vmax.f32 %v6229_v50, 0.0 }
 0x226   : > { %v6190_v56 = vpop.f32.mrf.mxu0  ;;  %v6231_v57 = vpop.f32.mrf.mxu1 }
 0x227   : > { %v7768_v59 = vcombine.low %v7760_v24, %v7767_v55  ;;  %v8468_v43 = vpack.c.bf16 %v6508_v49, %v6507_v60  ;;  %v8469_v3 = vpack.c.bf16 %v6510_v45, %v6509_v61 }
 0x228   : > { %v6267_v62 = vpop.f32.mrf.mxu0  ;;  %v6308_v1 = vpop.f32.mrf.mxu1 }
 0x229   : > { %v6268_v39 = vadd.f32 %v6267_v62, %v1241_v54  ;;  %7871 = vst [vmem:[%s9704_s8 + $0x90] sm:$0xff] %v7768_v59  ;;  %v6309_v5 = vadd.f32 %v6308_v1, %v1249_v22  ;;  %v7779_v2 = vrot.slane %v8468_v43, %v9655_v7  ;;  %v7786_v13 = vrot.slane %v8469_v3, %v9655_v7 }
 0x22a   : > { %v6269_v6 = vpop.f32.mrf.mxu0  ;;  %v6310_v8 = vpop.f32.mrf.mxu1 }
 0x22b   : > { %v6270_v51 = vadd.f32 %v6269_v6, %v1245_v58  ;;  %v6311_v10 = vadd.f32 %v6310_v8, %v1253_v63  ;;  %v6511_v12 = vmax.f32 %v6268_v39, 0.0  ;;  %v6513_v53 = vmax.f32 %v6309_v5, 0.0 }
 0x22c   : > { %v6271_v11 = vpop.f32.mrf.mxu0  ;;  %v6312_v0 = vpop.f32.mrf.mxu1  ;;  %v7801_v25 = vcombine.low %v7779_v2, %v7786_v13 }
 0x22d   : > { %v6512_v47 = vmax.f32 %v6270_v51, 0.0  ;;  %v6514_v4 = vmax.f32 %v6311_v10, 0.0 }
 0x22e   : > { %v6272_v14 = vpop.f32.mrf.mxu0  ;;  %v6313_v17 = vpop.f32.mrf.mxu1  ;;  %v7809_v31 = vrot.slane %v7801_v25, %v9655_v7 }
 0x22f   : > { %v8470_v16 = vpack.c.bf16 %v6512_v47, %v6511_v12  ;;  %v8471_v18 = vpack.c.bf16 %v6514_v4, %v6513_v53 }
 0x230   : > { %v6349_v23 = vpop.f32.mrf.mxu0 }
 0x231   : > { %v7793_v30 = vrot.slane %v8470_v16, %v9655_v7  ;;  %v6350_v35 = vadd.f32 %v7988_v9, %v6349_v23  ;;  %v7800_v19 = vrot.slane %v8471_v18, %v9655_v7 }
 0x232   : > { %v8485_v28 = vpop.f32.mrf.mxu0 }
 0x233   : > { %v6515_v29 = vmax.f32 %v6350_v35, 0.0  ;;  %v7802_v26 = vcombine.low %v7793_v30, %v7800_v19 }
 0x234   : > { %v6352_v36 = vpop.f32.mrf.mxu0 }
 0x235   : > { %v6676_v37 = vpack.c.bf16 %v6515_v29, %v6515_v29  ;;  %v7816_v32 = vrot.slane %v7802_v26, %v9655_v7 }
 0x236   : > { %v8486_v33 = vpop.f32.mrf.mxu0 }
 0x237   : > { %v7824_v34 = vrot.slane %v6676_v37, %v9655_v7  ;;  %v7817_v27 = vcombine.low %v7809_v31, %v7816_v32 }
 0x239   : > { %8472 = vst.sshfl [vmem:[%s9704_s8 + $0xa0] sm:$0x1 pattern:$0x73625140] %v7824_v34  ;;  %7872 = vst [vmem:[%s9704_s8 + $0x98] sm:$0xff] %v7817_v27 }
 0x23a PF: > { %s16_s17 = sadd.s32 1, %s9113_s17   ;;  %s10271_s12 = smov %s9097_s13 }
 0x23b   : > { %p13_p8 = scmp.ge.s32.totalorder %s16_s17, 4   ;;  %s10272_s13 = smov %s9101_s14 }
 0x23c   : > { %s10273_s14 = smov %s9188_s23  ;;  %s10274_s15 = smov %s9109_s16 }
 0x23d   : > { %s10275_s16 = smov %s10277_s19  ;;  %15 = sbr.rel (!%p13_p8) target bundleno = 4 (0x4), region = 78 }
 0x242   :  { %7902 = vsyncpa [#allocation3], 1 }
 0x243   :  { %7904 = vsyncpa [#allocation3 + $0x1], 1 }

// kernel: decoder_forward.5
= control target key start
LH: loop header
LB: loop body
LE: loop exit
PB: predicated region body
PF: predicated region fallthrough
CT: control target
= control target key end

     0   :  { %s4707_s12 = smov 0   ;;  %s4709_s13 = smov 0   ;;  %s5907_s0 = inlined_call_operand.vmem [shape: bf16[1344,576], index: 0, kind: input, shape index: {}]   ;;  %s5908_s1 = inlined_call_operand.vmem [shape: bf16[576,32], index: 1, kind: input, shape index: {}]   ;;  %s5909_s2 = inlined_call_operand.vmem [shape: f32[1,32], index: 2, kind: input, shape index: {}]   ;;  %s5910_s3 = inlined_call_operand.vmem [shape: bf16[1344,32], index: 3, kind: output, shape index: {}]  }
   0x1   :  { %s4711_s14 = smov 0  }
   0x2 LB: > { %s25_s15 = sadd.s32 1, %s4680_s13  ;;  %p3673_p0 = scmp.ge.s32.totalorder %s4684_s14, 1  ;;  %s4684_s14 = sphi %s4711_s14, %s13_s14   ;;  %s4680_s13 = sphi %s4709_s13, %s5980_s13   ;;  %s4676_s12 = sphi %s4707_s12, %s5979_s12  }
   0x3   : > { %p27_p1 = scmp.ge.s32.totalorder %s25_s15, 2  ;;  %p170_p2 = scmp.lt.s32.totalorder %s4684_s14, 3 }
   0x5   : > { %s5982_s15 = smov (%p27_p1, %s25_s15), 0  ;;  %p171_p3 = pnand %p3673_p0, %p170_p2 }
   0x7   : > { %174 = sbr.rel (%p171_p3) target bundleno = 699 (0x2bb), region = 32 }
   0xc   : > { %v4331_v0 = vld [vmem:[%s5908_s1 + $0x38] sm:$0xff]   ;;  %v4686_v1 = vmov 0   ;;  %s205_s18 = smul.u32 84, %s4676_s12  ;;  %v4332_v2 = vld [vmem:[%s5908_s1 + $0x30] sm:$0xff]   ;;  %v4333_v3 = vld [vmem:[%s5908_s1 + $0x28] sm:$0xff]   ;;  %vm1826_vm0 = vcmask 523264  }
   0xd   : > { %1953 = vmatprep.subr.bf16.mxu0 %v4686_v1  ;;  %4273 = vmatprep.subr.bf16.mxu1 %v4686_v1  ;;  %v4334_v4 = vld [vmem:[%s5908_s1 + $0x20] sm:$0xff]   ;;  %v4335_v5 = vld [vmem:[%s5908_s1 + $0x18] sm:$0xff]   ;;  %v4336_v7 = vld [vmem:[%s5908_s1 + $0x10] sm:$0xff]   ;;  %vm3480_vm1 = vcmask 257024  }
   0xe   : > { %1954 = vmatpush1.bf16.msra.mxu0 %v4331_v0  ;;  %4289 = vmatpush1.bf16.msra.mxu1 %v4331_v0  ;;  %p206_p4 = scmp.lt.s32.totalorder %s205_s18, 167  ;;  %v4337_v9 = vld [vmem:[%s5908_s1 + $0x8] sm:$0xff]   ;;  %v4338_v10 = vld [vmem:[%s5908_s1] sm:$0xff]   ;;  %v4339_v11 = vld [vmem:[%s5908_s1 + $0x78] sm:$0xff]  }
   0xf   : > { %1955 = vmatprep.subr.bf16.mxu0 %v4686_v1  ;;  %4274 = vmatprep.subr.bf16.mxu1 %v4686_v1  ;;  %v4340_v12 = vld [vmem:[%s5908_s1 + $0x70] sm:$0xff]   ;;  %v4341_v13 = vld [vmem:[%s5908_s1 + $0x68] sm:$0xff]   ;;  %v4342_v14 = vld [vmem:[%s5908_s1 + $0x60] sm:$0xff]  }
  0x10   : > { %s5984_s18 = smov (!%p206_p4, %s205_s18), 167  ;;  %v4343_v15 = vld [vmem:[%s5908_s1 + $0x58] sm:$0xff]   ;;  %v4344_v16 = vld [vmem:[%s5908_s1 + $0x50] sm:$0xff]   ;;  %v4345_v17 = vld [vmem:[%s5908_s1 + $0x48] sm:$0xff]  }
  0x11   : > { %s4305_s25 = smul.u32 20, %s5984_s18  ;;  %v4346_v18 = vld [vmem:[%s5908_s1 + $0x40] sm:$0xff]   ;;  %v4353_v19 = vld [vmem:[%s5908_s1 + $0x118] sm:$0xff]   ;;  %v4414_v25 = vld [vmem:[%s5908_s1 + $0x110] sm:$0xff]  }
  0x12   : > { %1956 = vmatpush1.bf16.msra.mxu0 %v4332_v2  ;;  %4290 = vmatpush1.bf16.msra.mxu1 %v4332_v2  ;;  %v4360_v24 = vld [vmem:[%s5908_s1 + $0xb8] sm:$0xff]   ;;  %v4361_v26 = vld [vmem:[%s5908_s1 + $0xb0] sm:$0xff]   ;;  %v4368_v31 = vld [vmem:[%s5908_s1 + $0xa8] sm:$0xff]  }
  0x13   : > { %1957 = vmatprep.subr.bf16.mxu0 %v4686_v1  ;;  %4275 = vmatprep.subr.bf16.mxu1 %v4686_v1  ;;  %s4754_s30 = scalar_lea.vmem %s5907_s0, %s4305_s25  ;;  %v4375_v32 = vld [vmem:[%s5908_s1 + $0xa0] sm:$0xff]   ;;  %v4376_v37 = vld [vmem:[%s5908_s1 + $0x98] sm:$0xff]   ;;  %v4467_v38 = vld [vmem:[%s5908_s1 + $0x108] sm:$0xff]  }
  0x14   : > { %v4349_v6 = vld [vmem:[%s4754_s30 + $0x4] ss:$20 sps:$4 sm:$0xff]   ;;  %v4347_v20 = vld [vmem:[%s4754_s30] ss:$20 sps:$4 sm:$0xff]   ;;  %v4358_v27 = vld [vmem:[%s4754_s30 + $0x28] ss:$20 sps:$4 sm:$0xff]  }
  0x15   : > { %v4352_v8 = vld [vmem:[%s4754_s30 + $0x504] ss:$20 sps:$4 sm:$0xff]   ;;  %1985 = vmatprep.mubr.bf16.mxu0 %v4349_v6  ;;  %v4350_v21 = vld [vmem:[%s4754_s30 + $0x500] ss:$20 sps:$4 sm:$0xff]   ;;  %v4359_v28 = vld [vmem:[%s4754_s30 + $0x528] ss:$20 sps:$4 sm:$0xff]  }
  0x16   : > { %1958 = vmatpush1.bf16.msra.mxu0 %v4333_v3  ;;  %4291 = vmatpush1.bf16.msra.mxu1 %v4333_v3  ;;  %v4354_v22 = vld [vmem:[%s4754_s30 + $0x2c] ss:$20 sps:$4 sm:$0xff]   ;;  %v4362_v29 = vld [vmem:[%s4754_s30 + $0x54] ss:$20 sps:$4 sm:$0xff]   ;;  %v4366_v33 = vld [vmem:[%s4754_s30 + $0x50] ss:$20 sps:$4 sm:$0xff]  }
  0x17   : > { %1959 = vmatprep.subr.bf16.mxu0 %v4686_v1  ;;  %4276 = vmatprep.subr.bf16.mxu1 %v4686_v1  ;;  %v4356_v23 = vld [vmem:[%s4754_s30 + $0x52c] ss:$20 sps:$4 sm:$0xff]   ;;  %v4364_v30 = vld [vmem:[%s4754_s30 + $0x554] ss:$20 sps:$4 sm:$0xff]   ;;  %v4367_v34 = vld [vmem:[%s4754_s30 + $0x550] ss:$20 sps:$4 sm:$0xff]  }
  0x18   : > { %2241 = vmatprep.mubr.bf16.mxu1 %v4352_v8  ;;  %v4369_v35 = vld [vmem:[%s4754_s30 + $0x7c] ss:$20 sps:$4 sm:$0xff]   ;;  %v4373_v40 = vld [vmem:[%s4754_s30 + $0x78] ss:$20 sps:$4 sm:$0xff]   ;;  %v4391_v45 = vld [vmem:[%s5908_s1 + $0x80] sm:$0xff]  }
  0x19   : > { %v4371_v36 = vld [vmem:[%s4754_s30 + $0x57c] ss:$20 sps:$4 sm:$0xff]   ;;  %v4374_v41 = vld [vmem:[%s4754_s30 + $0x578] ss:$20 sps:$4 sm:$0xff]   ;;  %v4381_v46 = vld [vmem:[%s4754_s30 + $0xa0] ss:$20 sps:$4 sm:$0xff]  }
  0x1a   : > { %1960 = vmatpush1.bf16.msra.mxu0 %v4334_v4  ;;  %4292 = vmatpush1.bf16.msra.mxu1 %v4334_v4  ;;  %v4383_v39 = vld [vmem:[%s5908_s1 + $0x90] sm:$0xff]   ;;  %v4377_v42 = vld [vmem:[%s4754_s30 + $0xa4] ss:$20 sps:$4 sm:$0xff]   ;;  %v4388_v44 = vld [vmem:[%s5908_s1 + $0x88] sm:$0xff]  }
  0x1b   : > { %1961 = vmatprep.subr.bf16.mxu0 %v4686_v1  ;;  %4277 = vmatprep.subr.bf16.mxu1 %v4686_v1  ;;  %v4379_v43 = vld [vmem:[%s4754_s30 + $0x5a4] ss:$20 sps:$4 sm:$0xff]   ;;  %v4382_v47 = vld [vmem:[%s4754_s30 + $0x5a0] ss:$20 sps:$4 sm:$0xff]   ;;  %v4389_v52 = vld [vmem:[%s4754_s30 + $0xc8] ss:$20 sps:$4 sm:$0xff]  }
  0x1c   : > { %v4384_v48 = vld [vmem:[%s4754_s30 + $0xcc] ss:$20 sps:$4 sm:$0xff]   ;;  %v4398_v50 = vld [vmem:[%s5908_s1 + $0xf8] sm:$0xff]   ;;  %v4399_v51 = vld [vmem:[%s5908_s1 + $0xf0] sm:$0xff]  }
  0x1d   : > { %v4386_v49 = vld [vmem:[%s4754_s30 + $0x5cc] ss:$20 sps:$4 sm:$0xff]   ;;  %v4390_v53 = vld [vmem:[%s4754_s30 + $0x5c8] ss:$20 sps:$4 sm:$0xff]   ;;  %v4396_v58 = vld [vmem:[%s4754_s30 + $0xf0] ss:$20 sps:$4 sm:$0xff]  }
  0x1e   : > { %1962 = vmatpush1.bf16.msra.mxu0 %v4335_v5  ;;  %4293 = vmatpush1.bf16.msra.mxu1 %v4335_v5  ;;  %v4392_v54 = vld [vmem:[%s4754_s30 + $0xf4] ss:$20 sps:$4 sm:$0xff]   ;;  %v4407_v57 = vld [vmem:[%s5908_s1 + $0xe0] sm:$0xff]   ;;  %v4400_v60 = vld [vmem:[%s4754_s30 + $0x11c] ss:$20 sps:$4 sm:$0xff]  }
  0x1f   : > { %1963 = vmatprep.subr.bf16.mxu0 %v4686_v1  ;;  %4278 = vmatprep.subr.bf16.mxu1 %v4686_v1  ;;  %v4394_v55 = vld [vmem:[%s4754_s30 + $0x5f4] ss:$20 sps:$4 sm:$0xff]   ;;  %v4397_v59 = vld [vmem:[%s4754_s30 + $0x5f0] ss:$20 sps:$4 sm:$0xff]   ;;  %v4415_v62 = vld [vmem:[%s5908_s1 + $0xd8] sm:$0xff]  }
  0x20   : > { %v4406_v56 = vld [vmem:[%s5908_s1 + $0xe8] sm:$0xff]   ;;  %v4402_v61 = vld [vmem:[%s4754_s30 + $0x61c] ss:$20 sps:$4 sm:$0xff]   ;;  %v4408_v3 = vld [vmem:[%s4754_s30 + $0x144] ss:$20 sps:$4 sm:$0xff]  }
  0x21   : > { %v4416_v63 = vld [vmem:[%s5908_s1 + $0xd0] sm:$0xff]   ;;  %v4404_v0 = vld [vmem:[%s4754_s30 + $0x118] ss:$20 sps:$4 sm:$0xff]   ;;  %v4424_v6 = vld [vmem:[%s5908_s1 + $0xc0] sm:$0xff]  }
  0x22   : > { %1964 = vmatpush1.bf16.msra.mxu0 %v4336_v7  ;;  %4294 = vmatpush1.bf16.msra.mxu1 %v4336_v7  ;;  %v4405_v2 = vld [vmem:[%s4754_s30 + $0x618] ss:$20 sps:$4 sm:$0xff]   ;;  %v4412_v7 = vld [vmem:[%s4754_s30 + $0x140] ss:$20 sps:$4 sm:$0xff]  }
  0x23   : > { %1965 = vmatprep.subr.bf16.mxu0 %v4686_v1  ;;  %4279 = vmatprep.subr.bf16.mxu1 %v4686_v1  ;;  %v4410_v4 = vld [vmem:[%s4754_s30 + $0x644] ss:$20 sps:$4 sm:$0xff]   ;;  %v4423_v5 = vld [vmem:[%s5908_s1 + $0xc8] sm:$0xff]   ;;  %v4413_v8 = vld [vmem:[%s4754_s30 + $0x640] ss:$20 sps:$4 sm:$0xff]  }
  0x26   : > { %1966 = vmatpush1.bf16.msra.mxu0 %v4337_v9  ;;  %4295 = vmatpush1.bf16.msra.mxu1 %v4337_v9  ;;  %v4417_v9 = vld [vmem:[%s4754_s30 + $0x16c] ss:$20 sps:$4 sm:$0xff]  }
  0x27   : > { %1967 = vmatprep.subr.bf16.mxu0 %v4686_v1  ;;  %4280 = vmatprep.subr.bf16.mxu1 %v4686_v1 }
  0x2a   : > { %1968 = vmatpush1.bf16.msra.mxu0 %v4338_v10  ;;  %4296 = vmatpush1.bf16.msra.mxu1 %v4338_v10  ;;  %v4419_v10 = vld [vmem:[%s4754_s30 + $0x66c] ss:$20 sps:$4 sm:$0xff]  }
  0x2b   : > { %1969 = vmatprep.subr.bf16.mxu0 %v4686_v1  ;;  %4281 = vmatprep.subr.bf16.mxu1 %v4686_v1 }
  0x2e   : > { %1970 = vmatpush2.bf16.msra.mxu0 %v4339_v11  ;;  %4297 = vmatpush2.bf16.msra.mxu1 %v4339_v11  ;;  %v4516_v11 = vld [vmem:[%s5908_s1 + $0x100] sm:$0xff]  }
  0x2f   : > { %1971 = vmatprep.subr.bf16.mxu0 %v4686_v1  ;;  %4282 = vmatprep.subr.bf16.mxu1 %v4686_v1 }
  0x32   : > { %1972 = vmatpush2.bf16.msra.mxu0 %v4340_v12  ;;  %4298 = vmatpush2.bf16.msra.mxu1 %v4340_v12  ;;  %v4421_v12 = vld [vmem:[%s4754_s30 + $0x168] ss:$20 sps:$4 sm:$0xff]  }
  0x33   : > { %1973 = vmatprep.subr.bf16.mxu0 %v4686_v1  ;;  %4283 = vmatprep.subr.bf16.mxu1 %v4686_v1 }
  0x36   : > { %1974 = vmatpush2.bf16.msra.mxu0 %v4341_v13  ;;  %4299 = vmatpush2.bf16.msra.mxu1 %v4341_v13  ;;  %v4422_v13 = vld [vmem:[%s4754_s30 + $0x668] ss:$20 sps:$4 sm:$0xff]  }
  0x37   : > { %1975 = vmatprep.subr.bf16.mxu0 %v4686_v1  ;;  %4284 = vmatprep.subr.bf16.mxu1 %v4686_v1 }
  0x3a   : > { %1976 = vmatpush2.bf16.msra.mxu0 %v4342_v14  ;;  %4300 = vmatpush2.bf16.msra.mxu1 %v4342_v14  ;;  %v4429_v14 = vld [vmem:[%s4754_s30 + $0xc] ss:$20 sps:$4 sm:$0xff]  }
  0x3b   : > { %1977 = vmatprep.subr.bf16.mxu0 %v4686_v1  ;;  %4285 = vmatprep.subr.bf16.mxu1 %v4686_v1 }
  0x3e   : > { %1978 = vmatpush2.bf16.msra.mxu0 %v4343_v15  ;;  %4301 = vmatpush2.bf16.msra.mxu1 %v4343_v15  ;;  %v4427_v15 = vld [vmem:[%s4754_s30 + $0x8] ss:$20 sps:$4 sm:$0xff]  }
  0x3f   : > { %1979 = vmatprep.subr.bf16.mxu0 %v4686_v1  ;;  %4286 = vmatprep.subr.bf16.mxu1 %v4686_v1 }
  0x42   : > { %1980 = vmatpush2.bf16.msra.mxu0 %v4344_v16  ;;  %4302 = vmatpush2.bf16.msra.mxu1 %v4344_v16  ;;  %v4430_v16 = vld [vmem:[%s4754_s30 + $0x190] ss:$20 sps:$4 sm:$0xff]  }
  0x43   : > { %1981 = vmatprep.subr.bf16.mxu0 %v4686_v1  ;;  %4287 = vmatprep.subr.bf16.mxu1 %v4686_v1 }
  0x46   : > { %1982 = vmatpush2.bf16.msra.mxu0 %v4345_v17  ;;  %4303 = vmatpush2.bf16.msra.mxu1 %v4345_v17  ;;  %v4431_v17 = vld [vmem:[%s4754_s30 + $0x1bc] ss:$20 sps:$4 sm:$0xff]  }
  0x47   : > { %1983 = vmatprep.subr.bf16.mxu0 %v4686_v1  ;;  %4288 = vmatprep.subr.bf16.mxu1 %v4686_v1 }
  0x4a   : > { %1984 = vmatpush2.bf16.msra.mxu0 %v4346_v18  ;;  %4304 = vmatpush2.bf16.msra.mxu1 %v4346_v18  ;;  %v4433_v18 = vld [vmem:[%s4754_s30 + $0x34] ss:$20 sps:$4 sm:$0xff]  }
  0x4b   : > { %4181 = vmatprep.subr.bf16.mxu0 %v4353_v19  ;;  %2322 = vmatprep.subr.bf16.mxu1 %v4686_v1 }
  0x4d   : > { %1986 = vmatmul.mubr.bf16.vlgmr.msra.gmra.mxu0 %v4347_v20  ;;  %2242 = vmatmul.mubr.bf16.vlgmr.msra.gmra.mxu1 %v4350_v21  ;;  %v4436_v20 = vld [vmem:[%s4754_s30 + $0x30] ss:$20 sps:$4 sm:$0xff]  }
  0x4e   : > { %4182 = vmatpush3.bf16.msra.mxu0 %v4353_v19  ;;  %1993 = vmatprep.mubr.bf16.mxu0 %v4354_v22  ;;  %v4435_v19 = vld [vmem:[%s4754_s30 + $0x1b8] ss:$20 sps:$4 sm:$0xff]   ;;  %v4439_v22 = vld [vmem:[%s4754_s30 + $0x5c] ss:$20 sps:$4 sm:$0xff]  }
  0x4f   : > { %2249 = vmatprep.mubr.bf16.mxu1 %v4356_v23  ;;  %2323 = vmatpush1.bf16.msra.mxu1 %v4360_v24  ;;  %v4437_v21 = vld [vmem:[%s4754_s30 + $0x1e4] ss:$20 sps:$4 sm:$0xff]   ;;  %v4441_v23 = vld [vmem:[%s4754_s30 + $0x1e0] ss:$20 sps:$4 sm:$0xff]  }
  0x50   : > { %2324 = vmatprep.subr.bf16.mxu1 %v4686_v1  ;;  %4183 = vmatprep.subr.bf16.mxu0 %v4414_v25  ;;  %v4442_v24 = vld [vmem:[%s4754_s30 + $0x58] ss:$20 sps:$4 sm:$0xff]  }
  0x52   : > { %4184 = vmatpush3.bf16.msra.mxu0 %v4414_v25  ;;  %v4443_v25 = vld [vmem:[%s4754_s30 + $0x20c] ss:$20 sps:$4 sm:$0xff]  }
  0x53   : > { %2325 = vmatpush1.bf16.msra.mxu1 %v4361_v26  ;;  %4185 = vmatprep.subr.bf16.mxu0 %v4467_v38  ;;  %v4445_v26 = vld [vmem:[%s4754_s30 + $0x84] ss:$20 sps:$4 sm:$0xff]  }
  0x54   : > { %2326 = vmatprep.subr.bf16.mxu1 %v4686_v1 }
  0x55   : > { %1994 = vmatmul.mubr.bf16.gmra.mxu0 %v4358_v27  ;;  %2250 = vmatmul.mubr.bf16.gmra.mxu1 %v4359_v28  ;;  %v4447_v27 = vld [vmem:[%s4754_s30 + $0x208] ss:$20 sps:$4 sm:$0xff]   ;;  %v4448_v28 = vld [vmem:[%s4754_s30 + $0x80] ss:$20 sps:$4 sm:$0xff]  }
  0x56   : > { %2001 = vmatprep.mubr.bf16.mxu0 %v4362_v29  ;;  %2257 = vmatprep.mubr.bf16.mxu1 %v4364_v30  ;;  %v4449_v29 = vld [vmem:[%s4754_s30 + $0x234] ss:$20 sps:$4 sm:$0xff]   ;;  %v4451_v30 = vld [vmem:[%s4754_s30 + $0xac] ss:$20 sps:$4 sm:$0xff]  }
  0x57   : > { %2327 = vmatpush1.bf16.msra.mxu1 %v4368_v31  ;;  %4186 = vmatpush3.bf16.msra.mxu0 %v4467_v38  ;;  %v4453_v31 = vld [vmem:[%s4754_s30 + $0x230] ss:$20 sps:$4 sm:$0xff]  }
  0x58   : > { %2328 = vmatprep.subr.bf16.mxu1 %v4686_v1  ;;  %4187 = vmatprep.subr.bf16.mxu0 %v4516_v11  ;;  %v4463_v38 = vld [vmem:[%s4754_s30 + $0xfc] ss:$20 sps:$4 sm:$0xff]  }
  0x5b   : > { %2329 = vmatpush1.bf16.msra.mxu1 %v4375_v32  ;;  %4188 = vmatpush3.bf16.msra.mxu0 %v4516_v11  ;;  %v4454_v32 = vld [vmem:[%s4754_s30 + $0xa8] ss:$20 sps:$4 sm:$0xff]   ;;  %v4519_v11 = vld [vmem:[%s4754_s30 + $0x264] ss:$20 sps:$4 sm:$0xff]  }
  0x5c   : > { %2330 = vmatprep.subr.bf16.mxu1 %v4686_v1 }
  0x5d   : > { %2002 = vmatmul.mubr.bf16.gmra.mxu0 %v4366_v33  ;;  %2258 = vmatmul.mubr.bf16.gmra.mxu1 %v4367_v34  ;;  %v4455_v33 = vld [vmem:[%s4754_s30 + $0x25c] ss:$20 sps:$4 sm:$0xff]   ;;  %v4457_v34 = vld [vmem:[%s4754_s30 + $0xd4] ss:$20 sps:$4 sm:$0xff]  }
  0x5e   : > { %2009 = vmatprep.mubr.bf16.mxu0 %v4369_v35  ;;  %2265 = vmatprep.mubr.bf16.mxu1 %v4371_v36  ;;  %v4459_v35 = vld [vmem:[%s4754_s30 + $0x258] ss:$20 sps:$4 sm:$0xff]   ;;  %v4460_v36 = vld [vmem:[%s4754_s30 + $0xd0] ss:$20 sps:$4 sm:$0xff]  }
  0x5f   : > { %2331 = vmatpush1.bf16.msra.mxu1 %v4376_v37  ;;  %v4461_v37 = vld [vmem:[%s4754_s30 + $0x284] ss:$20 sps:$4 sm:$0xff]  }
  0x60   : > { %2332 = vmatprep.subr.bf16.mxu1 %v4686_v1 }
  0x63   : > { %2333 = vmatpush1.bf16.msra.mxu1 %v4383_v39  ;;  %v4465_v39 = vld [vmem:[%s4754_s30 + $0x280] ss:$20 sps:$4 sm:$0xff]  }
  0x64   : > { %2334 = vmatprep.subr.bf16.mxu1 %v4686_v1 }
  0x65   : > { %2010 = vmatmul.mubr.bf16.gmra.mxu0 %v4373_v40  ;;  %2266 = vmatmul.mubr.bf16.gmra.mxu1 %v4374_v41  ;;  %v4466_v40 = vld [vmem:[%s4754_s30 + $0xf8] ss:$20 sps:$4 sm:$0xff]  }
  0x66   : > { %2017 = vmatprep.mubr.bf16.mxu0 %v4377_v42  ;;  %2273 = vmatprep.mubr.bf16.mxu1 %v4379_v43  ;;  %v4468_v41 = vld [vmem:[%s4754_s30 + $0x2ac] ss:$20 sps:$4 sm:$0xff]   ;;  %v4470_v42 = vld [vmem:[%s4754_s30 + $0x124] ss:$20 sps:$4 sm:$0xff]   ;;  %v4472_v43 = vld [vmem:[%s4754_s30 + $0x2a8] ss:$20 sps:$4 sm:$0xff]  }
  0x67   : > { %2335 = vmatpush1.bf16.msra.mxu1 %v4388_v44  ;;  %v4473_v44 = vld [vmem:[%s4754_s30 + $0x120] ss:$20 sps:$4 sm:$0xff]  }
  0x68   : > { %2336 = vmatprep.subr.bf16.mxu1 %v4686_v1 }
  0x6b   : > { %2337 = vmatpush1.bf16.msra.mxu1 %v4391_v45  ;;  %v4474_v45 = vld [vmem:[%s4754_s30 + $0x2d4] ss:$20 sps:$4 sm:$0xff]  }
  0x6c   : > { %2338 = vmatprep.subr.bf16.mxu1 %v4686_v1 }
  0x6d   : > { %2018 = vmatmul.mubr.bf16.gmra.mxu0 %v4381_v46  ;;  %2274 = vmatmul.mubr.bf16.gmra.mxu1 %v4382_v47  ;;  %v4476_v46 = vld [vmem:[%s4754_s30 + $0x14c] ss:$20 sps:$4 sm:$0xff]   ;;  %v4478_v47 = vld [vmem:[%s4754_s30 + $0x2d0] ss:$20 sps:$4 sm:$0xff]  }
  0x6e   : > { %2025 = vmatprep.mubr.bf16.mxu0 %v4384_v48  ;;  %2281 = vmatprep.mubr.bf16.mxu1 %v4386_v49  ;;  %v4479_v48 = vld [vmem:[%s4754_s30 + $0x148] ss:$20 sps:$4 sm:$0xff]  }
  0x6f   : > { %2339 = vmatpush2.bf16.msra.mxu1 %v4398_v50  ;;  %v4480_v49 = vld [vmem:[%s4754_s30 + $0x2fc] ss:$20 sps:$4 sm:$0xff]   ;;  %v4482_v50 = vld [vmem:[%s4754_s30 + $0x174] ss:$20 sps:$4 sm:$0xff]  }
  0x70   : > { %2340 = vmatprep.subr.bf16.mxu1 %v4686_v1 }
  0x73   : > { %2341 = vmatpush2.bf16.msra.mxu1 %v4399_v51  ;;  %v4484_v51 = vld [vmem:[%s4754_s30 + $0x2f8] ss:$20 sps:$4 sm:$0xff]  }
  0x74   : > { %2342 = vmatprep.subr.bf16.mxu1 %v4686_v1 }
  0x75   : > { %2026 = vmatmul.mubr.bf16.gmra.mxu0 %v4389_v52  ;;  %2282 = vmatmul.mubr.bf16.gmra.mxu1 %v4390_v53  ;;  %v4485_v52 = vld [vmem:[%s4754_s30 + $0x170] ss:$20 sps:$4 sm:$0xff]  }
  0x76   : > { %2033 = vmatprep.mubr.bf16.mxu0 %v4392_v54  ;;  %2289 = vmatprep.mubr.bf16.mxu1 %v4394_v55  ;;  %v4486_v53 = vld [vmem:[%s4754_s30 + $0x324] ss:$20 sps:$4 sm:$0xff]   ;;  %v4488_v54 = vld [vmem:[%s4754_s30 + $0x19c] ss:$20 sps:$4 sm:$0xff]   ;;  %v4490_v55 = vld [vmem:[%s4754_s30 + $0x320] ss:$20 sps:$4 sm:$0xff]  }
  0x77   : > { %2343 = vmatpush2.bf16.msra.mxu1 %v4406_v56  ;;  %v4491_v56 = vld [vmem:[%s4754_s30 + $0x198] ss:$20 sps:$4 sm:$0xff]  }
  0x78   : > { %2344 = vmatprep.subr.bf16.mxu1 %v4686_v1 }
  0x7b   : > { %2345 = vmatpush2.bf16.msra.mxu1 %v4407_v57  ;;  %v4492_v57 = vld [vmem:[%s4754_s30 + $0x34c] ss:$20 sps:$4 sm:$0xff]  }
  0x7c   : > { %2346 = vmatprep.subr.bf16.mxu1 %v4686_v1 }
  0x7d   : > { %2034 = vmatmul.mubr.bf16.gmra.mxu0 %v4396_v58  ;;  %2290 = vmatmul.mubr.bf16.gmra.mxu1 %v4397_v59  ;;  %v4494_v58 = vld [vmem:[%s4754_s30 + $0x1c4] ss:$20 sps:$4 sm:$0xff]   ;;  %v4496_v59 = vld [vmem:[%s4754_s30 + $0x348] ss:$20 sps:$4 sm:$0xff]  }
  0x7e   : > { %2041 = vmatprep.mubr.bf16.mxu0 %v4400_v60  ;;  %2297 = vmatprep.mubr.bf16.mxu1 %v4402_v61  ;;  %v4497_v60 = vld [vmem:[%s4754_s30 + $0x1c0] ss:$20 sps:$4 sm:$0xff]  }
  0x7f   : > { %2347 = vmatpush2.bf16.msra.mxu1 %v4415_v62  ;;  %v4498_v61 = vld [vmem:[%s4754_s30 + $0x374] ss:$20 sps:$4 sm:$0xff]   ;;  %v4500_v62 = vld [vmem:[%s4754_s30 + $0x1ec] ss:$20 sps:$4 sm:$0xff]  }
  0x80   : > { %2348 = vmatprep.subr.bf16.mxu1 %v4686_v1 }
  0x83   : > { %2349 = vmatpush2.bf16.msra.mxu1 %v4416_v63  ;;  %v4502_v63 = vld [vmem:[%s4754_s30 + $0x370] ss:$20 sps:$4 sm:$0xff]  }
  0x84   : > { %2350 = vmatprep.subr.bf16.mxu1 %v4686_v1 }
  0x85   : > { %2042 = vmatmul.mubr.bf16.gmra.mxu0 %v4404_v0  ;;  %2298 = vmatmul.mubr.bf16.gmra.mxu1 %v4405_v2  ;;  %v4503_v0 = vld [vmem:[%s4754_s30 + $0x1e8] ss:$20 sps:$4 sm:$0xff]  }
  0x86   : > { %2049 = vmatprep.mubr.bf16.mxu0 %v4408_v3  ;;  %2305 = vmatprep.mubr.bf16.mxu1 %v4410_v4  ;;  %v4504_v2 = vld [vmem:[%s4754_s30 + $0x39c] ss:$20 sps:$4 sm:$0xff]   ;;  %v4506_v3 = vld [vmem:[%s4754_s30 + $0x214] ss:$20 sps:$4 sm:$0xff]   ;;  %v4508_v4 = vld [vmem:[%s4754_s30 + $0x398] ss:$20 sps:$4 sm:$0xff]  }
  0x87   : > { %2351 = vmatpush2.bf16.msra.mxu1 %v4423_v5  ;;  %v4509_v5 = vld [vmem:[%s4754_s30 + $0x210] ss:$20 sps:$4 sm:$0xff]  }
  0x88   : > { %2352 = vmatprep.subr.bf16.mxu1 %v4686_v1  ;;  %v4425_v1 = vld [vmem:[%s4754_s30 + $0x194] ss:$20 sps:$4 sm:$0xff]  }
  0x8b   : > { %2353 = vmatpush2.bf16.msra.mxu1 %v4424_v6  ;;  %v4510_v6 = vld [vmem:[%s4754_s30 + $0x3c4] ss:$20 sps:$4 sm:$0xff]  }
  0x8d   : > { %2050 = vmatmul.mubr.bf16.gmra.mxu0 %v4412_v7  ;;  %2306 = vmatmul.mubr.bf16.gmra.mxu1 %v4413_v8  ;;  %v4512_v7 = vld [vmem:[%s4754_s30 + $0x23c] ss:$20 sps:$4 sm:$0xff]   ;;  %v4514_v8 = vld [vmem:[%s4754_s30 + $0x3c0] ss:$20 sps:$4 sm:$0xff]  }
  0x8e   : > { %2057 = vmatprep.mubr.bf16.mxu0 %v4417_v9  ;;  %2313 = vmatprep.mubr.bf16.mxu1 %v4419_v10  ;;  %v4515_v9 = vld [vmem:[%s4754_s30 + $0x238] ss:$20 sps:$4 sm:$0xff]  }
  0x8f   : > { %v4517_v10 = vld [vmem:[%s4754_s30 + $0x3ec] ss:$20 sps:$4 sm:$0xff]  }
  0x95   : > { %2058 = vmatmul.mubr.bf16.gmra.mxu0 %v4421_v12  ;;  %2314 = vmatmul.mubr.bf16.gmra.mxu1 %v4422_v13 }
  0x96   : > { %2065 = vmatprep.mubr.bf16.mxu0 %v4425_v1  ;;  %2354 = vmatprep.mubr.bf16.mxu1 %v4429_v14 }
  0x9d   : > { %2066 = vmatmul.mubr.bf16.gmra.mxu0 %v4430_v16  ;;  %2355 = vmatmul.mubr.bf16.vlgmr.msra.gmra.mxu1 %v4427_v15 }
  0x9e   : > { %2073 = vmatprep.mubr.bf16.mxu0 %v4431_v17  ;;  %2362 = vmatprep.mubr.bf16.mxu1 %v4433_v18  ;;  %v4521_v17 = vld [vmem:[%s4754_s30 + $0x3e8] ss:$20 sps:$4 sm:$0xff]   ;;  %v4522_v18 = vld [vmem:[%s4754_s30 + $0x260] ss:$20 sps:$4 sm:$0xff]  }
  0xa5   : > { %2074 = vmatmul.mubr.bf16.gmra.mxu0 %v4435_v19  ;;  %2363 = vmatmul.mubr.bf16.gmra.mxu1 %v4436_v20  ;;  %v4523_v19 = vld [vmem:[%s4754_s30 + $0x414] ss:$20 sps:$4 sm:$0xff]   ;;  %v4525_v20 = vld [vmem:[%s4754_s30 + $0x28c] ss:$20 sps:$4 sm:$0xff]  }
  0xa6   : > { %2081 = vmatprep.mubr.bf16.mxu0 %v4437_v21  ;;  %2370 = vmatprep.mubr.bf16.mxu1 %v4439_v22 }
  0xad   : > { %2082 = vmatmul.mubr.bf16.gmra.mxu0 %v4441_v23  ;;  %2371 = vmatmul.mubr.bf16.gmra.mxu1 %v4442_v24 }
  0xae   : > { %2089 = vmatprep.mubr.bf16.mxu0 %v4443_v25  ;;  %2378 = vmatprep.mubr.bf16.mxu1 %v4445_v26 }
  0xb5   : > { %2090 = vmatmul.mubr.bf16.gmra.mxu0 %v4447_v27  ;;  %2379 = vmatmul.mubr.bf16.gmra.mxu1 %v4448_v28 }
  0xb6   : > { %2097 = vmatprep.mubr.bf16.mxu0 %v4449_v29  ;;  %2386 = vmatprep.mubr.bf16.mxu1 %v4451_v30  ;;  %v4527_v29 = vld [vmem:[%s4754_s30 + $0x410] ss:$20 sps:$4 sm:$0xff]   ;;  %v4528_v30 = vld [vmem:[%s4754_s30 + $0x288] ss:$20 sps:$4 sm:$0xff]  }
  0xbd   : > { %2098 = vmatmul.mubr.bf16.gmra.mxu0 %v4453_v31  ;;  %2387 = vmatmul.mubr.bf16.gmra.mxu1 %v4454_v32  ;;  %v4529_v31 = vld [vmem:[%s4754_s30 + $0x43c] ss:$20 sps:$4 sm:$0xff]   ;;  %v4531_v32 = vld [vmem:[%s4754_s30 + $0x2b4] ss:$20 sps:$4 sm:$0xff]  }
  0xbe   : > { %2105 = vmatprep.mubr.bf16.mxu0 %v4455_v33  ;;  %2394 = vmatprep.mubr.bf16.mxu1 %v4457_v34 }
  0xc5   : > { %2106 = vmatmul.mubr.bf16.gmra.mxu0 %v4459_v35  ;;  %2395 = vmatmul.mubr.bf16.gmra.mxu1 %v4460_v36 }
  0xc6   : > { %2113 = vmatprep.mubr.bf16.mxu0 %v4461_v37  ;;  %2402 = vmatprep.mubr.bf16.mxu1 %v4463_v38 }
  0xcd   : > { %2114 = vmatmul.mubr.bf16.gmra.mxu0 %v4465_v39  ;;  %2403 = vmatmul.mubr.bf16.gmra.mxu1 %v4466_v40 }
  0xce   : > { %2121 = vmatprep.mubr.bf16.mxu0 %v4468_v41  ;;  %2410 = vmatprep.mubr.bf16.mxu1 %v4470_v42  ;;  %v4533_v41 = vld [vmem:[%s4754_s30 + $0x438] ss:$20 sps:$4 sm:$0xff]   ;;  %v4534_v42 = vld [vmem:[%s4754_s30 + $0x2b0] ss:$20 sps:$4 sm:$0xff]  }
  0xd5   : > { %2122 = vmatmul.mubr.bf16.gmra.mxu0 %v4472_v43  ;;  %2411 = vmatmul.mubr.bf16.gmra.mxu1 %v4473_v44  ;;  %v4537_v43 = vld [vmem:[%s4754_s30 + $0x464] ss:$20 sps:$4 sm:$0xff]   ;;  %v4540_v44 = vld [vmem:[%s4754_s30 + $0x2dc] ss:$20 sps:$4 sm:$0xff]  }
  0xd6   : > { %2129 = vmatprep.mubr.bf16.mxu0 %v4474_v45  ;;  %2418 = vmatprep.mubr.bf16.mxu1 %v4476_v46 }
  0xdd   : > { %2130 = vmatmul.mubr.bf16.gmra.mxu0 %v4478_v47  ;;  %2419 = vmatmul.mubr.bf16.gmra.mxu1 %v4479_v48 }
  0xde   : > { %2137 = vmatprep.mubr.bf16.mxu0 %v4480_v49  ;;  %2426 = vmatprep.mubr.bf16.mxu1 %v4482_v50 }
  0xe5   : > { %2138 = vmatmul.mubr.bf16.gmra.mxu0 %v4484_v51  ;;  %2427 = vmatmul.mubr.bf16.gmra.mxu1 %v4485_v52 }
  0xe6   : > { %2145 = vmatprep.mubr.bf16.mxu0 %v4486_v53  ;;  %2434 = vmatprep.mubr.bf16.mxu1 %v4488_v54  ;;  %v4535_v53 = vld [vmem:[%s4754_s30 + $0x460] ss:$20 sps:$4 sm:$0xff]   ;;  %v4538_v54 = vld [vmem:[%s4754_s30 + $0x2d8] ss:$20 sps:$4 sm:$0xff]  }
  0xed   : > { %2146 = vmatmul.mubr.bf16.gmra.mxu0 %v4490_v55  ;;  %2435 = vmatmul.mubr.bf16.gmra.mxu1 %v4491_v56  ;;  %v4543_v55 = vld [vmem:[%s4754_s30 + $0x48c] ss:$20 sps:$4 sm:$0xff]   ;;  %v4546_v56 = vld [vmem:[%s4754_s30 + $0x304] ss:$20 sps:$4 sm:$0xff]  }
  0xee   : > { %2153 = vmatprep.mubr.bf16.mxu0 %v4492_v57  ;;  %2442 = vmatprep.mubr.bf16.mxu1 %v4494_v58 }
  0xf5   : > { %2154 = vmatmul.mubr.bf16.gmra.mxu0 %v4496_v59  ;;  %2443 = vmatmul.mubr.bf16.gmra.mxu1 %v4497_v60 }
  0xf6   : > { %2161 = vmatprep.mubr.bf16.mxu0 %v4498_v61  ;;  %2450 = vmatprep.mubr.bf16.mxu1 %v4500_v62 }
  0xfd   : > { %2162 = vmatmul.mubr.bf16.gmra.mxu0 %v4502_v63  ;;  %2451 = vmatmul.mubr.bf16.gmra.mxu1 %v4503_v0 }
  0xfe   : > { %2169 = vmatprep.mubr.bf16.mxu0 %v4504_v2  ;;  %2458 = vmatprep.mubr.bf16.mxu1 %v4506_v3  ;;  %v4541_v2 = vld [vmem:[%s4754_s30 + $0x488] ss:$20 sps:$4 sm:$0xff]   ;;  %v4544_v3 = vld [vmem:[%s4754_s30 + $0x300] ss:$20 sps:$4 sm:$0xff]  }
 0x105   : > { %2170 = vmatmul.mubr.bf16.gmra.mxu0 %v4508_v4  ;;  %2459 = vmatmul.mubr.bf16.gmra.mxu1 %v4509_v5  ;;  %v4549_v4 = vld [vmem:[%s4754_s30 + $0x4b4] ss:$20 sps:$4 sm:$0xff]   ;;  %v4552_v5 = vld [vmem:[%s4754_s30 + $0x32c] ss:$20 sps:$4 sm:$0xff]  }
 0x106   : > { %2177 = vmatprep.mubr.bf16.mxu0 %v4510_v6  ;;  %2466 = vmatprep.mubr.bf16.mxu1 %v4512_v7 }
 0x10d   : > { %v4991_v12 = vpop.f32.mrf.mxu0  ;;  %2178 = vmatmul.mubr.bf16.gmra.mxu0 %v4514_v8  ;;  %v4993_v13 = vpop.f32.mrf.mxu1  ;;  %2467 = vmatmul.mubr.bf16.gmra.mxu1 %v4515_v9 }
 0x10e   : > { %5911 = vst [vmem:[#allocation2_spill] sm:$0xff] %v4993_v13  ;;  %2185 = vmatprep.mubr.bf16.mxu0 %v4517_v10  ;;  %2474 = vmatprep.mubr.bf16.mxu1 %v4519_v11  ;;  %v4647_v13 = vld [vmem:[%s4754_s30 + $0x560] ss:$20 sps:$4 sm:$0xff]  }
 0x10f   : > { %v1989_v1 = vpop.f32.mrf.mxu0  ;;  %v2245_v14 = vpop.f32.mrf.mxu1 }
 0x111   : > { %v4995_v15 = vpop.f32.mrf.mxu0  ;;  %v4997_v16 = vpop.f32.mrf.mxu1 }
 0x112   : > { %5912 = vst [vmem:[#allocation3_spill] sm:$0xff] %v4997_v16  ;;  %v4642_v16 = vld [vmem:[%s4754_s30 + $0x510] ss:$20 sps:$4 sm:$0xff]  }
 0x113   : > { %v1992_v21 = vpop.f32.mrf.mxu0  ;;  %v2248_v22 = vpop.f32.mrf.mxu1 }
 0x115   : > { %v5003_v23 = vpop.f32.mrf.mxu0  ;;  %2186 = vmatmul.mubr.bf16.gmra.mxu0 %v4521_v17  ;;  %v5005_v24 = vpop.f32.mrf.mxu1  ;;  %2475 = vmatmul.mubr.bf16.gmra.mxu1 %v4522_v18  ;;  %v4547_v17 = vld [vmem:[%s4754_s30 + $0x4b0] ss:$20 sps:$4 sm:$0xff]   ;;  %v4550_v18 = vld [vmem:[%s4754_s30 + $0x328] ss:$20 sps:$4 sm:$0xff]  }
 0x116   : > { %5913 = vst [vmem:[#allocation4_spill] sm:$0xff] %v5005_v24  ;;  %2193 = vmatprep.mubr.bf16.mxu0 %v4523_v19  ;;  %2482 = vmatprep.mubr.bf16.mxu1 %v4525_v20  ;;  %v4555_v19 = vld [vmem:[%s4754_s30 + $0x4dc] ss:$20 sps:$4 sm:$0xff]   ;;  %v4558_v20 = vld [vmem:[%s4754_s30 + $0x354] ss:$20 sps:$4 sm:$0xff]  }
 0x117   : > { %v1997_v25 = vpop.f32.mrf.mxu0  ;;  %v2253_v26 = vpop.f32.mrf.mxu1 }
 0x119   : > { %v5007_v27 = vpop.f32.mrf.mxu0  ;;  %v5009_v28 = vpop.f32.mrf.mxu1 }
 0x11a   : > { %5914 = vst [vmem:[#allocation5_spill] sm:$0xff] %v5009_v28 }
 0x11b   : > { %v2000_v33 = vpop.f32.mrf.mxu0  ;;  %v2256_v34 = vpop.f32.mrf.mxu1 }
 0x11c   : > { %v4553_v33 = vld [vmem:[%s4754_s30 + $0x4d8] ss:$20 sps:$4 sm:$0xff]   ;;  %v4556_v34 = vld [vmem:[%s4754_s30 + $0x350] ss:$20 sps:$4 sm:$0xff]  }
 0x11d   : > { %v5015_v35 = vpop.f32.mrf.mxu0  ;;  %2194 = vmatmul.mubr.bf16.gmra.mxu0 %v4527_v29  ;;  %v5017_v36 = vpop.f32.mrf.mxu1  ;;  %2483 = vmatmul.mubr.bf16.gmra.mxu1 %v4528_v30 }
 0x11e   : > { %5915 = vst [vmem:[#allocation6_spill] sm:$0xff] %v5017_v36  ;;  %2201 = vmatprep.mubr.bf16.mxu0 %v4529_v31  ;;  %2490 = vmatprep.mubr.bf16.mxu1 %v4531_v32  ;;  %v4637_v36 = vld [vmem:[%s4754_s30 + $0x4c0] ss:$20 sps:$4 sm:$0xff]  }
 0x11f   : > { %v2005_v37 = vpop.f32.mrf.mxu0  ;;  %v2261_v38 = vpop.f32.mrf.mxu1 }
 0x120   : > { %v4561_v37 = vld [vmem:[%s4754_s30 + $0x37c] ss:$20 sps:$4 sm:$0xff]  }
 0x121   : > { %v5019_v39 = vpop.f32.mrf.mxu0  ;;  %v5021_v40 = vpop.f32.mrf.mxu1  ;;  %v4562_v38 = vld [vmem:[%s4754_s30 + $0x10] ss:$20 sps:$4 sm:$0xff]  }
 0x122   : > { %5916 = vst [vmem:[#allocation7_spill] sm:$0xff] %v5021_v40  ;;  %v4632_v40 = vld [vmem:[%s4754_s30 + $0x470] ss:$20 sps:$4 sm:$0xff]  }
 0x123   : > { %v2008_v45 = vpop.f32.mrf.mxu0  ;;  %v2264_v46 = vpop.f32.mrf.mxu1 }
 0x125   : > { %v5027_v47 = vpop.f32.mrf.mxu0  ;;  %2202 = vmatmul.mubr.bf16.gmra.mxu0 %v4533_v41  ;;  %v5029_v48 = vpop.f32.mrf.mxu1  ;;  %2491 = vmatmul.mubr.bf16.gmra.mxu1 %v4534_v42 }
 0x126   : > { %5917 = vst [vmem:[#allocation8_spill] sm:$0xff] %v5029_v48  ;;  %2209 = vmatprep.mubr.bf16.mxu0 %v4537_v43  ;;  %2498 = vmatprep.mubr.bf16.mxu1 %v4540_v44 }
 0x127   : > { %v2013_v49 = vpop.f32.mrf.mxu0  ;;  %v2269_v50 = vpop.f32.mrf.mxu1 }
 0x129   : > { %v5031_v51 = vpop.f32.mrf.mxu0  ;;  %v5033_v52 = vpop.f32.mrf.mxu1 }
 0x12a   : > { %5918 = vst [vmem:[#allocation9_spill] sm:$0xff] %v5033_v52 }
 0x12b   : > { %v2016_v57 = vpop.f32.mrf.mxu0  ;;  %v2272_v58 = vpop.f32.mrf.mxu1 }
 0x12d   : > { %v5039_v59 = vpop.f32.mrf.mxu0  ;;  %2210 = vmatmul.mubr.bf16.gmra.mxu0 %v4535_v53  ;;  %v5041_v60 = vpop.f32.mrf.mxu1  ;;  %2499 = vmatmul.mubr.bf16.gmra.mxu1 %v4538_v54  ;;  %v4559_v53 = vld [vmem:[%s4754_s30 + $0x378] ss:$20 sps:$4 sm:$0xff]  }
 0x12e   : > { %5919 = vst [vmem:[#allocation10_spill] sm:$0xff] %v5041_v60  ;;  %2217 = vmatprep.mubr.bf16.mxu0 %v4543_v55  ;;  %2506 = vmatprep.mubr.bf16.mxu1 %v4546_v56  ;;  %v4563_v54 = vld [vmem:[%s4754_s30 + $0x38] ss:$20 sps:$4 sm:$0xff]   ;;  %v4567_v56 = vld [vmem:[%s4754_s30 + $0x60] ss:$20 sps:$4 sm:$0xff]  }
 0x12f   : > { %v2021_v61 = vpop.f32.mrf.mxu0  ;;  %v2277_v62 = vpop.f32.mrf.mxu1  ;;  %v4566_v55 = vld [vmem:[%s4754_s30 + $0x3a4] ss:$20 sps:$4 sm:$0xff]   ;;  %v4627_v60 = vld [vmem:[%s4754_s30 + $0x420] ss:$20 sps:$4 sm:$0xff]  }
 0x131   : > { %v5043_v63 = vpop.f32.mrf.mxu0  ;;  %v5045_v0 = vpop.f32.mrf.mxu1 }
 0x132   : > { %5920 = vst [vmem:[#allocation11_spill] sm:$0xff] %v5045_v0  ;;  %v4622_v0 = vld [vmem:[%s4754_s30 + $0x3d0] ss:$20 sps:$4 sm:$0xff]  }
 0x133   : > { %v2024_v6 = vpop.f32.mrf.mxu0  ;;  %v2280_v7 = vpop.f32.mrf.mxu1 }
 0x134   : > { %v4564_v6 = vld [vmem:[%s4754_s30 + $0x3a0] ss:$20 sps:$4 sm:$0xff]   ;;  %v4568_v7 = vld [vmem:[%s4754_s30 + $0x88] ss:$20 sps:$4 sm:$0xff]  }
 0x135   : > { %v5051_v8 = vpop.f32.mrf.mxu0  ;;  %2218 = vmatmul.mubr.bf16.gmra.mxu0 %v4541_v2  ;;  %v5053_v9 = vpop.f32.mrf.mxu1  ;;  %2507 = vmatmul.mubr.bf16.gmra.mxu1 %v4544_v3 }
 0x136   : > { %5921 = vst [vmem:[#allocation12_spill] sm:$0xff] %v5053_v9  ;;  %2225 = vmatprep.mubr.bf16.mxu0 %v4549_v4  ;;  %2514 = vmatprep.mubr.bf16.mxu1 %v4552_v5 }
 0x137   : > { %v2029_v10 = vpop.f32.mrf.mxu0  ;;  %v2285_v11 = vpop.f32.mrf.mxu1 }
 0x138   : > { %v4571_v10 = vld [vmem:[%s4754_s30 + $0x3cc] ss:$20 sps:$4 sm:$0xff]   ;;  %v4572_v11 = vld [vmem:[%s4754_s30 + $0xb0] ss:$20 sps:$4 sm:$0xff]  }
 0x139   : > { %v5055_v1 = vpop.f32.mrf.mxu0  ;;  %v5057_v14 = vpop.f32.mrf.mxu1 }
 0x13a   : > { %5922 = vst [vmem:[#allocation13_spill] sm:$0xff] %v5057_v14 }
 0x13b   : > { %v2032_v21 = vpop.f32.mrf.mxu0  ;;  %v2288_v22 = vpop.f32.mrf.mxu1 }
 0x13d   : > { %v5063_v25 = vpop.f32.mrf.mxu0  ;;  %2226 = vmatmul.mubr.bf16.gmra.mxu0 %v4547_v17  ;;  %v5065_v26 = vpop.f32.mrf.mxu1  ;;  %2515 = vmatmul.mubr.bf16.gmra.mxu1 %v4550_v18 }
 0x13e   : > { %5923 = vst [vmem:[#allocation14_spill] sm:$0xff] %v5065_v26  ;;  %2233 = vmatprep.mubr.bf16.mxu0 %v4555_v19  ;;  %2522 = vmatprep.mubr.bf16.mxu1 %v4558_v20  ;;  %v4617_v26 = vld [vmem:[%s4754_s30 + $0x380] ss:$20 sps:$4 sm:$0xff]  }
 0x13f   : > { %v2037_v29 = vpop.f32.mrf.mxu0  ;;  %v2293_v30 = vpop.f32.mrf.mxu1 }
 0x140   : > { %v5111_v29 = vld [vmem:[%s5909_s2] ss:$0 sm:$0xff] }
 0x141   : > { %v5067_v31 = vpop.f32.mrf.mxu0  ;;  %v5069_v32 = vpop.f32.mrf.mxu1 }
 0x142   : > { %5924 = vst [vmem:[#allocation15_spill] sm:$0xff] %v5069_v32  ;;  %v4612_v32 = vld [vmem:[%s4754_s30 + $0x330] ss:$20 sps:$4 sm:$0xff]  }
 0x143   : > { %v2040_v41 = vpop.f32.mrf.mxu0  ;;  %v2296_v42 = vpop.f32.mrf.mxu1 }
 0x144   : > { %v4577_v41 = vld [vmem:[%s4754_s30 + $0x100] ss:$20 sps:$4 sm:$0xff]  }
 0x145   : > { %v5075_v43 = vpop.f32.mrf.mxu0  ;;  %2234 = vmatmul.mubr.bf16.gmra.mxu0 %v4553_v33  ;;  %v5077_v44 = vpop.f32.mrf.mxu1  ;;  %2523 = vmatmul.mubr.bf16.gmra.mxu1 %v4556_v34  ;;  %v4569_v34 = vld [vmem:[%s4754_s30 + $0x3c8] ss:$20 sps:$4 sm:$0xff]  }
 0x146   : > { %5925 = vst [vmem:[#allocation16_spill] sm:$0xff] %v5077_v44  ;;  %2530 = vmatprep.mubr.bf16.mxu1 %v4561_v37  ;;  %4189 = vmatprep.mubr.msk.bf16.mxu0 %vm1826_vm0, %v4562_v38  ;;  %v4573_v37 = vld [vmem:[%s4754_s30 + $0xd8] ss:$20 sps:$4 sm:$0xff]   ;;  %v4576_v38 = vld [vmem:[%s4754_s30 + $0x3f4] ss:$20 sps:$4 sm:$0xff]  }
 0x147   : > { %v2045_v45 = vpop.f32.mrf.mxu0  ;;  %v2301_v46 = vpop.f32.mrf.mxu1 }
 0x148   : > { %v1988_v46 = vadd.f32 %v5111_v29, %v4991_v12 }
 0x149   : > { %v5080_v49 = vpop.f32.mrf.mxu0  ;;  %v5082_v50 = vpop.f32.mrf.mxu1 }
 0x14a   : > { %5926 = vst [vmem:[#allocation17_spill] sm:$0xff] %v5082_v50 }
 0x14b   : > { %v2048_v57 = vpop.f32.mrf.mxu0  ;;  %v2304_v58 = vpop.f32.mrf.mxu1 }
 0x14c   : > { %v1991_v58 = vadd.f32 %v5111_v29, %v4995_v15 }
 0x14d   : > { %v5088_v61 = vpop.f32.mrf.mxu0  ;;  %v5090_v62 = vpop.f32.mrf.mxu1  ;;  %2531 = vmatmul.mubr.bf16.gmra.mxu1 %v4559_v53  ;;  %4190 = vmatmul.mubr.msk.bf16.vlgmr.msra.gmra.mxu0 %vm1826_vm0, %v4563_v54 }
 0x14e   : > { %5927 = vst [vmem:[#allocation18_spill] sm:$0xff] %v5090_v62  ;;  %2538 = vmatprep.mubr.bf16.mxu1 %v4566_v55  ;;  %4193 = vmatprep.mubr.msk.bf16.mxu0 %vm1826_vm0, %v4567_v56  ;;  %v4607_v62 = vld [vmem:[%s4754_s30 + $0x2e0] ss:$20 sps:$4 sm:$0xff]  }
 0x14f   : > { %v2053_v2 = vpop.f32.mrf.mxu0  ;;  %v2309_v3 = vpop.f32.mrf.mxu1 }
 0x150   : > { %v4574_v3 = vld [vmem:[%s4754_s30 + $0x3f0] ss:$20 sps:$4 sm:$0xff]  }
 0x151   : > { %v5094_v4 = vpop.f32.mrf.mxu0  ;;  %v5096_v5 = vpop.f32.mrf.mxu1 }
 0x152   : > { %5928 = vst [vmem:[#allocation19_spill] sm:$0xff] %v5096_v5  ;;  %v4602_v5 = vld [vmem:[%s4754_s30 + $0x290] ss:$20 sps:$4 sm:$0xff]  }
 0x153   : > { %v2056_v17 = vpop.f32.mrf.mxu0  ;;  %v2312_v18 = vpop.f32.mrf.mxu1 }
 0x155   : > { %v5102_v19 = vpop.f32.mrf.mxu0  ;;  %v5104_v20 = vpop.f32.mrf.mxu1  ;;  %2539 = vmatmul.mubr.bf16.gmra.mxu1 %v4564_v6  ;;  %4194 = vmatmul.mubr.msk.bf16.gmra.mxu0 %vm1826_vm0, %v4568_v7  ;;  %v4578_v6 = vld [vmem:[%s4754_s30 + $0x128] ss:$20 sps:$4 sm:$0xff]  }
 0x156   : > { %5929 = vst [vmem:[#allocation20_spill] sm:$0xff] %v5104_v20  ;;  %2546 = vmatprep.mubr.bf16.mxu1 %v4571_v10  ;;  %4197 = vmatprep.mubr.msk.bf16.mxu0 %vm1826_vm0, %v4572_v11  ;;  %v4581_v10 = vld [vmem:[%s4754_s30 + $0x41c] ss:$20 sps:$4 sm:$0xff]  }
 0x157   : > { %v2061_v21 = vpop.f32.mrf.mxu0  ;;  %v2317_v22 = vpop.f32.mrf.mxu1  ;;  %v4582_v11 = vld [vmem:[%s4754_s30 + $0x150] ss:$20 sps:$4 sm:$0xff]  }
 0x158   : > { %v1996_v21 = vadd.f32 %v5111_v29, %v5003_v23 }
 0x159   : > { %v5113_v30 = vpop.f32.mrf.mxu0  ;;  %v5115_v33 = vpop.f32.mrf.mxu1 }
 0x15a   : > { %5930 = vst [vmem:[#allocation21_spill] sm:$0xff] %v5115_v33 }
 0x15b   : > { %v2064_v42 = vpop.f32.mrf.mxu0  ;;  %v2320_v45 = vpop.f32.mrf.mxu1 }
 0x15c   : > { %v4579_v45 = vld [vmem:[%s4754_s30 + $0x418] ss:$20 sps:$4 sm:$0xff]  }
 0x15d   : > { %v5123_v53 = vpop.f32.mrf.mxu0  ;;  %v2356_v54 = vpop.f32.mrf.mxu1  ;;  %2547 = vmatmul.mubr.bf16.gmra.mxu1 %v4569_v34  ;;  %4198 = vmatmul.mubr.msk.bf16.gmra.mxu0 %vm1826_vm0, %v4573_v37 }
 0x15e   : > { %v5126_v55 = vadd.f32 %v2356_v54, %v1988_v46  ;;  %2554 = vmatprep.mubr.bf16.mxu1 %v4576_v38  ;;  %4201 = vmatprep.mubr.msk.bf16.mxu0 %vm1826_vm0, %v4577_v41  ;;  %v1999_v41 = vadd.f32 %v5111_v29, %v5007_v27  ;;  %v4583_v46 = vld [vmem:[%s4754_s30 + $0x178] ss:$20 sps:$4 sm:$0xff]  }
 0x15f   : > { %v2069_v56 = vpop.f32.mrf.mxu0  ;;  %v2358_v57 = vpop.f32.mrf.mxu1 }
 0x160   : > { %v4586_v56 = vld [vmem:[%s4754_s30 + $0x444] ss:$20 sps:$4 sm:$0xff]   ;;  %v4587_v57 = vld [vmem:[%s4754_s30 + $0x1a0] ss:$20 sps:$4 sm:$0xff]  }
 0x161   : > { %v5131_v2 = vpop.f32.mrf.mxu0  ;;  %v2359_v12 = vpop.f32.mrf.mxu1 }
 0x162   : > { %v5135_v7 = vadd.f32 %v2359_v12, %v1991_v58 }
 0x163   : > { %v2072_v17 = vpop.f32.mrf.mxu0  ;;  %v2361_v18 = vpop.f32.mrf.mxu1 }
 0x164   : > { %v2007_v18 = vadd.f32 %v5111_v29, %v5019_v39 }
 0x165   : > { %v5141_v22 = vpop.f32.mrf.mxu0  ;;  %v2364_v15 = vpop.f32.mrf.mxu1  ;;  %2555 = vmatmul.mubr.bf16.gmra.mxu1 %v4574_v3  ;;  %4202 = vmatmul.mubr.msk.bf16.gmra.mxu0 %vm1826_vm0, %v4578_v6  ;;  %v2004_v3 = vadd.f32 %v5111_v29, %v5015_v35 }
 0x166   : > { %v5144_v34 = vadd.f32 %v2364_v15, %v1996_v21  ;;  %2562 = vmatprep.mubr.bf16.mxu1 %v4581_v10  ;;  %4205 = vmatprep.mubr.msk.bf16.mxu0 %vm1826_vm0, %v4582_v11  ;;  %v4584_v15 = vld [vmem:[%s4754_s30 + $0x440] ss:$20 sps:$4 sm:$0xff]  }
 0x167   : > { %v2077_v37 = vpop.f32.mrf.mxu0  ;;  %v2366_v38 = vpop.f32.mrf.mxu1 }
 0x168   : > { %v4588_v37 = vld [vmem:[%s4754_s30 + $0x1c8] ss:$20 sps:$4 sm:$0xff]  }
 0x169   : > { %v5149_v42 = vpop.f32.mrf.mxu0  ;;  %v2367_v23 = vpop.f32.mrf.mxu1 }
 0x16a   : > { %v5153_v54 = vadd.f32 %v2367_v23, %v1999_v41  ;;  %v4591_v41 = vld [vmem:[%s4754_s30 + $0x46c] ss:$20 sps:$4 sm:$0xff]   ;;  %v4592_v23 = vld [vmem:[%s4754_s30 + $0x1f0] ss:$20 sps:$4 sm:$0xff]  }
 0x16b   : > { %v2080_v58 = vpop.f32.mrf.mxu0  ;;  %v2369_v12 = vpop.f32.mrf.mxu1 }
 0x16d   : > { %v5159_v6 = vpop.f32.mrf.mxu0  ;;  %v2372_v27 = vpop.f32.mrf.mxu1  ;;  %2563 = vmatmul.mubr.bf16.gmra.mxu1 %v4579_v45  ;;  %4206 = vmatmul.mubr.msk.bf16.gmra.mxu0 %vm1826_vm0, %v4583_v46 }
 0x16e   : > { %v5162_v10 = vadd.f32 %v2372_v27, %v2004_v3  ;;  %2570 = vmatprep.mubr.bf16.mxu1 %v4586_v56  ;;  %4209 = vmatprep.mubr.msk.bf16.mxu0 %vm1826_vm0, %v4587_v57  ;;  %v2012_v56 = vadd.f32 %v5111_v29, %v5027_v47  ;;  %v2015_v27 = vadd.f32 %v5111_v29, %v5031_v51 }
 0x16f   : > { %v2085_v11 = vpop.f32.mrf.mxu0  ;;  %v2374_v17 = vpop.f32.mrf.mxu1 }
 0x170   : > { %v4589_v17 = vld [vmem:[%s4754_s30 + $0x468] ss:$20 sps:$4 sm:$0xff]  }
 0x171   : > { %v5167_v21 = vpop.f32.mrf.mxu0  ;;  %v2375_v35 = vpop.f32.mrf.mxu1 }
 0x172   : > { %v5171_v38 = vadd.f32 %v2375_v35, %v2007_v18  ;;  %v4593_v18 = vld [vmem:[%s4754_s30 + $0x218] ss:$20 sps:$4 sm:$0xff]  }
 0x173   : > { %v2088_v45 = vpop.f32.mrf.mxu0  ;;  %v2377_v46 = vpop.f32.mrf.mxu1 }
 0x174   : > { %v4597_v45 = vld [vmem:[%s4754_s30 + $0x240] ss:$20 sps:$4 sm:$0xff]  }
 0x175   : > { %v5177_v57 = vpop.f32.mrf.mxu0  ;;  %v2380_v39 = vpop.f32.mrf.mxu1  ;;  %2571 = vmatmul.mubr.bf16.gmra.mxu1 %v4584_v15  ;;  %4210 = vmatmul.mubr.msk.bf16.gmra.mxu0 %vm1826_vm0, %v4588_v37  ;;  %v4596_v15 = vld [vmem:[%s4754_s30 + $0x494] ss:$20 sps:$4 sm:$0xff]  }
 0x176   : > { %v5180_v58 = vadd.f32 %v2380_v39, %v2012_v56  ;;  %2578 = vmatprep.mubr.bf16.mxu1 %v4591_v41  ;;  %4213 = vmatprep.mubr.msk.bf16.mxu0 %vm1826_vm0, %v4592_v23  ;;  %v2020_v23 = vadd.f32 %v5111_v29, %v5039_v59 }
 0x177   : > { %v2093_v12 = vpop.f32.mrf.mxu0  ;;  %v2382_v3 = vpop.f32.mrf.mxu1 }
 0x178   : > { %v2023_v3 = vadd.f32 %v5111_v29, %v5043_v63 }
 0x179   : > { %v5185_v11 = vpop.f32.mrf.mxu0  ;;  %v2383_v47 = vpop.f32.mrf.mxu1 }
 0x17a   : > { %v5189_v35 = vadd.f32 %v2383_v47, %v2015_v27  ;;  %v4594_v47 = vld [vmem:[%s4754_s30 + $0x490] ss:$20 sps:$4 sm:$0xff]  }
 0x17b   : > { %v2096_v37 = vpop.f32.mrf.mxu0  ;;  %v2385_v41 = vpop.f32.mrf.mxu1 }
 0x17c   : > { %v4598_v37 = vld [vmem:[%s4754_s30 + $0x268] ss:$20 sps:$4 sm:$0xff]  }
 0x17d   : > { %v5195_v46 = vpop.f32.mrf.mxu0  ;;  %v2388_v51 = vpop.f32.mrf.mxu1  ;;  %2579 = vmatmul.mubr.bf16.gmra.mxu1 %v4589_v17  ;;  %4214 = vmatmul.mubr.msk.bf16.gmra.mxu0 %vm1826_vm0, %v4593_v18  ;;  %v4601_v17 = vld [vmem:[%s4754_s30 + $0x4bc] ss:$20 sps:$4 sm:$0xff]  }
 0x17e   : > { %v5198_v56 = vadd.f32 %v2388_v51, %v2020_v23  ;;  %2586 = vmatprep.mubr.bf16.mxu1 %v4596_v15  ;;  %4217 = vmatprep.mubr.msk.bf16.mxu0 %vm1826_vm0, %v4597_v45  ;;  %v2028_v45 = vadd.f32 %v5111_v29, %v5051_v8 }
 0x17f   : > { %v2101_v39 = vpop.f32.mrf.mxu0  ;;  %v2390_v12 = vpop.f32.mrf.mxu1 }
 0x181   : > { %v5203_v27 = vpop.f32.mrf.mxu0  ;;  %v2391_v59 = vpop.f32.mrf.mxu1 }
 0x182   : > { %v5207_v41 = vadd.f32 %v2391_v59, %v2023_v3  ;;  %v2031_v3 = vadd.f32 %v5111_v29, %v5055_v1 }
 0x183   : > { %v2104_v18 = vpop.f32.mrf.mxu0  ;;  %v2393_v15 = vpop.f32.mrf.mxu1 }
 0x184   : > { %v4599_v18 = vld [vmem:[%s4754_s30 + $0x4b8] ss:$20 sps:$4 sm:$0xff]  }
 0x185   : > { %v5213_v23 = vpop.f32.mrf.mxu0  ;;  %v2396_v63 = vpop.f32.mrf.mxu1  ;;  %2587 = vmatmul.mubr.bf16.gmra.mxu1 %v4594_v47  ;;  %4218 = vmatmul.mubr.msk.bf16.gmra.mxu0 %vm1826_vm0, %v4598_v37  ;;  %v4603_v15 = vld [vmem:[%s4754_s30 + $0x2b8] ss:$20 sps:$4 sm:$0xff]  }
 0x186   : > { %v5216_v51 = vadd.f32 %v2396_v63, %v2028_v45  ;;  %2594 = vmatprep.mubr.bf16.mxu1 %v4601_v17  ;;  %4221 = vmatprep.mubr.msk.bf16.mxu0 %vm1826_vm0, %v4602_v5  ;;  %v4606_v47 = vld [vmem:[%s4754_s30 + $0x4e4] ss:$20 sps:$4 sm:$0xff]   ;;  %v2036_v5 = vadd.f32 %v5111_v29, %v5063_v25 }
 0x187   : > { %v2109_v39 = vpop.f32.mrf.mxu0  ;;  %v2398_v12 = vpop.f32.mrf.mxu1 }
 0x189   : > { %v5221_v59 = vpop.f32.mrf.mxu0  ;;  %v2399_v8 = vpop.f32.mrf.mxu1 }
 0x18a   : > { %v5225_v33 = vadd.f32 %v2399_v8, %v2031_v3  ;;  %v2039_v3 = vadd.f32 %v5111_v29, %v5067_v31 }
 0x18b   : > { %v2112_v37 = vpop.f32.mrf.mxu0  ;;  %v2401_v17 = vpop.f32.mrf.mxu1 }
 0x18c   : > { %v4604_v37 = vld [vmem:[%s4754_s30 + $0x4e0] ss:$20 sps:$4 sm:$0xff]   ;;  %v4608_v17 = vld [vmem:[%s4754_s30 + $0x308] ss:$20 sps:$4 sm:$0xff]  }
 0x18d   : > { %v5231_v45 = vpop.f32.mrf.mxu0  ;;  %v2404_v1 = vpop.f32.mrf.mxu1  ;;  %2595 = vmatmul.mubr.bf16.gmra.mxu1 %v4599_v18  ;;  %4222 = vmatmul.mubr.msk.bf16.gmra.mxu0 %vm1826_vm0, %v4603_v15  ;;  %v4611_v18 = vld [vmem:[%s4754_s30 + $0x50c] ss:$20 sps:$4 sm:$0xff]  }
 0x18e   : > { %v5234_v63 = vadd.f32 %v2404_v1, %v2036_v5  ;;  %2602 = vmatprep.mubr.bf16.mxu1 %v4606_v47  ;;  %4225 = vmatprep.mubr.msk.bf16.mxu0 %vm1826_vm0, %v4607_v62  ;;  %v2044_v62 = vadd.f32 %v5111_v29, %v5075_v43 }
 0x18f   : > { %v2117_v39 = vpop.f32.mrf.mxu0  ;;  %v2406_v12 = vpop.f32.mrf.mxu1 }
 0x191   : > { %v5239_v8 = vpop.f32.mrf.mxu0  ;;  %v2407_v25 = vpop.f32.mrf.mxu1 }
 0x192   : > { %v5243_v20 = vadd.f32 %v2407_v25, %v2039_v3  ;;  %v2047_v3 = vadd.f32 %v5111_v29, %v5080_v49 }
 0x193   : > { %v2120_v15 = vpop.f32.mrf.mxu0  ;;  %v2409_v47 = vpop.f32.mrf.mxu1 }
 0x194   : > { %v4609_v15 = vld [vmem:[%s4754_s30 + $0x508] ss:$20 sps:$4 sm:$0xff]   ;;  %v4613_v47 = vld [vmem:[%s4754_s30 + $0x358] ss:$20 sps:$4 sm:$0xff]  }
 0x195   : > { %v5249_v5 = vpop.f32.mrf.mxu0  ;;  %v2412_v31 = vpop.f32.mrf.mxu1  ;;  %2603 = vmatmul.mubr.bf16.gmra.mxu1 %v4604_v37  ;;  %4226 = vmatmul.mubr.msk.bf16.gmra.mxu0 %vm1826_vm0, %v4608_v17  ;;  %v4616_v37 = vld [vmem:[%s4754_s30 + $0x534] ss:$20 sps:$4 sm:$0xff]  }
 0x196   : > { %v5252_v1 = vadd.f32 %v2412_v31, %v2044_v62  ;;  %2610 = vmatprep.mubr.bf16.mxu1 %v4611_v18  ;;  %4229 = vmatprep.mubr.msk.bf16.mxu0 %vm1826_vm0, %v4612_v32  ;;  %v2052_v32 = vadd.f32 %v5111_v29, %v5088_v61 }
 0x197   : > { %v2125_v39 = vpop.f32.mrf.mxu0  ;;  %v2414_v12 = vpop.f32.mrf.mxu1 }
 0x199   : > { %v5257_v25 = vpop.f32.mrf.mxu0  ;;  %v2415_v43 = vpop.f32.mrf.mxu1 }
 0x19a   : > { %v5261_v50 = vadd.f32 %v2415_v43, %v2047_v3  ;;  %v2055_v3 = vadd.f32 %v5111_v29, %v5094_v4 }
 0x19b   : > { %v2128_v17 = vpop.f32.mrf.mxu0  ;;  %v2417_v18 = vpop.f32.mrf.mxu1 }
 0x19c   : > { %v4614_v17 = vld [vmem:[%s4754_s30 + $0x530] ss:$20 sps:$4 sm:$0xff]   ;;  %v4618_v18 = vld [vmem:[%s4754_s30 + $0x3a8] ss:$20 sps:$4 sm:$0xff]  }
 0x19d   : > { %v5267_v62 = vpop.f32.mrf.mxu0  ;;  %v2420_v49 = vpop.f32.mrf.mxu1  ;;  %2611 = vmatmul.mubr.bf16.gmra.mxu1 %v4609_v15  ;;  %4230 = vmatmul.mubr.msk.bf16.gmra.mxu0 %vm1826_vm0, %v4613_v47  ;;  %v4621_v15 = vld [vmem:[%s4754_s30 + $0x55c] ss:$20 sps:$4 sm:$0xff]  }
 0x19e   : > { %v5270_v31 = vadd.f32 %v2420_v49, %v2052_v32  ;;  %2618 = vmatprep.mubr.bf16.mxu1 %v4616_v37  ;;  %4233 = vmatprep.mubr.msk.bf16.mxu0 %vm1826_vm0, %v4617_v26  ;;  %v2060_v26 = vadd.f32 %v5111_v29, %v5102_v19 }
 0x19f   : > { %v2133_v39 = vpop.f32.mrf.mxu0  ;;  %v2422_v12 = vpop.f32.mrf.mxu1 }
 0x1a1   : > { %v5275_v43 = vpop.f32.mrf.mxu0  ;;  %v2423_v61 = vpop.f32.mrf.mxu1 }
 0x1a2   : > { %v5279_v44 = vadd.f32 %v2423_v61, %v2055_v3  ;;  %v2063_v3 = vadd.f32 %v5111_v29, %v5113_v30 }
 0x1a3   : > { %v2136_v47 = vpop.f32.mrf.mxu0  ;;  %v2425_v37 = vpop.f32.mrf.mxu1 }
 0x1a4   : > { %v4619_v47 = vld [vmem:[%s4754_s30 + $0x558] ss:$20 sps:$4 sm:$0xff]  }
 0x1a5   : > { %v5285_v32 = vpop.f32.mrf.mxu0  ;;  %v2428_v4 = vpop.f32.mrf.mxu1  ;;  %2619 = vmatmul.mubr.bf16.gmra.mxu1 %v4614_v17  ;;  %4234 = vmatmul.mubr.msk.bf16.gmra.mxu0 %vm1826_vm0, %v4618_v18  ;;  %v4623_v37 = vld [vmem:[%s4754_s30 + $0x3f8] ss:$20 sps:$4 sm:$0xff]  }
 0x1a6   : > { %v5288_v49 = vadd.f32 %v2428_v4, %v2060_v26  ;;  %2626 = vmatprep.mubr.bf16.mxu1 %v4621_v15  ;;  %4237 = vmatprep.mubr.msk.bf16.mxu0 %vm1826_vm0, %v4622_v0  ;;  %v4626_v17 = vld [vmem:[%s4754_s30 + $0x584] ss:$20 sps:$4 sm:$0xff]   ;;  %v2068_v0 = vadd.f32 %v5111_v29, %v5123_v53 }
 0x1a7   : > { %v2141_v39 = vpop.f32.mrf.mxu0  ;;  %v2430_v12 = vpop.f32.mrf.mxu1 }
 0x1a9   : > { %v5293_v61 = vpop.f32.mrf.mxu0  ;;  %v2431_v19 = vpop.f32.mrf.mxu1 }
 0x1aa   : > { %v5297_v14 = vadd.f32 %v2431_v19, %v2063_v3  ;;  %v2071_v3 = vadd.f32 %v5111_v29, %v5131_v2 }
 0x1ab   : > { %v2144_v18 = vpop.f32.mrf.mxu0  ;;  %v2433_v15 = vpop.f32.mrf.mxu1 }
 0x1ac   : > { %v4624_v18 = vld [vmem:[%s4754_s30 + $0x580] ss:$20 sps:$4 sm:$0xff]   ;;  %v4628_v15 = vld [vmem:[%s4754_s30 + $0x448] ss:$20 sps:$4 sm:$0xff]  }
 0x1ad   : > { %v5303_v26 = vpop.f32.mrf.mxu0  ;;  %v2436_v30 = vpop.f32.mrf.mxu1  ;;  %2627 = vmatmul.mubr.bf16.gmra.mxu1 %v4619_v47  ;;  %4238 = vmatmul.mubr.msk.bf16.gmra.mxu0 %vm1826_vm0, %v4623_v37  ;;  %v4631_v47 = vld [vmem:[%s4754_s30 + $0x5ac] ss:$20 sps:$4 sm:$0xff]  }
 0x1ae   : > { %v5306_v4 = vadd.f32 %v2436_v30, %v2068_v0  ;;  %2634 = vmatprep.mubr.bf16.mxu1 %v4626_v17  ;;  %4241 = vmatprep.mubr.msk.bf16.mxu0 %vm1826_vm0, %v4627_v60  ;;  %v2076_v60 = vadd.f32 %v5111_v29, %v5141_v22 }
 0x1af   : > { %v2149_v39 = vpop.f32.mrf.mxu0  ;;  %v2438_v12 = vpop.f32.mrf.mxu1 }
 0x1b1   : > { %v5311_v19 = vpop.f32.mrf.mxu0  ;;  %v2439_v53 = vpop.f32.mrf.mxu1 }
 0x1b2   : > { %v5315_v9 = vadd.f32 %v2439_v53, %v2071_v3  ;;  %v2079_v3 = vadd.f32 %v5111_v29, %v5149_v42 }
 0x1b3   : > { %v2152_v37 = vpop.f32.mrf.mxu0  ;;  %v2441_v17 = vpop.f32.mrf.mxu1 }
 0x1b4   : > { %v4629_v37 = vld [vmem:[%s4754_s30 + $0x5a8] ss:$20 sps:$4 sm:$0xff]   ;;  %v4633_v17 = vld [vmem:[%s4754_s30 + $0x498] ss:$20 sps:$4 sm:$0xff]  }
 0x1b5   : > { %v5321_v0 = vpop.f32.mrf.mxu0  ;;  %v2444_v2 = vpop.f32.mrf.mxu1  ;;  %2635 = vmatmul.mubr.bf16.gmra.mxu1 %v4624_v18  ;;  %4242 = vmatmul.mubr.msk.bf16.gmra.mxu0 %vm1826_vm0, %v4628_v15  ;;  %v4636_v18 = vld [vmem:[%s4754_s30 + $0x5d4] ss:$20 sps:$4 sm:$0xff]  }
 0x1b6   : > { %v5324_v30 = vadd.f32 %v2444_v2, %v2076_v60  ;;  %2642 = vmatprep.mubr.bf16.mxu1 %v4631_v47  ;;  %4245 = vmatprep.mubr.msk.bf16.mxu0 %vm1826_vm0, %v4632_v40  ;;  %v2084_v40 = vadd.f32 %v5111_v29, %v5159_v6 }
 0x1b7   : > { %v2157_v39 = vpop.f32.mrf.mxu0  ;;  %v2446_v12 = vpop.f32.mrf.mxu1 }
 0x1b9   : > { %v5329_v53 = vpop.f32.mrf.mxu0  ;;  %v2447_v22 = vpop.f32.mrf.mxu1 }
 0x1ba   : > { %v5333_v52 = vadd.f32 %v2447_v22, %v2079_v3  ;;  %v2087_v3 = vadd.f32 %v5111_v29, %v5167_v21 }
 0x1bb   : > { %v2160_v15 = vpop.f32.mrf.mxu0  ;;  %v2449_v47 = vpop.f32.mrf.mxu1 }
 0x1bc   : > { %v4634_v15 = vld [vmem:[%s4754_s30 + $0x5d0] ss:$20 sps:$4 sm:$0xff]   ;;  %v4638_v47 = vld [vmem:[%s4754_s30 + $0x4e8] ss:$20 sps:$4 sm:$0xff]  }
 0x1bd   : > { %v5339_v60 = vpop.f32.mrf.mxu0  ;;  %v2452_v42 = vpop.f32.mrf.mxu1  ;;  %2643 = vmatmul.mubr.bf16.gmra.mxu1 %v4629_v37  ;;  %4246 = vmatmul.mubr.msk.bf16.gmra.mxu0 %vm1826_vm0, %v4633_v17  ;;  %v4641_v37 = vld [vmem:[%s4754_s30 + $0x5fc] ss:$20 sps:$4 sm:$0xff]  }
 0x1be   : > { %v5342_v2 = vadd.f32 %v2452_v42, %v2084_v40  ;;  %2650 = vmatprep.mubr.bf16.mxu1 %v4636_v18  ;;  %4249 = vmatprep.mubr.msk.bf16.mxu0 %vm1826_vm0, %v4637_v36  ;;  %v2092_v36 = vadd.f32 %v5111_v29, %v5177_v57 }
 0x1bf   : > { %v2165_v39 = vpop.f32.mrf.mxu0  ;;  %v2454_v12 = vpop.f32.mrf.mxu1 }
 0x1c1   : > { %v5347_v22 = vpop.f32.mrf.mxu0  ;;  %v2455_v6 = vpop.f32.mrf.mxu1 }
 0x1c2   : > { %v5351_v48 = vadd.f32 %v2455_v6, %v2087_v3  ;;  %v2095_v3 = vadd.f32 %v5111_v29, %v5185_v11 }
 0x1c3   : > { %v2168_v17 = vpop.f32.mrf.mxu0  ;;  %v2457_v18 = vpop.f32.mrf.mxu1 }
 0x1c4   : > { %5931 = vst [vmem:[#allocation22_spill] sm:$0xff] %v5351_v48  ;;  %v4639_v17 = vld [vmem:[%s4754_s30 + $0x5f8] ss:$20 sps:$4 sm:$0xff]   ;;  %v4652_v48 = vld [vmem:[%s4754_s30 + $0x5b0] ss:$20 sps:$4 sm:$0xff]  }
 0x1c5   : > { %v5357_v40 = vpop.f32.mrf.mxu0  ;;  %v2460_v21 = vpop.f32.mrf.mxu1  ;;  %2651 = vmatmul.mubr.bf16.gmra.mxu1 %v4634_v15  ;;  %4250 = vmatmul.mubr.msk.bf16.gmra.mxu0 %vm1826_vm0, %v4638_v47  ;;  %v4643_v18 = vld [vmem:[%s4754_s30 + $0x538] ss:$20 sps:$4 sm:$0xff]  }
 0x1c6   : > { %v5360_v42 = vadd.f32 %v2460_v21, %v2092_v36  ;;  %2658 = vmatprep.mubr.bf16.mxu1 %v4641_v37  ;;  %4253 = vmatprep.mubr.msk.bf16.mxu0 %vm1826_vm0, %v4642_v16  ;;  %v4646_v15 = vld [vmem:[%s4754_s30 + $0x624] ss:$20 sps:$4 sm:$0xff]   ;;  %v2100_v16 = vadd.f32 %v5111_v29, %v5195_v46 }
 0x1c7   : > { %v2173_v39 = vpop.f32.mrf.mxu0  ;;  %v2462_v12 = vpop.f32.mrf.mxu1 }
 0x1c9   : > { %v5365_v6 = vpop.f32.mrf.mxu0  ;;  %v2463_v57 = vpop.f32.mrf.mxu1 }
 0x1ca   : > { %v5369_v28 = vadd.f32 %v2463_v57, %v2095_v3  ;;  %v2103_v3 = vadd.f32 %v5111_v29, %v5203_v27 }
 0x1cb   : > { %v2176_v47 = vpop.f32.mrf.mxu0  ;;  %v2465_v37 = vpop.f32.mrf.mxu1 }
 0x1cc   : > { %v4644_v47 = vld [vmem:[%s4754_s30 + $0x620] ss:$20 sps:$4 sm:$0xff]   ;;  %v4648_v37 = vld [vmem:[%s4754_s30 + $0x588] ss:$20 sps:$4 sm:$0xff]  }
 0x1cd   : > { %v5375_v36 = vpop.f32.mrf.mxu0  ;;  %v2468_v11 = vpop.f32.mrf.mxu1  ;;  %2659 = vmatmul.mubr.bf16.gmra.mxu1 %v4639_v17  ;;  %4254 = vmatmul.mubr.msk.bf16.gmra.mxu0 %vm1826_vm0, %v4643_v18  ;;  %v4651_v17 = vld [vmem:[%s4754_s30 + $0x64c] ss:$20 sps:$4 sm:$0xff]  }
 0x1ce   : > { %v5378_v21 = vadd.f32 %v2468_v11, %v2100_v16  ;;  %2666 = vmatprep.mubr.bf16.mxu1 %v4646_v15  ;;  %4257 = vmatprep.mubr.msk.bf16.mxu0 %vm1826_vm0, %v4647_v13  ;;  %v2108_v13 = vadd.f32 %v5111_v29, %v5213_v23 }
 0x1cf   : > { %v2181_v39 = vpop.f32.mrf.mxu0  ;;  %v2470_v12 = vpop.f32.mrf.mxu1 }
 0x1d0   : > { %5932 = vst [vmem:[#allocation23_spill] sm:$0xff] %v5378_v21  ;;  %v4657_v21 = vld [vmem:[%s4754_s30 + $0x600] ss:$20 sps:$4 sm:$0xff]  }
 0x1d1   : > { %v5383_v57 = vpop.f32.mrf.mxu0  ;;  %v2471_v46 = vpop.f32.mrf.mxu1 }
 0x1d2   : > { %v5387_v24 = vadd.f32 %v2471_v46, %v2103_v3  ;;  %v2111_v3 = vadd.f32 %v5111_v29, %v5221_v59 }
 0x1d3   : > { %v2184_v18 = vpop.f32.mrf.mxu0  ;;  %v2473_v15 = vpop.f32.mrf.mxu1 }
 0x1d4   : > { %5933 = vst [vmem:[#allocation24_spill] sm:$0xff] %v5387_v24  ;;  %v4649_v18 = vld [vmem:[%s4754_s30 + $0x648] ss:$20 sps:$4 sm:$0xff]   ;;  %v4653_v15 = vld [vmem:[%s4754_s30 + $0x5d8] ss:$20 sps:$4 sm:$0xff]  }
 0x1d5   : > { %v5393_v16 = vpop.f32.mrf.mxu0  ;;  %v2476_v27 = vpop.f32.mrf.mxu1  ;;  %2667 = vmatmul.mubr.bf16.gmra.mxu1 %v4644_v47  ;;  %4258 = vmatmul.mubr.msk.bf16.gmra.mxu0 %vm1826_vm0, %v4648_v37  ;;  %v4656_v47 = vld [vmem:[%s4754_s30 + $0x674] ss:$20 sps:$4 sm:$0xff]  }
 0x1d6   : > { %v5396_v11 = vadd.f32 %v2476_v27, %v2108_v13  ;;  %2674 = vmatprep.mubr.bf16.mxu1 %v4651_v17  ;;  %4261 = vmatprep.mubr.msk.bf16.mxu0 %vm1826_vm0, %v4652_v48  ;;  %v2116_v48 = vadd.f32 %v5111_v29, %v5231_v45 }
 0x1d7   : > { %v2189_v39 = vpop.f32.mrf.mxu0  ;;  %v2478_v12 = vpop.f32.mrf.mxu1 }
 0x1d9   : > { %v5401_v46 = vpop.f32.mrf.mxu0  ;;  %v2479_v23 = vpop.f32.mrf.mxu1 }
 0x1da   : > { %v5405_v24 = vadd.f32 %v2479_v23, %v2111_v3  ;;  %v2119_v3 = vadd.f32 %v5111_v29, %v5239_v8 }
 0x1db   : > { %v2192_v37 = vpop.f32.mrf.mxu0  ;;  %v2481_v17 = vpop.f32.mrf.mxu1 }
 0x1dc   : > { %5934 = vst [vmem:[#allocation25_spill] sm:$0xff] %v5405_v24  ;;  %v4654_v37 = vld [vmem:[%s4754_s30 + $0x670] ss:$20 sps:$4 sm:$0xff]   ;;  %v4658_v17 = vld [vmem:[%s4754_s30 + $0x628] ss:$20 sps:$4 sm:$0xff]  }
 0x1dd   : > { %v5411_v13 = vpop.f32.mrf.mxu0  ;;  %v2484_v59 = vpop.f32.mrf.mxu1  ;;  %2675 = vmatmul.mubr.bf16.gmra.mxu1 %v4649_v18  ;;  %4262 = vmatmul.mubr.msk.bf16.gmra.mxu0 %vm1826_vm0, %v4653_v15  ;;  %v4659_v18 = vld [vmem:[%s4754_s30 + $0x650] ss:$20 sps:$4 sm:$0xff]  }
 0x1de   : > { %v5414_v27 = vadd.f32 %v2484_v59, %v2116_v48  ;;  %2682 = vmatprep.mubr.bf16.mxu1 %v4656_v47  ;;  %4265 = vmatprep.mubr.msk.bf16.mxu0 %vm1826_vm0, %v4657_v21  ;;  %v2124_v47 = vadd.f32 %v5111_v29, %v5249_v5 }
 0x1df   : > { %v2197_v39 = vpop.f32.mrf.mxu0  ;;  %v2486_v12 = vpop.f32.mrf.mxu1 }
 0x1e1   : > { %v5419_v23 = vpop.f32.mrf.mxu0  ;;  %v2487_v45 = vpop.f32.mrf.mxu1 }
 0x1e2   : > { %v5423_v24 = vadd.f32 %v2487_v45, %v2119_v3  ;;  %v2127_v3 = vadd.f32 %v5111_v29, %v5257_v25 }
 0x1e3   : > { %v2200_v15 = vpop.f32.mrf.mxu0  ;;  %v2489_v48 = vpop.f32.mrf.mxu1 }
 0x1e4   : > { %5935 = vst [vmem:[#allocation26_spill] sm:$0xff] %v5423_v24  ;;  %v4660_v48 = vld [vmem:[%s4754_s30 + $0x678] ss:$20 sps:$4 sm:$0xff]   ;;  %s3675_s30 = sshll.u32 %s5984_s18, 2 }
 0x1e5   : > { %v5428_v21 = vpop.f32.mrf.mxu0  ;;  %v2492_v59 = vpop.f32.mrf.mxu1  ;;  %2683 = vmatmul.mubr.bf16.gmra.mxu1 %v4654_v37  ;;  %4266 = vmatmul.mubr.msk.bf16.gmra.mxu0 %vm1826_vm0, %v4658_v17  ;;  %v2132_v37 = vadd.f32 %v5111_v29, %v5267_v62  ;;  %v2140_v62 = vadd.f32 %v5111_v29, %v5285_v32  ;;  %v2148_v32 = vadd.f32 %v5111_v29, %v5303_v26  ;;  %s5502_s4 = scalar_lea.vmem %s5910_s3, %s3675_s30 }
 0x1e6   : > { %5936 = vst [vmem:[#allocation27_spill] sm:$0xff] %v5428_v21  ;;  %v5431_v8 = vadd.f32 %v2492_v59, %v2124_v47  ;;  %4269 = vmatprep.mubr.msk.bf16.mxu0 %vm1826_vm0, %v4659_v18  ;;  %v2156_v26 = vadd.f32 %v5111_v29, %v5321_v0  ;;  %v2164_v0 = vadd.f32 %v5111_v29, %v5339_v60 }
 0x1e7   : > { %v2205_v39 = vpop.f32.mrf.mxu0  ;;  %v2494_v12 = vpop.f32.mrf.mxu1 }
 0x1e8   : > { %v2135_v39 = vadd.f32 %v5111_v29, %v5275_v43  ;;  %v2143_v43 = vadd.f32 %v5111_v29, %v5293_v61  ;;  %v2151_v61 = vadd.f32 %v5111_v29, %v5311_v19  ;;  %v2159_v19 = vadd.f32 %v5111_v29, %v5329_v53 }
 0x1e9   : > { %v5436_v45 = vpop.f32.mrf.mxu0  ;;  %v2495_v15 = vpop.f32.mrf.mxu1  ;;  %v2167_v53 = vadd.f32 %v5111_v29, %v5347_v22 }
 0x1ea   : > { %5937 = vst [vmem:[#allocation28_spill] sm:$0xff] %v5436_v45  ;;  %v5439_v5 = vadd.f32 %v2495_v15, %v2127_v3 }
 0x1eb   : > { %v2208_v21 = vpop.f32.mrf.mxu0  ;;  %v2497_v24 = vpop.f32.mrf.mxu1 }
 0x1ed   : > { %v5443_v17 = vpop.f32.mrf.mxu0  ;;  %v2500_v47 = vpop.f32.mrf.mxu1  ;;  %4270 = vmatmul.mubr.msk.bf16.gmra.mxu0 %vm1826_vm0, %v4660_v48 }
 0x1ee   : > { %v5446_v18 = vadd.f32 %v2500_v47, %v2132_v37 }
 0x1ef   : > { %v2213_v59 = vpop.f32.mrf.mxu0  ;;  %v2502_v25 = vpop.f32.mrf.mxu1 }
 0x1f0   : > { %5938 = vst [vmem:[#allocation29_spill] sm:$0xff] %v5446_v18 }
 0x1f1   : > { %v5450_v12 = vpop.f32.mrf.mxu0  ;;  %v2503_v3 = vpop.f32.mrf.mxu1 }
 0x1f2   : > { %v5452_v21 = vadd.f32 %v2503_v3, %v2135_v39 }
 0x1f3   : > { %v2216_v24 = vpop.f32.mrf.mxu0  ;;  %v2505_v15 = vpop.f32.mrf.mxu1 }
 0x1f5   : > { %v5456_v45 = vpop.f32.mrf.mxu0  ;;  %v2508_v48 = vpop.f32.mrf.mxu1 }
 0x1f6   : > { %5939 = vst [vmem:[#allocation30_spill] sm:$0xff] %v5456_v45  ;;  %v5458_v37 = vadd.f32 %v2508_v48, %v2140_v62 }
 0x1f7   : > { %v2221_v47 = vpop.f32.mrf.mxu0  ;;  %v2510_v59 = vpop.f32.mrf.mxu1 }
 0x1f9   : > { %v5462_v25 = vpop.f32.mrf.mxu0  ;;  %v2511_v18 = vpop.f32.mrf.mxu1 }
 0x1fa   : > { %5940 = vst [vmem:[#allocation31_spill] sm:$0xff] %v5462_v25  ;;  %v5464_v39 = vadd.f32 %v2511_v18, %v2143_v43 }
 0x1fb   : > { %v2224_v3 = vpop.f32.mrf.mxu0  ;;  %v2513_v24 = vpop.f32.mrf.mxu1 }
 0x1fd   : > { %v5468_v15 = vpop.f32.mrf.mxu0  ;;  %v2516_v45 = vpop.f32.mrf.mxu1 }
 0x1fe   : > { %5941 = vst [vmem:[#allocation32_spill] sm:$0xff] %v5468_v15  ;;  %v5470_v62 = vadd.f32 %v2516_v45, %v2148_v32 }
 0x1ff   : > { %v2229_v48 = vpop.f32.mrf.mxu0  ;;  %v2518_v47 = vpop.f32.mrf.mxu1 }
 0x201   : > { %v5474_v59 = vpop.f32.mrf.mxu0  ;;  %v2519_v25 = vpop.f32.mrf.mxu1 }
 0x202   : > { %5942 = vst [vmem:[#allocation33_spill] sm:$0xff] %v5474_v59  ;;  %v5476_v18 = vadd.f32 %v2519_v25, %v2151_v61 }
 0x203   : > { %v2232_v43 = vpop.f32.mrf.mxu0  ;;  %v2521_v3 = vpop.f32.mrf.mxu1 }
 0x204   : > { %5943 = vst [vmem:[#allocation34_spill] sm:$0xff] %v5476_v18 }
 0x205   : > { %v5480_v24 = vpop.f32.mrf.mxu0  ;;  %v2524_v45 = vpop.f32.mrf.mxu1 }
 0x206   : > { %5944 = vst [vmem:[#allocation35_spill] sm:$0xff] %v5480_v24  ;;  %v5482_v32 = vadd.f32 %v2524_v45, %v2156_v26 }
 0x207   : > { %v2237_v48 = vpop.f32.mrf.mxu0  ;;  %v2526_v47 = vpop.f32.mrf.mxu1 }
 0x209   : > { %v5486_v59 = vpop.f32.mrf.mxu0  ;;  %v2527_v25 = vpop.f32.mrf.mxu1 }
 0x20a   : > { %v5488_v61 = vadd.f32 %v2527_v25, %v2159_v19 }
 0x20b   : > { %v2240_v43 = vpop.f32.mrf.mxu0  ;;  %v2529_v3 = vpop.f32.mrf.mxu1 }
 0x20d   : > { %v2532_v15 = vpop.f32.mrf.mxu1  ;;  %v4191_v24 = vpop.f32.mrf.mxu0 }
 0x20e   : > { %v5492_v18 = vadd.f32 %v2532_v15, %v2164_v0  ;;  %v2734_v26 = vadd.f32 %v4191_v24, %v5144_v34 }
 0x20f   : > { %v2534_v45 = vpop.f32.mrf.mxu1  ;;  %v2725_v48 = vpop.f32.mrf.mxu0 }
 0x210   : > { %v3062_v47 = vmax.f32 %v2734_v26, 0.0  ;;  %v2726_v19 = vadd.f32 %v2725_v48, %v5126_v55  ;;  %v2172_v55 = vadd.f32 %v5111_v29, %v5357_v40  ;;  %v2175_v40 = vadd.f32 %v5111_v29, %v5365_v6 }
 0x211   : > { %v2535_v60 = vpop.f32.mrf.mxu1  ;;  %v4192_v15 = vpop.f32.mrf.mxu0  ;;  %v2180_v6 = vadd.f32 %v5111_v29, %v5375_v36  ;;  %v2183_v36 = vadd.f32 %v5111_v29, %v5383_v57  ;;  %v2188_v57 = vadd.f32 %v5111_v29, %v5393_v16  ;;  %v2191_v16 = vadd.f32 %v5111_v29, %v5401_v46  ;;  %v5570_v46 = vld [vmem:[%s5909_s2] ss:$0 sm:$0xff] }
 0x212   : > { %v4053_v25 = vpack.c.bf16 %v3062_v47, %v3062_v47  ;;  %v3060_v34 = vmax.f32 %v2726_v19, 0.0  ;;  %v5504_v24 = vadd.f32 %v2535_v60, %v2167_v53  ;;  %v2737_v43 = vadd.f32 %v4192_v15, %v5153_v54 }
 0x213   : > { %v2537_v22 = vpop.f32.mrf.mxu1  ;;  %v2728_v3 = vpop.f32.mrf.mxu0 }
 0x214   : > { %3483 = vst.msk [vmem:[%s5502_s4 + $0x8] sm:$0xf] %vm3480_vm1, %v4053_v25  ;;  %v4051_v0 = vpack.c.bf16 %v3060_v34, %v3060_v34  ;;  %v3063_v26 = vmax.f32 %v2737_v43, 0.0  ;;  %v2729_v45 = vadd.f32 %v2728_v3, %v5135_v7 }
 0x215   : > { %v2540_v48 = vpop.f32.mrf.mxu1  ;;  %v4195_v47 = vpop.f32.mrf.mxu0 }
 0x216   : > { %3481 = vst.msk [vmem:[%s5502_s4] sm:$0xf] %vm3480_vm1, %v4051_v0  ;;  %v4054_v53 = vpack.c.bf16 %v3063_v26, %v3063_v26  ;;  %v3061_v19 = vmax.f32 %v2729_v45, 0.0  ;;  %v5514_v54 = vadd.f32 %v2540_v48, %v2172_v55  ;;  %v2750_v60 = vadd.f32 %v4195_v47, %v5180_v58 }
 0x217   : > { %v2542_v15 = vpop.f32.mrf.mxu1  ;;  %v2741_v22 = vpop.f32.mrf.mxu0 }
 0x218   : > { %3484 = vst.msk [vmem:[%s5502_s4 + $0xc] sm:$0xf] %vm3480_vm1, %v4054_v53  ;;  %v4052_v7 = vpack.c.bf16 %v3061_v19, %v3061_v19  ;;  %v3066_v25 = vmax.f32 %v2750_v60, 0.0  ;;  %v2742_v34 = vadd.f32 %v2741_v22, %v5162_v10 }
 0x219   : > { %v2543_v43 = vpop.f32.mrf.mxu1  ;;  %v4196_v3 = vpop.f32.mrf.mxu0 }
 0x21a   : > { %3482 = vst.msk [vmem:[%s5502_s4 + $0x4] sm:$0xf] %vm3480_vm1, %v4052_v7  ;;  %v4057_v55 = vpack.c.bf16 %v3066_v25, %v3066_v25  ;;  %v3064_v0 = vmax.f32 %v2742_v34, 0.0  ;;  %v5524_v58 = vadd.f32 %v2543_v43, %v2175_v40  ;;  %v2753_v26 = vadd.f32 %v4196_v3, %v5189_v35 }
 0x21b   : > { %v2545_v45 = vpop.f32.mrf.mxu1  ;;  %v2744_v48 = vpop.f32.mrf.mxu0 }
 0x21c   : > { %3487 = vst.msk [vmem:[%s5502_s4 + $0x18] sm:$0xf] %vm3480_vm1, %v4057_v55  ;;  %v4055_v10 = vpack.c.bf16 %v3064_v0, %v3064_v0  ;;  %v3067_v47 = vmax.f32 %v2753_v26, 0.0  ;;  %v2745_v53 = vadd.f32 %v2744_v48, %v5171_v38 }
 0x21d   : > { %v2548_v19 = vpop.f32.mrf.mxu1  ;;  %v4199_v60 = vpop.f32.mrf.mxu0 }
 0x21e   : > { %3485 = vst.msk [vmem:[%s5502_s4 + $0x10] sm:$0xf] %vm3480_vm1, %v4055_v10  ;;  %v4058_v15 = vpack.c.bf16 %v3067_v47, %v3067_v47  ;;  %v3065_v22 = vmax.f32 %v2745_v53, 0.0  ;;  %v5534_v35 = vadd.f32 %v2548_v19, %v2180_v6  ;;  %v2766_v40 = vadd.f32 %v4199_v60, %v5216_v51 }
 0x21f   : > { %v2550_v7 = vpop.f32.mrf.mxu1  ;;  %v2757_v25 = vpop.f32.mrf.mxu0 }
 0x220   : > { %3488 = vst.msk [vmem:[%s5502_s4 + $0x1c] sm:$0xf] %vm3480_vm1, %v4058_v15  ;;  %v4056_v38 = vpack.c.bf16 %v3065_v22, %v3065_v22  ;;  %v3070_v34 = vmax.f32 %v2766_v40, 0.0  ;;  %v2758_v43 = vadd.f32 %v2757_v25, %v5198_v56 }
 0x221   : > { %v2551_v3 = vpop.f32.mrf.mxu1  ;;  %v4200_v55 = vpop.f32.mrf.mxu0 }
 0x222   : > { %3486 = vst.msk [vmem:[%s5502_s4 + $0x14] sm:$0xf] %vm3480_vm1, %v4056_v38  ;;  %v4061_v0 = vpack.c.bf16 %v3070_v34, %v3070_v34  ;;  %v3068_v26 = vmax.f32 %v2758_v43, 0.0  ;;  %v5544_v51 = vadd.f32 %v2551_v3, %v2183_v36  ;;  %v2769_v45 = vadd.f32 %v4200_v55, %v5225_v33 }
 0x223   : > { %v2553_v48 = vpop.f32.mrf.mxu1  ;;  %v2760_v6 = vpop.f32.mrf.mxu0 }
 0x224   : > { %3491 = vst.msk [vmem:[%s5502_s4 + $0x28] sm:$0xf] %vm3480_vm1, %v4061_v0  ;;  %v4059_v56 = vpack.c.bf16 %v3068_v26, %v3068_v26  ;;  %v3071_v10 = vmax.f32 %v2769_v45, 0.0  ;;  %v2761_v47 = vadd.f32 %v2760_v6, %v5207_v41 }
 0x225   : > { %v2556_v53 = vpop.f32.mrf.mxu1  ;;  %v4203_v19 = vpop.f32.mrf.mxu0 }
 0x226   : > { %3489 = vst.msk [vmem:[%s5502_s4 + $0x20] sm:$0xf] %vm3480_vm1, %v4059_v56  ;;  %v4062_v60 = vpack.c.bf16 %v3071_v10, %v3071_v10  ;;  %v3069_v15 = vmax.f32 %v2761_v47, 0.0  ;;  %v5554_v33 = vadd.f32 %v2556_v53, %v2188_v57  ;;  %v2782_v22 = vadd.f32 %v4203_v19, %v5252_v1 }
 0x227   : > { %v2558_v40 = vpop.f32.mrf.mxu1  ;;  %v2773_v7 = vpop.f32.mrf.mxu0  ;;  %v2199_v19 = vadd.f32 %v5570_v46, %v5419_v23 }
 0x228   : > { %3492 = vst.msk [vmem:[%s5502_s4 + $0x2c] sm:$0xf] %vm3480_vm1, %v4062_v60  ;;  %v4060_v41 = vpack.c.bf16 %v3069_v15, %v3069_v15  ;;  %v3074_v25 = vmax.f32 %v2782_v22, 0.0  ;;  %v2774_v36 = vadd.f32 %v2773_v7, %v5234_v63  ;;  %v2196_v63 = vadd.f32 %v5570_v46, %v5411_v13 }
 0x229   : > { %v2559_v38 = vpop.f32.mrf.mxu1  ;;  %v4204_v34 = vpop.f32.mrf.mxu0 }
 0x22a   : > { %3490 = vst.msk [vmem:[%s5502_s4 + $0x24] sm:$0xf] %vm3480_vm1, %v4060_v41  ;;  %v4065_v43 = vpack.c.bf16 %v3074_v25, %v3074_v25  ;;  %v3072_v3 = vmax.f32 %v2774_v36, 0.0  ;;  %v5564_v1 = vadd.f32 %v2559_v38, %v2191_v16  ;;  %v2785_v55 = vadd.f32 %v4204_v34, %v5261_v50 }
 0x22b   : > { %v2561_v0 = vpop.f32.mrf.mxu1  ;;  %v2776_v29 = vpop.f32.mrf.mxu0 }
 0x22c   : > { %3495 = vst.msk [vmem:[%s5502_s4 + $0x38] sm:$0xf] %vm3480_vm1, %v4065_v43  ;;  %v4063_v26 = vpack.c.bf16 %v3072_v3, %v3072_v3  ;;  %v3075_v45 = vmax.f32 %v2785_v55, 0.0  ;;  %v2777_v48 = vadd.f32 %v2776_v29, %v5243_v20 }
 0x22d   : > { %v2564_v6 = vpop.f32.mrf.mxu1  ;;  %v4207_v50 = vpop.f32.mrf.mxu0 }
 0x22e   : > { %3493 = vst.msk [vmem:[%s5502_s4 + $0x30] sm:$0xf] %vm3480_vm1, %v4063_v26  ;;  %v4066_v57 = vpack.c.bf16 %v3075_v45, %v3075_v45  ;;  %v3073_v56 = vmax.f32 %v2777_v48, 0.0  ;;  %v5579_v10 = vadd.f32 %v2564_v6, %v2196_v63  ;;  %v2798_v47 = vadd.f32 %v4207_v50, %v5288_v49 }
 0x22f   : > { %v2566_v53 = vpop.f32.mrf.mxu1  ;;  %v2789_v13 = vpop.f32.mrf.mxu0 }
 0x230   : > { %3496 = vst.msk [vmem:[%s5502_s4 + $0x3c] sm:$0xf] %vm3480_vm1, %v4066_v57  ;;  %v4064_v20 = vpack.c.bf16 %v3073_v56, %v3073_v56  ;;  %v3078_v60 = vmax.f32 %v2798_v47, 0.0  ;;  %v2790_v15 = vadd.f32 %v2789_v13, %v5270_v31  ;;  %v2212_v47 = vadd.f32 %v5570_v46, %v5443_v17 }
 0x231   : > { %v2567_v22 = vpop.f32.mrf.mxu1  ;;  %v4208_v40 = vpop.f32.mrf.mxu0 }
 0x232   : > { %3494 = vst.msk [vmem:[%s5502_s4 + $0x34] sm:$0xf] %vm3480_vm1, %v4064_v20  ;;  %v4069_v7 = vpack.c.bf16 %v3078_v60, %v3078_v60  ;;  %v3076_v16 = vmax.f32 %v2790_v15, 0.0  ;;  %v5589_v49 = vadd.f32 %v2567_v22, %v2199_v19  ;;  %v2801_v41 = vadd.f32 %v4208_v40, %v5297_v14 }
 0x233   : > { %v2569_v25 = vpop.f32.mrf.mxu1  ;;  %v2792_v23 = vpop.f32.mrf.mxu0 }
 0x234   : > { %3499 = vst.msk [vmem:[%s5502_s4 + $0x48] sm:$0xf] %vm3480_vm1, %v4069_v7  ;;  %v4067_v36 = vpack.c.bf16 %v3076_v16, %v3076_v16  ;;  %v3079_v38 = vmax.f32 %v2801_v41, 0.0  ;;  %v2793_v31 = vadd.f32 %v2792_v23, %v5279_v44  ;;  %v2215_v7 = vadd.f32 %v5570_v46, %v5450_v12 }
 0x235   : > { %v5595_v34 = vpop.f32.mrf.mxu1  ;;  %v4211_v43 = vpop.f32.mrf.mxu0 }
 0x236   : > { %3497 = vst.msk [vmem:[%s5502_s4 + $0x40] sm:$0xf] %vm3480_vm1, %v4067_v36  ;;  %v4070_v3 = vpack.c.bf16 %v3079_v38, %v3079_v38  ;;  %v3077_v55 = vmax.f32 %v2793_v31, 0.0  ;;  %v2814_v0 = vadd.f32 %v4211_v43, %v5324_v30 }
 0x237   : > { %v2574_v14 = vpop.f32.mrf.mxu1  ;;  %v2805_v29 = vpop.f32.mrf.mxu0 }
 0x238   : > { %3500 = vst.msk [vmem:[%s5502_s4 + $0x4c] sm:$0xf] %vm3480_vm1, %v4070_v3  ;;  %v4068_v63 = vpack.c.bf16 %v3077_v55, %v3077_v55  ;;  %v3082_v26 = vmax.f32 %v2814_v0, 0.0  ;;  %v2806_v45 = vadd.f32 %v2805_v29, %v5306_v4  ;;  %v5945_v0 = vld [vmem:[#allocation22_spill] sm:$0xff] }
 0x239   : > { %v5603_v44 = vpop.f32.mrf.mxu1  ;;  %v4212_v48 = vpop.f32.mrf.mxu0 }
 0x23a   : > { %3498 = vst.msk [vmem:[%s5502_s4 + $0x44] sm:$0xf] %vm3480_vm1, %v4068_v63  ;;  %v4073_v6 = vpack.c.bf16 %v3082_v26, %v3082_v26  ;;  %v3080_v50 = vmax.f32 %v2806_v45, 0.0  ;;  %v2817_v57 = vadd.f32 %v4212_v48, %v5333_v52 }
 0x23b   : > { %v2577_v30 = vpop.f32.mrf.mxu1  ;;  %v2808_v56 = vpop.f32.mrf.mxu0 }
 0x23c   : > { %3503 = vst.msk [vmem:[%s5502_s4 + $0x58] sm:$0xf] %vm3480_vm1, %v4073_v6  ;;  %v4071_v53 = vpack.c.bf16 %v3080_v50, %v3080_v50  ;;  %v3083_v4 = vmax.f32 %v2817_v57, 0.0  ;;  %v2809_v13 = vadd.f32 %v2808_v56, %v5315_v9  ;;  %v5946_v57 = vld [vmem:[#allocation23_spill] sm:$0xff] }
 0x23d   : > { %v2580_v19 = vpop.f32.mrf.mxu1  ;;  %v4215_v20 = vpop.f32.mrf.mxu0 }
 0x23e   : > { %3501 = vst.msk [vmem:[%s5502_s4 + $0x50] sm:$0xf] %vm3480_vm1, %v4071_v53  ;;  %v4074_v60 = vpack.c.bf16 %v3083_v4, %v3083_v4  ;;  %v3081_v15 = vmax.f32 %v2809_v13, 0.0  ;;  %v5615_v52 = vadd.f32 %v2580_v19, %v2212_v47  ;;  %v2830_v22 = vadd.f32 %v4215_v20, %v5360_v42  ;;  %v5947_v13 = vld [vmem:[#allocation25_spill] sm:$0xff] }
 0x23f   : > { %v2582_v40 = vpop.f32.mrf.mxu1  ;;  %v2821_v17 = vpop.f32.mrf.mxu0 }
 0x240   : > { %3504 = vst.msk [vmem:[%s5502_s4 + $0x5c] sm:$0xf] %vm3480_vm1, %v4074_v60  ;;  %v4072_v9 = vpack.c.bf16 %v3081_v15, %v3081_v15  ;;  %v3086_v16 = vmax.f32 %v2830_v22, 0.0  ;;  %v2822_v41 = vadd.f32 %v2821_v17, %v5342_v2  ;;  %v5948_v22 = vld [vmem:[#allocation24_spill] sm:$0xff] }
 0x241   : > { %v2583_v25 = vpop.f32.mrf.mxu1  ;;  %v4216_v23 = vpop.f32.mrf.mxu0 }
 0x242   : > { %3502 = vst.msk [vmem:[%s5502_s4 + $0x54] sm:$0xf] %vm3480_vm1, %v4072_v9  ;;  %v4077_v36 = vpack.c.bf16 %v3086_v16, %v3086_v16  ;;  %v3084_v38 = vmax.f32 %v2822_v41, 0.0  ;;  %v5625_v42 = vadd.f32 %v2583_v25, %v2215_v7  ;;  %v2833_v31 = vadd.f32 %v4216_v23, %v5369_v28 }
 0x243   : > { %v2585_v43 = vpop.f32.mrf.mxu1  ;;  %v2824_v12 = vpop.f32.mrf.mxu0 }
 0x244   : > { %3507 = vst.msk [vmem:[%s5502_s4 + $0x68] sm:$0xf] %vm3480_vm1, %v4077_v36  ;;  %v4075_v3 = vpack.c.bf16 %v3084_v38, %v3084_v38  ;;  %v3087_v55 = vmax.f32 %v2833_v31, 0.0  ;;  %v2825_v2 = vadd.f32 %v2824_v12, %v5945_v0 }
 0x245   : > { %v5631_v14 = vpop.f32.mrf.mxu1  ;;  %v4219_v29 = vpop.f32.mrf.mxu0 }
 0x246   : > { %3505 = vst.msk [vmem:[%s5502_s4 + $0x60] sm:$0xf] %vm3480_vm1, %v4075_v3  ;;  %v4078_v63 = vpack.c.bf16 %v3087_v55, %v3087_v55  ;;  %v3085_v26 = vmax.f32 %v2825_v2, 0.0  ;;  %v2846_v45 = vadd.f32 %v4219_v29, %v5396_v11 }
 0x247   : > { %v2590_v28 = vpop.f32.mrf.mxu1  ;;  %v2837_v48 = vpop.f32.mrf.mxu0 }
 0x248   : > { %3508 = vst.msk [vmem:[%s5502_s4 + $0x6c] sm:$0xf] %vm3480_vm1, %v4078_v63  ;;  %v4076_v6 = vpack.c.bf16 %v3085_v26, %v3085_v26  ;;  %v3090_v50 = vmax.f32 %v2846_v45, 0.0  ;;  %v2838_v30 = vadd.f32 %v2837_v48, %v5946_v57  ;;  %v5949_v26 = vld [vmem:[#allocation26_spill] sm:$0xff] }
 0x249   : > { %v5639_v56 = vpop.f32.mrf.mxu1  ;;  %v4220_v47 = vpop.f32.mrf.mxu0 }
 0x24a   : > { %3506 = vst.msk [vmem:[%s5502_s4 + $0x64] sm:$0xf] %vm3480_vm1, %v4076_v6  ;;  %v4081_v53 = vpack.c.bf16 %v3090_v50, %v3090_v50  ;;  %v3088_v4 = vmax.f32 %v2838_v30, 0.0  ;;  %v2849_v19 = vadd.f32 %v4220_v47, %v5947_v13 }
 0x24b   : > { %v2593_v11 = vpop.f32.mrf.mxu1  ;;  %v2840_v20 = vpop.f32.mrf.mxu0 }
 0x24c   : > { %3511 = vst.msk [vmem:[%s5502_s4 + $0x78] sm:$0xf] %vm3480_vm1, %v4081_v53  ;;  %v4079_v60 = vpack.c.bf16 %v3088_v4, %v3088_v4  ;;  %v3091_v15 = vmax.f32 %v2849_v19, 0.0  ;;  %v2841_v40 = vadd.f32 %v2840_v20, %v5948_v22  ;;  %v5950_v53 = vld [vmem:[#allocation29_spill] sm:$0xff] }
 0x24d   : > { %v5647_v17 = vpop.f32.mrf.mxu1  ;;  %v4223_v7 = vpop.f32.mrf.mxu0 }
 0x24e   : > { %3509 = vst.msk [vmem:[%s5502_s4 + $0x70] sm:$0xf] %vm3480_vm1, %v4079_v60  ;;  %v4082_v9 = vpack.c.bf16 %v3091_v15, %v3091_v15  ;;  %v3089_v16 = vmax.f32 %v2841_v40, 0.0  ;;  %v2862_v41 = vadd.f32 %v4223_v7, %v5431_v8 }
 0x24f   : > { %v2598_v25 = vpop.f32.mrf.mxu1  ;;  %v2853_v23 = vpop.f32.mrf.mxu0 }
 0x250   : > { %3512 = vst.msk [vmem:[%s5502_s4 + $0x7c] sm:$0xf] %vm3480_vm1, %v4082_v9  ;;  %v4080_v36 = vpack.c.bf16 %v3089_v16, %v3089_v16  ;;  %v3094_v38 = vmax.f32 %v2862_v41, 0.0  ;;  %v2854_v31 = vadd.f32 %v2853_v23, %v5414_v27 }
 0x251   : > { %v5655_v43 = vpop.f32.mrf.mxu1  ;;  %v4224_v12 = vpop.f32.mrf.mxu0 }
 0x252   : > { %3510 = vst.msk [vmem:[%s5502_s4 + $0x74] sm:$0xf] %vm3480_vm1, %v4080_v36  ;;  %v4085_v3 = vpack.c.bf16 %v3094_v38, %v3094_v38  ;;  %v3092_v55 = vmax.f32 %v2854_v31, 0.0  ;;  %v2865_v0 = vadd.f32 %v4224_v12, %v5439_v5 }
 0x253   : > { %v2601_v8 = vpop.f32.mrf.mxu1  ;;  %v2856_v2 = vpop.f32.mrf.mxu0 }
 0x254   : > { %3515 = vst.msk [vmem:[%s5502_s4 + $0x88] sm:$0xf] %vm3480_vm1, %v4085_v3  ;;  %v4083_v29 = vpack.c.bf16 %v3092_v55, %v3092_v55  ;;  %v3095_v63 = vmax.f32 %v2865_v0, 0.0  ;;  %v2857_v45 = vadd.f32 %v2856_v2, %v5949_v26  ;;  %v5951_v26 = vld [vmem:[#allocation34_spill] sm:$0xff] }
 0x255   : > { %v5663_v27 = vpop.f32.mrf.mxu1  ;;  %v4227_v28 = vpop.f32.mrf.mxu0 }
 0x256   : > { %3513 = vst.msk [vmem:[%s5502_s4 + $0x80] sm:$0xf] %vm3480_vm1, %v4083_v29  ;;  %v4086_v48 = vpack.c.bf16 %v3095_v63, %v3095_v63  ;;  %v3093_v6 = vmax.f32 %v2857_v45, 0.0  ;;  %v2878_v50 = vadd.f32 %v4227_v28, %v5458_v37 }
 0x257   : > { %v2606_v5 = vpop.f32.mrf.mxu1  ;;  %v2869_v57 = vpop.f32.mrf.mxu0 }
 0x258   : > { %3516 = vst.msk [vmem:[%s5502_s4 + $0x8c] sm:$0xf] %vm3480_vm1, %v4086_v48  ;;  %v4084_v30 = vpack.c.bf16 %v3093_v6, %v3093_v6  ;;  %v3098_v47 = vmax.f32 %v2878_v50, 0.0  ;;  %v2870_v4 = vadd.f32 %v2869_v57, %v5950_v53 }
 0x259   : > { %v5671_v13 = vpop.f32.mrf.mxu1  ;;  %v4228_v19 = vpop.f32.mrf.mxu0 }
 0x25a   : > { %3514 = vst.msk [vmem:[%s5502_s4 + $0x84] sm:$0xf] %vm3480_vm1, %v4084_v30  ;;  %v4089_v11 = vpack.c.bf16 %v3098_v47, %v3098_v47  ;;  %v3096_v20 = vmax.f32 %v2870_v4, 0.0  ;;  %v2881_v60 = vadd.f32 %v4228_v19, %v5464_v39 }
 0x25b   : > { %v2609_v37 = vpop.f32.mrf.mxu1  ;;  %v2872_v15 = vpop.f32.mrf.mxu0 }
 0x25c   : > { %3519 = vst.msk [vmem:[%s5502_s4 + $0x98] sm:$0xf] %vm3480_vm1, %v4089_v11  ;;  %v4087_v22 = vpack.c.bf16 %v3096_v20, %v3096_v20  ;;  %v3099_v40 = vmax.f32 %v2881_v60, 0.0  ;;  %v2873_v7 = vadd.f32 %v2872_v15, %v5452_v21 }
 0x25d   : > { %v5679_v9 = vpop.f32.mrf.mxu1  ;;  %v4231_v16 = vpop.f32.mrf.mxu0 }
 0x25e   : > { %3517 = vst.msk [vmem:[%s5502_s4 + $0x90] sm:$0xf] %vm3480_vm1, %v4087_v22  ;;  %v4090_v41 = vpack.c.bf16 %v3099_v40, %v3099_v40  ;;  %v3097_v25 = vmax.f32 %v2873_v7, 0.0  ;;  %v2894_v23 = vadd.f32 %v4231_v16, %v5482_v32 }
 0x25f   : > { %v2614_v39 = vpop.f32.mrf.mxu1  ;;  %v2885_v36 = vpop.f32.mrf.mxu0 }
 0x260   : > { %3520 = vst.msk [vmem:[%s5502_s4 + $0x9c] sm:$0xf] %vm3480_vm1, %v4090_v41  ;;  %v4088_v38 = vpack.c.bf16 %v3097_v25, %v3097_v25  ;;  %v3102_v31 = vmax.f32 %v2894_v23, 0.0  ;;  %v2886_v12 = vadd.f32 %v2885_v36, %v5470_v62 }
 0x261   : > { %v5687_v21 = vpop.f32.mrf.mxu1  ;;  %v4232_v3 = vpop.f32.mrf.mxu0 }
 0x262   : > { %3518 = vst.msk [vmem:[%s5502_s4 + $0x94] sm:$0xf] %vm3480_vm1, %v4088_v38  ;;  %v4093_v55 = vpack.c.bf16 %v3102_v31, %v3102_v31  ;;  %v3100_v0 = vmax.f32 %v2886_v12, 0.0  ;;  %v2897_v8 = vadd.f32 %v4232_v3, %v5488_v61  ;;  %v5952_v31 = vld [vmem:[#allocation27_spill] sm:$0xff] }
 0x263   : > { %v2617_v32 = vpop.f32.mrf.mxu1  ;;  %v2888_v2 = vpop.f32.mrf.mxu0  ;;  %v2204_v12 = vadd.f32 %v5570_v46, %v5952_v31 }
 0x264   : > { %3523 = vst.msk [vmem:[%s5502_s4 + $0xa8] sm:$0xf] %vm3480_vm1, %v4093_v55  ;;  %v4091_v29 = vpack.c.bf16 %v3100_v0, %v3100_v0  ;;  %v3103_v63 = vmax.f32 %v2897_v8, 0.0  ;;  %v2889_v45 = vadd.f32 %v2888_v2, %v5951_v26 }
 0x265   : > { %v5695_v62 = vpop.f32.mrf.mxu1  ;;  %v4235_v28 = vpop.f32.mrf.mxu0  ;;  %v2573_v32 = vadd.f32 %v5595_v34, %v2204_v12 }
 0x266   : > { %3521 = vst.msk [vmem:[%s5502_s4 + $0xa0] sm:$0xf] %vm3480_vm1, %v4091_v29  ;;  %v4094_v48 = vpack.c.bf16 %v3103_v63, %v3103_v63  ;;  %v3101_v6 = vmax.f32 %v2889_v45, 0.0  ;;  %v2910_v50 = vadd.f32 %v4235_v28, %v5514_v54  ;;  %v5953_v45 = vld [vmem:[#allocation28_spill] sm:$0xff] }
 0x267   : > { %v2622_v61 = vpop.f32.mrf.mxu1  ;;  %v2901_v5 = vpop.f32.mrf.mxu0  ;;  %v2207_v28 = vadd.f32 %v5570_v46, %v5953_v45 }
 0x268   : > { %3524 = vst.msk [vmem:[%s5502_s4 + $0xac] sm:$0xf] %vm3480_vm1, %v4094_v48  ;;  %v4092_v57 = vpack.c.bf16 %v3101_v6, %v3101_v6  ;;  %v3106_v30 = vmax.f32 %v2910_v50, 0.0  ;;  %v2902_v47 = vadd.f32 %v2901_v5, %v5492_v18 }
 0x269   : > { %v5703_v53 = vpop.f32.mrf.mxu1  ;;  %v4236_v4 = vpop.f32.mrf.mxu0  ;;  %v2576_v61 = vadd.f32 %v5603_v44, %v2207_v28 }
 0x26a   : > { %3522 = vst.msk [vmem:[%s5502_s4 + $0xa4] sm:$0xf] %vm3480_vm1, %v4092_v57  ;;  %v4097_v19 = vpack.c.bf16 %v3106_v30, %v3106_v30  ;;  %v3104_v11 = vmax.f32 %v2902_v47, 0.0  ;;  %v2913_v20 = vadd.f32 %v4236_v4, %v5524_v58  ;;  %v5954_v4 = vld [vmem:[#allocation30_spill] sm:$0xff] }
 0x26b   : > { %v2625_v54 = vpop.f32.mrf.mxu1  ;;  %v2904_v60 = vpop.f32.mrf.mxu0 }
 0x26c   : > { %3527 = vst.msk [vmem:[%s5502_s4 + $0xb8] sm:$0xf] %vm3480_vm1, %v4097_v19  ;;  %v4095_v37 = vpack.c.bf16 %v3104_v11, %v3104_v11  ;;  %v3107_v15 = vmax.f32 %v2913_v20, 0.0  ;;  %v2905_v22 = vadd.f32 %v2904_v60, %v5504_v24  ;;  %v2220_v19 = vadd.f32 %v5570_v46, %v5954_v4 }
 0x26d   : > { %v5711_v18 = vpop.f32.mrf.mxu1  ;;  %v4239_v40 = vpop.f32.mrf.mxu0 }
 0x26e   : > { %3525 = vst.msk [vmem:[%s5502_s4 + $0xb0] sm:$0xf] %vm3480_vm1, %v4095_v37  ;;  %v4098_v7 = vpack.c.bf16 %v3107_v15, %v3107_v15  ;;  %v3105_v16 = vmax.f32 %v2905_v22, 0.0  ;;  %v2926_v41 = vadd.f32 %v4239_v40, %v5554_v33  ;;  %v2589_v37 = vadd.f32 %v5631_v14, %v2220_v19 }
 0x26f   : > { %v2630_v25 = vpop.f32.mrf.mxu1  ;;  %v2917_v58 = vpop.f32.mrf.mxu0 }
 0x270   : > { %3528 = vst.msk [vmem:[%s5502_s4 + $0xbc] sm:$0xf] %vm3480_vm1, %v4098_v7  ;;  %v4096_v23 = vpack.c.bf16 %v3105_v16, %v3105_v16  ;;  %v3110_v39 = vmax.f32 %v2926_v41, 0.0  ;;  %v2918_v36 = vadd.f32 %v2917_v58, %v5534_v35  ;;  %v5955_v16 = vld [vmem:[#allocation31_spill] sm:$0xff] }
 0x271   : > { %v5719_v24 = vpop.f32.mrf.mxu1  ;;  %v4240_v38 = vpop.f32.mrf.mxu0  ;;  %v2223_v41 = vadd.f32 %v5570_v46, %v5955_v16 }
 0x272   : > { %3526 = vst.msk [vmem:[%s5502_s4 + $0xb4] sm:$0xf] %vm3480_vm1, %v4096_v23  ;;  %v4101_v3 = vpack.c.bf16 %v3110_v39, %v3110_v39  ;;  %v3108_v33 = vmax.f32 %v2918_v36, 0.0  ;;  %v2929_v55 = vadd.f32 %v4240_v38, %v5564_v1 }
 0x273   : > { %v2633_v0 = vpop.f32.mrf.mxu1  ;;  %v2920_v8 = vpop.f32.mrf.mxu0  ;;  %v2592_v36 = vadd.f32 %v5639_v56, %v2223_v41  ;;  %v5957_v56 = vld [vmem:[#allocation32_spill] sm:$0xff] }
 0x274   : > { %3531 = vst.msk [vmem:[%s5502_s4 + $0xc8] sm:$0xf] %vm3480_vm1, %v4101_v3  ;;  %v4099_v35 = vpack.c.bf16 %v3108_v33, %v3108_v33  ;;  %v3111_v2 = vmax.f32 %v2929_v55, 0.0  ;;  %v2921_v29 = vadd.f32 %v2920_v8, %v5544_v51  ;;  %v5956_v33 = vld [vmem:[#allocation35_spill] sm:$0xff] }
 0x275   : > { %v5730_v63 = vpop.f32.mrf.mxu1  ;;  %v4243_v26 = vpop.f32.mrf.mxu0  ;;  %v2236_v55 = vadd.f32 %v5570_v46, %v5956_v33 }
 0x276   : > { %3529 = vst.msk [vmem:[%s5502_s4 + $0xc0] sm:$0xf] %vm3480_vm1, %v4099_v35  ;;  %v4102_v1 = vpack.c.bf16 %v3111_v2, %v3111_v2  ;;  %v3109_v48 = vmax.f32 %v2921_v29, 0.0  ;;  %v2942_v6 = vadd.f32 %v4243_v26, %v2573_v32  ;;  %v2228_v35 = vadd.f32 %v5570_v46, %v5957_v56 }
 0x277   : > { %v2638_v50 = vpop.f32.mrf.mxu1  ;;  %v2933_v34 = vpop.f32.mrf.mxu0  ;;  %v2605_v26 = vadd.f32 %v5663_v27, %v2236_v55 }
 0x278   : > { %3532 = vst.msk [vmem:[%s5502_s4 + $0xcc] sm:$0xf] %vm3480_vm1, %v4102_v1  ;;  %v4100_v51 = vpack.c.bf16 %v3109_v48, %v3109_v48  ;;  %v3114_v5 = vmax.f32 %v2942_v6, 0.0  ;;  %v2934_v57 = vadd.f32 %v2933_v34, %v5579_v10  ;;  %v2239_v1 = vadd.f32 %v5570_v46, %v5486_v59 }
 0x279   : > { %v5740_v30 = vpop.f32.mrf.mxu1  ;;  %v4244_v47 = vpop.f32.mrf.mxu0  ;;  %v2597_v50 = vadd.f32 %v5647_v17, %v2228_v35  ;;  %v5959_v17 = vld [vmem:[#allocation4_spill] sm:$0xff] }
 0x27a   : > { %3530 = vst.msk [vmem:[%s5502_s4 + $0xc4] sm:$0xf] %vm3480_vm1, %v4100_v51  ;;  %v4105_v11 = vpack.c.bf16 %v3114_v5, %v3114_v5  ;;  %v3112_v20 = vmax.f32 %v2934_v57, 0.0  ;;  %v2945_v54 = vadd.f32 %v4244_v47, %v2576_v61  ;;  %v5958_v51 = vld [vmem:[#allocation33_spill] sm:$0xff] }
 0x27b   : > { %v2641_v60 = vpop.f32.mrf.mxu1  ;;  %v2936_v44 = vpop.f32.mrf.mxu0  ;;  %v2231_v5 = vadd.f32 %v5570_v46, %v5958_v51 }
 0x27c   : > { %3535 = vst.msk [vmem:[%s5502_s4 + $0xd8] sm:$0xf] %vm3480_vm1, %v4105_v11  ;;  %v4103_v10 = vpack.c.bf16 %v3112_v20, %v3112_v20  ;;  %v3115_v15 = vmax.f32 %v2945_v54, 0.0  ;;  %v2937_v22 = vadd.f32 %v2936_v44, %v5589_v49  ;;  %v2252_v11 = vadd.f32 %v5570_v46, %v5959_v17 }
 0x27d   : > { %v5750_v40 = vpop.f32.mrf.mxu1  ;;  %v4247_v7 = vpop.f32.mrf.mxu0  ;;  %v2600_v60 = vadd.f32 %v5655_v43, %v2231_v5  ;;  %v5961_v43 = vld [vmem:[#allocation5_spill] sm:$0xff] }
 0x27e   : > { %3533 = vst.msk [vmem:[%s5502_s4 + $0xd0] sm:$0xf] %vm3480_vm1, %v4103_v10  ;;  %v4106_v25 = vpack.c.bf16 %v3115_v15, %v3115_v15  ;;  %v3113_v58 = vmax.f32 %v2937_v22, 0.0  ;;  %v2958_v23 = vadd.f32 %v4247_v7, %v2589_v37  ;;  %v5960_v10 = vld [vmem:[#allocation2_spill] sm:$0xff]  ;;  %v2621_v16 = vadd.f32 %v5695_v62, %v2252_v11 }
 0x27f   : > { %v2646_v39 = vpop.f32.mrf.mxu1  ;;  %v2949_v14 = vpop.f32.mrf.mxu0  ;;  %v2244_v15 = vadd.f32 %v5570_v46, %v5960_v10 }
 0x280   : > { %3536 = vst.msk [vmem:[%s5502_s4 + $0xdc] sm:$0xf] %vm3480_vm1, %v4106_v25  ;;  %v4104_v49 = vpack.c.bf16 %v3113_v58, %v3113_v58  ;;  %v3118_v38 = vmax.f32 %v2958_v23, 0.0  ;;  %v2950_v31 = vadd.f32 %v2949_v14, %v5615_v52  ;;  %v2255_v23 = vadd.f32 %v5570_v46, %v5961_v43 }
 0x281   : > { %v5760_v12 = vpop.f32.mrf.mxu1  ;;  %v4248_v3 = vpop.f32.mrf.mxu0 }
 0x282   : > { %3534 = vst.msk [vmem:[%s5502_s4 + $0xd4] sm:$0xf] %vm3480_vm1, %v4104_v49  ;;  %v4109_v0 = vpack.c.bf16 %v3118_v38, %v3118_v38  ;;  %v3116_v8 = vmax.f32 %v2950_v31, 0.0  ;;  %v2961_v32 = vadd.f32 %v4248_v3, %v2592_v36  ;;  %v2613_v36 = vadd.f32 %v5679_v9, %v2244_v15  ;;  %v5962_v31 = vld [vmem:[#allocation3_spill] sm:$0xff]  ;;  %v5963_v9 = vld [vmem:[#allocation8_spill] sm:$0xff] }
 0x283   : > { %v2649_v2 = vpop.f32.mrf.mxu1  ;;  %v2952_v29 = vpop.f32.mrf.mxu0  ;;  %v2247_v3 = vadd.f32 %v5570_v46, %v5962_v31  ;;  %v2268_v35 = vadd.f32 %v5570_v46, %v5963_v9 }
 0x284   : > { %3539 = vst.msk [vmem:[%s5502_s4 + $0xe8] sm:$0xf] %vm3480_vm1, %v4109_v0  ;;  %v4107_v52 = vpack.c.bf16 %v3116_v8, %v3116_v8  ;;  %v3119_v45 = vmax.f32 %v2961_v32, 0.0  ;;  %v2953_v28 = vadd.f32 %v2952_v29, %v5625_v42  ;;  %v2608_v42 = vadd.f32 %v5671_v13, %v2239_v1 }
 0x285   : > { %v5774_v48 = vpop.f32.mrf.mxu1  ;;  %v4251_v6 = vpop.f32.mrf.mxu0  ;;  %v2624_v0 = vadd.f32 %v5703_v53, %v2255_v23 }
 0x286   : > { %3537 = vst.msk [vmem:[%s5502_s4 + $0xe0] sm:$0xf] %vm3480_vm1, %v4107_v52  ;;  %v4110_v34 = vpack.c.bf16 %v3119_v45, %v3119_v45  ;;  %v3117_v27 = vmax.f32 %v2953_v28, 0.0  ;;  %v2974_v61 = vadd.f32 %v4251_v6, %v2605_v26  ;;  %v2616_v26 = vadd.f32 %v5687_v21, %v2247_v3  ;;  %v5964_v28 = vld [vmem:[#allocation6_spill] sm:$0xff]  ;;  %v5965_v21 = vld [vmem:[#allocation9_spill] sm:$0xff] }
 0x287   : > { %v2654_v57 = vpop.f32.mrf.mxu1  ;;  %v2965_v47 = vpop.f32.mrf.mxu0  ;;  %v2260_v1 = vadd.f32 %v5570_v46, %v5964_v28  ;;  %v2271_v5 = vadd.f32 %v5570_v46, %v5965_v21 }
 0x288   : > { %3540 = vst.msk [vmem:[%s5502_s4 + $0xec] sm:$0xf] %vm3480_vm1, %v4110_v34  ;;  %v4108_v59 = vpack.c.bf16 %v3117_v27, %v3117_v27  ;;  %v3122_v4 = vmax.f32 %v2974_v61, 0.0  ;;  %v2966_v19 = vadd.f32 %v2965_v47, %v2597_v50  ;;  %v2637_v34 = vadd.f32 %v5730_v63, %v2268_v35  ;;  %v5966_v63 = vld [vmem:[#allocation7_spill] sm:$0xff] }
 0x289   : > { %v5786_v20 = vpop.f32.mrf.mxu1  ;;  %v4252_v54 = vpop.f32.mrf.mxu0  ;;  %v2263_v17 = vadd.f32 %v5570_v46, %v5966_v63 }
 0x28a   : > { %3538 = vst.msk [vmem:[%s5502_s4 + $0xe4] sm:$0xf] %vm3480_vm1, %v4108_v59  ;;  %v4113_v44 = vpack.c.bf16 %v3122_v4, %v3122_v4  ;;  %v3120_v37 = vmax.f32 %v2966_v19, 0.0  ;;  %v2977_v13 = vadd.f32 %v4252_v54, %v2608_v42  ;;  %v2629_v42 = vadd.f32 %v5711_v18, %v2260_v1  ;;  %v5967_v18 = vld [vmem:[#allocation12_spill] sm:$0xff] }
 0x28b   : > { %v2657_v22 = vpop.f32.mrf.mxu1  ;;  %v2968_v7 = vpop.f32.mrf.mxu0  ;;  %v2284_v10 = vadd.f32 %v5570_v46, %v5967_v18 }
 0x28c   : > { %3543 = vst.msk [vmem:[%s5502_s4 + $0xf8] sm:$0xf] %vm3480_vm1, %v4113_v44  ;;  %v4111_v41 = vpack.c.bf16 %v3120_v37, %v3120_v37  ;;  %v3123_v25 = vmax.f32 %v2977_v13, 0.0  ;;  %v2969_v58 = vadd.f32 %v2968_v7, %v2600_v60  ;;  %v2640_v60 = vadd.f32 %v5740_v30, %v2271_v5  ;;  %v5968_v30 = vld [vmem:[#allocation10_spill] sm:$0xff] }
 0x28d   : > { %v5798_v39 = vpop.f32.mrf.mxu1  ;;  %v4255_v14 = vpop.f32.mrf.mxu0  ;;  %v2632_v7 = vadd.f32 %v5719_v24, %v2263_v17  ;;  %v5969_v24 = vld [vmem:[#allocation13_spill] sm:$0xff] }
 0x28e   : > { %3541 = vst.msk [vmem:[%s5502_s4 + $0xf0] sm:$0xf] %vm3480_vm1, %v4111_v41  ;;  %v4114_v49 = vpack.c.bf16 %v3123_v25, %v3123_v25  ;;  %v3121_v38 = vmax.f32 %v2969_v58, 0.0  ;;  %v2990_v62 = vadd.f32 %v4255_v14, %v2621_v16  ;;  %v2276_v58 = vadd.f32 %v5570_v46, %v5968_v30 }
 0x28f   : > { %v2662_v33 = vpop.f32.mrf.mxu1  ;;  %v2981_v55 = vpop.f32.mrf.mxu0  ;;  %v2653_v14 = vadd.f32 %v5774_v48, %v2284_v10 }
 0x290   : > { %3544 = vst.msk [vmem:[%s5502_s4 + $0xfc] sm:$0xf] %vm3480_vm1, %v4114_v49  ;;  %v4112_v8 = vpack.c.bf16 %v3121_v38, %v3121_v38  ;;  %v3126_v32 = vmax.f32 %v2990_v62, 0.0  ;;  %v2982_v56 = vadd.f32 %v2981_v55, %v2613_v36  ;;  %v2287_v62 = vadd.f32 %v5570_v46, %v5969_v24 }
 0x291   : > { %v5810_v2 = vpop.f32.mrf.mxu1  ;;  %v4256_v29 = vpop.f32.mrf.mxu0  ;;  %v2645_v33 = vadd.f32 %v5750_v40, %v2276_v58  ;;  %v5971_v40 = vld [vmem:[#allocation16_spill] sm:$0xff] }
 0x292   : > { %3542 = vst.msk [vmem:[%s5502_s4 + $0xf4] sm:$0xf] %vm3480_vm1, %v4112_v8  ;;  %v4117_v52 = vpack.c.bf16 %v3126_v32, %v3126_v32  ;;  %v3124_v45 = vmax.f32 %v2982_v56, 0.0  ;;  %v2993_v53 = vadd.f32 %v4256_v29, %v2624_v0  ;;  %v5970_v8 = vld [vmem:[#allocation11_spill] sm:$0xff]  ;;  %v2656_v35 = vadd.f32 %v5786_v20, %v2287_v62  ;;  %v5972_v20 = vld [vmem:[#allocation14_spill] sm:$0xff] }
 0x293   : > { %v2665_v6 = vpop.f32.mrf.mxu1  ;;  %v2984_v50 = vpop.f32.mrf.mxu0  ;;  %v2279_v32 = vadd.f32 %v5570_v46, %v5970_v8 }
 0x294   : > { %3547 = vst.msk [vmem:[%s5502_s4 + $0x108] sm:$0xf] %vm3480_vm1, %v4117_v52  ;;  %v4115_v27 = vpack.c.bf16 %v3124_v45, %v3124_v45  ;;  %v3127_v61 = vmax.f32 %v2993_v53, 0.0  ;;  %v2985_v51 = vadd.f32 %v2984_v50, %v2616_v26  ;;  %v2300_v45 = vadd.f32 %v5570_v46, %v5971_v40 }
 0x295   : > { %v2668_v57 = vpop.f32.mrf.mxu1  ;;  %v4259_v47 = vpop.f32.mrf.mxu0  ;;  %v2648_v1 = vadd.f32 %v5760_v12, %v2279_v32  ;;  %v5978_v32 = vld [vmem:[#allocation19_spill] sm:$0xff] }
 0x296   : > { %3545 = vst.msk [vmem:[%s5502_s4 + $0x100] sm:$0xf] %vm3480_vm1, %v4115_v27  ;;  %v4118_v59 = vpack.c.bf16 %v3127_v61, %v3127_v61  ;;  %v3125_v4 = vmax.f32 %v2985_v51, 0.0  ;;  %v3006_v19 = vadd.f32 %v4259_v47, %v2637_v34  ;;  %v2292_v27 = vadd.f32 %v5570_v46, %v5972_v20 }
 0x297   : > { %v2670_v11 = vpop.f32.mrf.mxu1  ;;  %v2997_v54 = vpop.f32.mrf.mxu0  ;;  %v2669_v21 = vadd.f32 %v2668_v57, %v2300_v45  ;;  %v5974_v57 = vld [vmem:[#allocation15_spill] sm:$0xff] }
 0x298   : > { %3548 = vst.msk [vmem:[%s5502_s4 + $0x10c] sm:$0xf] %vm3480_vm1, %v4118_v59  ;;  %v4116_v44 = vpack.c.bf16 %v3125_v4, %v3125_v4  ;;  %v3130_v37 = vmax.f32 %v3006_v19, 0.0  ;;  %v2998_v13 = vadd.f32 %v2997_v54, %v2629_v42  ;;  %v5973_v59 = vld [vmem:[#allocation17_spill] sm:$0xff]  ;;  %v2661_v63 = vadd.f32 %v5798_v39, %v2292_v27 }
 0x299   : > { %v2671_v15 = vpop.f32.mrf.mxu1  ;;  %v4260_v22 = vpop.f32.mrf.mxu0  ;;  %v2303_v12 = vadd.f32 %v5570_v46, %v5973_v59 }
 0x29a   : > { %3546 = vst.msk [vmem:[%s5502_s4 + $0x104] sm:$0xf] %vm3480_vm1, %v4116_v44  ;;  %v4121_v16 = vpack.c.bf16 %v3130_v37, %v3130_v37  ;;  %v3128_v41 = vmax.f32 %v2998_v13, 0.0  ;;  %v3009_v25 = vadd.f32 %v4260_v22, %v2640_v60  ;;  %v2295_v60 = vadd.f32 %v5570_v46, %v5974_v57 }
 0x29b   : > { %v2673_v43 = vpop.f32.mrf.mxu1  ;;  %v3000_v23 = vpop.f32.mrf.mxu0  ;;  %v2672_v13 = vadd.f32 %v2671_v15, %v2303_v12  ;;  %v5976_v15 = vld [vmem:[#allocation18_spill] sm:$0xff] }
 0x29c   : > { %3551 = vst.msk [vmem:[%s5502_s4 + $0x118] sm:$0xf] %vm3480_vm1, %v4121_v16  ;;  %v4119_v36 = vpack.c.bf16 %v3128_v41, %v3128_v41  ;;  %v3131_v49 = vmax.f32 %v3009_v25, 0.0  ;;  %v3001_v38 = vadd.f32 %v3000_v23, %v2632_v7  ;;  %v5975_v7 = vld [vmem:[#allocation20_spill] sm:$0xff]  ;;  %v2664_v25 = vadd.f32 %v5810_v2, %v2295_v60 }
 0x29d   : > { %v5842_v31 = vpop.f32.mrf.mxu1  ;;  %v4263_v3 = vpop.f32.mrf.mxu0  ;;  %v2316_v39 = vadd.f32 %v5570_v46, %v5975_v7  ;;  %v2308_v23 = vadd.f32 %v5570_v46, %v5976_v15 }
 0x29e   : > { %3549 = vst.msk [vmem:[%s5502_s4 + $0x110] sm:$0xf] %vm3480_vm1, %v4119_v36  ;;  %v4122_v55 = vpack.c.bf16 %v3131_v49, %v3131_v49  ;;  %v3129_v0 = vmax.f32 %v3001_v38, 0.0  ;;  %v3022_v48 = vadd.f32 %v4263_v3, %v2653_v14  ;;  %v5977_v3 = vld [vmem:[#allocation21_spill] sm:$0xff] }
 0x29f   : > { %v2678_v56 = vpop.f32.mrf.mxu1  ;;  %v3013_v9 = vpop.f32.mrf.mxu0  ;;  %v2319_v2 = vadd.f32 %v5570_v46, %v5977_v3 }
 0x2a0   : > { %3552 = vst.msk [vmem:[%s5502_s4 + $0x11c] sm:$0xf] %vm3480_vm1, %v4122_v55  ;;  %v4120_v29 = vpack.c.bf16 %v3129_v0, %v3129_v0  ;;  %v3134_v26 = vmax.f32 %v3022_v48, 0.0  ;;  %v3014_v52 = vadd.f32 %v3013_v9, %v2645_v33  ;;  %v2677_v55 = vadd.f32 %v5842_v31, %v2308_v23 }
 0x2a1   : > { %v2679_v53 = vpop.f32.mrf.mxu1  ;;  %v4264_v28 = vpop.f32.mrf.mxu0  ;;  %v2311_v56 = vadd.f32 %v5570_v46, %v5978_v32 }
 0x2a2   : > { %3550 = vst.msk [vmem:[%s5502_s4 + $0x114] sm:$0xf] %vm3480_vm1, %v4120_v29  ;;  %v4125_v6 = vpack.c.bf16 %v3134_v26, %v3134_v26  ;;  %v3132_v50 = vmax.f32 %v3014_v52, 0.0  ;;  %v3025_v34 = vadd.f32 %v4264_v28, %v2656_v35 }
 0x2a3   : > { %v2681_v61 = vpop.f32.mrf.mxu1  ;;  %v3016_v51 = vpop.f32.mrf.mxu0  ;;  %v2680_v31 = vadd.f32 %v2679_v53, %v2311_v56 }
 0x2a4   : > { %3555 = vst.msk [vmem:[%s5502_s4 + $0x128] sm:$0xf] %vm3480_vm1, %v4125_v6  ;;  %v4123_v5 = vpack.c.bf16 %v3132_v50, %v3132_v50  ;;  %v3135_v47 = vmax.f32 %v3025_v34, 0.0  ;;  %v3017_v42 = vadd.f32 %v3016_v51, %v2648_v1 }
 0x2a5   : > { %v2684_v4 = vpop.f32.mrf.mxu1  ;;  %v4267_v19 = vpop.f32.mrf.mxu0 }
 0x2a6   : > { %3553 = vst.msk [vmem:[%s5502_s4 + $0x120] sm:$0xf] %vm3480_vm1, %v4123_v5  ;;  %v4126_v17 = vpack.c.bf16 %v3135_v47, %v3135_v47  ;;  %v3133_v11 = vmax.f32 %v3017_v42, 0.0  ;;  %v3038_v54 = vadd.f32 %v4267_v19, %v2669_v21  ;;  %v2685_v49 = vadd.f32 %v2684_v4, %v2316_v39 }
 0x2a7   : > { %v2686_v44 = vpop.f32.mrf.mxu1  ;;  %v3029_v37 = vpop.f32.mrf.mxu0 }
 0x2a8   : > { %3556 = vst.msk [vmem:[%s5502_s4 + $0x12c] sm:$0xf] %vm3480_vm1, %v4126_v17  ;;  %v4124_v18 = vpack.c.bf16 %v3133_v11, %v3133_v11  ;;  %v3138_v10 = vmax.f32 %v3038_v54, 0.0  ;;  %v3030_v22 = vadd.f32 %v3029_v37, %v2661_v63 }
 0x2a9   : > { %v2687_v16 = vpop.f32.mrf.mxu1  ;;  %v4268_v41 = vpop.f32.mrf.mxu0 }
 0x2aa   : > { %3554 = vst.msk [vmem:[%s5502_s4 + $0x124] sm:$0xf] %vm3480_vm1, %v4124_v18  ;;  %v4129_v30 = vpack.c.bf16 %v3138_v10, %v3138_v10  ;;  %v3136_v58 = vmax.f32 %v3030_v22, 0.0  ;;  %v3041_v43 = vadd.f32 %v4268_v41, %v2672_v13  ;;  %v2688_v35 = vadd.f32 %v2687_v16, %v2319_v2 }
 0x2ab   : > { %v3032_v14 = vpop.f32.mrf.mxu0  ;;  %v2689_v36 = vpop.f32.mrf.mxu1 }
 0x2ac   : > { %3559 = vst.msk [vmem:[%s5502_s4 + $0x138] sm:$0xf] %vm3480_vm1, %v4129_v30  ;;  %v4127_v38 = vpack.c.bf16 %v3136_v58, %v3136_v58  ;;  %v3139_v24 = vmax.f32 %v3041_v43, 0.0  ;;  %v3033_v62 = vadd.f32 %v3032_v14, %v2664_v25 }
 0x2ad   : > { %v4271_v33 = vpop.f32.mrf.mxu0 }
 0x2ae   : > { %3557 = vst.msk [vmem:[%s5502_s4 + $0x130] sm:$0xf] %vm3480_vm1, %v4127_v38  ;;  %v4130_v0 = vpack.c.bf16 %v3139_v24, %v3139_v24  ;;  %v3137_v48 = vmax.f32 %v3033_v62, 0.0  ;;  %v3054_v8 = vadd.f32 %v4271_v33, %v2685_v49 }
 0x2af   : > { %v3045_v9 = vpop.f32.mrf.mxu0 }
 0x2b0   : > { %3560 = vst.msk [vmem:[%s5502_s4 + $0x13c] sm:$0xf] %vm3480_vm1, %v4130_v0  ;;  %v4128_v29 = vpack.c.bf16 %v3137_v48, %v3137_v48  ;;  %v3142_v26 = vmax.f32 %v3054_v8, 0.0  ;;  %v3046_v52 = vadd.f32 %v3045_v9, %v2677_v55 }
 0x2b1   : > { %v4272_v40 = vpop.f32.mrf.mxu0 }
 0x2b2   : > { %3558 = vst.msk [vmem:[%s5502_s4 + $0x134] sm:$0xf] %vm3480_vm1, %v4128_v29  ;;  %v4133_v45 = vpack.c.bf16 %v3142_v26, %v3142_v26  ;;  %v3140_v28 = vmax.f32 %v3046_v52, 0.0  ;;  %v3057_v1 = vadd.f32 %v4272_v40, %v2688_v35 }
 0x2b3   : > { %v3048_v6 = vpop.f32.mrf.mxu0 }
 0x2b4   : > { %3563 = vst.msk [vmem:[%s5502_s4 + $0x148] sm:$0xf] %vm3480_vm1, %v4133_v45  ;;  %v4131_v46 = vpack.c.bf16 %v3140_v28, %v3140_v28  ;;  %v3143_v50 = vmax.f32 %v3057_v1, 0.0  ;;  %v3049_v34 = vadd.f32 %v3048_v6, %v2680_v31 }
 0x2b6   : > { %3561 = vst.msk [vmem:[%s5502_s4 + $0x140] sm:$0xf] %vm3480_vm1, %v4131_v46  ;;  %v4134_v20 = vpack.c.bf16 %v3143_v50, %v3143_v50  ;;  %v3141_v27 = vmax.f32 %v3049_v34, 0.0 }
 0x2b8   : > { %3564 = vst.msk [vmem:[%s5502_s4 + $0x14c] sm:$0xf] %vm3480_vm1, %v4134_v20  ;;  %v4132_v61 = vpack.c.bf16 %v3141_v27, %v3141_v27 }
 0x2ba   : > { %3562 = vst.msk [vmem:[%s5502_s4 + $0x144] sm:$0xf] %vm3480_vm1, %v4132_v61 }
 0x2bb PF: > { %s13_s14 = sadd.s32 1, %s4684_s14   ;;  %s5979_s12 = smov %s4680_s13 }
 0x2bc   : > { %p10_p5 = scmp.ge.s32.totalorder %s13_s14, 4   ;;  %s5980_s13 = smov %s5982_s15 }
 0x2be   :  { %12 = sbr.rel (!%p10_p5) target bundleno = 2 (0x2), region = 68 }

// kernel: decoder_forward.6
= control target key start
LH: loop header
LB: loop body
LE: loop exit
PB: predicated region body
PF: predicated region fallthrough
CT: control target
= control target key end

     0   :  { %s2123_s12 = smov 0   ;;  %s2125_s13 = smov 0   ;;  %s2490_s0 = inlined_call_operand.vmem [shape: bf16[1344,128], index: 0, kind: input, shape index: {}]   ;;  %s2491_s1 = inlined_call_operand.vmem [shape: bf16[128,64], index: 1, kind: input, shape index: {}]   ;;  %s2492_s2 = inlined_call_operand.vmem [shape: f32[1,64], index: 2, kind: input, shape index: {}]   ;;  %s2493_s3 = inlined_call_operand.vmem [shape: bf16[1344,64], index: 3, kind: output, shape index: {}]  }
   0x1   :  { %s2127_s14 = smov 0  }
   0x2 LB: > { %s25_s15 = sadd.s32 1, %s2097_s13  ;;  %p1615_p0 = scmp.ge.s32.totalorder %s2101_s14, 1  ;;  %s2101_s14 = sphi %s2127_s14, %s13_s14   ;;  %s2097_s13 = sphi %s2125_s13, %s2495_s13   ;;  %s2093_s12 = sphi %s2123_s12, %s2494_s12  }
   0x3   : > { %p27_p1 = scmp.ge.s32.totalorder %s25_s15, 2  ;;  %p169_p2 = scmp.lt.s32.totalorder %s2101_s14, 3 }
   0x5   : > { %s2497_s15 = smov (%p27_p1, %s25_s15), 0  ;;  %p170_p3 = pnand %p1615_p0, %p169_p2 }
   0x6   : > { %s203_s18 = smul.u32 (!%p170_p3), 84, %s2093_s12 }
   0x7   : > { %173 = sbr.rel (%p170_p3) target bundleno = 331 (0x14b), region = 32 }
   0x8   : > { %p204_p4 = scmp.lt.s32.totalorder (!%p170_p3), %s203_s18, 167 }
   0xc   : > { %v2029_v0 = vld [vmem:[%s2491_s1 + $0x38] sm:$0xff]   ;;  %v2030_v1 = vld [vmem:[%s2491_s1 + $0x30] sm:$0xff]   ;;  %v2031_v2 = vld [vmem:[%s2491_s1 + $0x28] sm:$0xff]   ;;  %s2499_s18 = smov (!%p204_p4, %s203_s18), 167  ;;  %vm1422_vm0 = vcmask 519168  }
   0xd   : > { %1889 = vmatprep.subr.bf16.mxu0 %v2029_v0  ;;  %1989 = vmatprep.subr.bf16.mxu1 %v2029_v0  ;;  %s1616_s23 = sshll.u32 %s2499_s18, 2  ;;  %v2032_v3 = vld [vmem:[%s2491_s1 + $0x20] sm:$0xff]   ;;  %v2033_v6 = vld [vmem:[%s2491_s1 + $0x18] sm:$0xff]   ;;  %v2034_v7 = vld [vmem:[%s2491_s1 + $0x10] sm:$0xff]  }
   0xe   : > { %1890 = vmatpush3.bf16.msra.mxu0 %v2029_v0  ;;  %1997 = vmatpush3.bf16.msra.mxu1 %v2029_v0  ;;  %s2161_s28 = scalar_lea.vmem %s2490_s0, %s1616_s23  ;;  %v2035_v8 = vld [vmem:[%s2491_s1 + $0x8] sm:$0xff]   ;;  %v2036_v9 = vld [vmem:[%s2491_s1] sm:$0xff]   ;;  %s2231_s17 = scalar_lea.vmem %s2493_s3, %s1616_s23 }
   0xf   : > { %1891 = vmatprep.subr.bf16.mxu0 %v2030_v1  ;;  %1990 = vmatprep.subr.bf16.mxu1 %v2030_v1  ;;  %v2037_v4 = vld [vmem:[%s2161_s28] sm:$0xff]   ;;  %v2039_v5 = vld [vmem:[%s2161_s28 + $0xb0] sm:$0xff]   ;;  %v2038_v10 = vld [vmem:[%s2161_s28 + $0x8] sm:$0xff]  }
  0x10   : > { %1905 = vmatprep.mubr.bf16.mxu0 %v2037_v4  ;;  %1949 = vmatprep.mubr.bf16.mxu1 %v2039_v5  ;;  %v2040_v11 = vld [vmem:[%s2161_s28 + $0xb8] sm:$0xff]   ;;  %v2041_v12 = vld [vmem:[%s2161_s28 + $0x10] sm:$0xff]   ;;  %v2043_v13 = vld [vmem:[%s2161_s28 + $0xc0] sm:$0xff]  }
  0x11   : > { %v2042_v14 = vld [vmem:[%s2161_s28 + $0x18] sm:$0xff]   ;;  %v2044_v15 = vld [vmem:[%s2161_s28 + $0xc8] sm:$0xff]   ;;  %v2045_v16 = vld [vmem:[%s2161_s28 + $0x20] sm:$0xff]  }
  0x12   : > { %1892 = vmatpush3.bf16.msra.mxu0 %v2030_v1  ;;  %1998 = vmatpush3.bf16.msra.mxu1 %v2030_v1  ;;  %v2047_v17 = vld [vmem:[%s2161_s28 + $0xd0] sm:$0xff]   ;;  %v2046_v18 = vld [vmem:[%s2161_s28 + $0x28] sm:$0xff]   ;;  %v2048_v19 = vld [vmem:[%s2161_s28 + $0xd8] sm:$0xff]  }
  0x13   : > { %1893 = vmatprep.subr.bf16.mxu0 %v2031_v2  ;;  %1991 = vmatprep.subr.bf16.mxu1 %v2031_v2  ;;  %v2049_v20 = vld [vmem:[%s2161_s28 + $0x30] sm:$0xff]   ;;  %v2051_v21 = vld [vmem:[%s2161_s28 + $0xe0] sm:$0xff]   ;;  %v2050_v22 = vld [vmem:[%s2161_s28 + $0x38] sm:$0xff]  }
  0x14   : > { %v2052_v23 = vld [vmem:[%s2161_s28 + $0xe8] sm:$0xff]   ;;  %v2053_v24 = vld [vmem:[%s2161_s28 + $0x40] sm:$0xff]   ;;  %v2055_v25 = vld [vmem:[%s2161_s28 + $0xf0] sm:$0xff]  }
  0x15   : > { %v2054_v26 = vld [vmem:[%s2161_s28 + $0x48] sm:$0xff]   ;;  %v2056_v27 = vld [vmem:[%s2161_s28 + $0xf8] sm:$0xff]   ;;  %v2057_v28 = vld [vmem:[%s2161_s28 + $0x50] sm:$0xff]  }
  0x16   : > { %1894 = vmatpush3.bf16.msra.mxu0 %v2031_v2  ;;  %1999 = vmatpush3.bf16.msra.mxu1 %v2031_v2  ;;  %v2059_v29 = vld [vmem:[%s2161_s28 + $0x100] sm:$0xff]   ;;  %v2058_v30 = vld [vmem:[%s2161_s28 + $0x58] sm:$0xff]   ;;  %v2060_v31 = vld [vmem:[%s2161_s28 + $0x108] sm:$0xff]  }
  0x17   : > { %1895 = vmatprep.subr.bf16.mxu0 %v2032_v3  ;;  %1992 = vmatprep.subr.bf16.mxu1 %v2032_v3  ;;  %v2061_v32 = vld [vmem:[%s2161_s28 + $0x60] sm:$0xff]   ;;  %v2063_v33 = vld [vmem:[%s2161_s28 + $0x110] sm:$0xff]   ;;  %v2062_v34 = vld [vmem:[%s2161_s28 + $0x68] sm:$0xff]  }
  0x18   : > { %v2064_v35 = vld [vmem:[%s2161_s28 + $0x118] sm:$0xff]   ;;  %v2065_v36 = vld [vmem:[%s2161_s28 + $0x70] sm:$0xff]   ;;  %v2067_v37 = vld [vmem:[%s2161_s28 + $0x120] sm:$0xff]  }
  0x19   : > { %v2066_v38 = vld [vmem:[%s2161_s28 + $0x78] sm:$0xff]   ;;  %v2068_v39 = vld [vmem:[%s2161_s28 + $0x128] sm:$0xff]   ;;  %v2069_v40 = vld [vmem:[%s2161_s28 + $0x80] sm:$0xff]  }
  0x1a   : > { %1896 = vmatpush3.bf16.msra.mxu0 %v2032_v3  ;;  %2000 = vmatpush3.bf16.msra.mxu1 %v2032_v3  ;;  %v2071_v41 = vld [vmem:[%s2161_s28 + $0x130] sm:$0xff]   ;;  %v2070_v42 = vld [vmem:[%s2161_s28 + $0x88] sm:$0xff]   ;;  %v2072_v43 = vld [vmem:[%s2161_s28 + $0x138] sm:$0xff]  }
  0x1b   : > { %1897 = vmatprep.subr.bf16.mxu0 %v2033_v6  ;;  %1993 = vmatprep.subr.bf16.mxu1 %v2033_v6  ;;  %v2073_v44 = vld [vmem:[%s2161_s28 + $0x90] sm:$0xff]   ;;  %v2075_v45 = vld [vmem:[%s2161_s28 + $0x140] sm:$0xff]   ;;  %v2074_v46 = vld [vmem:[%s2161_s28 + $0x98] sm:$0xff]  }
  0x1c   : > { %v2076_v47 = vld [vmem:[%s2161_s28 + $0x148] sm:$0xff]   ;;  %v2077_v48 = vld [vmem:[%s2161_s28 + $0xa0] sm:$0xff]  }
  0x1d   : > { %v2078_v49 = vld [vmem:[%s2161_s28 + $0xa8] sm:$0xff]   ;;  %v2220_v50 = vld [vmem:[%s2492_s2] ss:$0 sm:$0xff] }
  0x1e   : > { %1898 = vmatpush3.bf16.msra.mxu0 %v2033_v6  ;;  %2001 = vmatpush3.bf16.msra.mxu1 %v2033_v6 }
  0x1f   : > { %1899 = vmatprep.subr.bf16.mxu0 %v2034_v7  ;;  %1994 = vmatprep.subr.bf16.mxu1 %v2034_v7 }
  0x22   : > { %1900 = vmatpush3.bf16.msra.mxu0 %v2034_v7  ;;  %2002 = vmatpush3.bf16.msra.mxu1 %v2034_v7 }
  0x23   : > { %1901 = vmatprep.subr.bf16.mxu0 %v2035_v8  ;;  %1995 = vmatprep.subr.bf16.mxu1 %v2035_v8 }
  0x26   : > { %1902 = vmatpush3.bf16.msra.mxu0 %v2035_v8  ;;  %2003 = vmatpush3.bf16.msra.mxu1 %v2035_v8 }
  0x27   : > { %1903 = vmatprep.subr.bf16.mxu0 %v2036_v9  ;;  %1996 = vmatprep.subr.bf16.mxu1 %v2036_v9 }
  0x2a   : > { %1904 = vmatpush3.bf16.msra.mxu0 %v2036_v9  ;;  %2004 = vmatpush3.bf16.msra.mxu1 %v2036_v9 }
  0x2d   : > { %1906 = vmatmul.mubr.bf16.vlgmr.msra.gmra.mxu0 %v2038_v10  ;;  %1950 = vmatmul.mubr.bf16.vlgmr.msra.gmra.mxu1 %v2040_v11 }
  0x2e   : > { %1909 = vmatprep.mubr.bf16.mxu0 %v2041_v12  ;;  %1953 = vmatprep.mubr.bf16.mxu1 %v2043_v13 }
  0x35   : > { %1910 = vmatmul.mubr.bf16.gmra.mxu0 %v2042_v14  ;;  %1954 = vmatmul.mubr.bf16.gmra.mxu1 %v2044_v15 }
  0x36   : > { %1913 = vmatprep.mubr.bf16.mxu0 %v2045_v16  ;;  %1957 = vmatprep.mubr.bf16.mxu1 %v2047_v17 }
  0x3d   : > { %1914 = vmatmul.mubr.bf16.gmra.mxu0 %v2046_v18  ;;  %1958 = vmatmul.mubr.bf16.gmra.mxu1 %v2048_v19 }
  0x3e   : > { %1917 = vmatprep.mubr.bf16.mxu0 %v2049_v20  ;;  %1961 = vmatprep.mubr.bf16.mxu1 %v2051_v21 }
  0x45   : > { %1918 = vmatmul.mubr.bf16.gmra.mxu0 %v2050_v22  ;;  %1962 = vmatmul.mubr.bf16.gmra.mxu1 %v2052_v23 }
  0x46   : > { %1921 = vmatprep.mubr.bf16.mxu0 %v2053_v24  ;;  %1965 = vmatprep.mubr.bf16.mxu1 %v2055_v25 }
  0x4d   : > { %1922 = vmatmul.mubr.bf16.gmra.mxu0 %v2054_v26  ;;  %1966 = vmatmul.mubr.bf16.gmra.mxu1 %v2056_v27 }
  0x4e   : > { %1925 = vmatprep.mubr.bf16.mxu0 %v2057_v28  ;;  %1969 = vmatprep.mubr.bf16.mxu1 %v2059_v29 }
  0x55   : > { %1926 = vmatmul.mubr.bf16.gmra.mxu0 %v2058_v30  ;;  %1970 = vmatmul.mubr.bf16.gmra.mxu1 %v2060_v31 }
  0x56   : > { %1929 = vmatprep.mubr.bf16.mxu0 %v2061_v32  ;;  %1973 = vmatprep.mubr.bf16.mxu1 %v2063_v33 }
  0x5d   : > { %1930 = vmatmul.mubr.bf16.gmra.mxu0 %v2062_v34  ;;  %1974 = vmatmul.mubr.bf16.gmra.mxu1 %v2064_v35 }
  0x5e   : > { %1933 = vmatprep.mubr.bf16.mxu0 %v2065_v36  ;;  %1977 = vmatprep.mubr.bf16.mxu1 %v2067_v37 }
  0x65   : > { %1934 = vmatmul.mubr.bf16.gmra.mxu0 %v2066_v38  ;;  %1978 = vmatmul.mubr.bf16.gmra.mxu1 %v2068_v39 }
  0x66   : > { %1937 = vmatprep.mubr.bf16.mxu0 %v2069_v40  ;;  %1981 = vmatprep.mubr.bf16.mxu1 %v2071_v41 }
  0x6d   : > { %1938 = vmatmul.mubr.bf16.gmra.mxu0 %v2070_v42  ;;  %1982 = vmatmul.mubr.bf16.gmra.mxu1 %v2072_v43 }
  0x6e   : > { %1941 = vmatprep.mubr.bf16.mxu0 %v2073_v44  ;;  %1985 = vmatprep.mubr.bf16.mxu1 %v2075_v45 }
  0x75   : > { %1942 = vmatmul.mubr.bf16.gmra.mxu0 %v2074_v46  ;;  %1986 = vmatmul.mubr.bf16.gmra.mxu1 %v2076_v47 }
  0x76   : > { %1945 = vmatprep.mubr.bf16.mxu0 %v2077_v48 }
  0x7d   : > { %1946 = vmatmul.mubr.bf16.gmra.mxu0 %v2078_v49 }
  0xed   : > { %v1907_v51 = vpop.f32.mrf.mxu0  ;;  %v1951_v52 = vpop.f32.mrf.mxu1 }
  0xee   : > { %v676_v53 = vadd.f32 %v1907_v51, %v2220_v50  ;;  %v852_v54 = vadd.f32 %v1951_v52, %v2220_v50 }
  0xef   : > { %v667_v55 = vpop.f32.mrf.mxu0  ;;  %v843_v56 = vpop.f32.mrf.mxu1 }
  0xf0   : > { %v1004_v57 = vmax.f32 %v676_v53, 0.0  ;;  %v668_v58 = vadd.f32 %v2220_v50, %v667_v55  ;;  %v1048_v59 = vmax.f32 %v852_v54, 0.0  ;;  %v844_v60 = vadd.f32 %v2220_v50, %v843_v56 }
  0xf1   : > { %v1908_v61 = vpop.f32.mrf.mxu0  ;;  %v1952_v62 = vpop.f32.mrf.mxu1 }
  0xf2   : > { %v1757_v63 = vpack.c.bf16 %v1004_v57, %v1004_v57  ;;  %v1002_v0 = vmax.f32 %v668_v58, 0.0  ;;  %v1801_v1 = vpack.c.bf16 %v1048_v59, %v1048_v59  ;;  %v679_v2 = vadd.f32 %v1908_v61, %v2220_v50 }
  0xf3   : > { %v1046_v3 = vmax.f32 %v844_v60, 0.0  ;;  %v670_v4 = vpop.f32.mrf.mxu0  ;;  %v855_v5 = vadd.f32 %v1952_v62, %v2220_v50  ;;  %v846_v6 = vpop.f32.mrf.mxu1 }
  0xf4   : > { %1425 = vst.msk [vmem:[%s2231_s17 + $0x8] sm:$0xf] %vm1422_vm0, %v1757_v63  ;;  %v1755_v7 = vpack.c.bf16 %v1002_v0, %v1002_v0  ;;  %1469 = vst.msk [vmem:[%s2231_s17 + $0xb8] sm:$0xf] %vm1422_vm0, %v1801_v1  ;;  %v1005_v8 = vmax.f32 %v679_v2, 0.0  ;;  %v671_v9 = vadd.f32 %v2220_v50, %v670_v4  ;;  %v847_v10 = vadd.f32 %v2220_v50, %v846_v6 }
  0xf5   : > { %v1799_v11 = vpack.c.bf16 %v1046_v3, %v1046_v3  ;;  %v1049_v12 = vmax.f32 %v855_v5, 0.0  ;;  %v1911_v13 = vpop.f32.mrf.mxu0  ;;  %v1955_v14 = vpop.f32.mrf.mxu1 }
  0xf6   : > { %1423 = vst.msk [vmem:[%s2231_s17] sm:$0xf] %vm1422_vm0, %v1755_v7  ;;  %v1758_v15 = vpack.c.bf16 %v1005_v8, %v1005_v8  ;;  %v1003_v16 = vmax.f32 %v671_v9, 0.0  ;;  %v692_v17 = vadd.f32 %v1911_v13, %v2220_v50  ;;  %v1047_v18 = vmax.f32 %v847_v10, 0.0 }
  0xf7   : > { %1467 = vst.msk [vmem:[%s2231_s17 + $0xb0] sm:$0xf] %vm1422_vm0, %v1799_v11  ;;  %v1802_v19 = vpack.c.bf16 %v1049_v12, %v1049_v12  ;;  %v683_v20 = vpop.f32.mrf.mxu0  ;;  %v868_v21 = vadd.f32 %v1955_v14, %v2220_v50  ;;  %v859_v22 = vpop.f32.mrf.mxu1 }
  0xf8   : > { %1426 = vst.msk [vmem:[%s2231_s17 + $0xc] sm:$0xf] %vm1422_vm0, %v1758_v15  ;;  %v1756_v23 = vpack.c.bf16 %v1003_v16, %v1003_v16  ;;  %v1008_v24 = vmax.f32 %v692_v17, 0.0  ;;  %v1800_v25 = vpack.c.bf16 %v1047_v18, %v1047_v18  ;;  %v684_v26 = vadd.f32 %v2220_v50, %v683_v20 }
  0xf9   : > { %1470 = vst.msk [vmem:[%s2231_s17 + $0xbc] sm:$0xf] %vm1422_vm0, %v1802_v19  ;;  %v1052_v27 = vmax.f32 %v868_v21, 0.0  ;;  %v1912_v28 = vpop.f32.mrf.mxu0  ;;  %v860_v29 = vadd.f32 %v2220_v50, %v859_v22  ;;  %v1956_v30 = vpop.f32.mrf.mxu1 }
  0xfa   : > { %1424 = vst.msk [vmem:[%s2231_s17 + $0x4] sm:$0xf] %vm1422_vm0, %v1756_v23  ;;  %v1761_v31 = vpack.c.bf16 %v1008_v24, %v1008_v24  ;;  %1468 = vst.msk [vmem:[%s2231_s17 + $0xb4] sm:$0xf] %vm1422_vm0, %v1800_v25  ;;  %v1006_v32 = vmax.f32 %v684_v26, 0.0  ;;  %v695_v33 = vadd.f32 %v1912_v28, %v2220_v50  ;;  %v871_v34 = vadd.f32 %v1956_v30, %v2220_v50 }
  0xfb   : > { %v1805_v35 = vpack.c.bf16 %v1052_v27, %v1052_v27  ;;  %v1050_v36 = vmax.f32 %v860_v29, 0.0  ;;  %v686_v37 = vpop.f32.mrf.mxu0  ;;  %v862_v38 = vpop.f32.mrf.mxu1 }
  0xfc   : > { %1429 = vst.msk [vmem:[%s2231_s17 + $0x18] sm:$0xf] %vm1422_vm0, %v1761_v31  ;;  %v1759_v39 = vpack.c.bf16 %v1006_v32, %v1006_v32  ;;  %v1009_v40 = vmax.f32 %v695_v33, 0.0  ;;  %v687_v41 = vadd.f32 %v2220_v50, %v686_v37  ;;  %v1053_v42 = vmax.f32 %v871_v34, 0.0 }
  0xfd   : > { %1473 = vst.msk [vmem:[%s2231_s17 + $0xc8] sm:$0xf] %vm1422_vm0, %v1805_v35  ;;  %v1803_v43 = vpack.c.bf16 %v1050_v36, %v1050_v36  ;;  %v1915_v44 = vpop.f32.mrf.mxu0  ;;  %v863_v45 = vadd.f32 %v2220_v50, %v862_v38  ;;  %v1959_v46 = vpop.f32.mrf.mxu1 }
  0xfe   : > { %1427 = vst.msk [vmem:[%s2231_s17 + $0x10] sm:$0xf] %vm1422_vm0, %v1759_v39  ;;  %v1762_v47 = vpack.c.bf16 %v1009_v40, %v1009_v40  ;;  %v1007_v48 = vmax.f32 %v687_v41, 0.0  ;;  %v1806_v49 = vpack.c.bf16 %v1053_v42, %v1053_v42  ;;  %v708_v51 = vadd.f32 %v1915_v44, %v2220_v50 }
  0xff   : > { %1471 = vst.msk [vmem:[%s2231_s17 + $0xc0] sm:$0xf] %vm1422_vm0, %v1803_v43  ;;  %v1051_v52 = vmax.f32 %v863_v45, 0.0  ;;  %v699_v53 = vpop.f32.mrf.mxu0  ;;  %v884_v54 = vadd.f32 %v1959_v46, %v2220_v50  ;;  %v875_v55 = vpop.f32.mrf.mxu1 }
 0x100   : > { %1430 = vst.msk [vmem:[%s2231_s17 + $0x1c] sm:$0xf] %vm1422_vm0, %v1762_v47  ;;  %v1760_v56 = vpack.c.bf16 %v1007_v48, %v1007_v48  ;;  %1474 = vst.msk [vmem:[%s2231_s17 + $0xcc] sm:$0xf] %vm1422_vm0, %v1806_v49  ;;  %v1012_v57 = vmax.f32 %v708_v51, 0.0  ;;  %v700_v58 = vadd.f32 %v2220_v50, %v699_v53  ;;  %v876_v59 = vadd.f32 %v2220_v50, %v875_v55 }
 0x101   : > { %v1804_v60 = vpack.c.bf16 %v1051_v52, %v1051_v52  ;;  %v1056_v61 = vmax.f32 %v884_v54, 0.0  ;;  %v1916_v62 = vpop.f32.mrf.mxu0  ;;  %v1960_v63 = vpop.f32.mrf.mxu1 }
 0x102   : > { %1428 = vst.msk [vmem:[%s2231_s17 + $0x14] sm:$0xf] %vm1422_vm0, %v1760_v56  ;;  %v1765_v0 = vpack.c.bf16 %v1012_v57, %v1012_v57  ;;  %v1010_v1 = vmax.f32 %v700_v58, 0.0  ;;  %v711_v2 = vadd.f32 %v1916_v62, %v2220_v50  ;;  %v1054_v3 = vmax.f32 %v876_v59, 0.0 }
 0x103   : > { %1472 = vst.msk [vmem:[%s2231_s17 + $0xc4] sm:$0xf] %vm1422_vm0, %v1804_v60  ;;  %v1809_v4 = vpack.c.bf16 %v1056_v61, %v1056_v61  ;;  %v702_v5 = vpop.f32.mrf.mxu0  ;;  %v887_v6 = vadd.f32 %v1960_v63, %v2220_v50  ;;  %v878_v7 = vpop.f32.mrf.mxu1 }
 0x104   : > { %1433 = vst.msk [vmem:[%s2231_s17 + $0x28] sm:$0xf] %vm1422_vm0, %v1765_v0  ;;  %v1763_v8 = vpack.c.bf16 %v1010_v1, %v1010_v1  ;;  %v1013_v9 = vmax.f32 %v711_v2, 0.0  ;;  %v1807_v10 = vpack.c.bf16 %v1054_v3, %v1054_v3  ;;  %v703_v11 = vadd.f32 %v2220_v50, %v702_v5 }
 0x105   : > { %1477 = vst.msk [vmem:[%s2231_s17 + $0xd8] sm:$0xf] %vm1422_vm0, %v1809_v4  ;;  %v1057_v12 = vmax.f32 %v887_v6, 0.0  ;;  %v1919_v13 = vpop.f32.mrf.mxu0  ;;  %v879_v14 = vadd.f32 %v2220_v50, %v878_v7  ;;  %v1963_v15 = vpop.f32.mrf.mxu1 }
 0x106   : > { %1431 = vst.msk [vmem:[%s2231_s17 + $0x20] sm:$0xf] %vm1422_vm0, %v1763_v8  ;;  %v1766_v16 = vpack.c.bf16 %v1013_v9, %v1013_v9  ;;  %1475 = vst.msk [vmem:[%s2231_s17 + $0xd0] sm:$0xf] %vm1422_vm0, %v1807_v10  ;;  %v1011_v17 = vmax.f32 %v703_v11, 0.0  ;;  %v724_v18 = vadd.f32 %v1919_v13, %v2220_v50  ;;  %v900_v19 = vadd.f32 %v1963_v15, %v2220_v50 }
 0x107   : > { %v1810_v20 = vpack.c.bf16 %v1057_v12, %v1057_v12  ;;  %v1055_v21 = vmax.f32 %v879_v14, 0.0  ;;  %v715_v22 = vpop.f32.mrf.mxu0  ;;  %v891_v23 = vpop.f32.mrf.mxu1 }
 0x108   : > { %1434 = vst.msk [vmem:[%s2231_s17 + $0x2c] sm:$0xf] %vm1422_vm0, %v1766_v16  ;;  %v1764_v24 = vpack.c.bf16 %v1011_v17, %v1011_v17  ;;  %v1016_v25 = vmax.f32 %v724_v18, 0.0  ;;  %v716_v26 = vadd.f32 %v2220_v50, %v715_v22  ;;  %v1060_v27 = vmax.f32 %v900_v19, 0.0 }
 0x109   : > { %1478 = vst.msk [vmem:[%s2231_s17 + $0xdc] sm:$0xf] %vm1422_vm0, %v1810_v20  ;;  %v1808_v28 = vpack.c.bf16 %v1055_v21, %v1055_v21  ;;  %v1920_v29 = vpop.f32.mrf.mxu0  ;;  %v892_v30 = vadd.f32 %v2220_v50, %v891_v23  ;;  %v1964_v31 = vpop.f32.mrf.mxu1 }
 0x10a   : > { %1432 = vst.msk [vmem:[%s2231_s17 + $0x24] sm:$0xf] %vm1422_vm0, %v1764_v24  ;;  %v1769_v32 = vpack.c.bf16 %v1016_v25, %v1016_v25  ;;  %v1014_v33 = vmax.f32 %v716_v26, 0.0  ;;  %v1813_v34 = vpack.c.bf16 %v1060_v27, %v1060_v27  ;;  %v727_v35 = vadd.f32 %v1920_v29, %v2220_v50 }
 0x10b   : > { %1476 = vst.msk [vmem:[%s2231_s17 + $0xd4] sm:$0xf] %vm1422_vm0, %v1808_v28  ;;  %v1058_v36 = vmax.f32 %v892_v30, 0.0  ;;  %v718_v37 = vpop.f32.mrf.mxu0  ;;  %v903_v38 = vadd.f32 %v1964_v31, %v2220_v50  ;;  %v894_v39 = vpop.f32.mrf.mxu1 }
 0x10c   : > { %1437 = vst.msk [vmem:[%s2231_s17 + $0x38] sm:$0xf] %vm1422_vm0, %v1769_v32  ;;  %v1767_v40 = vpack.c.bf16 %v1014_v33, %v1014_v33  ;;  %1481 = vst.msk [vmem:[%s2231_s17 + $0xe8] sm:$0xf] %vm1422_vm0, %v1813_v34  ;;  %v1017_v41 = vmax.f32 %v727_v35, 0.0  ;;  %v719_v42 = vadd.f32 %v2220_v50, %v718_v37  ;;  %v895_v43 = vadd.f32 %v2220_v50, %v894_v39 }
 0x10d   : > { %v1811_v44 = vpack.c.bf16 %v1058_v36, %v1058_v36  ;;  %v1061_v45 = vmax.f32 %v903_v38, 0.0  ;;  %v1923_v46 = vpop.f32.mrf.mxu0  ;;  %v1967_v47 = vpop.f32.mrf.mxu1 }
 0x10e   : > { %1435 = vst.msk [vmem:[%s2231_s17 + $0x30] sm:$0xf] %vm1422_vm0, %v1767_v40  ;;  %v1770_v48 = vpack.c.bf16 %v1017_v41, %v1017_v41  ;;  %v1015_v49 = vmax.f32 %v719_v42, 0.0  ;;  %v740_v51 = vadd.f32 %v1923_v46, %v2220_v50  ;;  %v1059_v52 = vmax.f32 %v895_v43, 0.0 }
 0x10f   : > { %1479 = vst.msk [vmem:[%s2231_s17 + $0xe0] sm:$0xf] %vm1422_vm0, %v1811_v44  ;;  %v1814_v53 = vpack.c.bf16 %v1061_v45, %v1061_v45  ;;  %v731_v54 = vpop.f32.mrf.mxu0  ;;  %v916_v55 = vadd.f32 %v1967_v47, %v2220_v50  ;;  %v907_v56 = vpop.f32.mrf.mxu1 }
 0x110   : > { %1438 = vst.msk [vmem:[%s2231_s17 + $0x3c] sm:$0xf] %vm1422_vm0, %v1770_v48  ;;  %v1768_v57 = vpack.c.bf16 %v1015_v49, %v1015_v49  ;;  %v1020_v58 = vmax.f32 %v740_v51, 0.0  ;;  %v1812_v59 = vpack.c.bf16 %v1059_v52, %v1059_v52  ;;  %v732_v60 = vadd.f32 %v2220_v50, %v731_v54 }
 0x111   : > { %1482 = vst.msk [vmem:[%s2231_s17 + $0xec] sm:$0xf] %vm1422_vm0, %v1814_v53  ;;  %v1064_v61 = vmax.f32 %v916_v55, 0.0  ;;  %v1924_v62 = vpop.f32.mrf.mxu0  ;;  %v908_v63 = vadd.f32 %v2220_v50, %v907_v56  ;;  %v1968_v0 = vpop.f32.mrf.mxu1 }
 0x112   : > { %1436 = vst.msk [vmem:[%s2231_s17 + $0x34] sm:$0xf] %vm1422_vm0, %v1768_v57  ;;  %v1773_v1 = vpack.c.bf16 %v1020_v58, %v1020_v58  ;;  %1480 = vst.msk [vmem:[%s2231_s17 + $0xe4] sm:$0xf] %vm1422_vm0, %v1812_v59  ;;  %v1018_v2 = vmax.f32 %v732_v60, 0.0  ;;  %v743_v3 = vadd.f32 %v1924_v62, %v2220_v50  ;;  %v919_v4 = vadd.f32 %v1968_v0, %v2220_v50 }
 0x113   : > { %v1817_v5 = vpack.c.bf16 %v1064_v61, %v1064_v61  ;;  %v1062_v6 = vmax.f32 %v908_v63, 0.0  ;;  %v734_v7 = vpop.f32.mrf.mxu0  ;;  %v910_v8 = vpop.f32.mrf.mxu1 }
 0x114   : > { %1441 = vst.msk [vmem:[%s2231_s17 + $0x48] sm:$0xf] %vm1422_vm0, %v1773_v1  ;;  %v1771_v9 = vpack.c.bf16 %v1018_v2, %v1018_v2  ;;  %v1021_v10 = vmax.f32 %v743_v3, 0.0  ;;  %v735_v11 = vadd.f32 %v2220_v50, %v734_v7  ;;  %v1065_v12 = vmax.f32 %v919_v4, 0.0 }
 0x115   : > { %1485 = vst.msk [vmem:[%s2231_s17 + $0xf8] sm:$0xf] %vm1422_vm0, %v1817_v5  ;;  %v1815_v13 = vpack.c.bf16 %v1062_v6, %v1062_v6  ;;  %v1927_v14 = vpop.f32.mrf.mxu0  ;;  %v911_v15 = vadd.f32 %v2220_v50, %v910_v8  ;;  %v1971_v16 = vpop.f32.mrf.mxu1 }
 0x116   : > { %1439 = vst.msk [vmem:[%s2231_s17 + $0x40] sm:$0xf] %vm1422_vm0, %v1771_v9  ;;  %v1774_v17 = vpack.c.bf16 %v1021_v10, %v1021_v10  ;;  %v1019_v18 = vmax.f32 %v735_v11, 0.0  ;;  %v1818_v19 = vpack.c.bf16 %v1065_v12, %v1065_v12  ;;  %v756_v20 = vadd.f32 %v1927_v14, %v2220_v50 }
 0x117   : > { %1483 = vst.msk [vmem:[%s2231_s17 + $0xf0] sm:$0xf] %vm1422_vm0, %v1815_v13  ;;  %v1063_v21 = vmax.f32 %v911_v15, 0.0  ;;  %v747_v22 = vpop.f32.mrf.mxu0  ;;  %v932_v23 = vadd.f32 %v1971_v16, %v2220_v50  ;;  %v923_v24 = vpop.f32.mrf.mxu1 }
 0x118   : > { %1442 = vst.msk [vmem:[%s2231_s17 + $0x4c] sm:$0xf] %vm1422_vm0, %v1774_v17  ;;  %v1772_v25 = vpack.c.bf16 %v1019_v18, %v1019_v18  ;;  %1486 = vst.msk [vmem:[%s2231_s17 + $0xfc] sm:$0xf] %vm1422_vm0, %v1818_v19  ;;  %v1024_v26 = vmax.f32 %v756_v20, 0.0  ;;  %v748_v27 = vadd.f32 %v2220_v50, %v747_v22  ;;  %v924_v28 = vadd.f32 %v2220_v50, %v923_v24 }
 0x119   : > { %v1816_v29 = vpack.c.bf16 %v1063_v21, %v1063_v21  ;;  %v1068_v30 = vmax.f32 %v932_v23, 0.0  ;;  %v1928_v31 = vpop.f32.mrf.mxu0  ;;  %v1972_v32 = vpop.f32.mrf.mxu1 }
 0x11a   : > { %1440 = vst.msk [vmem:[%s2231_s17 + $0x44] sm:$0xf] %vm1422_vm0, %v1772_v25  ;;  %v1777_v33 = vpack.c.bf16 %v1024_v26, %v1024_v26  ;;  %v1022_v34 = vmax.f32 %v748_v27, 0.0  ;;  %v759_v35 = vadd.f32 %v1928_v31, %v2220_v50  ;;  %v1066_v36 = vmax.f32 %v924_v28, 0.0 }
 0x11b   : > { %1484 = vst.msk [vmem:[%s2231_s17 + $0xf4] sm:$0xf] %vm1422_vm0, %v1816_v29  ;;  %v1821_v37 = vpack.c.bf16 %v1068_v30, %v1068_v30  ;;  %v750_v38 = vpop.f32.mrf.mxu0  ;;  %v935_v39 = vadd.f32 %v1972_v32, %v2220_v50  ;;  %v926_v40 = vpop.f32.mrf.mxu1 }
 0x11c   : > { %1445 = vst.msk [vmem:[%s2231_s17 + $0x58] sm:$0xf] %vm1422_vm0, %v1777_v33  ;;  %v1775_v41 = vpack.c.bf16 %v1022_v34, %v1022_v34  ;;  %v1025_v42 = vmax.f32 %v759_v35, 0.0  ;;  %v1819_v43 = vpack.c.bf16 %v1066_v36, %v1066_v36  ;;  %v751_v44 = vadd.f32 %v2220_v50, %v750_v38 }
 0x11d   : > { %1489 = vst.msk [vmem:[%s2231_s17 + $0x108] sm:$0xf] %vm1422_vm0, %v1821_v37  ;;  %v1069_v45 = vmax.f32 %v935_v39, 0.0  ;;  %v1931_v46 = vpop.f32.mrf.mxu0  ;;  %v927_v47 = vadd.f32 %v2220_v50, %v926_v40  ;;  %v1975_v48 = vpop.f32.mrf.mxu1 }
 0x11e   : > { %1443 = vst.msk [vmem:[%s2231_s17 + $0x50] sm:$0xf] %vm1422_vm0, %v1775_v41  ;;  %v1778_v49 = vpack.c.bf16 %v1025_v42, %v1025_v42  ;;  %1487 = vst.msk [vmem:[%s2231_s17 + $0x100] sm:$0xf] %vm1422_vm0, %v1819_v43  ;;  %v1023_v51 = vmax.f32 %v751_v44, 0.0  ;;  %v772_v52 = vadd.f32 %v1931_v46, %v2220_v50  ;;  %v948_v53 = vadd.f32 %v1975_v48, %v2220_v50 }
 0x11f   : > { %v1822_v54 = vpack.c.bf16 %v1069_v45, %v1069_v45  ;;  %v1067_v55 = vmax.f32 %v927_v47, 0.0  ;;  %v763_v56 = vpop.f32.mrf.mxu0  ;;  %v939_v57 = vpop.f32.mrf.mxu1 }
 0x120   : > { %1446 = vst.msk [vmem:[%s2231_s17 + $0x5c] sm:$0xf] %vm1422_vm0, %v1778_v49  ;;  %v1776_v58 = vpack.c.bf16 %v1023_v51, %v1023_v51  ;;  %v1028_v59 = vmax.f32 %v772_v52, 0.0  ;;  %v764_v60 = vadd.f32 %v2220_v50, %v763_v56  ;;  %v1072_v61 = vmax.f32 %v948_v53, 0.0 }
 0x121   : > { %1490 = vst.msk [vmem:[%s2231_s17 + $0x10c] sm:$0xf] %vm1422_vm0, %v1822_v54  ;;  %v1820_v62 = vpack.c.bf16 %v1067_v55, %v1067_v55  ;;  %v1932_v63 = vpop.f32.mrf.mxu0  ;;  %v940_v0 = vadd.f32 %v2220_v50, %v939_v57  ;;  %v1976_v1 = vpop.f32.mrf.mxu1 }
 0x122   : > { %1444 = vst.msk [vmem:[%s2231_s17 + $0x54] sm:$0xf] %vm1422_vm0, %v1776_v58  ;;  %v1781_v2 = vpack.c.bf16 %v1028_v59, %v1028_v59  ;;  %v1026_v3 = vmax.f32 %v764_v60, 0.0  ;;  %v1825_v4 = vpack.c.bf16 %v1072_v61, %v1072_v61  ;;  %v775_v5 = vadd.f32 %v1932_v63, %v2220_v50 }
 0x123   : > { %1488 = vst.msk [vmem:[%s2231_s17 + $0x104] sm:$0xf] %vm1422_vm0, %v1820_v62  ;;  %v1070_v6 = vmax.f32 %v940_v0, 0.0  ;;  %v766_v7 = vpop.f32.mrf.mxu0  ;;  %v951_v8 = vadd.f32 %v1976_v1, %v2220_v50  ;;  %v942_v9 = vpop.f32.mrf.mxu1 }
 0x124   : > { %1449 = vst.msk [vmem:[%s2231_s17 + $0x68] sm:$0xf] %vm1422_vm0, %v1781_v2  ;;  %v1779_v10 = vpack.c.bf16 %v1026_v3, %v1026_v3  ;;  %1493 = vst.msk [vmem:[%s2231_s17 + $0x118] sm:$0xf] %vm1422_vm0, %v1825_v4  ;;  %v1029_v11 = vmax.f32 %v775_v5, 0.0  ;;  %v767_v12 = vadd.f32 %v2220_v50, %v766_v7  ;;  %v943_v13 = vadd.f32 %v2220_v50, %v942_v9 }
 0x125   : > { %v1823_v14 = vpack.c.bf16 %v1070_v6, %v1070_v6  ;;  %v1073_v15 = vmax.f32 %v951_v8, 0.0  ;;  %v1935_v16 = vpop.f32.mrf.mxu0  ;;  %v1979_v17 = vpop.f32.mrf.mxu1 }
 0x126   : > { %1447 = vst.msk [vmem:[%s2231_s17 + $0x60] sm:$0xf] %vm1422_vm0, %v1779_v10  ;;  %v1782_v18 = vpack.c.bf16 %v1029_v11, %v1029_v11  ;;  %v1027_v19 = vmax.f32 %v767_v12, 0.0  ;;  %v788_v20 = vadd.f32 %v1935_v16, %v2220_v50  ;;  %v1071_v21 = vmax.f32 %v943_v13, 0.0 }
 0x127   : > { %1491 = vst.msk [vmem:[%s2231_s17 + $0x110] sm:$0xf] %vm1422_vm0, %v1823_v14  ;;  %v1826_v22 = vpack.c.bf16 %v1073_v15, %v1073_v15  ;;  %v779_v23 = vpop.f32.mrf.mxu0  ;;  %v964_v24 = vadd.f32 %v1979_v17, %v2220_v50  ;;  %v955_v25 = vpop.f32.mrf.mxu1 }
 0x128   : > { %1450 = vst.msk [vmem:[%s2231_s17 + $0x6c] sm:$0xf] %vm1422_vm0, %v1782_v18  ;;  %v1780_v26 = vpack.c.bf16 %v1027_v19, %v1027_v19  ;;  %v1032_v27 = vmax.f32 %v788_v20, 0.0  ;;  %v1824_v28 = vpack.c.bf16 %v1071_v21, %v1071_v21  ;;  %v780_v29 = vadd.f32 %v2220_v50, %v779_v23 }
 0x129   : > { %1494 = vst.msk [vmem:[%s2231_s17 + $0x11c] sm:$0xf] %vm1422_vm0, %v1826_v22  ;;  %v1076_v30 = vmax.f32 %v964_v24, 0.0  ;;  %v1936_v31 = vpop.f32.mrf.mxu0  ;;  %v956_v32 = vadd.f32 %v2220_v50, %v955_v25  ;;  %v1980_v33 = vpop.f32.mrf.mxu1 }
 0x12a   : > { %1448 = vst.msk [vmem:[%s2231_s17 + $0x64] sm:$0xf] %vm1422_vm0, %v1780_v26  ;;  %v1785_v34 = vpack.c.bf16 %v1032_v27, %v1032_v27  ;;  %1492 = vst.msk [vmem:[%s2231_s17 + $0x114] sm:$0xf] %vm1422_vm0, %v1824_v28  ;;  %v1030_v35 = vmax.f32 %v780_v29, 0.0  ;;  %v791_v36 = vadd.f32 %v1936_v31, %v2220_v50  ;;  %v967_v37 = vadd.f32 %v1980_v33, %v2220_v50 }
 0x12b   : > { %v1829_v38 = vpack.c.bf16 %v1076_v30, %v1076_v30  ;;  %v1074_v39 = vmax.f32 %v956_v32, 0.0  ;;  %v782_v40 = vpop.f32.mrf.mxu0  ;;  %v958_v41 = vpop.f32.mrf.mxu1 }
 0x12c   : > { %1453 = vst.msk [vmem:[%s2231_s17 + $0x78] sm:$0xf] %vm1422_vm0, %v1785_v34  ;;  %v1783_v42 = vpack.c.bf16 %v1030_v35, %v1030_v35  ;;  %v1033_v43 = vmax.f32 %v791_v36, 0.0  ;;  %v783_v44 = vadd.f32 %v2220_v50, %v782_v40  ;;  %v1077_v45 = vmax.f32 %v967_v37, 0.0 }
 0x12d   : > { %1497 = vst.msk [vmem:[%s2231_s17 + $0x128] sm:$0xf] %vm1422_vm0, %v1829_v38  ;;  %v1827_v46 = vpack.c.bf16 %v1074_v39, %v1074_v39  ;;  %v1939_v47 = vpop.f32.mrf.mxu0  ;;  %v959_v48 = vadd.f32 %v2220_v50, %v958_v41  ;;  %v1983_v49 = vpop.f32.mrf.mxu1 }
 0x12e   : > { %1451 = vst.msk [vmem:[%s2231_s17 + $0x70] sm:$0xf] %vm1422_vm0, %v1783_v42  ;;  %v1786_v51 = vpack.c.bf16 %v1033_v43, %v1033_v43  ;;  %v1031_v52 = vmax.f32 %v783_v44, 0.0  ;;  %v1830_v53 = vpack.c.bf16 %v1077_v45, %v1077_v45  ;;  %v804_v54 = vadd.f32 %v1939_v47, %v2220_v50 }
 0x12f   : > { %1495 = vst.msk [vmem:[%s2231_s17 + $0x120] sm:$0xf] %vm1422_vm0, %v1827_v46  ;;  %v1075_v55 = vmax.f32 %v959_v48, 0.0  ;;  %v795_v56 = vpop.f32.mrf.mxu0  ;;  %v980_v57 = vadd.f32 %v1983_v49, %v2220_v50  ;;  %v971_v58 = vpop.f32.mrf.mxu1 }
 0x130   : > { %1454 = vst.msk [vmem:[%s2231_s17 + $0x7c] sm:$0xf] %vm1422_vm0, %v1786_v51  ;;  %v1784_v59 = vpack.c.bf16 %v1031_v52, %v1031_v52  ;;  %1498 = vst.msk [vmem:[%s2231_s17 + $0x12c] sm:$0xf] %vm1422_vm0, %v1830_v53  ;;  %v1036_v60 = vmax.f32 %v804_v54, 0.0  ;;  %v796_v61 = vadd.f32 %v2220_v50, %v795_v56  ;;  %v972_v62 = vadd.f32 %v2220_v50, %v971_v58 }
 0x131   : > { %v1828_v63 = vpack.c.bf16 %v1075_v55, %v1075_v55  ;;  %v1080_v0 = vmax.f32 %v980_v57, 0.0  ;;  %v1940_v1 = vpop.f32.mrf.mxu0  ;;  %v1984_v2 = vpop.f32.mrf.mxu1 }
 0x132   : > { %1452 = vst.msk [vmem:[%s2231_s17 + $0x74] sm:$0xf] %vm1422_vm0, %v1784_v59  ;;  %v1789_v3 = vpack.c.bf16 %v1036_v60, %v1036_v60  ;;  %v1034_v4 = vmax.f32 %v796_v61, 0.0  ;;  %v807_v5 = vadd.f32 %v1940_v1, %v2220_v50  ;;  %v1078_v6 = vmax.f32 %v972_v62, 0.0 }
 0x133   : > { %1496 = vst.msk [vmem:[%s2231_s17 + $0x124] sm:$0xf] %vm1422_vm0, %v1828_v63  ;;  %v1833_v7 = vpack.c.bf16 %v1080_v0, %v1080_v0  ;;  %v798_v8 = vpop.f32.mrf.mxu0  ;;  %v983_v9 = vadd.f32 %v1984_v2, %v2220_v50  ;;  %v974_v10 = vpop.f32.mrf.mxu1 }
 0x134   : > { %1457 = vst.msk [vmem:[%s2231_s17 + $0x88] sm:$0xf] %vm1422_vm0, %v1789_v3  ;;  %v1787_v11 = vpack.c.bf16 %v1034_v4, %v1034_v4  ;;  %v1037_v12 = vmax.f32 %v807_v5, 0.0  ;;  %v1831_v13 = vpack.c.bf16 %v1078_v6, %v1078_v6  ;;  %v799_v14 = vadd.f32 %v2220_v50, %v798_v8 }
 0x135   : > { %1501 = vst.msk [vmem:[%s2231_s17 + $0x138] sm:$0xf] %vm1422_vm0, %v1833_v7  ;;  %v1081_v15 = vmax.f32 %v983_v9, 0.0  ;;  %v1943_v16 = vpop.f32.mrf.mxu0  ;;  %v975_v17 = vadd.f32 %v2220_v50, %v974_v10  ;;  %v1987_v18 = vpop.f32.mrf.mxu1 }
 0x136   : > { %1455 = vst.msk [vmem:[%s2231_s17 + $0x80] sm:$0xf] %vm1422_vm0, %v1787_v11  ;;  %v1790_v19 = vpack.c.bf16 %v1037_v12, %v1037_v12  ;;  %1499 = vst.msk [vmem:[%s2231_s17 + $0x130] sm:$0xf] %vm1422_vm0, %v1831_v13  ;;  %v1035_v20 = vmax.f32 %v799_v14, 0.0  ;;  %v820_v21 = vadd.f32 %v1943_v16, %v2220_v50  ;;  %v996_v22 = vadd.f32 %v1987_v18, %v2220_v50 }
 0x137   : > { %v1834_v23 = vpack.c.bf16 %v1081_v15, %v1081_v15  ;;  %v1079_v24 = vmax.f32 %v975_v17, 0.0  ;;  %v811_v25 = vpop.f32.mrf.mxu0  ;;  %v987_v26 = vpop.f32.mrf.mxu1 }
 0x138   : > { %1458 = vst.msk [vmem:[%s2231_s17 + $0x8c] sm:$0xf] %vm1422_vm0, %v1790_v19  ;;  %v1788_v27 = vpack.c.bf16 %v1035_v20, %v1035_v20  ;;  %v1040_v28 = vmax.f32 %v820_v21, 0.0  ;;  %v812_v29 = vadd.f32 %v2220_v50, %v811_v25  ;;  %v1084_v30 = vmax.f32 %v996_v22, 0.0 }
 0x139   : > { %1502 = vst.msk [vmem:[%s2231_s17 + $0x13c] sm:$0xf] %vm1422_vm0, %v1834_v23  ;;  %v1832_v31 = vpack.c.bf16 %v1079_v24, %v1079_v24  ;;  %v1944_v32 = vpop.f32.mrf.mxu0  ;;  %v988_v33 = vadd.f32 %v2220_v50, %v987_v26  ;;  %v1988_v34 = vpop.f32.mrf.mxu1 }
 0x13a   : > { %1456 = vst.msk [vmem:[%s2231_s17 + $0x84] sm:$0xf] %vm1422_vm0, %v1788_v27  ;;  %v1793_v35 = vpack.c.bf16 %v1040_v28, %v1040_v28  ;;  %v1038_v36 = vmax.f32 %v812_v29, 0.0  ;;  %v1837_v37 = vpack.c.bf16 %v1084_v30, %v1084_v30  ;;  %v823_v38 = vadd.f32 %v1944_v32, %v2220_v50 }
 0x13b   : > { %1500 = vst.msk [vmem:[%s2231_s17 + $0x134] sm:$0xf] %vm1422_vm0, %v1832_v31  ;;  %v1082_v39 = vmax.f32 %v988_v33, 0.0  ;;  %v814_v40 = vpop.f32.mrf.mxu0  ;;  %v999_v41 = vadd.f32 %v1988_v34, %v2220_v50  ;;  %v990_v42 = vpop.f32.mrf.mxu1 }
 0x13c   : > { %1461 = vst.msk [vmem:[%s2231_s17 + $0x98] sm:$0xf] %vm1422_vm0, %v1793_v35  ;;  %v1791_v43 = vpack.c.bf16 %v1038_v36, %v1038_v36  ;;  %1505 = vst.msk [vmem:[%s2231_s17 + $0x148] sm:$0xf] %vm1422_vm0, %v1837_v37  ;;  %v1041_v44 = vmax.f32 %v823_v38, 0.0  ;;  %v815_v45 = vadd.f32 %v2220_v50, %v814_v40  ;;  %v991_v46 = vadd.f32 %v2220_v50, %v990_v42 }
 0x13d   : > { %v1835_v47 = vpack.c.bf16 %v1082_v39, %v1082_v39  ;;  %v1085_v48 = vmax.f32 %v999_v41, 0.0  ;;  %v1947_v49 = vpop.f32.mrf.mxu0 }
 0x13e   : > { %1459 = vst.msk [vmem:[%s2231_s17 + $0x90] sm:$0xf] %vm1422_vm0, %v1791_v43  ;;  %v1794_v51 = vpack.c.bf16 %v1041_v44, %v1041_v44  ;;  %v1039_v52 = vmax.f32 %v815_v45, 0.0  ;;  %v836_v53 = vadd.f32 %v1947_v49, %v2220_v50  ;;  %v1083_v54 = vmax.f32 %v991_v46, 0.0 }
 0x13f   : > { %1503 = vst.msk [vmem:[%s2231_s17 + $0x140] sm:$0xf] %vm1422_vm0, %v1835_v47  ;;  %v1838_v55 = vpack.c.bf16 %v1085_v48, %v1085_v48  ;;  %v827_v56 = vpop.f32.mrf.mxu0 }
 0x140   : > { %1462 = vst.msk [vmem:[%s2231_s17 + $0x9c] sm:$0xf] %vm1422_vm0, %v1794_v51  ;;  %v1792_v57 = vpack.c.bf16 %v1039_v52, %v1039_v52  ;;  %v1044_v58 = vmax.f32 %v836_v53, 0.0  ;;  %v1836_v59 = vpack.c.bf16 %v1083_v54, %v1083_v54  ;;  %v828_v60 = vadd.f32 %v2220_v50, %v827_v56 }
 0x141   : > { %1506 = vst.msk [vmem:[%s2231_s17 + $0x14c] sm:$0xf] %vm1422_vm0, %v1838_v55  ;;  %v1948_v61 = vpop.f32.mrf.mxu0 }
 0x142   : > { %1460 = vst.msk [vmem:[%s2231_s17 + $0x94] sm:$0xf] %vm1422_vm0, %v1792_v57  ;;  %v1797_v62 = vpack.c.bf16 %v1044_v58, %v1044_v58  ;;  %1504 = vst.msk [vmem:[%s2231_s17 + $0x144] sm:$0xf] %vm1422_vm0, %v1836_v59  ;;  %v1042_v63 = vmax.f32 %v828_v60, 0.0  ;;  %v839_v0 = vadd.f32 %v1948_v61, %v2220_v50 }
 0x143   : > { %v830_v1 = vpop.f32.mrf.mxu0 }
 0x144   : > { %1465 = vst.msk [vmem:[%s2231_s17 + $0xa8] sm:$0xf] %vm1422_vm0, %v1797_v62  ;;  %v1795_v2 = vpack.c.bf16 %v1042_v63, %v1042_v63  ;;  %v1045_v3 = vmax.f32 %v839_v0, 0.0  ;;  %v831_v4 = vadd.f32 %v2220_v50, %v830_v1 }
 0x146   : > { %1463 = vst.msk [vmem:[%s2231_s17 + $0xa0] sm:$0xf] %vm1422_vm0, %v1795_v2  ;;  %v1798_v5 = vpack.c.bf16 %v1045_v3, %v1045_v3  ;;  %v1043_v6 = vmax.f32 %v831_v4, 0.0 }
 0x148   : > { %1466 = vst.msk [vmem:[%s2231_s17 + $0xac] sm:$0xf] %vm1422_vm0, %v1798_v5  ;;  %v1796_v7 = vpack.c.bf16 %v1043_v6, %v1043_v6 }
 0x14a   : > { %1464 = vst.msk [vmem:[%s2231_s17 + $0xa4] sm:$0xf] %vm1422_vm0, %v1796_v7 }
 0x14b PF: > { %s13_s14 = sadd.s32 1, %s2101_s14   ;;  %s2494_s12 = smov %s2097_s13 }
 0x14c   : > { %p10_p5 = scmp.ge.s32.totalorder %s13_s14, 4   ;;  %s2495_s13 = smov %s2497_s15 }
 0x14e   :  { %12 = sbr.rel (!%p10_p5) target bundleno = 2 (0x2), region = 68 }

// kernel: decoder_forward.7
= control target key start
LH: loop header
LB: loop body
LE: loop exit
PB: predicated region body
PF: predicated region fallthrough
CT: control target
= control target key end

     0   :  { %s4615_s12 = smov 0   ;;  %s4617_s13 = smov 0   ;;  %s5929_s0 = inlined_call_operand.vmem [shape: bf16[5040,64], index: 0, kind: input, shape index: {}]   ;;  %s5930_s1 = inlined_call_operand.vmem [shape: bf16[64,12], index: 1, kind: input, shape index: {}]   ;;  %s5931_s2 = inlined_call_operand.vmem [shape: f32[1,12], index: 2, kind: input, shape index: {}]   ;;  %s5932_s3 = inlined_call_operand.vmem [shape: f32[5040,12], index: 3, kind: output, shape index: {}]  }
   0x1   :  { %s4619_s14 = smov 0  }
   0x2 LB: > { %s25_s15 = sadd.s32 1, %s4589_s13  ;;  %p3563_p0 = scmp.ge.s32.totalorder %s4593_s14, 1  ;;  %s4593_s14 = sphi %s4619_s14, %s13_s14   ;;  %s4589_s13 = sphi %s4617_s13, %s5934_s13   ;;  %s4585_s12 = sphi %s4615_s12, %s5933_s12  }
   0x3   : > { %p27_p1 = scmp.ge.s32.totalorder %s25_s15, 2  ;;  %p169_p2 = scmp.lt.s32.totalorder %s4593_s14, 3 }
   0x5   : > { %s5936_s15 = smov (%p27_p1, %s25_s15), 0  ;;  %p170_p3 = pnand %p3563_p0, %p169_p2 }
   0x6   : > { %s203_s18 = smul.u32 (!%p170_p3), 315, %s4585_s12 }
   0x7   : > { %173 = sbr.rel (%p170_p3) target bundleno = 543 (0x21f), region = 32 }
   0x8   : > { %p204_p4 = scmp.lt.s32.totalorder (!%p170_p3), %s203_s18, 629 }
   0xc   : > { %v4407_v0 = vld [vmem:[%s5930_s1 + $0x18] sm:$0xff]   ;;  %v4408_v1 = vld [vmem:[%s5930_s1 + $0x10] sm:$0xff]   ;;  %v4409_v2 = vld [vmem:[%s5930_s1 + $0x8] sm:$0xff]   ;;  %s5938_s18 = smov (!%p204_p4, %s203_s18), 629  ;;  %vm1368_vm0 = vcmask 523264   ;;  %vm3139_vm1 = vcmask 97280  }
   0xd   : > { %4051 = vmatprep.subr.bf16.mxu0 %v4407_v0  ;;  %4375 = vmatprep.subr.bf16.mxu1 %v4407_v0  ;;  %s3564_s23 = sshll.u32 %s5938_s18, 2  ;;  %v4410_v3 = vld [vmem:[%s5930_s1] sm:$0xff]   ;;  %s3565_s29 = sshll.u32 %s5938_s18, 3 }
   0xe   : > { %4052 = vmatpush3.bf16.msra.mxu0 %v4407_v0  ;;  %4379 = vmatpush3.bf16.msra.mxu1 %v4407_v0  ;;  %s4651_s28 = scalar_lea.vmem %s5929_s0, %s3564_s23  ;;  %s4862_s7 = scalar_lea.vmem %s5932_s3, %s3565_s29 }
   0xf   : > { %4053 = vmatprep.subr.bf16.mxu0 %v4408_v1  ;;  %4376 = vmatprep.subr.bf16.mxu1 %v4408_v1  ;;  %v4411_v4 = vld [vmem:[%s4651_s28] sm:$0xff]   ;;  %v4412_v6 = vld [vmem:[%s4651_s28 + $0x8] sm:$0xff]   ;;  %v4415_v8 = vld [vmem:[%s4651_s28 + $0x10] sm:$0xff]  }
  0x10   : > { %4059 = vmatprep.mubr.msk.bf16.mxu0 %vm1368_vm0, %v4411_v4  ;;  %v4413_v5 = vld [vmem:[%s4651_s28 + $0x280] sm:$0xff]   ;;  %v4414_v7 = vld [vmem:[%s4651_s28 + $0x288] sm:$0xff]   ;;  %v4417_v9 = vld [vmem:[%s4651_s28 + $0x290] sm:$0xff]  }
  0x11   : > { %4219 = vmatprep.mubr.msk.bf16.mxu1 %vm1368_vm0, %v4413_v5  ;;  %v4416_v10 = vld [vmem:[%s4651_s28 + $0x18] sm:$0xff]   ;;  %v4419_v12 = vld [vmem:[%s4651_s28 + $0x20] sm:$0xff]   ;;  %v4420_v14 = vld [vmem:[%s4651_s28 + $0x28] sm:$0xff]  }
  0x12   : > { %4054 = vmatpush3.bf16.msra.mxu0 %v4408_v1  ;;  %4380 = vmatpush3.bf16.msra.mxu1 %v4408_v1  ;;  %v4418_v11 = vld [vmem:[%s4651_s28 + $0x298] sm:$0xff]   ;;  %v4421_v13 = vld [vmem:[%s4651_s28 + $0x2a0] sm:$0xff]   ;;  %v4422_v15 = vld [vmem:[%s4651_s28 + $0x2a8] sm:$0xff]  }
  0x13   : > { %4055 = vmatprep.subr.bf16.mxu0 %v4409_v2  ;;  %4377 = vmatprep.subr.bf16.mxu1 %v4409_v2  ;;  %v4423_v16 = vld [vmem:[%s4651_s28 + $0x30] sm:$0xff]   ;;  %v4424_v18 = vld [vmem:[%s4651_s28 + $0x38] sm:$0xff]   ;;  %v4427_v20 = vld [vmem:[%s4651_s28 + $0x40] sm:$0xff]  }
  0x14   : > { %v4425_v17 = vld [vmem:[%s4651_s28 + $0x2b0] sm:$0xff]   ;;  %v4426_v19 = vld [vmem:[%s4651_s28 + $0x2b8] sm:$0xff]   ;;  %v4429_v21 = vld [vmem:[%s4651_s28 + $0x2c0] sm:$0xff]  }
  0x15   : > { %v4428_v22 = vld [vmem:[%s4651_s28 + $0x48] sm:$0xff]   ;;  %v4431_v24 = vld [vmem:[%s4651_s28 + $0x50] sm:$0xff]   ;;  %v4432_v26 = vld [vmem:[%s4651_s28 + $0x58] sm:$0xff]  }
  0x16   : > { %4056 = vmatpush3.bf16.msra.mxu0 %v4409_v2  ;;  %4381 = vmatpush3.bf16.msra.mxu1 %v4409_v2  ;;  %v4430_v23 = vld [vmem:[%s4651_s28 + $0x2c8] sm:$0xff]   ;;  %v4433_v25 = vld [vmem:[%s4651_s28 + $0x2d0] sm:$0xff]   ;;  %v4434_v27 = vld [vmem:[%s4651_s28 + $0x2d8] sm:$0xff]  }
  0x17   : > { %4057 = vmatprep.subr.bf16.mxu0 %v4410_v3  ;;  %4378 = vmatprep.subr.bf16.mxu1 %v4410_v3  ;;  %v4435_v28 = vld [vmem:[%s4651_s28 + $0x60] sm:$0xff]   ;;  %v4436_v30 = vld [vmem:[%s4651_s28 + $0x68] sm:$0xff]   ;;  %v4439_v32 = vld [vmem:[%s4651_s28 + $0x70] sm:$0xff]  }
  0x18   : > { %v4437_v29 = vld [vmem:[%s4651_s28 + $0x2e0] sm:$0xff]   ;;  %v4438_v31 = vld [vmem:[%s4651_s28 + $0x2e8] sm:$0xff]   ;;  %v4441_v33 = vld [vmem:[%s4651_s28 + $0x2f0] sm:$0xff]  }
  0x19   : > { %v4440_v34 = vld [vmem:[%s4651_s28 + $0x78] sm:$0xff]   ;;  %v4443_v36 = vld [vmem:[%s4651_s28 + $0x80] sm:$0xff]   ;;  %v4444_v38 = vld [vmem:[%s4651_s28 + $0x88] sm:$0xff]  }
  0x1a   : > { %4058 = vmatpush3.bf16.msra.mxu0 %v4410_v3  ;;  %4382 = vmatpush3.bf16.msra.mxu1 %v4410_v3  ;;  %v4442_v35 = vld [vmem:[%s4651_s28 + $0x2f8] sm:$0xff]   ;;  %v4445_v37 = vld [vmem:[%s4651_s28 + $0x300] sm:$0xff]   ;;  %v4446_v39 = vld [vmem:[%s4651_s28 + $0x308] sm:$0xff]  }
  0x1b   : > { %v4447_v40 = vld [vmem:[%s4651_s28 + $0x90] sm:$0xff]   ;;  %v4448_v42 = vld [vmem:[%s4651_s28 + $0x98] sm:$0xff]   ;;  %v4451_v44 = vld [vmem:[%s4651_s28 + $0xa0] sm:$0xff]  }
  0x1c   : > { %v4449_v41 = vld [vmem:[%s4651_s28 + $0x310] sm:$0xff]   ;;  %v4450_v43 = vld [vmem:[%s4651_s28 + $0x318] sm:$0xff]   ;;  %v4453_v45 = vld [vmem:[%s4651_s28 + $0x320] sm:$0xff]  }
  0x1d   : > { %4060 = vmatmul.mubr.msk.bf16.vlgmr.msra.gmra.mxu0 %vm1368_vm0, %v4412_v6  ;;  %4220 = vmatmul.mubr.msk.bf16.vlgmr.msra.gmra.mxu1 %vm1368_vm0, %v4414_v7  ;;  %v4452_v46 = vld [vmem:[%s4651_s28 + $0xa8] sm:$0xff]   ;;  %v4455_v48 = vld [vmem:[%s4651_s28 + $0xb0] sm:$0xff]   ;;  %v4456_v50 = vld [vmem:[%s4651_s28 + $0xb8] sm:$0xff]  }
  0x1e   : > { %4063 = vmatprep.mubr.msk.bf16.mxu0 %vm1368_vm0, %v4415_v8  ;;  %4223 = vmatprep.mubr.msk.bf16.mxu1 %vm1368_vm0, %v4417_v9  ;;  %v4454_v47 = vld [vmem:[%s4651_s28 + $0x328] sm:$0xff]   ;;  %v4457_v49 = vld [vmem:[%s4651_s28 + $0x330] sm:$0xff]   ;;  %v4458_v51 = vld [vmem:[%s4651_s28 + $0x338] sm:$0xff]  }
  0x1f   : > { %v4459_v52 = vld [vmem:[%s4651_s28 + $0xc0] sm:$0xff]   ;;  %v4460_v54 = vld [vmem:[%s4651_s28 + $0xc8] sm:$0xff]   ;;  %v4463_v56 = vld [vmem:[%s4651_s28 + $0xd0] sm:$0xff]  }
  0x20   : > { %v4461_v53 = vld [vmem:[%s4651_s28 + $0x340] sm:$0xff]   ;;  %v4462_v55 = vld [vmem:[%s4651_s28 + $0x348] sm:$0xff]   ;;  %v4465_v57 = vld [vmem:[%s4651_s28 + $0x350] sm:$0xff]  }
  0x21   : > { %v4464_v58 = vld [vmem:[%s4651_s28 + $0xd8] sm:$0xff]   ;;  %v4467_v60 = vld [vmem:[%s4651_s28 + $0xe0] sm:$0xff]   ;;  %v4468_v62 = vld [vmem:[%s4651_s28 + $0xe8] sm:$0xff]  }
  0x22   : > { %v4466_v59 = vld [vmem:[%s4651_s28 + $0x358] sm:$0xff]   ;;  %v4469_v61 = vld [vmem:[%s4651_s28 + $0x360] sm:$0xff]   ;;  %v4470_v63 = vld [vmem:[%s4651_s28 + $0x368] sm:$0xff]  }
  0x23   : > { %v4471_v0 = vld [vmem:[%s4651_s28 + $0xf0] sm:$0xff]   ;;  %v4472_v2 = vld [vmem:[%s4651_s28 + $0xf8] sm:$0xff]   ;;  %v4475_v4 = vld [vmem:[%s4651_s28 + $0x100] sm:$0xff]  }
  0x24   : > { %v4473_v1 = vld [vmem:[%s4651_s28 + $0x370] sm:$0xff]   ;;  %v4474_v3 = vld [vmem:[%s4651_s28 + $0x378] sm:$0xff]   ;;  %v4477_v5 = vld [vmem:[%s4651_s28 + $0x380] sm:$0xff]  }
  0x25   : > { %4064 = vmatmul.mubr.msk.bf16.gmra.mxu0 %vm1368_vm0, %v4416_v10  ;;  %4224 = vmatmul.mubr.msk.bf16.gmra.mxu1 %vm1368_vm0, %v4418_v11  ;;  %v4476_v6 = vld [vmem:[%s4651_s28 + $0x108] sm:$0xff]   ;;  %v4479_v8 = vld [vmem:[%s4651_s28 + $0x110] sm:$0xff]   ;;  %v4480_v10 = vld [vmem:[%s4651_s28 + $0x118] sm:$0xff]  }
  0x26   : > { %4067 = vmatprep.mubr.msk.bf16.mxu0 %vm1368_vm0, %v4419_v12  ;;  %4227 = vmatprep.mubr.msk.bf16.mxu1 %vm1368_vm0, %v4421_v13  ;;  %v4478_v7 = vld [vmem:[%s4651_s28 + $0x388] sm:$0xff]   ;;  %v4481_v9 = vld [vmem:[%s4651_s28 + $0x390] sm:$0xff]   ;;  %v4482_v11 = vld [vmem:[%s4651_s28 + $0x398] sm:$0xff]  }
  0x27   : > { %v4483_v12 = vld [vmem:[%s4651_s28 + $0x120] sm:$0xff]  }
  0x28   : > { %v4485_v13 = vld [vmem:[%s4651_s28 + $0x3a0] sm:$0xff]  }
  0x2d   : > { %4068 = vmatmul.mubr.msk.bf16.gmra.mxu0 %vm1368_vm0, %v4420_v14  ;;  %4228 = vmatmul.mubr.msk.bf16.gmra.mxu1 %vm1368_vm0, %v4422_v15  ;;  %v4484_v14 = vld [vmem:[%s4651_s28 + $0x128] sm:$0xff]  }
  0x2e   : > { %4071 = vmatprep.mubr.msk.bf16.mxu0 %vm1368_vm0, %v4423_v16  ;;  %4231 = vmatprep.mubr.msk.bf16.mxu1 %vm1368_vm0, %v4425_v17  ;;  %v4486_v15 = vld [vmem:[%s4651_s28 + $0x3a8] sm:$0xff]   ;;  %v4487_v16 = vld [vmem:[%s4651_s28 + $0x130] sm:$0xff]  }
  0x2f   : > { %v4489_v17 = vld [vmem:[%s4651_s28 + $0x3b0] sm:$0xff]  }
  0x35   : > { %4072 = vmatmul.mubr.msk.bf16.gmra.mxu0 %vm1368_vm0, %v4424_v18  ;;  %4232 = vmatmul.mubr.msk.bf16.gmra.mxu1 %vm1368_vm0, %v4426_v19  ;;  %v4488_v18 = vld [vmem:[%s4651_s28 + $0x138] sm:$0xff]  }
  0x36   : > { %4075 = vmatprep.mubr.msk.bf16.mxu0 %vm1368_vm0, %v4427_v20  ;;  %4235 = vmatprep.mubr.msk.bf16.mxu1 %vm1368_vm0, %v4429_v21  ;;  %v4490_v19 = vld [vmem:[%s4651_s28 + $0x3b8] sm:$0xff]   ;;  %v4491_v20 = vld [vmem:[%s4651_s28 + $0x140] sm:$0xff]  }
  0x37   : > { %v4493_v21 = vld [vmem:[%s4651_s28 + $0x3c0] sm:$0xff]  }
  0x3d   : > { %4076 = vmatmul.mubr.msk.bf16.gmra.mxu0 %vm1368_vm0, %v4428_v22  ;;  %4236 = vmatmul.mubr.msk.bf16.gmra.mxu1 %vm1368_vm0, %v4430_v23  ;;  %v4492_v22 = vld [vmem:[%s4651_s28 + $0x148] sm:$0xff]  }
  0x3e   : > { %4079 = vmatprep.mubr.msk.bf16.mxu0 %vm1368_vm0, %v4431_v24  ;;  %4239 = vmatprep.mubr.msk.bf16.mxu1 %vm1368_vm0, %v4433_v25  ;;  %v4494_v23 = vld [vmem:[%s4651_s28 + $0x3c8] sm:$0xff]   ;;  %v4495_v24 = vld [vmem:[%s4651_s28 + $0x150] sm:$0xff]  }
  0x3f   : > { %v4497_v25 = vld [vmem:[%s4651_s28 + $0x3d0] sm:$0xff]  }
  0x45   : > { %4080 = vmatmul.mubr.msk.bf16.gmra.mxu0 %vm1368_vm0, %v4432_v26  ;;  %4240 = vmatmul.mubr.msk.bf16.gmra.mxu1 %vm1368_vm0, %v4434_v27  ;;  %v4496_v26 = vld [vmem:[%s4651_s28 + $0x158] sm:$0xff]  }
  0x46   : > { %4083 = vmatprep.mubr.msk.bf16.mxu0 %vm1368_vm0, %v4435_v28  ;;  %4243 = vmatprep.mubr.msk.bf16.mxu1 %vm1368_vm0, %v4437_v29  ;;  %v4498_v27 = vld [vmem:[%s4651_s28 + $0x3d8] sm:$0xff]   ;;  %v4499_v28 = vld [vmem:[%s4651_s28 + $0x160] sm:$0xff]  }
  0x47   : > { %v4501_v29 = vld [vmem:[%s4651_s28 + $0x3e0] sm:$0xff]  }
  0x4d   : > { %4084 = vmatmul.mubr.msk.bf16.gmra.mxu0 %vm1368_vm0, %v4436_v30  ;;  %4244 = vmatmul.mubr.msk.bf16.gmra.mxu1 %vm1368_vm0, %v4438_v31  ;;  %v4500_v30 = vld [vmem:[%s4651_s28 + $0x168] sm:$0xff]  }
  0x4e   : > { %4087 = vmatprep.mubr.msk.bf16.mxu0 %vm1368_vm0, %v4439_v32  ;;  %4247 = vmatprep.mubr.msk.bf16.mxu1 %vm1368_vm0, %v4441_v33  ;;  %v4502_v31 = vld [vmem:[%s4651_s28 + $0x3e8] sm:$0xff]   ;;  %v4503_v32 = vld [vmem:[%s4651_s28 + $0x170] sm:$0xff]  }
  0x4f   : > { %v4505_v33 = vld [vmem:[%s4651_s28 + $0x3f0] sm:$0xff]  }
  0x55   : > { %4088 = vmatmul.mubr.msk.bf16.gmra.mxu0 %vm1368_vm0, %v4440_v34  ;;  %4248 = vmatmul.mubr.msk.bf16.gmra.mxu1 %vm1368_vm0, %v4442_v35  ;;  %v4504_v34 = vld [vmem:[%s4651_s28 + $0x178] sm:$0xff]  }
  0x56   : > { %4091 = vmatprep.mubr.msk.bf16.mxu0 %vm1368_vm0, %v4443_v36  ;;  %4251 = vmatprep.mubr.msk.bf16.mxu1 %vm1368_vm0, %v4445_v37  ;;  %v4506_v35 = vld [vmem:[%s4651_s28 + $0x3f8] sm:$0xff]   ;;  %v4507_v36 = vld [vmem:[%s4651_s28 + $0x180] sm:$0xff]  }
  0x57   : > { %v4509_v37 = vld [vmem:[%s4651_s28 + $0x400] sm:$0xff]  }
  0x5d   : > { %4092 = vmatmul.mubr.msk.bf16.gmra.mxu0 %vm1368_vm0, %v4444_v38  ;;  %4252 = vmatmul.mubr.msk.bf16.gmra.mxu1 %vm1368_vm0, %v4446_v39  ;;  %v4508_v38 = vld [vmem:[%s4651_s28 + $0x188] sm:$0xff]  }
  0x5e   : > { %4095 = vmatprep.mubr.msk.bf16.mxu0 %vm1368_vm0, %v4447_v40  ;;  %4255 = vmatprep.mubr.msk.bf16.mxu1 %vm1368_vm0, %v4449_v41  ;;  %v4510_v39 = vld [vmem:[%s4651_s28 + $0x408] sm:$0xff]   ;;  %v4511_v40 = vld [vmem:[%s4651_s28 + $0x190] sm:$0xff]  }
  0x5f   : > { %v4513_v41 = vld [vmem:[%s4651_s28 + $0x410] sm:$0xff]  }
  0x65   : > { %4096 = vmatmul.mubr.msk.bf16.gmra.mxu0 %vm1368_vm0, %v4448_v42  ;;  %4256 = vmatmul.mubr.msk.bf16.gmra.mxu1 %vm1368_vm0, %v4450_v43  ;;  %v4857_v42 = vld [vmem:[%s5931_s2] ss:$0 sm:$0xff] }
  0x66   : > { %4099 = vmatprep.mubr.msk.bf16.mxu0 %vm1368_vm0, %v4451_v44  ;;  %4259 = vmatprep.mubr.msk.bf16.mxu1 %vm1368_vm0, %v4453_v45 }
  0x6d   : > { %4100 = vmatmul.mubr.msk.bf16.gmra.mxu0 %vm1368_vm0, %v4452_v46  ;;  %4260 = vmatmul.mubr.msk.bf16.gmra.mxu1 %vm1368_vm0, %v4454_v47 }
  0x6e   : > { %4103 = vmatprep.mubr.msk.bf16.mxu0 %vm1368_vm0, %v4455_v48  ;;  %4263 = vmatprep.mubr.msk.bf16.mxu1 %vm1368_vm0, %v4457_v49 }
  0x75   : > { %4104 = vmatmul.mubr.msk.bf16.gmra.mxu0 %vm1368_vm0, %v4456_v50  ;;  %4264 = vmatmul.mubr.msk.bf16.gmra.mxu1 %vm1368_vm0, %v4458_v51 }
  0x76   : > { %4107 = vmatprep.mubr.msk.bf16.mxu0 %vm1368_vm0, %v4459_v52  ;;  %4267 = vmatprep.mubr.msk.bf16.mxu1 %vm1368_vm0, %v4461_v53  ;;  %v4512_v53 = vld [vmem:[%s4651_s28 + $0x198] sm:$0xff]  }
  0x7d   : > { %4108 = vmatmul.mubr.msk.bf16.gmra.mxu0 %vm1368_vm0, %v4460_v54  ;;  %4268 = vmatmul.mubr.msk.bf16.gmra.mxu1 %vm1368_vm0, %v4462_v55  ;;  %v4514_v54 = vld [vmem:[%s4651_s28 + $0x418] sm:$0xff]  }
  0x7e   : > { %4111 = vmatprep.mubr.msk.bf16.mxu0 %vm1368_vm0, %v4463_v56  ;;  %4271 = vmatprep.mubr.msk.bf16.mxu1 %vm1368_vm0, %v4465_v57  ;;  %v4515_v57 = vld [vmem:[%s4651_s28 + $0x1a0] sm:$0xff]  }
  0x85   : > { %4112 = vmatmul.mubr.msk.bf16.gmra.mxu0 %vm1368_vm0, %v4464_v58  ;;  %4272 = vmatmul.mubr.msk.bf16.gmra.mxu1 %vm1368_vm0, %v4466_v59  ;;  %v4517_v58 = vld [vmem:[%s4651_s28 + $0x420] sm:$0xff]  }
  0x86   : > { %4115 = vmatprep.mubr.msk.bf16.mxu0 %vm1368_vm0, %v4467_v60  ;;  %4275 = vmatprep.mubr.msk.bf16.mxu1 %vm1368_vm0, %v4469_v61 }
  0x8d   : > { %4116 = vmatmul.mubr.msk.bf16.gmra.mxu0 %vm1368_vm0, %v4468_v62  ;;  %4276 = vmatmul.mubr.msk.bf16.gmra.mxu1 %vm1368_vm0, %v4470_v63 }
  0x8e   : > { %4119 = vmatprep.mubr.msk.bf16.mxu0 %vm1368_vm0, %v4471_v0  ;;  %4279 = vmatprep.mubr.msk.bf16.mxu1 %vm1368_vm0, %v4473_v1 }
  0x95   : > { %4120 = vmatmul.mubr.msk.bf16.gmra.mxu0 %vm1368_vm0, %v4472_v2  ;;  %4280 = vmatmul.mubr.msk.bf16.gmra.mxu1 %vm1368_vm0, %v4474_v3 }
  0x96   : > { %4123 = vmatprep.mubr.msk.bf16.mxu0 %vm1368_vm0, %v4475_v4  ;;  %4283 = vmatprep.mubr.msk.bf16.mxu1 %vm1368_vm0, %v4477_v5 }
  0x9d   : > { %4124 = vmatmul.mubr.msk.bf16.gmra.mxu0 %vm1368_vm0, %v4476_v6  ;;  %4284 = vmatmul.mubr.msk.bf16.gmra.mxu1 %vm1368_vm0, %v4478_v7 }
  0x9e   : > { %4127 = vmatprep.mubr.msk.bf16.mxu0 %vm1368_vm0, %v4479_v8  ;;  %4287 = vmatprep.mubr.msk.bf16.mxu1 %vm1368_vm0, %v4481_v9  ;;  %v4516_v9 = vld [vmem:[%s4651_s28 + $0x1a8] sm:$0xff]  }
  0xa5   : > { %4128 = vmatmul.mubr.msk.bf16.gmra.mxu0 %vm1368_vm0, %v4480_v10  ;;  %4288 = vmatmul.mubr.msk.bf16.gmra.mxu1 %vm1368_vm0, %v4482_v11  ;;  %v4518_v10 = vld [vmem:[%s4651_s28 + $0x428] sm:$0xff]  }
  0xa6   : > { %4131 = vmatprep.mubr.msk.bf16.mxu0 %vm1368_vm0, %v4483_v12  ;;  %4291 = vmatprep.mubr.msk.bf16.mxu1 %vm1368_vm0, %v4485_v13  ;;  %v4519_v13 = vld [vmem:[%s4651_s28 + $0x1b0] sm:$0xff]  }
  0xad   : > { %4132 = vmatmul.mubr.msk.bf16.gmra.mxu0 %vm1368_vm0, %v4484_v14  ;;  %4292 = vmatmul.mubr.msk.bf16.gmra.mxu1 %vm1368_vm0, %v4486_v15  ;;  %v4521_v14 = vld [vmem:[%s4651_s28 + $0x430] sm:$0xff]  }
  0xae   : > { %4135 = vmatprep.mubr.msk.bf16.mxu0 %vm1368_vm0, %v4487_v16  ;;  %4295 = vmatprep.mubr.msk.bf16.mxu1 %vm1368_vm0, %v4489_v17 }
  0xb5   : > { %4136 = vmatmul.mubr.msk.bf16.gmra.mxu0 %vm1368_vm0, %v4488_v18  ;;  %4296 = vmatmul.mubr.msk.bf16.gmra.mxu1 %vm1368_vm0, %v4490_v19 }
  0xb6   : > { %4139 = vmatprep.mubr.msk.bf16.mxu0 %vm1368_vm0, %v4491_v20  ;;  %4299 = vmatprep.mubr.msk.bf16.mxu1 %vm1368_vm0, %v4493_v21 }
  0xbd   : > { %4140 = vmatmul.mubr.msk.bf16.gmra.mxu0 %vm1368_vm0, %v4492_v22  ;;  %4300 = vmatmul.mubr.msk.bf16.gmra.mxu1 %vm1368_vm0, %v4494_v23 }
  0xbe   : > { %4143 = vmatprep.mubr.msk.bf16.mxu0 %vm1368_vm0, %v4495_v24  ;;  %4303 = vmatprep.mubr.msk.bf16.mxu1 %vm1368_vm0, %v4497_v25 }
  0xc5   : > { %4144 = vmatmul.mubr.msk.bf16.gmra.mxu0 %vm1368_vm0, %v4496_v26  ;;  %4304 = vmatmul.mubr.msk.bf16.gmra.mxu1 %vm1368_vm0, %v4498_v27 }
  0xc6   : > { %4147 = vmatprep.mubr.msk.bf16.mxu0 %vm1368_vm0, %v4499_v28  ;;  %4307 = vmatprep.mubr.msk.bf16.mxu1 %vm1368_vm0, %v4501_v29  ;;  %v4520_v29 = vld [vmem:[%s4651_s28 + $0x1b8] sm:$0xff]  }
  0xcd   : > { %4148 = vmatmul.mubr.msk.bf16.gmra.mxu0 %vm1368_vm0, %v4500_v30  ;;  %4308 = vmatmul.mubr.msk.bf16.gmra.mxu1 %vm1368_vm0, %v4502_v31  ;;  %v4522_v30 = vld [vmem:[%s4651_s28 + $0x438] sm:$0xff]  }
  0xce   : > { %4151 = vmatprep.mubr.msk.bf16.mxu0 %vm1368_vm0, %v4503_v32  ;;  %4311 = vmatprep.mubr.msk.bf16.mxu1 %vm1368_vm0, %v4505_v33  ;;  %v4523_v33 = vld [vmem:[%s4651_s28 + $0x1c0] sm:$0xff]  }
  0xd5   : > { %4152 = vmatmul.mubr.msk.bf16.gmra.mxu0 %vm1368_vm0, %v4504_v34  ;;  %4312 = vmatmul.mubr.msk.bf16.gmra.mxu1 %vm1368_vm0, %v4506_v35  ;;  %v4525_v34 = vld [vmem:[%s4651_s28 + $0x440] sm:$0xff]  }
  0xd6   : > { %4155 = vmatprep.mubr.msk.bf16.mxu0 %vm1368_vm0, %v4507_v36  ;;  %4315 = vmatprep.mubr.msk.bf16.mxu1 %vm1368_vm0, %v4509_v37 }
  0xdd   : > { %v4061_v43 = vpop.f32.mrf.mxu0  ;;  %4156 = vmatmul.mubr.msk.bf16.gmra.mxu0 %vm1368_vm0, %v4508_v38  ;;  %v4221_v44 = vpop.f32.mrf.mxu1  ;;  %4316 = vmatmul.mubr.msk.bf16.gmra.mxu1 %vm1368_vm0, %v4510_v39 }
  0xde   : > { %v1886_v45 = vadd.f32 %v4061_v43, %v4857_v42  ;;  %v2526_v46 = vadd.f32 %v4221_v44, %v4857_v42  ;;  %4159 = vmatprep.mubr.msk.bf16.mxu0 %vm1368_vm0, %v4511_v40  ;;  %4319 = vmatprep.mubr.msk.bf16.mxu1 %vm1368_vm0, %v4513_v41 }
  0xdf   : > { %v1877_v47 = vpop.f32.mrf.mxu0  ;;  %v2517_v48 = vpop.f32.mrf.mxu1 }
  0xe0   : > { %3142 = vst.msk [vmem:[%s4862_s7 + $0x10] sm:$0xff] %vm3139_vm1, %v1886_v45  ;;  %v1878_v49 = vadd.f32 %v4857_v42, %v1877_v47  ;;  %3302 = vst.msk [vmem:[%s4862_s7 + $0x510] sm:$0xff] %vm3139_vm1, %v2526_v46  ;;  %v2518_v50 = vadd.f32 %v4857_v42, %v2517_v48 }
  0xe1   : > { %v4062_v51 = vpop.f32.mrf.mxu0  ;;  %v4222_v52 = vpop.f32.mrf.mxu1 }
  0xe2   : > { %3140 = vst.msk [vmem:[%s4862_s7] sm:$0xff] %vm3139_vm1, %v1878_v49  ;;  %v1889_v55 = vadd.f32 %v4062_v51, %v4857_v42  ;;  %3300 = vst.msk [vmem:[%s4862_s7 + $0x500] sm:$0xff] %vm3139_vm1, %v2518_v50  ;;  %v2529_v56 = vadd.f32 %v4222_v52, %v4857_v42  ;;  %v4524_v50 = vld [vmem:[%s4651_s28 + $0x1c8] sm:$0xff]  }
  0xe3   : > { %v1880_v59 = vpop.f32.mrf.mxu0  ;;  %v2520_v60 = vpop.f32.mrf.mxu1  ;;  %v4526_v51 = vld [vmem:[%s4651_s28 + $0x448] sm:$0xff]  }
  0xe4   : > { %3143 = vst.msk [vmem:[%s4862_s7 + $0x18] sm:$0xff] %vm3139_vm1, %v1889_v55  ;;  %v1881_v61 = vadd.f32 %v4857_v42, %v1880_v59  ;;  %3303 = vst.msk [vmem:[%s4862_s7 + $0x518] sm:$0xff] %vm3139_vm1, %v2529_v56  ;;  %v2521_v62 = vadd.f32 %v4857_v42, %v2520_v60  ;;  %v4529_v55 = vld [vmem:[%s4651_s28 + $0x450] sm:$0xff]  }
  0xe5   : > { %v4065_v63 = vpop.f32.mrf.mxu0  ;;  %4160 = vmatmul.mubr.msk.bf16.gmra.mxu0 %vm1368_vm0, %v4512_v53  ;;  %v4225_v0 = vpop.f32.mrf.mxu1  ;;  %4320 = vmatmul.mubr.msk.bf16.gmra.mxu1 %vm1368_vm0, %v4514_v54  ;;  %v4527_v54 = vld [vmem:[%s4651_s28 + $0x1d0] sm:$0xff]  }
  0xe6   : > { %3141 = vst.msk [vmem:[%s4862_s7 + $0x8] sm:$0xff] %vm3139_vm1, %v1881_v61  ;;  %v1902_v1 = vadd.f32 %v4065_v63, %v4857_v42  ;;  %3301 = vst.msk [vmem:[%s4862_s7 + $0x508] sm:$0xff] %vm3139_vm1, %v2521_v62  ;;  %v2542_v2 = vadd.f32 %v4225_v0, %v4857_v42  ;;  %4163 = vmatprep.mubr.msk.bf16.mxu0 %vm1368_vm0, %v4515_v57  ;;  %4323 = vmatprep.mubr.msk.bf16.mxu1 %vm1368_vm0, %v4517_v58 }
  0xe7   : > { %v1893_v3 = vpop.f32.mrf.mxu0  ;;  %v2533_v4 = vpop.f32.mrf.mxu1 }
  0xe8   : > { %3146 = vst.msk [vmem:[%s4862_s7 + $0x30] sm:$0xff] %vm3139_vm1, %v1902_v1  ;;  %v1894_v5 = vadd.f32 %v4857_v42, %v1893_v3  ;;  %3306 = vst.msk [vmem:[%s4862_s7 + $0x530] sm:$0xff] %vm3139_vm1, %v2542_v2  ;;  %v2534_v6 = vadd.f32 %v4857_v42, %v2533_v4 }
  0xe9   : > { %v4066_v7 = vpop.f32.mrf.mxu0  ;;  %v4226_v8 = vpop.f32.mrf.mxu1 }
  0xea   : > { %3144 = vst.msk [vmem:[%s4862_s7 + $0x20] sm:$0xff] %vm3139_vm1, %v1894_v5  ;;  %v1905_v11 = vadd.f32 %v4066_v7, %v4857_v42  ;;  %3304 = vst.msk [vmem:[%s4862_s7 + $0x520] sm:$0xff] %vm3139_vm1, %v2534_v6  ;;  %v2545_v12 = vadd.f32 %v4226_v8, %v4857_v42  ;;  %v4528_v6 = vld [vmem:[%s4651_s28 + $0x1d8] sm:$0xff]  }
  0xeb   : > { %v1896_v15 = vpop.f32.mrf.mxu0  ;;  %v2536_v16 = vpop.f32.mrf.mxu1  ;;  %v4530_v7 = vld [vmem:[%s4651_s28 + $0x458] sm:$0xff]  }
  0xec   : > { %3147 = vst.msk [vmem:[%s4862_s7 + $0x38] sm:$0xff] %vm3139_vm1, %v1905_v11  ;;  %v1897_v17 = vadd.f32 %v4857_v42, %v1896_v15  ;;  %3307 = vst.msk [vmem:[%s4862_s7 + $0x538] sm:$0xff] %vm3139_vm1, %v2545_v12  ;;  %v2537_v18 = vadd.f32 %v4857_v42, %v2536_v16  ;;  %v4533_v11 = vld [vmem:[%s4651_s28 + $0x460] sm:$0xff]  }
  0xed   : > { %v4069_v19 = vpop.f32.mrf.mxu0  ;;  %4164 = vmatmul.mubr.msk.bf16.gmra.mxu0 %vm1368_vm0, %v4516_v9  ;;  %v4229_v20 = vpop.f32.mrf.mxu1  ;;  %4324 = vmatmul.mubr.msk.bf16.gmra.mxu1 %vm1368_vm0, %v4518_v10  ;;  %v4531_v10 = vld [vmem:[%s4651_s28 + $0x1e0] sm:$0xff]  }
  0xee   : > { %3145 = vst.msk [vmem:[%s4862_s7 + $0x28] sm:$0xff] %vm3139_vm1, %v1897_v17  ;;  %v1918_v21 = vadd.f32 %v4069_v19, %v4857_v42  ;;  %3305 = vst.msk [vmem:[%s4862_s7 + $0x528] sm:$0xff] %vm3139_vm1, %v2537_v18  ;;  %v2558_v22 = vadd.f32 %v4229_v20, %v4857_v42  ;;  %4167 = vmatprep.mubr.msk.bf16.mxu0 %vm1368_vm0, %v4519_v13  ;;  %4327 = vmatprep.mubr.msk.bf16.mxu1 %vm1368_vm0, %v4521_v14 }
  0xef   : > { %v1909_v23 = vpop.f32.mrf.mxu0  ;;  %v2549_v24 = vpop.f32.mrf.mxu1 }
  0xf0   : > { %3150 = vst.msk [vmem:[%s4862_s7 + $0x50] sm:$0xff] %vm3139_vm1, %v1918_v21  ;;  %v1910_v25 = vadd.f32 %v4857_v42, %v1909_v23  ;;  %3310 = vst.msk [vmem:[%s4862_s7 + $0x550] sm:$0xff] %vm3139_vm1, %v2558_v22  ;;  %v2550_v26 = vadd.f32 %v4857_v42, %v2549_v24 }
  0xf1   : > { %v4070_v27 = vpop.f32.mrf.mxu0  ;;  %v4230_v28 = vpop.f32.mrf.mxu1 }
  0xf2   : > { %3148 = vst.msk [vmem:[%s4862_s7 + $0x40] sm:$0xff] %vm3139_vm1, %v1910_v25  ;;  %v1921_v31 = vadd.f32 %v4070_v27, %v4857_v42  ;;  %3308 = vst.msk [vmem:[%s4862_s7 + $0x540] sm:$0xff] %vm3139_vm1, %v2550_v26  ;;  %v2561_v32 = vadd.f32 %v4230_v28, %v4857_v42  ;;  %v4532_v26 = vld [vmem:[%s4651_s28 + $0x1e8] sm:$0xff]  }
  0xf3   : > { %v1912_v35 = vpop.f32.mrf.mxu0  ;;  %v2552_v36 = vpop.f32.mrf.mxu1  ;;  %v4534_v27 = vld [vmem:[%s4651_s28 + $0x468] sm:$0xff]  }
  0xf4   : > { %3151 = vst.msk [vmem:[%s4862_s7 + $0x58] sm:$0xff] %vm3139_vm1, %v1921_v31  ;;  %v1913_v37 = vadd.f32 %v4857_v42, %v1912_v35  ;;  %3311 = vst.msk [vmem:[%s4862_s7 + $0x558] sm:$0xff] %vm3139_vm1, %v2561_v32  ;;  %v2553_v38 = vadd.f32 %v4857_v42, %v2552_v36  ;;  %v4537_v31 = vld [vmem:[%s4651_s28 + $0x470] sm:$0xff]  }
  0xf5   : > { %v4073_v39 = vpop.f32.mrf.mxu0  ;;  %4168 = vmatmul.mubr.msk.bf16.gmra.mxu0 %vm1368_vm0, %v4520_v29  ;;  %v4233_v40 = vpop.f32.mrf.mxu1  ;;  %4328 = vmatmul.mubr.msk.bf16.gmra.mxu1 %vm1368_vm0, %v4522_v30  ;;  %v4535_v30 = vld [vmem:[%s4651_s28 + $0x1f0] sm:$0xff]  }
  0xf6   : > { %3149 = vst.msk [vmem:[%s4862_s7 + $0x48] sm:$0xff] %vm3139_vm1, %v1913_v37  ;;  %v1934_v41 = vadd.f32 %v4073_v39, %v4857_v42  ;;  %3309 = vst.msk [vmem:[%s4862_s7 + $0x548] sm:$0xff] %vm3139_vm1, %v2553_v38  ;;  %v2574_v43 = vadd.f32 %v4233_v40, %v4857_v42  ;;  %4171 = vmatprep.mubr.msk.bf16.mxu0 %vm1368_vm0, %v4523_v33  ;;  %4331 = vmatprep.mubr.msk.bf16.mxu1 %vm1368_vm0, %v4525_v34 }
  0xf7   : > { %v1925_v44 = vpop.f32.mrf.mxu0  ;;  %v2565_v45 = vpop.f32.mrf.mxu1 }
  0xf8   : > { %3154 = vst.msk [vmem:[%s4862_s7 + $0x70] sm:$0xff] %vm3139_vm1, %v1934_v41  ;;  %v1926_v46 = vadd.f32 %v4857_v42, %v1925_v44  ;;  %3314 = vst.msk [vmem:[%s4862_s7 + $0x570] sm:$0xff] %vm3139_vm1, %v2574_v43  ;;  %v2566_v47 = vadd.f32 %v4857_v42, %v2565_v45 }
  0xf9   : > { %v4074_v48 = vpop.f32.mrf.mxu0  ;;  %v4234_v49 = vpop.f32.mrf.mxu1 }
  0xfa   : > { %3152 = vst.msk [vmem:[%s4862_s7 + $0x60] sm:$0xff] %vm3139_vm1, %v1926_v46  ;;  %v1937_v52 = vadd.f32 %v4074_v48, %v4857_v42  ;;  %3312 = vst.msk [vmem:[%s4862_s7 + $0x560] sm:$0xff] %vm3139_vm1, %v2566_v47  ;;  %v2577_v53 = vadd.f32 %v4234_v49, %v4857_v42  ;;  %v4536_v47 = vld [vmem:[%s4651_s28 + $0x1f8] sm:$0xff]  }
  0xfb   : > { %v1928_v56 = vpop.f32.mrf.mxu0  ;;  %v2568_v57 = vpop.f32.mrf.mxu1  ;;  %v4538_v48 = vld [vmem:[%s4651_s28 + $0x478] sm:$0xff]  }
  0xfc   : > { %3155 = vst.msk [vmem:[%s4862_s7 + $0x78] sm:$0xff] %vm3139_vm1, %v1937_v52  ;;  %v1929_v58 = vadd.f32 %v4857_v42, %v1928_v56  ;;  %3315 = vst.msk [vmem:[%s4862_s7 + $0x578] sm:$0xff] %vm3139_vm1, %v2577_v53  ;;  %v2569_v59 = vadd.f32 %v4857_v42, %v2568_v57  ;;  %v4541_v52 = vld [vmem:[%s4651_s28 + $0x480] sm:$0xff]  }
  0xfd   : > { %v4077_v60 = vpop.f32.mrf.mxu0  ;;  %4172 = vmatmul.mubr.msk.bf16.gmra.mxu0 %vm1368_vm0, %v4524_v50  ;;  %v4237_v61 = vpop.f32.mrf.mxu1  ;;  %4332 = vmatmul.mubr.msk.bf16.gmra.mxu1 %vm1368_vm0, %v4526_v51  ;;  %v4539_v51 = vld [vmem:[%s4651_s28 + $0x200] sm:$0xff]  }
  0xfe   : > { %3153 = vst.msk [vmem:[%s4862_s7 + $0x68] sm:$0xff] %vm3139_vm1, %v1929_v58  ;;  %v1950_v62 = vadd.f32 %v4077_v60, %v4857_v42  ;;  %3313 = vst.msk [vmem:[%s4862_s7 + $0x568] sm:$0xff] %vm3139_vm1, %v2569_v59  ;;  %v2590_v63 = vadd.f32 %v4237_v61, %v4857_v42  ;;  %4175 = vmatprep.mubr.msk.bf16.mxu0 %vm1368_vm0, %v4527_v54  ;;  %4335 = vmatprep.mubr.msk.bf16.mxu1 %vm1368_vm0, %v4529_v55 }
  0xff   : > { %v1941_v0 = vpop.f32.mrf.mxu0  ;;  %v2581_v1 = vpop.f32.mrf.mxu1 }
 0x100   : > { %3158 = vst.msk [vmem:[%s4862_s7 + $0x90] sm:$0xff] %vm3139_vm1, %v1950_v62  ;;  %v1942_v2 = vadd.f32 %v4857_v42, %v1941_v0  ;;  %3318 = vst.msk [vmem:[%s4862_s7 + $0x590] sm:$0xff] %vm3139_vm1, %v2590_v63  ;;  %v2582_v3 = vadd.f32 %v4857_v42, %v2581_v1 }
 0x101   : > { %v4078_v4 = vpop.f32.mrf.mxu0  ;;  %v4238_v5 = vpop.f32.mrf.mxu1 }
 0x102   : > { %3156 = vst.msk [vmem:[%s4862_s7 + $0x80] sm:$0xff] %vm3139_vm1, %v1942_v2  ;;  %v1953_v8 = vadd.f32 %v4078_v4, %v4857_v42  ;;  %3316 = vst.msk [vmem:[%s4862_s7 + $0x580] sm:$0xff] %vm3139_vm1, %v2582_v3  ;;  %v2593_v9 = vadd.f32 %v4238_v5, %v4857_v42  ;;  %v4540_v3 = vld [vmem:[%s4651_s28 + $0x208] sm:$0xff]  }
 0x103   : > { %v1944_v12 = vpop.f32.mrf.mxu0  ;;  %v2584_v13 = vpop.f32.mrf.mxu1  ;;  %v4542_v4 = vld [vmem:[%s4651_s28 + $0x488] sm:$0xff]  }
 0x104   : > { %3159 = vst.msk [vmem:[%s4862_s7 + $0x98] sm:$0xff] %vm3139_vm1, %v1953_v8  ;;  %v1945_v14 = vadd.f32 %v4857_v42, %v1944_v12  ;;  %3319 = vst.msk [vmem:[%s4862_s7 + $0x598] sm:$0xff] %vm3139_vm1, %v2593_v9  ;;  %v2585_v15 = vadd.f32 %v4857_v42, %v2584_v13  ;;  %v4545_v8 = vld [vmem:[%s4651_s28 + $0x490] sm:$0xff]  }
 0x105   : > { %v4081_v16 = vpop.f32.mrf.mxu0  ;;  %4176 = vmatmul.mubr.msk.bf16.gmra.mxu0 %vm1368_vm0, %v4528_v6  ;;  %v4241_v17 = vpop.f32.mrf.mxu1  ;;  %4336 = vmatmul.mubr.msk.bf16.gmra.mxu1 %vm1368_vm0, %v4530_v7  ;;  %v4543_v7 = vld [vmem:[%s4651_s28 + $0x210] sm:$0xff]  }
 0x106   : > { %3157 = vst.msk [vmem:[%s4862_s7 + $0x88] sm:$0xff] %vm3139_vm1, %v1945_v14  ;;  %v1966_v18 = vadd.f32 %v4081_v16, %v4857_v42  ;;  %3317 = vst.msk [vmem:[%s4862_s7 + $0x588] sm:$0xff] %vm3139_vm1, %v2585_v15  ;;  %v2606_v19 = vadd.f32 %v4241_v17, %v4857_v42  ;;  %4179 = vmatprep.mubr.msk.bf16.mxu0 %vm1368_vm0, %v4531_v10  ;;  %4339 = vmatprep.mubr.msk.bf16.mxu1 %vm1368_vm0, %v4533_v11 }
 0x107   : > { %v1957_v20 = vpop.f32.mrf.mxu0  ;;  %v2597_v21 = vpop.f32.mrf.mxu1 }
 0x108   : > { %3162 = vst.msk [vmem:[%s4862_s7 + $0xb0] sm:$0xff] %vm3139_vm1, %v1966_v18  ;;  %v1958_v22 = vadd.f32 %v4857_v42, %v1957_v20  ;;  %3322 = vst.msk [vmem:[%s4862_s7 + $0x5b0] sm:$0xff] %vm3139_vm1, %v2606_v19  ;;  %v2598_v23 = vadd.f32 %v4857_v42, %v2597_v21 }
 0x109   : > { %v4082_v24 = vpop.f32.mrf.mxu0  ;;  %v4242_v25 = vpop.f32.mrf.mxu1 }
 0x10a   : > { %3160 = vst.msk [vmem:[%s4862_s7 + $0xa0] sm:$0xff] %vm3139_vm1, %v1958_v22  ;;  %v1969_v28 = vadd.f32 %v4082_v24, %v4857_v42  ;;  %3320 = vst.msk [vmem:[%s4862_s7 + $0x5a0] sm:$0xff] %vm3139_vm1, %v2598_v23  ;;  %v2609_v29 = vadd.f32 %v4242_v25, %v4857_v42  ;;  %v4544_v23 = vld [vmem:[%s4651_s28 + $0x218] sm:$0xff]  }
 0x10b   : > { %v1960_v32 = vpop.f32.mrf.mxu0  ;;  %v2600_v33 = vpop.f32.mrf.mxu1  ;;  %v4546_v24 = vld [vmem:[%s4651_s28 + $0x498] sm:$0xff]  }
 0x10c   : > { %3163 = vst.msk [vmem:[%s4862_s7 + $0xb8] sm:$0xff] %vm3139_vm1, %v1969_v28  ;;  %v1961_v34 = vadd.f32 %v4857_v42, %v1960_v32  ;;  %3323 = vst.msk [vmem:[%s4862_s7 + $0x5b8] sm:$0xff] %vm3139_vm1, %v2609_v29  ;;  %v2601_v35 = vadd.f32 %v4857_v42, %v2600_v33  ;;  %v4549_v28 = vld [vmem:[%s4651_s28 + $0x4a0] sm:$0xff]  }
 0x10d   : > { %v4085_v36 = vpop.f32.mrf.mxu0  ;;  %4180 = vmatmul.mubr.msk.bf16.gmra.mxu0 %vm1368_vm0, %v4532_v26  ;;  %v4245_v37 = vpop.f32.mrf.mxu1  ;;  %4340 = vmatmul.mubr.msk.bf16.gmra.mxu1 %vm1368_vm0, %v4534_v27  ;;  %v4547_v27 = vld [vmem:[%s4651_s28 + $0x220] sm:$0xff]  }
 0x10e   : > { %3161 = vst.msk [vmem:[%s4862_s7 + $0xa8] sm:$0xff] %vm3139_vm1, %v1961_v34  ;;  %v1982_v38 = vadd.f32 %v4085_v36, %v4857_v42  ;;  %3321 = vst.msk [vmem:[%s4862_s7 + $0x5a8] sm:$0xff] %vm3139_vm1, %v2601_v35  ;;  %v2622_v39 = vadd.f32 %v4245_v37, %v4857_v42  ;;  %4183 = vmatprep.mubr.msk.bf16.mxu0 %vm1368_vm0, %v4535_v30  ;;  %4343 = vmatprep.mubr.msk.bf16.mxu1 %vm1368_vm0, %v4537_v31 }
 0x10f   : > { %v1973_v40 = vpop.f32.mrf.mxu0  ;;  %v2613_v41 = vpop.f32.mrf.mxu1 }
 0x110   : > { %3166 = vst.msk [vmem:[%s4862_s7 + $0xd0] sm:$0xff] %vm3139_vm1, %v1982_v38  ;;  %v1974_v43 = vadd.f32 %v4857_v42, %v1973_v40  ;;  %3326 = vst.msk [vmem:[%s4862_s7 + $0x5d0] sm:$0xff] %vm3139_vm1, %v2622_v39  ;;  %v2614_v44 = vadd.f32 %v4857_v42, %v2613_v41 }
 0x111   : > { %v4086_v45 = vpop.f32.mrf.mxu0  ;;  %v4246_v46 = vpop.f32.mrf.mxu1 }
 0x112   : > { %3164 = vst.msk [vmem:[%s4862_s7 + $0xc0] sm:$0xff] %vm3139_vm1, %v1974_v43  ;;  %v1985_v49 = vadd.f32 %v4086_v45, %v4857_v42  ;;  %3324 = vst.msk [vmem:[%s4862_s7 + $0x5c0] sm:$0xff] %vm3139_vm1, %v2614_v44  ;;  %v2625_v50 = vadd.f32 %v4246_v46, %v4857_v42  ;;  %v4548_v44 = vld [vmem:[%s4651_s28 + $0x228] sm:$0xff]  }
 0x113   : > { %v1976_v53 = vpop.f32.mrf.mxu0  ;;  %v2616_v54 = vpop.f32.mrf.mxu1  ;;  %v4550_v45 = vld [vmem:[%s4651_s28 + $0x4a8] sm:$0xff]  }
 0x114   : > { %3167 = vst.msk [vmem:[%s4862_s7 + $0xd8] sm:$0xff] %vm3139_vm1, %v1985_v49  ;;  %v1977_v55 = vadd.f32 %v4857_v42, %v1976_v53  ;;  %3327 = vst.msk [vmem:[%s4862_s7 + $0x5d8] sm:$0xff] %vm3139_vm1, %v2625_v50  ;;  %v2617_v56 = vadd.f32 %v4857_v42, %v2616_v54  ;;  %v4553_v49 = vld [vmem:[%s4651_s28 + $0x4b0] sm:$0xff]  }
 0x115   : > { %v4089_v57 = vpop.f32.mrf.mxu0  ;;  %4184 = vmatmul.mubr.msk.bf16.gmra.mxu0 %vm1368_vm0, %v4536_v47  ;;  %v4249_v58 = vpop.f32.mrf.mxu1  ;;  %4344 = vmatmul.mubr.msk.bf16.gmra.mxu1 %vm1368_vm0, %v4538_v48  ;;  %v4551_v48 = vld [vmem:[%s4651_s28 + $0x230] sm:$0xff]  }
 0x116   : > { %3165 = vst.msk [vmem:[%s4862_s7 + $0xc8] sm:$0xff] %vm3139_vm1, %v1977_v55  ;;  %v1998_v59 = vadd.f32 %v4089_v57, %v4857_v42  ;;  %3325 = vst.msk [vmem:[%s4862_s7 + $0x5c8] sm:$0xff] %vm3139_vm1, %v2617_v56  ;;  %v2638_v60 = vadd.f32 %v4249_v58, %v4857_v42  ;;  %4187 = vmatprep.mubr.msk.bf16.mxu0 %vm1368_vm0, %v4539_v51  ;;  %4347 = vmatprep.mubr.msk.bf16.mxu1 %vm1368_vm0, %v4541_v52 }
 0x117   : > { %v1989_v61 = vpop.f32.mrf.mxu0  ;;  %v2629_v62 = vpop.f32.mrf.mxu1 }
 0x118   : > { %3170 = vst.msk [vmem:[%s4862_s7 + $0xf0] sm:$0xff] %vm3139_vm1, %v1998_v59  ;;  %v1990_v63 = vadd.f32 %v4857_v42, %v1989_v61  ;;  %3330 = vst.msk [vmem:[%s4862_s7 + $0x5f0] sm:$0xff] %vm3139_vm1, %v2638_v60  ;;  %v2630_v0 = vadd.f32 %v4857_v42, %v2629_v62 }
 0x119   : > { %v4090_v1 = vpop.f32.mrf.mxu0  ;;  %v4250_v2 = vpop.f32.mrf.mxu1 }
 0x11a   : > { %3168 = vst.msk [vmem:[%s4862_s7 + $0xe0] sm:$0xff] %vm3139_vm1, %v1990_v63  ;;  %v2001_v5 = vadd.f32 %v4090_v1, %v4857_v42  ;;  %3328 = vst.msk [vmem:[%s4862_s7 + $0x5e0] sm:$0xff] %vm3139_vm1, %v2630_v0  ;;  %v2641_v6 = vadd.f32 %v4250_v2, %v4857_v42  ;;  %v4552_v0 = vld [vmem:[%s4651_s28 + $0x238] sm:$0xff]  }
 0x11b   : > { %v1992_v9 = vpop.f32.mrf.mxu0  ;;  %v2632_v10 = vpop.f32.mrf.mxu1  ;;  %v4554_v1 = vld [vmem:[%s4651_s28 + $0x4b8] sm:$0xff]  }
 0x11c   : > { %3171 = vst.msk [vmem:[%s4862_s7 + $0xf8] sm:$0xff] %vm3139_vm1, %v2001_v5  ;;  %v1993_v11 = vadd.f32 %v4857_v42, %v1992_v9  ;;  %3331 = vst.msk [vmem:[%s4862_s7 + $0x5f8] sm:$0xff] %vm3139_vm1, %v2641_v6  ;;  %v2633_v12 = vadd.f32 %v4857_v42, %v2632_v10  ;;  %v4557_v5 = vld [vmem:[%s4651_s28 + $0x4c0] sm:$0xff]  }
 0x11d   : > { %v4093_v13 = vpop.f32.mrf.mxu0  ;;  %4188 = vmatmul.mubr.msk.bf16.gmra.mxu0 %vm1368_vm0, %v4540_v3  ;;  %v4253_v14 = vpop.f32.mrf.mxu1  ;;  %4348 = vmatmul.mubr.msk.bf16.gmra.mxu1 %vm1368_vm0, %v4542_v4  ;;  %v4555_v4 = vld [vmem:[%s4651_s28 + $0x240] sm:$0xff]  }
 0x11e   : > { %3169 = vst.msk [vmem:[%s4862_s7 + $0xe8] sm:$0xff] %vm3139_vm1, %v1993_v11  ;;  %v2014_v15 = vadd.f32 %v4093_v13, %v4857_v42  ;;  %3329 = vst.msk [vmem:[%s4862_s7 + $0x5e8] sm:$0xff] %vm3139_vm1, %v2633_v12  ;;  %v2654_v16 = vadd.f32 %v4253_v14, %v4857_v42  ;;  %4191 = vmatprep.mubr.msk.bf16.mxu0 %vm1368_vm0, %v4543_v7  ;;  %4351 = vmatprep.mubr.msk.bf16.mxu1 %vm1368_vm0, %v4545_v8 }
 0x11f   : > { %v2005_v17 = vpop.f32.mrf.mxu0  ;;  %v2645_v18 = vpop.f32.mrf.mxu1 }
 0x120   : > { %3174 = vst.msk [vmem:[%s4862_s7 + $0x110] sm:$0xff] %vm3139_vm1, %v2014_v15  ;;  %v2006_v19 = vadd.f32 %v4857_v42, %v2005_v17  ;;  %3334 = vst.msk [vmem:[%s4862_s7 + $0x610] sm:$0xff] %vm3139_vm1, %v2654_v16  ;;  %v2646_v20 = vadd.f32 %v4857_v42, %v2645_v18 }
 0x121   : > { %v4094_v21 = vpop.f32.mrf.mxu0  ;;  %v4254_v22 = vpop.f32.mrf.mxu1 }
 0x122   : > { %3172 = vst.msk [vmem:[%s4862_s7 + $0x100] sm:$0xff] %vm3139_vm1, %v2006_v19  ;;  %v2017_v25 = vadd.f32 %v4094_v21, %v4857_v42  ;;  %3332 = vst.msk [vmem:[%s4862_s7 + $0x600] sm:$0xff] %vm3139_vm1, %v2646_v20  ;;  %v2657_v26 = vadd.f32 %v4254_v22, %v4857_v42  ;;  %v4556_v20 = vld [vmem:[%s4651_s28 + $0x248] sm:$0xff]  }
 0x123   : > { %v2008_v29 = vpop.f32.mrf.mxu0  ;;  %v2648_v30 = vpop.f32.mrf.mxu1  ;;  %v4558_v21 = vld [vmem:[%s4651_s28 + $0x4c8] sm:$0xff]  }
 0x124   : > { %3175 = vst.msk [vmem:[%s4862_s7 + $0x118] sm:$0xff] %vm3139_vm1, %v2017_v25  ;;  %v2009_v31 = vadd.f32 %v4857_v42, %v2008_v29  ;;  %3335 = vst.msk [vmem:[%s4862_s7 + $0x618] sm:$0xff] %vm3139_vm1, %v2657_v26  ;;  %v2649_v32 = vadd.f32 %v4857_v42, %v2648_v30  ;;  %v4561_v25 = vld [vmem:[%s4651_s28 + $0x4d0] sm:$0xff]  }
 0x125   : > { %v4097_v33 = vpop.f32.mrf.mxu0  ;;  %4192 = vmatmul.mubr.msk.bf16.gmra.mxu0 %vm1368_vm0, %v4544_v23  ;;  %v4257_v34 = vpop.f32.mrf.mxu1  ;;  %4352 = vmatmul.mubr.msk.bf16.gmra.mxu1 %vm1368_vm0, %v4546_v24  ;;  %v4559_v24 = vld [vmem:[%s4651_s28 + $0x250] sm:$0xff]  }
 0x126   : > { %3173 = vst.msk [vmem:[%s4862_s7 + $0x108] sm:$0xff] %vm3139_vm1, %v2009_v31  ;;  %v2030_v35 = vadd.f32 %v4097_v33, %v4857_v42  ;;  %3333 = vst.msk [vmem:[%s4862_s7 + $0x608] sm:$0xff] %vm3139_vm1, %v2649_v32  ;;  %v2670_v36 = vadd.f32 %v4257_v34, %v4857_v42  ;;  %4195 = vmatprep.mubr.msk.bf16.mxu0 %vm1368_vm0, %v4547_v27  ;;  %4355 = vmatprep.mubr.msk.bf16.mxu1 %vm1368_vm0, %v4549_v28 }
 0x127   : > { %v2021_v37 = vpop.f32.mrf.mxu0  ;;  %v2661_v38 = vpop.f32.mrf.mxu1 }
 0x128   : > { %3178 = vst.msk [vmem:[%s4862_s7 + $0x130] sm:$0xff] %vm3139_vm1, %v2030_v35  ;;  %v2022_v39 = vadd.f32 %v4857_v42, %v2021_v37  ;;  %3338 = vst.msk [vmem:[%s4862_s7 + $0x630] sm:$0xff] %vm3139_vm1, %v2670_v36  ;;  %v2662_v40 = vadd.f32 %v4857_v42, %v2661_v38 }
 0x129   : > { %v4098_v41 = vpop.f32.mrf.mxu0  ;;  %v4258_v43 = vpop.f32.mrf.mxu1 }
 0x12a   : > { %3176 = vst.msk [vmem:[%s4862_s7 + $0x120] sm:$0xff] %vm3139_vm1, %v2022_v39  ;;  %v2033_v46 = vadd.f32 %v4098_v41, %v4857_v42  ;;  %3336 = vst.msk [vmem:[%s4862_s7 + $0x620] sm:$0xff] %vm3139_vm1, %v2662_v40  ;;  %v2673_v47 = vadd.f32 %v4258_v43, %v4857_v42  ;;  %v4560_v40 = vld [vmem:[%s4651_s28 + $0x258] sm:$0xff]  }
 0x12b   : > { %v2024_v50 = vpop.f32.mrf.mxu0  ;;  %v2664_v51 = vpop.f32.mrf.mxu1  ;;  %v4562_v41 = vld [vmem:[%s4651_s28 + $0x4d8] sm:$0xff]  }
 0x12c   : > { %3179 = vst.msk [vmem:[%s4862_s7 + $0x138] sm:$0xff] %vm3139_vm1, %v2033_v46  ;;  %v2025_v52 = vadd.f32 %v4857_v42, %v2024_v50  ;;  %3339 = vst.msk [vmem:[%s4862_s7 + $0x638] sm:$0xff] %vm3139_vm1, %v2673_v47  ;;  %v2665_v53 = vadd.f32 %v4857_v42, %v2664_v51  ;;  %v4565_v46 = vld [vmem:[%s4651_s28 + $0x4e0] sm:$0xff]  }
 0x12d   : > { %v4101_v54 = vpop.f32.mrf.mxu0  ;;  %4196 = vmatmul.mubr.msk.bf16.gmra.mxu0 %vm1368_vm0, %v4548_v44  ;;  %v4261_v55 = vpop.f32.mrf.mxu1  ;;  %4356 = vmatmul.mubr.msk.bf16.gmra.mxu1 %vm1368_vm0, %v4550_v45  ;;  %v4563_v45 = vld [vmem:[%s4651_s28 + $0x260] sm:$0xff]  }
 0x12e   : > { %3177 = vst.msk [vmem:[%s4862_s7 + $0x128] sm:$0xff] %vm3139_vm1, %v2025_v52  ;;  %v2046_v56 = vadd.f32 %v4101_v54, %v4857_v42  ;;  %3337 = vst.msk [vmem:[%s4862_s7 + $0x628] sm:$0xff] %vm3139_vm1, %v2665_v53  ;;  %v2686_v57 = vadd.f32 %v4261_v55, %v4857_v42  ;;  %4199 = vmatprep.mubr.msk.bf16.mxu0 %vm1368_vm0, %v4551_v48  ;;  %4359 = vmatprep.mubr.msk.bf16.mxu1 %vm1368_vm0, %v4553_v49 }
 0x12f   : > { %v2037_v58 = vpop.f32.mrf.mxu0  ;;  %v2677_v59 = vpop.f32.mrf.mxu1 }
 0x130   : > { %3182 = vst.msk [vmem:[%s4862_s7 + $0x150] sm:$0xff] %vm3139_vm1, %v2046_v56  ;;  %v2038_v60 = vadd.f32 %v4857_v42, %v2037_v58  ;;  %3342 = vst.msk [vmem:[%s4862_s7 + $0x650] sm:$0xff] %vm3139_vm1, %v2686_v57  ;;  %v2678_v61 = vadd.f32 %v4857_v42, %v2677_v59 }
 0x131   : > { %v4102_v62 = vpop.f32.mrf.mxu0  ;;  %v4262_v63 = vpop.f32.mrf.mxu1 }
 0x132   : > { %3180 = vst.msk [vmem:[%s4862_s7 + $0x140] sm:$0xff] %vm3139_vm1, %v2038_v60  ;;  %v2049_v2 = vadd.f32 %v4102_v62, %v4857_v42  ;;  %3340 = vst.msk [vmem:[%s4862_s7 + $0x640] sm:$0xff] %vm3139_vm1, %v2678_v61  ;;  %v2689_v3 = vadd.f32 %v4262_v63, %v4857_v42  ;;  %v4564_v61 = vld [vmem:[%s4651_s28 + $0x268] sm:$0xff]  }
 0x133   : > { %v2040_v6 = vpop.f32.mrf.mxu0  ;;  %v2680_v7 = vpop.f32.mrf.mxu1  ;;  %v4566_v62 = vld [vmem:[%s4651_s28 + $0x4e8] ss:$0 sps:$4 sm:$0xff]  }
 0x134   : > { %3183 = vst.msk [vmem:[%s4862_s7 + $0x158] sm:$0xff] %vm3139_vm1, %v2049_v2  ;;  %v2041_v8 = vadd.f32 %v4857_v42, %v2040_v6  ;;  %3343 = vst.msk [vmem:[%s4862_s7 + $0x658] sm:$0xff] %vm3139_vm1, %v2689_v3  ;;  %v2681_v9 = vadd.f32 %v4857_v42, %v2680_v7 }
 0x135   : > { %v4105_v10 = vpop.f32.mrf.mxu0  ;;  %4200 = vmatmul.mubr.msk.bf16.gmra.mxu0 %vm1368_vm0, %v4552_v0  ;;  %v4265_v11 = vpop.f32.mrf.mxu1  ;;  %4360 = vmatmul.mubr.msk.bf16.gmra.mxu1 %vm1368_vm0, %v4554_v1  ;;  %v4567_v1 = vld [vmem:[%s4651_s28 + $0x270] sm:$0xff]  }
 0x136   : > { %3181 = vst.msk [vmem:[%s4862_s7 + $0x148] sm:$0xff] %vm3139_vm1, %v2041_v8  ;;  %v2062_v12 = vadd.f32 %v4105_v10, %v4857_v42  ;;  %3341 = vst.msk [vmem:[%s4862_s7 + $0x648] sm:$0xff] %vm3139_vm1, %v2681_v9  ;;  %v2702_v13 = vadd.f32 %v4265_v11, %v4857_v42  ;;  %4203 = vmatprep.mubr.msk.bf16.mxu0 %vm1368_vm0, %v4555_v4  ;;  %4363 = vmatprep.mubr.msk.bf16.mxu1 %vm1368_vm0, %v4557_v5 }
 0x137   : > { %v2053_v14 = vpop.f32.mrf.mxu0  ;;  %v2693_v15 = vpop.f32.mrf.mxu1 }
 0x138   : > { %3186 = vst.msk [vmem:[%s4862_s7 + $0x170] sm:$0xff] %vm3139_vm1, %v2062_v12  ;;  %v2054_v16 = vadd.f32 %v4857_v42, %v2053_v14  ;;  %3346 = vst.msk [vmem:[%s4862_s7 + $0x670] sm:$0xff] %vm3139_vm1, %v2702_v13  ;;  %v2694_v17 = vadd.f32 %v4857_v42, %v2693_v15 }
 0x139   : > { %v4106_v18 = vpop.f32.mrf.mxu0  ;;  %v4266_v19 = vpop.f32.mrf.mxu1 }
 0x13a   : > { %3184 = vst.msk [vmem:[%s4862_s7 + $0x160] sm:$0xff] %vm3139_vm1, %v2054_v16  ;;  %v2065_v22 = vadd.f32 %v4106_v18, %v4857_v42  ;;  %3344 = vst.msk [vmem:[%s4862_s7 + $0x660] sm:$0xff] %vm3139_vm1, %v2694_v17  ;;  %v2705_v23 = vadd.f32 %v4266_v19, %v4857_v42  ;;  %v4568_v16 = vld [vmem:[%s4651_s28 + $0x278] sm:$0xff]  }
 0x13b   : > { %v2056_v26 = vpop.f32.mrf.mxu0  ;;  %v2696_v27 = vpop.f32.mrf.mxu1 }
 0x13c   : > { %3187 = vst.msk [vmem:[%s4862_s7 + $0x178] sm:$0xff] %vm3139_vm1, %v2065_v22  ;;  %v2057_v28 = vadd.f32 %v4857_v42, %v2056_v26  ;;  %3347 = vst.msk [vmem:[%s4862_s7 + $0x678] sm:$0xff] %vm3139_vm1, %v2705_v23  ;;  %v2697_v29 = vadd.f32 %v4857_v42, %v2696_v27 }
 0x13d   : > { %v4109_v30 = vpop.f32.mrf.mxu0  ;;  %4204 = vmatmul.mubr.msk.bf16.gmra.mxu0 %vm1368_vm0, %v4556_v20  ;;  %v4269_v31 = vpop.f32.mrf.mxu1  ;;  %4364 = vmatmul.mubr.msk.bf16.gmra.mxu1 %vm1368_vm0, %v4558_v21 }
 0x13e   : > { %3185 = vst.msk [vmem:[%s4862_s7 + $0x168] sm:$0xff] %vm3139_vm1, %v2057_v28  ;;  %v2078_v32 = vadd.f32 %v4109_v30, %v4857_v42  ;;  %3345 = vst.msk [vmem:[%s4862_s7 + $0x668] sm:$0xff] %vm3139_vm1, %v2697_v29  ;;  %v2718_v33 = vadd.f32 %v4269_v31, %v4857_v42  ;;  %4207 = vmatprep.mubr.msk.bf16.mxu0 %vm1368_vm0, %v4559_v24  ;;  %4367 = vmatprep.mubr.msk.bf16.mxu1 %vm1368_vm0, %v4561_v25 }
 0x13f   : > { %v2069_v34 = vpop.f32.mrf.mxu0  ;;  %v2709_v35 = vpop.f32.mrf.mxu1 }
 0x140   : > { %3190 = vst.msk [vmem:[%s4862_s7 + $0x190] sm:$0xff] %vm3139_vm1, %v2078_v32  ;;  %v2070_v36 = vadd.f32 %v4857_v42, %v2069_v34  ;;  %3350 = vst.msk [vmem:[%s4862_s7 + $0x690] sm:$0xff] %vm3139_vm1, %v2718_v33  ;;  %v2710_v37 = vadd.f32 %v4857_v42, %v2709_v35 }
 0x141   : > { %v4110_v38 = vpop.f32.mrf.mxu0  ;;  %v4270_v39 = vpop.f32.mrf.mxu1 }
 0x142   : > { %3188 = vst.msk [vmem:[%s4862_s7 + $0x180] sm:$0xff] %vm3139_vm1, %v2070_v36  ;;  %v2081_v43 = vadd.f32 %v4110_v38, %v4857_v42  ;;  %3348 = vst.msk [vmem:[%s4862_s7 + $0x680] sm:$0xff] %vm3139_vm1, %v2710_v37  ;;  %v2721_v44 = vadd.f32 %v4270_v39, %v4857_v42 }
 0x143   : > { %v2072_v47 = vpop.f32.mrf.mxu0  ;;  %v2712_v48 = vpop.f32.mrf.mxu1 }
 0x144   : > { %3191 = vst.msk [vmem:[%s4862_s7 + $0x198] sm:$0xff] %vm3139_vm1, %v2081_v43  ;;  %v2073_v49 = vadd.f32 %v4857_v42, %v2072_v47  ;;  %3351 = vst.msk [vmem:[%s4862_s7 + $0x698] sm:$0xff] %vm3139_vm1, %v2721_v44  ;;  %v2713_v50 = vadd.f32 %v4857_v42, %v2712_v48  ;;  %v5374_v47 = vld [vmem:[%s5931_s2] ss:$0 sm:$0xff] }
 0x145   : > { %v4113_v51 = vpop.f32.mrf.mxu0  ;;  %4208 = vmatmul.mubr.msk.bf16.gmra.mxu0 %vm1368_vm0, %v4560_v40  ;;  %v4273_v52 = vpop.f32.mrf.mxu1  ;;  %4368 = vmatmul.mubr.msk.bf16.gmra.mxu1 %vm1368_vm0, %v4562_v41 }
 0x146   : > { %3189 = vst.msk [vmem:[%s4862_s7 + $0x188] sm:$0xff] %vm3139_vm1, %v2073_v49  ;;  %v2094_v53 = vadd.f32 %v4113_v51, %v4857_v42  ;;  %3349 = vst.msk [vmem:[%s4862_s7 + $0x688] sm:$0xff] %vm3139_vm1, %v2713_v50  ;;  %v2734_v54 = vadd.f32 %v4273_v52, %v4857_v42  ;;  %4211 = vmatprep.mubr.msk.bf16.mxu0 %vm1368_vm0, %v4563_v45  ;;  %4371 = vmatprep.mubr.msk.bf16.mxu1 %vm1368_vm0, %v4565_v46 }
 0x147   : > { %v2085_v55 = vpop.f32.mrf.mxu0  ;;  %v2725_v56 = vpop.f32.mrf.mxu1 }
 0x148   : > { %3194 = vst.msk [vmem:[%s4862_s7 + $0x1b0] sm:$0xff] %vm3139_vm1, %v2094_v53  ;;  %v2086_v57 = vadd.f32 %v4857_v42, %v2085_v55  ;;  %3354 = vst.msk [vmem:[%s4862_s7 + $0x6b0] sm:$0xff] %vm3139_vm1, %v2734_v54  ;;  %v2726_v58 = vadd.f32 %v4857_v42, %v2725_v56 }
 0x149   : > { %v4114_v59 = vpop.f32.mrf.mxu0  ;;  %v4274_v60 = vpop.f32.mrf.mxu1 }
 0x14a   : > { %3192 = vst.msk [vmem:[%s4862_s7 + $0x1a0] sm:$0xff] %vm3139_vm1, %v2086_v57  ;;  %v2097_v63 = vadd.f32 %v4114_v59, %v4857_v42  ;;  %3352 = vst.msk [vmem:[%s4862_s7 + $0x6a0] sm:$0xff] %vm3139_vm1, %v2726_v58  ;;  %v2737_v0 = vadd.f32 %v4274_v60, %v4857_v42 }
 0x14b   : > { %v2088_v2 = vpop.f32.mrf.mxu0  ;;  %v2728_v3 = vpop.f32.mrf.mxu1 }
 0x14c   : > { %3195 = vst.msk [vmem:[%s4862_s7 + $0x1b8] sm:$0xff] %vm3139_vm1, %v2097_v63  ;;  %v2089_v4 = vadd.f32 %v4857_v42, %v2088_v2  ;;  %3355 = vst.msk [vmem:[%s4862_s7 + $0x6b8] sm:$0xff] %vm3139_vm1, %v2737_v0  ;;  %v2729_v5 = vadd.f32 %v4857_v42, %v2728_v3 }
 0x14d   : > { %v4117_v6 = vpop.f32.mrf.mxu0  ;;  %4212 = vmatmul.mubr.msk.bf16.gmra.mxu0 %vm1368_vm0, %v4564_v61  ;;  %v4277_v7 = vpop.f32.mrf.mxu1  ;;  %4372 = vmatmul.mubr.msk.bf16.gmra.mxu1 %vm1368_vm0, %v4566_v62 }
 0x14e   : > { %3193 = vst.msk [vmem:[%s4862_s7 + $0x1a8] sm:$0xff] %vm3139_vm1, %v2089_v4  ;;  %v2110_v8 = vadd.f32 %v4117_v6, %v4857_v42  ;;  %3353 = vst.msk [vmem:[%s4862_s7 + $0x6a8] sm:$0xff] %vm3139_vm1, %v2729_v5  ;;  %v2750_v9 = vadd.f32 %v4277_v7, %v4857_v42  ;;  %4215 = vmatprep.mubr.msk.bf16.mxu0 %vm1368_vm0, %v4567_v1 }
 0x14f   : > { %v2101_v10 = vpop.f32.mrf.mxu0  ;;  %v2741_v11 = vpop.f32.mrf.mxu1 }
 0x150   : > { %3198 = vst.msk [vmem:[%s4862_s7 + $0x1d0] sm:$0xff] %vm3139_vm1, %v2110_v8  ;;  %v2102_v12 = vadd.f32 %v4857_v42, %v2101_v10  ;;  %3358 = vst.msk [vmem:[%s4862_s7 + $0x6d0] sm:$0xff] %vm3139_vm1, %v2750_v9  ;;  %v2742_v13 = vadd.f32 %v4857_v42, %v2741_v11 }
 0x151   : > { %v4118_v14 = vpop.f32.mrf.mxu0  ;;  %v4278_v15 = vpop.f32.mrf.mxu1 }
 0x152   : > { %3196 = vst.msk [vmem:[%s4862_s7 + $0x1c0] sm:$0xff] %vm3139_vm1, %v2102_v12  ;;  %v2113_v17 = vadd.f32 %v4118_v14, %v4857_v42  ;;  %3356 = vst.msk [vmem:[%s4862_s7 + $0x6c0] sm:$0xff] %vm3139_vm1, %v2742_v13  ;;  %v2753_v18 = vadd.f32 %v4278_v15, %v4857_v42 }
 0x153   : > { %v2104_v19 = vpop.f32.mrf.mxu0  ;;  %v2744_v20 = vpop.f32.mrf.mxu1 }
 0x154   : > { %3199 = vst.msk [vmem:[%s4862_s7 + $0x1d8] sm:$0xff] %vm3139_vm1, %v2113_v17  ;;  %v2105_v21 = vadd.f32 %v4857_v42, %v2104_v19  ;;  %3359 = vst.msk [vmem:[%s4862_s7 + $0x6d8] sm:$0xff] %vm3139_vm1, %v2753_v18  ;;  %v2745_v22 = vadd.f32 %v4857_v42, %v2744_v20 }
 0x155   : > { %v4121_v23 = vpop.f32.mrf.mxu0  ;;  %4216 = vmatmul.mubr.msk.bf16.gmra.mxu0 %vm1368_vm0, %v4568_v16  ;;  %v4281_v24 = vpop.f32.mrf.mxu1 }
 0x156   : > { %3197 = vst.msk [vmem:[%s4862_s7 + $0x1c8] sm:$0xff] %vm3139_vm1, %v2105_v21  ;;  %v2126_v25 = vadd.f32 %v4121_v23, %v4857_v42  ;;  %3357 = vst.msk [vmem:[%s4862_s7 + $0x6c8] sm:$0xff] %vm3139_vm1, %v2745_v22  ;;  %v2766_v26 = vadd.f32 %v4281_v24, %v4857_v42 }
 0x157   : > { %v2117_v27 = vpop.f32.mrf.mxu0  ;;  %v2757_v28 = vpop.f32.mrf.mxu1 }
 0x158   : > { %3202 = vst.msk [vmem:[%s4862_s7 + $0x1f0] sm:$0xff] %vm3139_vm1, %v2126_v25  ;;  %v2118_v29 = vadd.f32 %v4857_v42, %v2117_v27  ;;  %3362 = vst.msk [vmem:[%s4862_s7 + $0x6f0] sm:$0xff] %vm3139_vm1, %v2766_v26  ;;  %v2758_v30 = vadd.f32 %v4857_v42, %v2757_v28 }
 0x159   : > { %v4122_v31 = vpop.f32.mrf.mxu0  ;;  %v4282_v32 = vpop.f32.mrf.mxu1 }
 0x15a   : > { %3200 = vst.msk [vmem:[%s4862_s7 + $0x1e0] sm:$0xff] %vm3139_vm1, %v2118_v29  ;;  %v2129_v33 = vadd.f32 %v4122_v31, %v4857_v42  ;;  %3360 = vst.msk [vmem:[%s4862_s7 + $0x6e0] sm:$0xff] %vm3139_vm1, %v2758_v30  ;;  %v2769_v34 = vadd.f32 %v4282_v32, %v4857_v42 }
 0x15b   : > { %v2120_v35 = vpop.f32.mrf.mxu0  ;;  %v2760_v36 = vpop.f32.mrf.mxu1 }
 0x15c   : > { %3203 = vst.msk [vmem:[%s4862_s7 + $0x1f8] sm:$0xff] %vm3139_vm1, %v2129_v33  ;;  %v2121_v37 = vadd.f32 %v4857_v42, %v2120_v35  ;;  %3363 = vst.msk [vmem:[%s4862_s7 + $0x6f8] sm:$0xff] %vm3139_vm1, %v2769_v34  ;;  %v2761_v38 = vadd.f32 %v4857_v42, %v2760_v36 }
 0x15d   : > { %v4125_v39 = vpop.f32.mrf.mxu0  ;;  %v4285_v40 = vpop.f32.mrf.mxu1 }
 0x15e   : > { %3201 = vst.msk [vmem:[%s4862_s7 + $0x1e8] sm:$0xff] %vm3139_vm1, %v2121_v37  ;;  %v2142_v41 = vadd.f32 %v4125_v39, %v4857_v42  ;;  %3361 = vst.msk [vmem:[%s4862_s7 + $0x6e8] sm:$0xff] %vm3139_vm1, %v2761_v38  ;;  %v2782_v43 = vadd.f32 %v4285_v40, %v4857_v42 }
 0x15f   : > { %v2133_v44 = vpop.f32.mrf.mxu0  ;;  %v2773_v45 = vpop.f32.mrf.mxu1 }
 0x160   : > { %3206 = vst.msk [vmem:[%s4862_s7 + $0x210] sm:$0xff] %vm3139_vm1, %v2142_v41  ;;  %v2134_v46 = vadd.f32 %v4857_v42, %v2133_v44  ;;  %3366 = vst.msk [vmem:[%s4862_s7 + $0x710] sm:$0xff] %vm3139_vm1, %v2782_v43  ;;  %v2774_v48 = vadd.f32 %v5374_v47, %v2773_v45 }
 0x161   : > { %v4126_v49 = vpop.f32.mrf.mxu0  ;;  %v4286_v50 = vpop.f32.mrf.mxu1 }
 0x162   : > { %3204 = vst.msk [vmem:[%s4862_s7 + $0x200] sm:$0xff] %vm3139_vm1, %v2134_v46  ;;  %v2145_v51 = vadd.f32 %v5374_v47, %v4126_v49  ;;  %3364 = vst.msk [vmem:[%s4862_s7 + $0x700] sm:$0xff] %vm3139_vm1, %v2774_v48  ;;  %v2785_v42 = vadd.f32 %v5374_v47, %v4286_v50 }
 0x163   : > { %v2136_v52 = vpop.f32.mrf.mxu0  ;;  %v2776_v53 = vpop.f32.mrf.mxu1 }
 0x164   : > { %3207 = vst.msk [vmem:[%s4862_s7 + $0x218] sm:$0xff] %vm3139_vm1, %v2145_v51  ;;  %v2137_v54 = vadd.f32 %v5374_v47, %v2136_v52  ;;  %3367 = vst.msk [vmem:[%s4862_s7 + $0x718] sm:$0xff] %vm3139_vm1, %v2785_v42  ;;  %v2777_v55 = vadd.f32 %v5374_v47, %v2776_v53 }
 0x165   : > { %v4129_v56 = vpop.f32.mrf.mxu0  ;;  %v4289_v57 = vpop.f32.mrf.mxu1 }
 0x166   : > { %3205 = vst.msk [vmem:[%s4862_s7 + $0x208] sm:$0xff] %vm3139_vm1, %v2137_v54  ;;  %v2158_v58 = vadd.f32 %v5374_v47, %v4129_v56  ;;  %3365 = vst.msk [vmem:[%s4862_s7 + $0x708] sm:$0xff] %vm3139_vm1, %v2777_v55  ;;  %v2798_v59 = vadd.f32 %v5374_v47, %v4289_v57 }
 0x167   : > { %v2149_v60 = vpop.f32.mrf.mxu0  ;;  %v2789_v61 = vpop.f32.mrf.mxu1 }
 0x168   : > { %3210 = vst.msk [vmem:[%s4862_s7 + $0x230] sm:$0xff] %vm3139_vm1, %v2158_v58  ;;  %v2150_v62 = vadd.f32 %v5374_v47, %v2149_v60  ;;  %3370 = vst.msk [vmem:[%s4862_s7 + $0x730] sm:$0xff] %vm3139_vm1, %v2798_v59  ;;  %v2790_v63 = vadd.f32 %v5374_v47, %v2789_v61 }
 0x169   : > { %v4130_v0 = vpop.f32.mrf.mxu0  ;;  %v4290_v1 = vpop.f32.mrf.mxu1 }
 0x16a   : > { %3208 = vst.msk [vmem:[%s4862_s7 + $0x220] sm:$0xff] %vm3139_vm1, %v2150_v62  ;;  %v2161_v2 = vadd.f32 %v5374_v47, %v4130_v0  ;;  %3368 = vst.msk [vmem:[%s4862_s7 + $0x720] sm:$0xff] %vm3139_vm1, %v2790_v63  ;;  %v2801_v3 = vadd.f32 %v5374_v47, %v4290_v1 }
 0x16b   : > { %v2152_v4 = vpop.f32.mrf.mxu0  ;;  %v2792_v5 = vpop.f32.mrf.mxu1 }
 0x16c   : > { %3211 = vst.msk [vmem:[%s4862_s7 + $0x238] sm:$0xff] %vm3139_vm1, %v2161_v2  ;;  %v2153_v6 = vadd.f32 %v5374_v47, %v2152_v4  ;;  %3371 = vst.msk [vmem:[%s4862_s7 + $0x738] sm:$0xff] %vm3139_vm1, %v2801_v3  ;;  %v2793_v7 = vadd.f32 %v5374_v47, %v2792_v5 }
 0x16d   : > { %v4133_v8 = vpop.f32.mrf.mxu0  ;;  %v4293_v9 = vpop.f32.mrf.mxu1 }
 0x16e   : > { %3209 = vst.msk [vmem:[%s4862_s7 + $0x228] sm:$0xff] %vm3139_vm1, %v2153_v6  ;;  %v2174_v10 = vadd.f32 %v5374_v47, %v4133_v8  ;;  %3369 = vst.msk [vmem:[%s4862_s7 + $0x728] sm:$0xff] %vm3139_vm1, %v2793_v7  ;;  %v2814_v11 = vadd.f32 %v5374_v47, %v4293_v9 }
 0x16f   : > { %v2165_v12 = vpop.f32.mrf.mxu0  ;;  %v2805_v13 = vpop.f32.mrf.mxu1 }
 0x170   : > { %3214 = vst.msk [vmem:[%s4862_s7 + $0x250] sm:$0xff] %vm3139_vm1, %v2174_v10  ;;  %v2166_v14 = vadd.f32 %v5374_v47, %v2165_v12  ;;  %3374 = vst.msk [vmem:[%s4862_s7 + $0x750] sm:$0xff] %vm3139_vm1, %v2814_v11  ;;  %v2806_v15 = vadd.f32 %v5374_v47, %v2805_v13 }
 0x171   : > { %v4134_v16 = vpop.f32.mrf.mxu0  ;;  %v4294_v17 = vpop.f32.mrf.mxu1 }
 0x172   : > { %3212 = vst.msk [vmem:[%s4862_s7 + $0x240] sm:$0xff] %vm3139_vm1, %v2166_v14  ;;  %v2177_v18 = vadd.f32 %v5374_v47, %v4134_v16  ;;  %3372 = vst.msk [vmem:[%s4862_s7 + $0x740] sm:$0xff] %vm3139_vm1, %v2806_v15  ;;  %v2817_v19 = vadd.f32 %v5374_v47, %v4294_v17 }
 0x173   : > { %v2168_v20 = vpop.f32.mrf.mxu0  ;;  %v2808_v21 = vpop.f32.mrf.mxu1 }
 0x174   : > { %3215 = vst.msk [vmem:[%s4862_s7 + $0x258] sm:$0xff] %vm3139_vm1, %v2177_v18  ;;  %v2169_v22 = vadd.f32 %v5374_v47, %v2168_v20  ;;  %3375 = vst.msk [vmem:[%s4862_s7 + $0x758] sm:$0xff] %vm3139_vm1, %v2817_v19  ;;  %v2809_v23 = vadd.f32 %v5374_v47, %v2808_v21 }
 0x175   : > { %v4137_v24 = vpop.f32.mrf.mxu0  ;;  %v4297_v25 = vpop.f32.mrf.mxu1 }
 0x176   : > { %3213 = vst.msk [vmem:[%s4862_s7 + $0x248] sm:$0xff] %vm3139_vm1, %v2169_v22  ;;  %v2190_v26 = vadd.f32 %v5374_v47, %v4137_v24  ;;  %3373 = vst.msk [vmem:[%s4862_s7 + $0x748] sm:$0xff] %vm3139_vm1, %v2809_v23  ;;  %v2830_v27 = vadd.f32 %v5374_v47, %v4297_v25 }
 0x177   : > { %v2181_v28 = vpop.f32.mrf.mxu0  ;;  %v2821_v29 = vpop.f32.mrf.mxu1 }
 0x178   : > { %3218 = vst.msk [vmem:[%s4862_s7 + $0x270] sm:$0xff] %vm3139_vm1, %v2190_v26  ;;  %v2182_v30 = vadd.f32 %v5374_v47, %v2181_v28  ;;  %3378 = vst.msk [vmem:[%s4862_s7 + $0x770] sm:$0xff] %vm3139_vm1, %v2830_v27  ;;  %v2822_v31 = vadd.f32 %v5374_v47, %v2821_v29 }
 0x179   : > { %v4138_v32 = vpop.f32.mrf.mxu0  ;;  %v4298_v33 = vpop.f32.mrf.mxu1 }
 0x17a   : > { %3216 = vst.msk [vmem:[%s4862_s7 + $0x260] sm:$0xff] %vm3139_vm1, %v2182_v30  ;;  %v2193_v34 = vadd.f32 %v5374_v47, %v4138_v32  ;;  %3376 = vst.msk [vmem:[%s4862_s7 + $0x760] sm:$0xff] %vm3139_vm1, %v2822_v31  ;;  %v2833_v35 = vadd.f32 %v5374_v47, %v4298_v33 }
 0x17b   : > { %v2184_v36 = vpop.f32.mrf.mxu0  ;;  %v2824_v37 = vpop.f32.mrf.mxu1 }
 0x17c   : > { %3219 = vst.msk [vmem:[%s4862_s7 + $0x278] sm:$0xff] %vm3139_vm1, %v2193_v34  ;;  %v2185_v38 = vadd.f32 %v5374_v47, %v2184_v36  ;;  %3379 = vst.msk [vmem:[%s4862_s7 + $0x778] sm:$0xff] %vm3139_vm1, %v2833_v35  ;;  %v2825_v39 = vadd.f32 %v5374_v47, %v2824_v37 }
 0x17d   : > { %v4141_v40 = vpop.f32.mrf.mxu0  ;;  %v4301_v41 = vpop.f32.mrf.mxu1 }
 0x17e   : > { %3217 = vst.msk [vmem:[%s4862_s7 + $0x268] sm:$0xff] %vm3139_vm1, %v2185_v38  ;;  %v2206_v43 = vadd.f32 %v5374_v47, %v4141_v40  ;;  %3377 = vst.msk [vmem:[%s4862_s7 + $0x768] sm:$0xff] %vm3139_vm1, %v2825_v39  ;;  %v2846_v44 = vadd.f32 %v5374_v47, %v4301_v41 }
 0x17f   : > { %v2197_v45 = vpop.f32.mrf.mxu0  ;;  %v2837_v46 = vpop.f32.mrf.mxu1 }
 0x180   : > { %3222 = vst.msk [vmem:[%s4862_s7 + $0x290] sm:$0xff] %vm3139_vm1, %v2206_v43  ;;  %v2198_v48 = vadd.f32 %v5374_v47, %v2197_v45  ;;  %3382 = vst.msk [vmem:[%s4862_s7 + $0x790] sm:$0xff] %vm3139_vm1, %v2846_v44  ;;  %v2838_v49 = vadd.f32 %v5374_v47, %v2837_v46 }
 0x181   : > { %v4142_v50 = vpop.f32.mrf.mxu0  ;;  %v4302_v51 = vpop.f32.mrf.mxu1 }
 0x182   : > { %3220 = vst.msk [vmem:[%s4862_s7 + $0x280] sm:$0xff] %vm3139_vm1, %v2198_v48  ;;  %v2209_v42 = vadd.f32 %v5374_v47, %v4142_v50  ;;  %3380 = vst.msk [vmem:[%s4862_s7 + $0x780] sm:$0xff] %vm3139_vm1, %v2838_v49  ;;  %v2849_v52 = vadd.f32 %v5374_v47, %v4302_v51 }
 0x183   : > { %v2200_v53 = vpop.f32.mrf.mxu0  ;;  %v2840_v54 = vpop.f32.mrf.mxu1 }
 0x184   : > { %3223 = vst.msk [vmem:[%s4862_s7 + $0x298] sm:$0xff] %vm3139_vm1, %v2209_v42  ;;  %v2201_v55 = vadd.f32 %v5374_v47, %v2200_v53  ;;  %3383 = vst.msk [vmem:[%s4862_s7 + $0x798] sm:$0xff] %vm3139_vm1, %v2849_v52  ;;  %v2841_v56 = vadd.f32 %v5374_v47, %v2840_v54 }
 0x185   : > { %v4145_v57 = vpop.f32.mrf.mxu0  ;;  %v4305_v58 = vpop.f32.mrf.mxu1 }
 0x186   : > { %3221 = vst.msk [vmem:[%s4862_s7 + $0x288] sm:$0xff] %vm3139_vm1, %v2201_v55  ;;  %v2222_v59 = vadd.f32 %v5374_v47, %v4145_v57  ;;  %3381 = vst.msk [vmem:[%s4862_s7 + $0x788] sm:$0xff] %vm3139_vm1, %v2841_v56  ;;  %v2862_v60 = vadd.f32 %v5374_v47, %v4305_v58 }
 0x187   : > { %v2213_v61 = vpop.f32.mrf.mxu0  ;;  %v2853_v62 = vpop.f32.mrf.mxu1 }
 0x188   : > { %3226 = vst.msk [vmem:[%s4862_s7 + $0x2b0] sm:$0xff] %vm3139_vm1, %v2222_v59  ;;  %v2214_v63 = vadd.f32 %v5374_v47, %v2213_v61  ;;  %3386 = vst.msk [vmem:[%s4862_s7 + $0x7b0] sm:$0xff] %vm3139_vm1, %v2862_v60  ;;  %v2854_v0 = vadd.f32 %v5374_v47, %v2853_v62 }
 0x189   : > { %v4146_v1 = vpop.f32.mrf.mxu0  ;;  %v4306_v2 = vpop.f32.mrf.mxu1 }
 0x18a   : > { %3224 = vst.msk [vmem:[%s4862_s7 + $0x2a0] sm:$0xff] %vm3139_vm1, %v2214_v63  ;;  %v2225_v3 = vadd.f32 %v5374_v47, %v4146_v1  ;;  %3384 = vst.msk [vmem:[%s4862_s7 + $0x7a0] sm:$0xff] %vm3139_vm1, %v2854_v0  ;;  %v2865_v4 = vadd.f32 %v5374_v47, %v4306_v2 }
 0x18b   : > { %v2216_v5 = vpop.f32.mrf.mxu0  ;;  %v2856_v6 = vpop.f32.mrf.mxu1 }
 0x18c   : > { %3227 = vst.msk [vmem:[%s4862_s7 + $0x2b8] sm:$0xff] %vm3139_vm1, %v2225_v3  ;;  %v2217_v7 = vadd.f32 %v5374_v47, %v2216_v5  ;;  %3387 = vst.msk [vmem:[%s4862_s7 + $0x7b8] sm:$0xff] %vm3139_vm1, %v2865_v4  ;;  %v2857_v8 = vadd.f32 %v5374_v47, %v2856_v6 }
 0x18d   : > { %v4149_v9 = vpop.f32.mrf.mxu0  ;;  %v4309_v10 = vpop.f32.mrf.mxu1 }
 0x18e   : > { %3225 = vst.msk [vmem:[%s4862_s7 + $0x2a8] sm:$0xff] %vm3139_vm1, %v2217_v7  ;;  %v2238_v11 = vadd.f32 %v5374_v47, %v4149_v9  ;;  %3385 = vst.msk [vmem:[%s4862_s7 + $0x7a8] sm:$0xff] %vm3139_vm1, %v2857_v8  ;;  %v2878_v12 = vadd.f32 %v5374_v47, %v4309_v10 }
 0x18f   : > { %v2229_v13 = vpop.f32.mrf.mxu0  ;;  %v2869_v14 = vpop.f32.mrf.mxu1 }
 0x190   : > { %3230 = vst.msk [vmem:[%s4862_s7 + $0x2d0] sm:$0xff] %vm3139_vm1, %v2238_v11  ;;  %v2230_v15 = vadd.f32 %v5374_v47, %v2229_v13  ;;  %3390 = vst.msk [vmem:[%s4862_s7 + $0x7d0] sm:$0xff] %vm3139_vm1, %v2878_v12  ;;  %v2870_v16 = vadd.f32 %v5374_v47, %v2869_v14 }
 0x191   : > { %v4150_v17 = vpop.f32.mrf.mxu0  ;;  %v4310_v18 = vpop.f32.mrf.mxu1 }
 0x192   : > { %3228 = vst.msk [vmem:[%s4862_s7 + $0x2c0] sm:$0xff] %vm3139_vm1, %v2230_v15  ;;  %v2241_v19 = vadd.f32 %v5374_v47, %v4150_v17  ;;  %3388 = vst.msk [vmem:[%s4862_s7 + $0x7c0] sm:$0xff] %vm3139_vm1, %v2870_v16  ;;  %v2881_v20 = vadd.f32 %v5374_v47, %v4310_v18 }
 0x193   : > { %v2232_v21 = vpop.f32.mrf.mxu0  ;;  %v2872_v22 = vpop.f32.mrf.mxu1 }
 0x194   : > { %3231 = vst.msk [vmem:[%s4862_s7 + $0x2d8] sm:$0xff] %vm3139_vm1, %v2241_v19  ;;  %v2233_v23 = vadd.f32 %v5374_v47, %v2232_v21  ;;  %3391 = vst.msk [vmem:[%s4862_s7 + $0x7d8] sm:$0xff] %vm3139_vm1, %v2881_v20  ;;  %v2873_v24 = vadd.f32 %v5374_v47, %v2872_v22 }
 0x195   : > { %v4153_v25 = vpop.f32.mrf.mxu0  ;;  %v4313_v26 = vpop.f32.mrf.mxu1 }
 0x196   : > { %3229 = vst.msk [vmem:[%s4862_s7 + $0x2c8] sm:$0xff] %vm3139_vm1, %v2233_v23  ;;  %v2254_v27 = vadd.f32 %v5374_v47, %v4153_v25  ;;  %3389 = vst.msk [vmem:[%s4862_s7 + $0x7c8] sm:$0xff] %vm3139_vm1, %v2873_v24  ;;  %v2894_v28 = vadd.f32 %v5374_v47, %v4313_v26 }
 0x197   : > { %v2245_v29 = vpop.f32.mrf.mxu0  ;;  %v2885_v30 = vpop.f32.mrf.mxu1 }
 0x198   : > { %3234 = vst.msk [vmem:[%s4862_s7 + $0x2f0] sm:$0xff] %vm3139_vm1, %v2254_v27  ;;  %v2246_v31 = vadd.f32 %v5374_v47, %v2245_v29  ;;  %3394 = vst.msk [vmem:[%s4862_s7 + $0x7f0] sm:$0xff] %vm3139_vm1, %v2894_v28  ;;  %v2886_v32 = vadd.f32 %v5374_v47, %v2885_v30 }
 0x199   : > { %v4154_v33 = vpop.f32.mrf.mxu0  ;;  %v4314_v34 = vpop.f32.mrf.mxu1 }
 0x19a   : > { %3232 = vst.msk [vmem:[%s4862_s7 + $0x2e0] sm:$0xff] %vm3139_vm1, %v2246_v31  ;;  %v2257_v35 = vadd.f32 %v5374_v47, %v4154_v33  ;;  %3392 = vst.msk [vmem:[%s4862_s7 + $0x7e0] sm:$0xff] %vm3139_vm1, %v2886_v32  ;;  %v2897_v36 = vadd.f32 %v5374_v47, %v4314_v34 }
 0x19b   : > { %v2248_v37 = vpop.f32.mrf.mxu0  ;;  %v2888_v38 = vpop.f32.mrf.mxu1 }
 0x19c   : > { %3235 = vst.msk [vmem:[%s4862_s7 + $0x2f8] sm:$0xff] %vm3139_vm1, %v2257_v35  ;;  %v2249_v39 = vadd.f32 %v5374_v47, %v2248_v37  ;;  %3395 = vst.msk [vmem:[%s4862_s7 + $0x7f8] sm:$0xff] %vm3139_vm1, %v2897_v36  ;;  %v2889_v40 = vadd.f32 %v5374_v47, %v2888_v38 }
 0x19d   : > { %v4157_v41 = vpop.f32.mrf.mxu0  ;;  %v4317_v43 = vpop.f32.mrf.mxu1 }
 0x19e   : > { %3233 = vst.msk [vmem:[%s4862_s7 + $0x2e8] sm:$0xff] %vm3139_vm1, %v2249_v39  ;;  %v2270_v44 = vadd.f32 %v5374_v47, %v4157_v41  ;;  %3393 = vst.msk [vmem:[%s4862_s7 + $0x7e8] sm:$0xff] %vm3139_vm1, %v2889_v40  ;;  %v2910_v45 = vadd.f32 %v5374_v47, %v4317_v43 }
 0x19f   : > { %v2261_v46 = vpop.f32.mrf.mxu0  ;;  %v2901_v48 = vpop.f32.mrf.mxu1 }
 0x1a0   : > { %3238 = vst.msk [vmem:[%s4862_s7 + $0x310] sm:$0xff] %vm3139_vm1, %v2270_v44  ;;  %v2262_v49 = vadd.f32 %v5374_v47, %v2261_v46  ;;  %3398 = vst.msk [vmem:[%s4862_s7 + $0x810] sm:$0xff] %vm3139_vm1, %v2910_v45  ;;  %v2902_v50 = vadd.f32 %v5374_v47, %v2901_v48 }
 0x1a1   : > { %v4158_v51 = vpop.f32.mrf.mxu0  ;;  %v4318_v42 = vpop.f32.mrf.mxu1 }
 0x1a2   : > { %3236 = vst.msk [vmem:[%s4862_s7 + $0x300] sm:$0xff] %vm3139_vm1, %v2262_v49  ;;  %v2273_v52 = vadd.f32 %v5374_v47, %v4158_v51  ;;  %3396 = vst.msk [vmem:[%s4862_s7 + $0x800] sm:$0xff] %vm3139_vm1, %v2902_v50  ;;  %v2913_v53 = vadd.f32 %v5374_v47, %v4318_v42 }
 0x1a3   : > { %v2264_v54 = vpop.f32.mrf.mxu0  ;;  %v2904_v55 = vpop.f32.mrf.mxu1 }
 0x1a4   : > { %3239 = vst.msk [vmem:[%s4862_s7 + $0x318] sm:$0xff] %vm3139_vm1, %v2273_v52  ;;  %v2265_v56 = vadd.f32 %v5374_v47, %v2264_v54  ;;  %3399 = vst.msk [vmem:[%s4862_s7 + $0x818] sm:$0xff] %vm3139_vm1, %v2913_v53  ;;  %v2905_v57 = vadd.f32 %v5374_v47, %v2904_v55 }
 0x1a5   : > { %v4161_v58 = vpop.f32.mrf.mxu0  ;;  %v4321_v59 = vpop.f32.mrf.mxu1 }
 0x1a6   : > { %3237 = vst.msk [vmem:[%s4862_s7 + $0x308] sm:$0xff] %vm3139_vm1, %v2265_v56  ;;  %v2286_v60 = vadd.f32 %v5374_v47, %v4161_v58  ;;  %3397 = vst.msk [vmem:[%s4862_s7 + $0x808] sm:$0xff] %vm3139_vm1, %v2905_v57  ;;  %v2926_v61 = vadd.f32 %v5374_v47, %v4321_v59 }
 0x1a7   : > { %v2277_v62 = vpop.f32.mrf.mxu0  ;;  %v2917_v63 = vpop.f32.mrf.mxu1 }
 0x1a8   : > { %3242 = vst.msk [vmem:[%s4862_s7 + $0x330] sm:$0xff] %vm3139_vm1, %v2286_v60  ;;  %v2278_v0 = vadd.f32 %v5374_v47, %v2277_v62  ;;  %3402 = vst.msk [vmem:[%s4862_s7 + $0x830] sm:$0xff] %vm3139_vm1, %v2926_v61  ;;  %v2918_v1 = vadd.f32 %v5374_v47, %v2917_v63 }
 0x1a9   : > { %v4162_v2 = vpop.f32.mrf.mxu0  ;;  %v4322_v3 = vpop.f32.mrf.mxu1 }
 0x1aa   : > { %3240 = vst.msk [vmem:[%s4862_s7 + $0x320] sm:$0xff] %vm3139_vm1, %v2278_v0  ;;  %v2289_v4 = vadd.f32 %v5374_v47, %v4162_v2  ;;  %3400 = vst.msk [vmem:[%s4862_s7 + $0x820] sm:$0xff] %vm3139_vm1, %v2918_v1  ;;  %v2929_v5 = vadd.f32 %v5374_v47, %v4322_v3 }
 0x1ab   : > { %v2280_v6 = vpop.f32.mrf.mxu0  ;;  %v2920_v7 = vpop.f32.mrf.mxu1 }
 0x1ac   : > { %3243 = vst.msk [vmem:[%s4862_s7 + $0x338] sm:$0xff] %vm3139_vm1, %v2289_v4  ;;  %v2281_v8 = vadd.f32 %v5374_v47, %v2280_v6  ;;  %3403 = vst.msk [vmem:[%s4862_s7 + $0x838] sm:$0xff] %vm3139_vm1, %v2929_v5  ;;  %v2921_v9 = vadd.f32 %v5374_v47, %v2920_v7 }
 0x1ad   : > { %v4165_v10 = vpop.f32.mrf.mxu0  ;;  %v4325_v11 = vpop.f32.mrf.mxu1 }
 0x1ae   : > { %3241 = vst.msk [vmem:[%s4862_s7 + $0x328] sm:$0xff] %vm3139_vm1, %v2281_v8  ;;  %v2302_v12 = vadd.f32 %v5374_v47, %v4165_v10  ;;  %3401 = vst.msk [vmem:[%s4862_s7 + $0x828] sm:$0xff] %vm3139_vm1, %v2921_v9  ;;  %v2942_v13 = vadd.f32 %v5374_v47, %v4325_v11 }
 0x1af   : > { %v2293_v14 = vpop.f32.mrf.mxu0  ;;  %v2933_v15 = vpop.f32.mrf.mxu1 }
 0x1b0   : > { %3246 = vst.msk [vmem:[%s4862_s7 + $0x350] sm:$0xff] %vm3139_vm1, %v2302_v12  ;;  %v2294_v16 = vadd.f32 %v5374_v47, %v2293_v14  ;;  %3406 = vst.msk [vmem:[%s4862_s7 + $0x850] sm:$0xff] %vm3139_vm1, %v2942_v13  ;;  %v2934_v17 = vadd.f32 %v5374_v47, %v2933_v15 }
 0x1b1   : > { %v4166_v18 = vpop.f32.mrf.mxu0  ;;  %v4326_v19 = vpop.f32.mrf.mxu1 }
 0x1b2   : > { %3244 = vst.msk [vmem:[%s4862_s7 + $0x340] sm:$0xff] %vm3139_vm1, %v2294_v16  ;;  %v2305_v20 = vadd.f32 %v5374_v47, %v4166_v18  ;;  %3404 = vst.msk [vmem:[%s4862_s7 + $0x840] sm:$0xff] %vm3139_vm1, %v2934_v17  ;;  %v2945_v21 = vadd.f32 %v5374_v47, %v4326_v19 }
 0x1b3   : > { %v2296_v22 = vpop.f32.mrf.mxu0  ;;  %v2936_v23 = vpop.f32.mrf.mxu1 }
 0x1b4   : > { %3247 = vst.msk [vmem:[%s4862_s7 + $0x358] sm:$0xff] %vm3139_vm1, %v2305_v20  ;;  %v2297_v24 = vadd.f32 %v5374_v47, %v2296_v22  ;;  %3407 = vst.msk [vmem:[%s4862_s7 + $0x858] sm:$0xff] %vm3139_vm1, %v2945_v21  ;;  %v2937_v25 = vadd.f32 %v5374_v47, %v2936_v23 }
 0x1b5   : > { %v4169_v26 = vpop.f32.mrf.mxu0  ;;  %v4329_v27 = vpop.f32.mrf.mxu1 }
 0x1b6   : > { %3245 = vst.msk [vmem:[%s4862_s7 + $0x348] sm:$0xff] %vm3139_vm1, %v2297_v24  ;;  %v2318_v28 = vadd.f32 %v5374_v47, %v4169_v26  ;;  %3405 = vst.msk [vmem:[%s4862_s7 + $0x848] sm:$0xff] %vm3139_vm1, %v2937_v25  ;;  %v2958_v29 = vadd.f32 %v5374_v47, %v4329_v27 }
 0x1b7   : > { %v2309_v30 = vpop.f32.mrf.mxu0  ;;  %v2949_v31 = vpop.f32.mrf.mxu1 }
 0x1b8   : > { %3250 = vst.msk [vmem:[%s4862_s7 + $0x370] sm:$0xff] %vm3139_vm1, %v2318_v28  ;;  %v2310_v32 = vadd.f32 %v5374_v47, %v2309_v30  ;;  %3410 = vst.msk [vmem:[%s4862_s7 + $0x870] sm:$0xff] %vm3139_vm1, %v2958_v29  ;;  %v2950_v33 = vadd.f32 %v5374_v47, %v2949_v31 }
 0x1b9   : > { %v4170_v34 = vpop.f32.mrf.mxu0  ;;  %v4330_v35 = vpop.f32.mrf.mxu1 }
 0x1ba   : > { %3248 = vst.msk [vmem:[%s4862_s7 + $0x360] sm:$0xff] %vm3139_vm1, %v2310_v32  ;;  %v2321_v36 = vadd.f32 %v5374_v47, %v4170_v34  ;;  %3408 = vst.msk [vmem:[%s4862_s7 + $0x860] sm:$0xff] %vm3139_vm1, %v2950_v33  ;;  %v2961_v37 = vadd.f32 %v5374_v47, %v4330_v35 }
 0x1bb   : > { %v2312_v38 = vpop.f32.mrf.mxu0  ;;  %v2952_v39 = vpop.f32.mrf.mxu1 }
 0x1bc   : > { %3251 = vst.msk [vmem:[%s4862_s7 + $0x378] sm:$0xff] %vm3139_vm1, %v2321_v36  ;;  %v2313_v40 = vadd.f32 %v5374_v47, %v2312_v38  ;;  %3411 = vst.msk [vmem:[%s4862_s7 + $0x878] sm:$0xff] %vm3139_vm1, %v2961_v37  ;;  %v2953_v41 = vadd.f32 %v5374_v47, %v2952_v39 }
 0x1bd   : > { %v4173_v43 = vpop.f32.mrf.mxu0  ;;  %v4333_v44 = vpop.f32.mrf.mxu1 }
 0x1be   : > { %3249 = vst.msk [vmem:[%s4862_s7 + $0x368] sm:$0xff] %vm3139_vm1, %v2313_v40  ;;  %v2334_v45 = vadd.f32 %v5374_v47, %v4173_v43  ;;  %3409 = vst.msk [vmem:[%s4862_s7 + $0x868] sm:$0xff] %vm3139_vm1, %v2953_v41  ;;  %v2974_v46 = vadd.f32 %v5374_v47, %v4333_v44 }
 0x1bf   : > { %v2325_v48 = vpop.f32.mrf.mxu0  ;;  %v2965_v49 = vpop.f32.mrf.mxu1 }
 0x1c0   : > { %3254 = vst.msk [vmem:[%s4862_s7 + $0x390] sm:$0xff] %vm3139_vm1, %v2334_v45  ;;  %v2326_v50 = vadd.f32 %v5374_v47, %v2325_v48  ;;  %3414 = vst.msk [vmem:[%s4862_s7 + $0x890] sm:$0xff] %vm3139_vm1, %v2974_v46  ;;  %v2966_v51 = vadd.f32 %v5374_v47, %v2965_v49 }
 0x1c1   : > { %v4174_v42 = vpop.f32.mrf.mxu0  ;;  %v4334_v52 = vpop.f32.mrf.mxu1 }
 0x1c2   : > { %3252 = vst.msk [vmem:[%s4862_s7 + $0x380] sm:$0xff] %vm3139_vm1, %v2326_v50  ;;  %v2337_v53 = vadd.f32 %v5374_v47, %v4174_v42  ;;  %3412 = vst.msk [vmem:[%s4862_s7 + $0x880] sm:$0xff] %vm3139_vm1, %v2966_v51  ;;  %v2977_v54 = vadd.f32 %v5374_v47, %v4334_v52 }
 0x1c3   : > { %v2328_v55 = vpop.f32.mrf.mxu0  ;;  %v2968_v56 = vpop.f32.mrf.mxu1 }
 0x1c4   : > { %3255 = vst.msk [vmem:[%s4862_s7 + $0x398] sm:$0xff] %vm3139_vm1, %v2337_v53  ;;  %v2329_v57 = vadd.f32 %v5374_v47, %v2328_v55  ;;  %3415 = vst.msk [vmem:[%s4862_s7 + $0x898] sm:$0xff] %vm3139_vm1, %v2977_v54  ;;  %v2969_v58 = vadd.f32 %v5374_v47, %v2968_v56 }
 0x1c5   : > { %v4177_v59 = vpop.f32.mrf.mxu0  ;;  %v4337_v60 = vpop.f32.mrf.mxu1 }
 0x1c6   : > { %3253 = vst.msk [vmem:[%s4862_s7 + $0x388] sm:$0xff] %vm3139_vm1, %v2329_v57  ;;  %v2350_v61 = vadd.f32 %v5374_v47, %v4177_v59  ;;  %3413 = vst.msk [vmem:[%s4862_s7 + $0x888] sm:$0xff] %vm3139_vm1, %v2969_v58  ;;  %v2990_v62 = vadd.f32 %v5374_v47, %v4337_v60 }
 0x1c7   : > { %v2341_v63 = vpop.f32.mrf.mxu0  ;;  %v2981_v0 = vpop.f32.mrf.mxu1 }
 0x1c8   : > { %3258 = vst.msk [vmem:[%s4862_s7 + $0x3b0] sm:$0xff] %vm3139_vm1, %v2350_v61  ;;  %v2342_v1 = vadd.f32 %v5374_v47, %v2341_v63  ;;  %3418 = vst.msk [vmem:[%s4862_s7 + $0x8b0] sm:$0xff] %vm3139_vm1, %v2990_v62  ;;  %v2982_v2 = vadd.f32 %v5374_v47, %v2981_v0 }
 0x1c9   : > { %v4178_v3 = vpop.f32.mrf.mxu0  ;;  %v4338_v4 = vpop.f32.mrf.mxu1 }
 0x1ca   : > { %3256 = vst.msk [vmem:[%s4862_s7 + $0x3a0] sm:$0xff] %vm3139_vm1, %v2342_v1  ;;  %v2353_v5 = vadd.f32 %v5374_v47, %v4178_v3  ;;  %3416 = vst.msk [vmem:[%s4862_s7 + $0x8a0] sm:$0xff] %vm3139_vm1, %v2982_v2  ;;  %v2993_v6 = vadd.f32 %v5374_v47, %v4338_v4 }
 0x1cb   : > { %v2344_v7 = vpop.f32.mrf.mxu0  ;;  %v2984_v8 = vpop.f32.mrf.mxu1 }
 0x1cc   : > { %3259 = vst.msk [vmem:[%s4862_s7 + $0x3b8] sm:$0xff] %vm3139_vm1, %v2353_v5  ;;  %v2345_v9 = vadd.f32 %v5374_v47, %v2344_v7  ;;  %3419 = vst.msk [vmem:[%s4862_s7 + $0x8b8] sm:$0xff] %vm3139_vm1, %v2993_v6  ;;  %v2985_v10 = vadd.f32 %v5374_v47, %v2984_v8 }
 0x1cd   : > { %v4181_v11 = vpop.f32.mrf.mxu0  ;;  %v4341_v12 = vpop.f32.mrf.mxu1 }
 0x1ce   : > { %3257 = vst.msk [vmem:[%s4862_s7 + $0x3a8] sm:$0xff] %vm3139_vm1, %v2345_v9  ;;  %v2366_v13 = vadd.f32 %v5374_v47, %v4181_v11  ;;  %3417 = vst.msk [vmem:[%s4862_s7 + $0x8a8] sm:$0xff] %vm3139_vm1, %v2985_v10  ;;  %v3006_v14 = vadd.f32 %v5374_v47, %v4341_v12 }
 0x1cf   : > { %v2357_v15 = vpop.f32.mrf.mxu0  ;;  %v2997_v16 = vpop.f32.mrf.mxu1 }
 0x1d0   : > { %3262 = vst.msk [vmem:[%s4862_s7 + $0x3d0] sm:$0xff] %vm3139_vm1, %v2366_v13  ;;  %v2358_v17 = vadd.f32 %v5374_v47, %v2357_v15  ;;  %3422 = vst.msk [vmem:[%s4862_s7 + $0x8d0] sm:$0xff] %vm3139_vm1, %v3006_v14  ;;  %v2998_v18 = vadd.f32 %v5374_v47, %v2997_v16 }
 0x1d1   : > { %v4182_v19 = vpop.f32.mrf.mxu0  ;;  %v4342_v20 = vpop.f32.mrf.mxu1 }
 0x1d2   : > { %3260 = vst.msk [vmem:[%s4862_s7 + $0x3c0] sm:$0xff] %vm3139_vm1, %v2358_v17  ;;  %v2369_v21 = vadd.f32 %v5374_v47, %v4182_v19  ;;  %3420 = vst.msk [vmem:[%s4862_s7 + $0x8c0] sm:$0xff] %vm3139_vm1, %v2998_v18  ;;  %v3009_v22 = vadd.f32 %v5374_v47, %v4342_v20 }
 0x1d3   : > { %v2360_v23 = vpop.f32.mrf.mxu0  ;;  %v3000_v24 = vpop.f32.mrf.mxu1 }
 0x1d4   : > { %3263 = vst.msk [vmem:[%s4862_s7 + $0x3d8] sm:$0xff] %vm3139_vm1, %v2369_v21  ;;  %v2361_v25 = vadd.f32 %v5374_v47, %v2360_v23  ;;  %3423 = vst.msk [vmem:[%s4862_s7 + $0x8d8] sm:$0xff] %vm3139_vm1, %v3009_v22  ;;  %v3001_v26 = vadd.f32 %v5374_v47, %v3000_v24 }
 0x1d5   : > { %v4185_v27 = vpop.f32.mrf.mxu0  ;;  %v4345_v28 = vpop.f32.mrf.mxu1 }
 0x1d6   : > { %3261 = vst.msk [vmem:[%s4862_s7 + $0x3c8] sm:$0xff] %vm3139_vm1, %v2361_v25  ;;  %v2382_v29 = vadd.f32 %v5374_v47, %v4185_v27  ;;  %3421 = vst.msk [vmem:[%s4862_s7 + $0x8c8] sm:$0xff] %vm3139_vm1, %v3001_v26  ;;  %v3022_v30 = vadd.f32 %v5374_v47, %v4345_v28 }
 0x1d7   : > { %v2373_v31 = vpop.f32.mrf.mxu0  ;;  %v3013_v32 = vpop.f32.mrf.mxu1 }
 0x1d8   : > { %3266 = vst.msk [vmem:[%s4862_s7 + $0x3f0] sm:$0xff] %vm3139_vm1, %v2382_v29  ;;  %v2374_v33 = vadd.f32 %v5374_v47, %v2373_v31  ;;  %3426 = vst.msk [vmem:[%s4862_s7 + $0x8f0] sm:$0xff] %vm3139_vm1, %v3022_v30  ;;  %v3014_v34 = vadd.f32 %v5374_v47, %v3013_v32 }
 0x1d9   : > { %v4186_v35 = vpop.f32.mrf.mxu0  ;;  %v4346_v36 = vpop.f32.mrf.mxu1 }
 0x1da   : > { %3264 = vst.msk [vmem:[%s4862_s7 + $0x3e0] sm:$0xff] %vm3139_vm1, %v2374_v33  ;;  %v2385_v37 = vadd.f32 %v5374_v47, %v4186_v35  ;;  %3424 = vst.msk [vmem:[%s4862_s7 + $0x8e0] sm:$0xff] %vm3139_vm1, %v3014_v34  ;;  %v3025_v38 = vadd.f32 %v5374_v47, %v4346_v36 }
 0x1db   : > { %v2376_v39 = vpop.f32.mrf.mxu0  ;;  %v3016_v40 = vpop.f32.mrf.mxu1 }
 0x1dc   : > { %3267 = vst.msk [vmem:[%s4862_s7 + $0x3f8] sm:$0xff] %vm3139_vm1, %v2385_v37  ;;  %v2377_v41 = vadd.f32 %v5374_v47, %v2376_v39  ;;  %3427 = vst.msk [vmem:[%s4862_s7 + $0x8f8] sm:$0xff] %vm3139_vm1, %v3025_v38  ;;  %v3017_v43 = vadd.f32 %v5374_v47, %v3016_v40 }
 0x1dd   : > { %v4189_v44 = vpop.f32.mrf.mxu0  ;;  %v4349_v45 = vpop.f32.mrf.mxu1 }
 0x1de   : > { %3265 = vst.msk [vmem:[%s4862_s7 + $0x3e8] sm:$0xff] %vm3139_vm1, %v2377_v41  ;;  %v2398_v46 = vadd.f32 %v5374_v47, %v4189_v44  ;;  %3425 = vst.msk [vmem:[%s4862_s7 + $0x8e8] sm:$0xff] %vm3139_vm1, %v3017_v43  ;;  %v3038_v48 = vadd.f32 %v5374_v47, %v4349_v45 }
 0x1df   : > { %v2389_v49 = vpop.f32.mrf.mxu0  ;;  %v3029_v50 = vpop.f32.mrf.mxu1 }
 0x1e0   : > { %3270 = vst.msk [vmem:[%s4862_s7 + $0x410] sm:$0xff] %vm3139_vm1, %v2398_v46  ;;  %v2390_v51 = vadd.f32 %v5374_v47, %v2389_v49  ;;  %3430 = vst.msk [vmem:[%s4862_s7 + $0x910] sm:$0xff] %vm3139_vm1, %v3038_v48  ;;  %v3030_v42 = vadd.f32 %v5374_v47, %v3029_v50 }
 0x1e1   : > { %v4190_v52 = vpop.f32.mrf.mxu0  ;;  %v4350_v53 = vpop.f32.mrf.mxu1 }
 0x1e2   : > { %3268 = vst.msk [vmem:[%s4862_s7 + $0x400] sm:$0xff] %vm3139_vm1, %v2390_v51  ;;  %v2401_v54 = vadd.f32 %v5374_v47, %v4190_v52  ;;  %3428 = vst.msk [vmem:[%s4862_s7 + $0x900] sm:$0xff] %vm3139_vm1, %v3030_v42  ;;  %v3041_v55 = vadd.f32 %v5374_v47, %v4350_v53 }
 0x1e3   : > { %v2392_v56 = vpop.f32.mrf.mxu0  ;;  %v3032_v57 = vpop.f32.mrf.mxu1 }
 0x1e4   : > { %3271 = vst.msk [vmem:[%s4862_s7 + $0x418] sm:$0xff] %vm3139_vm1, %v2401_v54  ;;  %v2393_v58 = vadd.f32 %v5374_v47, %v2392_v56  ;;  %3431 = vst.msk [vmem:[%s4862_s7 + $0x918] sm:$0xff] %vm3139_vm1, %v3041_v55  ;;  %v3033_v59 = vadd.f32 %v5374_v47, %v3032_v57 }
 0x1e5   : > { %v4193_v60 = vpop.f32.mrf.mxu0  ;;  %v4353_v61 = vpop.f32.mrf.mxu1 }
 0x1e6   : > { %3269 = vst.msk [vmem:[%s4862_s7 + $0x408] sm:$0xff] %vm3139_vm1, %v2393_v58  ;;  %v2414_v62 = vadd.f32 %v5374_v47, %v4193_v60  ;;  %3429 = vst.msk [vmem:[%s4862_s7 + $0x908] sm:$0xff] %vm3139_vm1, %v3033_v59  ;;  %v3054_v63 = vadd.f32 %v5374_v47, %v4353_v61 }
 0x1e7   : > { %v2405_v0 = vpop.f32.mrf.mxu0  ;;  %v3045_v1 = vpop.f32.mrf.mxu1 }
 0x1e8   : > { %3274 = vst.msk [vmem:[%s4862_s7 + $0x430] sm:$0xff] %vm3139_vm1, %v2414_v62  ;;  %v2406_v2 = vadd.f32 %v5374_v47, %v2405_v0  ;;  %3434 = vst.msk [vmem:[%s4862_s7 + $0x930] sm:$0xff] %vm3139_vm1, %v3054_v63  ;;  %v3046_v3 = vadd.f32 %v5374_v47, %v3045_v1 }
 0x1e9   : > { %v4194_v4 = vpop.f32.mrf.mxu0  ;;  %v4354_v5 = vpop.f32.mrf.mxu1 }
 0x1ea   : > { %3272 = vst.msk [vmem:[%s4862_s7 + $0x420] sm:$0xff] %vm3139_vm1, %v2406_v2  ;;  %v2417_v6 = vadd.f32 %v5374_v47, %v4194_v4  ;;  %3432 = vst.msk [vmem:[%s4862_s7 + $0x920] sm:$0xff] %vm3139_vm1, %v3046_v3  ;;  %v3057_v7 = vadd.f32 %v5374_v47, %v4354_v5 }
 0x1eb   : > { %v2408_v8 = vpop.f32.mrf.mxu0  ;;  %v3048_v9 = vpop.f32.mrf.mxu1 }
 0x1ec   : > { %3275 = vst.msk [vmem:[%s4862_s7 + $0x438] sm:$0xff] %vm3139_vm1, %v2417_v6  ;;  %v2409_v10 = vadd.f32 %v5374_v47, %v2408_v8  ;;  %3435 = vst.msk [vmem:[%s4862_s7 + $0x938] sm:$0xff] %vm3139_vm1, %v3057_v7  ;;  %v3049_v11 = vadd.f32 %v5374_v47, %v3048_v9 }
 0x1ed   : > { %v4197_v12 = vpop.f32.mrf.mxu0  ;;  %v4357_v13 = vpop.f32.mrf.mxu1 }
 0x1ee   : > { %3273 = vst.msk [vmem:[%s4862_s7 + $0x428] sm:$0xff] %vm3139_vm1, %v2409_v10  ;;  %v2430_v14 = vadd.f32 %v5374_v47, %v4197_v12  ;;  %3433 = vst.msk [vmem:[%s4862_s7 + $0x928] sm:$0xff] %vm3139_vm1, %v3049_v11  ;;  %v3070_v15 = vadd.f32 %v5374_v47, %v4357_v13  ;;  %v4570_v11 = vld [vmem:[%s5931_s2] ss:$0 sm:$0xff] }
 0x1ef   : > { %v2421_v16 = vpop.f32.mrf.mxu0  ;;  %v3061_v17 = vpop.f32.mrf.mxu1 }
 0x1f0   : > { %3278 = vst.msk [vmem:[%s4862_s7 + $0x450] sm:$0xff] %vm3139_vm1, %v2430_v14  ;;  %v2422_v18 = vadd.f32 %v5374_v47, %v2421_v16  ;;  %3438 = vst.msk [vmem:[%s4862_s7 + $0x950] sm:$0xff] %vm3139_vm1, %v3070_v15  ;;  %v3062_v19 = vadd.f32 %v5374_v47, %v3061_v17 }
 0x1f1   : > { %v4198_v20 = vpop.f32.mrf.mxu0  ;;  %v4358_v21 = vpop.f32.mrf.mxu1 }
 0x1f2   : > { %3276 = vst.msk [vmem:[%s4862_s7 + $0x440] sm:$0xff] %vm3139_vm1, %v2422_v18  ;;  %v2433_v22 = vadd.f32 %v5374_v47, %v4198_v20  ;;  %3436 = vst.msk [vmem:[%s4862_s7 + $0x940] sm:$0xff] %vm3139_vm1, %v3062_v19  ;;  %v3073_v23 = vadd.f32 %v5374_v47, %v4358_v21 }
 0x1f3   : > { %v2424_v24 = vpop.f32.mrf.mxu0  ;;  %v3064_v25 = vpop.f32.mrf.mxu1 }
 0x1f4   : > { %3279 = vst.msk [vmem:[%s4862_s7 + $0x458] sm:$0xff] %vm3139_vm1, %v2433_v22  ;;  %v2425_v26 = vadd.f32 %v5374_v47, %v2424_v24  ;;  %3439 = vst.msk [vmem:[%s4862_s7 + $0x958] sm:$0xff] %vm3139_vm1, %v3073_v23  ;;  %v3065_v27 = vadd.f32 %v5374_v47, %v3064_v25 }
 0x1f5   : > { %v4201_v28 = vpop.f32.mrf.mxu0  ;;  %v4361_v29 = vpop.f32.mrf.mxu1 }
 0x1f6   : > { %3277 = vst.msk [vmem:[%s4862_s7 + $0x448] sm:$0xff] %vm3139_vm1, %v2425_v26  ;;  %v2446_v30 = vadd.f32 %v5374_v47, %v4201_v28  ;;  %3437 = vst.msk [vmem:[%s4862_s7 + $0x948] sm:$0xff] %vm3139_vm1, %v3065_v27  ;;  %v3086_v31 = vadd.f32 %v5374_v47, %v4361_v29 }
 0x1f7   : > { %v2437_v32 = vpop.f32.mrf.mxu0  ;;  %v3077_v33 = vpop.f32.mrf.mxu1 }
 0x1f8   : > { %3282 = vst.msk [vmem:[%s4862_s7 + $0x470] sm:$0xff] %vm3139_vm1, %v2446_v30  ;;  %v2438_v34 = vadd.f32 %v5374_v47, %v2437_v32  ;;  %3442 = vst.msk [vmem:[%s4862_s7 + $0x970] sm:$0xff] %vm3139_vm1, %v3086_v31  ;;  %v3078_v35 = vadd.f32 %v5374_v47, %v3077_v33 }
 0x1f9   : > { %v4202_v36 = vpop.f32.mrf.mxu0  ;;  %v4362_v37 = vpop.f32.mrf.mxu1 }
 0x1fa   : > { %3280 = vst.msk [vmem:[%s4862_s7 + $0x460] sm:$0xff] %vm3139_vm1, %v2438_v34  ;;  %v2449_v38 = vadd.f32 %v5374_v47, %v4202_v36  ;;  %3440 = vst.msk [vmem:[%s4862_s7 + $0x960] sm:$0xff] %vm3139_vm1, %v3078_v35  ;;  %v3089_v39 = vadd.f32 %v5374_v47, %v4362_v37 }
 0x1fb   : > { %v2440_v40 = vpop.f32.mrf.mxu0  ;;  %v3080_v41 = vpop.f32.mrf.mxu1 }
 0x1fc   : > { %3283 = vst.msk [vmem:[%s4862_s7 + $0x478] sm:$0xff] %vm3139_vm1, %v2449_v38  ;;  %v2441_v43 = vadd.f32 %v5374_v47, %v2440_v40  ;;  %3443 = vst.msk [vmem:[%s4862_s7 + $0x978] sm:$0xff] %vm3139_vm1, %v3089_v39  ;;  %v3081_v44 = vadd.f32 %v5374_v47, %v3080_v41 }
 0x1fd   : > { %v4205_v45 = vpop.f32.mrf.mxu0  ;;  %v4365_v46 = vpop.f32.mrf.mxu1 }
 0x1fe   : > { %3281 = vst.msk [vmem:[%s4862_s7 + $0x468] sm:$0xff] %vm3139_vm1, %v2441_v43  ;;  %v2462_v48 = vadd.f32 %v5374_v47, %v4205_v45  ;;  %3441 = vst.msk [vmem:[%s4862_s7 + $0x968] sm:$0xff] %vm3139_vm1, %v3081_v44  ;;  %v3102_v49 = vadd.f32 %v5374_v47, %v4365_v46 }
 0x1ff   : > { %v2453_v50 = vpop.f32.mrf.mxu0  ;;  %v3093_v51 = vpop.f32.mrf.mxu1 }
 0x200   : > { %3286 = vst.msk [vmem:[%s4862_s7 + $0x490] sm:$0xff] %vm3139_vm1, %v2462_v48  ;;  %v2454_v42 = vadd.f32 %v5374_v47, %v2453_v50  ;;  %3446 = vst.msk [vmem:[%s4862_s7 + $0x990] sm:$0xff] %vm3139_vm1, %v3102_v49  ;;  %v3094_v52 = vadd.f32 %v5374_v47, %v3093_v51 }
 0x201   : > { %v4206_v53 = vpop.f32.mrf.mxu0  ;;  %v4366_v54 = vpop.f32.mrf.mxu1 }
 0x202   : > { %3284 = vst.msk [vmem:[%s4862_s7 + $0x480] sm:$0xff] %vm3139_vm1, %v2454_v42  ;;  %v2465_v55 = vadd.f32 %v5374_v47, %v4206_v53  ;;  %3444 = vst.msk [vmem:[%s4862_s7 + $0x980] sm:$0xff] %vm3139_vm1, %v3094_v52  ;;  %v3105_v56 = vadd.f32 %v5374_v47, %v4366_v54 }
 0x203   : > { %v2456_v57 = vpop.f32.mrf.mxu0  ;;  %v3096_v58 = vpop.f32.mrf.mxu1 }
 0x204   : > { %3287 = vst.msk [vmem:[%s4862_s7 + $0x498] sm:$0xff] %vm3139_vm1, %v2465_v55  ;;  %v2457_v59 = vadd.f32 %v5374_v47, %v2456_v57  ;;  %3447 = vst.msk [vmem:[%s4862_s7 + $0x998] sm:$0xff] %vm3139_vm1, %v3105_v56  ;;  %v3097_v60 = vadd.f32 %v5374_v47, %v3096_v58 }
 0x205   : > { %v4209_v61 = vpop.f32.mrf.mxu0  ;;  %v4369_v62 = vpop.f32.mrf.mxu1 }
 0x206   : > { %3285 = vst.msk [vmem:[%s4862_s7 + $0x488] sm:$0xff] %vm3139_vm1, %v2457_v59  ;;  %v2478_v63 = vadd.f32 %v5374_v47, %v4209_v61  ;;  %3445 = vst.msk [vmem:[%s4862_s7 + $0x988] sm:$0xff] %vm3139_vm1, %v3097_v60  ;;  %v3118_v0 = vadd.f32 %v5374_v47, %v4369_v62 }
 0x207   : > { %v2469_v1 = vpop.f32.mrf.mxu0  ;;  %v3109_v2 = vpop.f32.mrf.mxu1 }
 0x208   : > { %3290 = vst.msk [vmem:[%s4862_s7 + $0x4b0] sm:$0xff] %vm3139_vm1, %v2478_v63  ;;  %v2470_v3 = vadd.f32 %v5374_v47, %v2469_v1  ;;  %3450 = vst.msk [vmem:[%s4862_s7 + $0x9b0] sm:$0xff] %vm3139_vm1, %v3118_v0  ;;  %v3110_v4 = vadd.f32 %v5374_v47, %v3109_v2 }
 0x209   : > { %v4210_v5 = vpop.f32.mrf.mxu0  ;;  %v4370_v6 = vpop.f32.mrf.mxu1 }
 0x20a   : > { %3288 = vst.msk [vmem:[%s4862_s7 + $0x4a0] sm:$0xff] %vm3139_vm1, %v2470_v3  ;;  %v2481_v7 = vadd.f32 %v5374_v47, %v4210_v5  ;;  %3448 = vst.msk [vmem:[%s4862_s7 + $0x9a0] sm:$0xff] %vm3139_vm1, %v3110_v4  ;;  %v3121_v8 = vadd.f32 %v5374_v47, %v4370_v6 }
 0x20b   : > { %v2472_v9 = vpop.f32.mrf.mxu0  ;;  %v3112_v10 = vpop.f32.mrf.mxu1 }
 0x20c   : > { %3291 = vst.msk [vmem:[%s4862_s7 + $0x4b8] sm:$0xff] %vm3139_vm1, %v2481_v7  ;;  %v2473_v12 = vadd.f32 %v4570_v11, %v2472_v9  ;;  %3451 = vst.msk [vmem:[%s4862_s7 + $0x9b8] sm:$0xff] %vm3139_vm1, %v3121_v8  ;;  %v3113_v13 = vadd.f32 %v4570_v11, %v3112_v10 }
 0x20d   : > { %v4213_v14 = vpop.f32.mrf.mxu0  ;;  %v4373_v15 = vpop.f32.mrf.mxu1 }
 0x20e   : > { %3289 = vst.msk [vmem:[%s4862_s7 + $0x4a8] sm:$0xff] %vm3139_vm1, %v2473_v12  ;;  %v2494_v47 = vadd.f32 %v4570_v11, %v4213_v14  ;;  %3449 = vst.msk [vmem:[%s4862_s7 + $0x9a8] sm:$0xff] %vm3139_vm1, %v3113_v13  ;;  %v3134_v16 = vadd.f32 %v4570_v11, %v4373_v15 }
 0x20f   : > { %v2485_v17 = vpop.f32.mrf.mxu0  ;;  %v3125_v18 = vpop.f32.mrf.mxu1 }
 0x210   : > { %3294 = vst.msk [vmem:[%s4862_s7 + $0x4d0] sm:$0xff] %vm3139_vm1, %v2494_v47  ;;  %v2486_v19 = vadd.f32 %v4570_v11, %v2485_v17  ;;  %3454 = vst.msk [vmem:[%s4862_s7 + $0x9d0] sm:$0xff] %vm3139_vm1, %v3134_v16  ;;  %v3126_v20 = vadd.f32 %v4570_v11, %v3125_v18 }
 0x211   : > { %v4214_v21 = vpop.f32.mrf.mxu0  ;;  %v4374_v22 = vpop.f32.mrf.mxu1 }
 0x212   : > { %3292 = vst.msk [vmem:[%s4862_s7 + $0x4c0] sm:$0xff] %vm3139_vm1, %v2486_v19  ;;  %v2497_v23 = vadd.f32 %v4570_v11, %v4214_v21  ;;  %3452 = vst.msk [vmem:[%s4862_s7 + $0x9c0] sm:$0xff] %vm3139_vm1, %v3126_v20 }
 0x213   : > { %v2488_v24 = vpop.f32.mrf.mxu0  ;;  %v3128_v25 = vpop.f32.mrf.mxu1 }
 0x214   : > { %3295 = vst.msk [vmem:[%s4862_s7 + $0x4d8] sm:$0xff] %vm3139_vm1, %v2497_v23  ;;  %v2489_v26 = vadd.f32 %v4570_v11, %v2488_v24  ;;  %v3129_v27 = vadd.f32 %v4570_v11, %v3128_v25 }
 0x215   : > { %v4217_v28 = vpop.f32.mrf.mxu0 }
 0x216   : > { %3293 = vst.msk [vmem:[%s4862_s7 + $0x4c8] sm:$0xff] %vm3139_vm1, %v2489_v26  ;;  %v2510_v29 = vadd.f32 %v4570_v11, %v4217_v28  ;;  %3453 = vst.msk [vmem:[%s4862_s7 + $0x9c8] sm:$0xff] %vm3139_vm1, %v3129_v27 }
 0x217   : > { %v2501_v30 = vpop.f32.mrf.mxu0 }
 0x218   : > { %3298 = vst.msk [vmem:[%s4862_s7 + $0x4f0] sm:$0xff] %vm3139_vm1, %v2510_v29  ;;  %v2502_v31 = vadd.f32 %v4570_v11, %v2501_v30 }
 0x219   : > { %v4218_v32 = vpop.f32.mrf.mxu0 }
 0x21a   : > { %3296 = vst.msk [vmem:[%s4862_s7 + $0x4e0] sm:$0xff] %vm3139_vm1, %v2502_v31  ;;  %v2513_v33 = vadd.f32 %v4570_v11, %v4218_v32 }
 0x21b   : > { %v2504_v34 = vpop.f32.mrf.mxu0 }
 0x21c   : > { %3299 = vst.msk [vmem:[%s4862_s7 + $0x4f8] sm:$0xff] %vm3139_vm1, %v2513_v33  ;;  %v2505_v35 = vadd.f32 %v4570_v11, %v2504_v34 }
 0x21e   : > { %3297 = vst.msk [vmem:[%s4862_s7 + $0x4e8] sm:$0xff] %vm3139_vm1, %v2505_v35 }
 0x21f PF: > { %s13_s14 = sadd.s32 1, %s4593_s14   ;;  %s5933_s12 = smov %s4589_s13 }
 0x220   : > { %p10_p5 = scmp.ge.s32.totalorder %s13_s14, 4   ;;  %s5934_s13 = smov %s5936_s15 }
 0x222   :  { %12 = sbr.rel (!%p10_p5) target bundleno = 2 (0x2), region = 68 }

</bundles_post_ra>
